<compile_context>
chip_gen: v5e
topology: v5e:2x2
jax: 0.10.0
libtpu: 0.0.40
codegen_flags: <defaults>
</compile_context>

<pallas_src>
import functools

import jax
import jax.numpy as jnp
from jax.experimental import pallas as pl
from jax.experimental.pallas import tpu as pltpu


LEAKY_SLOPE = 0.01  # PyTorch nn.LeakyReLU default negative_slope
HIDDEN1 = 1200
HIDDEN2 = 600
LANE = 128
H1_PAD = 1280  # 1200 rounded up to a lane multiple
H2_PAD = 640   # 600 rounded up to a lane multiple


def _round_up(n, m):
    return ((n + m - 1) // m) * m


def _leaky_relu(x):
    return jnp.where(x >= 0, x, LEAKY_SLOPE * x)


def actor_kernel(x_ref, w1_ref, b1_ref, w2_ref, b2_ref, w3_ref, b3_ref,
                 o_ref, *, max_action):
    # Cast the activation tile to bf16 so the matmuls use the bf16 MXU path.
    x = x_ref[...].astype(jnp.bfloat16)

    # Layer 1: Linear(state_dim -> 1280 padded) + LeakyReLU (f32 accumulate).
    h1 = jnp.dot(x, w1_ref[...], preferred_element_type=jnp.float32)
    h1 = _leaky_relu(h1 + b1_ref[...])

    # Layer 2: Linear(1280 -> 640 padded) + LeakyReLU.
    h2 = jnp.dot(h1.astype(jnp.bfloat16), w2_ref[...],
                 preferred_element_type=jnp.float32)
    h2 = _leaky_relu(h2 + b2_ref[...])

    # Layer 3: Linear(640 -> 128 padded) + Tanh, then scale by max_action.
    h3 = jnp.dot(h2.astype(jnp.bfloat16), w3_ref[...],
                 preferred_element_type=jnp.float32)
    h3 = jnp.tanh(h3 + b3_ref[...])

    # bf16 store halves the lane-padded HBM writeback.
    o_ref[...] = (max_action * h3).astype(o_ref.dtype)


def actor_forward(x, kparams, max_action, *, block_batch=1024):
    """x: (batch, state_dim) float32. kparams: output of prepare_params."""
    batch, state_dim = x.shape
    action_dim = kparams["action_dim"]
    w1, b1 = kparams["w1"], kparams["b1"]
    w2, b2 = kparams["w2"], kparams["b2"]
    w3, b3 = kparams["w3"], kparams["b3"]
    out_pad = w3.shape[1]  # lane-padded action width (multiple of 128)

    # Batch tile: always a multiple of 8 sublanes, never (much) bigger than
    # the batch itself.
    tb = min(_round_up(block_batch, 8), _round_up(batch, 8))
    # v7x has two TensorCores: make sure the "parallel" batch grid has at
    # least 2 steps whenever the tile is splittable, so both cores get work.
    if _round_up(batch, tb) // tb == 1 and tb >= 16:
        tb = _round_up((tb + 1) // 2, 8)
    padded_batch = _round_up(batch, tb)
    if padded_batch != batch:
        x = jnp.pad(x, ((0, padded_batch - batch), (0, 0)))
    grid = (padded_batch // tb,)

    # VMEM budget: resident weights (single copy) + pipelined activations
    # (x/out double-buffered, h1/h2 live inside the kernel) + headroom.
    # Cap at 75% of physical VMEM (64 MiB/TC on v7x, 128 MiB on v5e/v6e).
    try:
        vmem_cap = int(pltpu.get_tpu_info().vmem_capacity_bytes)
    except Exception:
        vmem_cap = 64 << 20
    vmem_budget = (vmem_cap * 3) // 4
    weight_bytes = sum(int(p.size * p.dtype.itemsize)
                       for p in (w1, b1, w2, b2, w3, b3))
    act_bytes = tb * (2 * state_dim * 4          # x, double-buffered, f32
                      + (H1_PAD + H2_PAD) * 4    # h1/h2 intermediates, f32
                      + 2 * out_pad * 2)         # out, double-buffered, bf16
    vmem_limit = int(min(2 * weight_bytes + act_bytes + (8 << 20),
                         vmem_budget))

    flops = 2 * padded_batch * (state_dim * H1_PAD
                                + H1_PAD * H2_PAD
                                + H2_PAD * out_pad)
    cost = pl.CostEstimate(
        flops=flops,
        transcendentals=padded_batch * out_pad,
        bytes_accessed=weight_bytes
        + padded_batch * (state_dim * 4 + out_pad * 2),
    )

    kernel = functools.partial(actor_kernel, max_action=float(max_action))

    def _call(weight_pipeline_mode):
        kw = ({} if weight_pipeline_mode is None
              else {"pipeline_mode": weight_pipeline_mode})

        def resident(shape):
            # Same block every grid step -> fetched once, stays in VMEM.
            return pl.BlockSpec(shape, lambda i: (0, 0), **kw)

        return pl.pallas_call(
            kernel,
            out_shape=jax.ShapeDtypeStruct((padded_batch, out_pad),
                                           jnp.bfloat16),
            grid=grid,
            in_specs=[
                pl.BlockSpec((tb, state_dim), lambda i: (i, 0)),
                resident(w1.shape), resident(b1.shape),
                resident(w2.shape), resident(b2.shape),
                resident(w3.shape), resident(b3.shape),
            ],
            out_specs=pl.BlockSpec((tb, out_pad), lambda i: (i, 0)),
            compiler_params=pltpu.CompilerParams(
                dimension_semantics=("parallel",),  # megacore split on v7x
                vmem_limit_bytes=vmem_limit,
            ),
            cost_estimate=cost,
        )(x, w1, b1, w2, b2, w3, b3)

    try:
        # Resident weights don't need double buffers; saves ~weight_bytes VMEM.
        out = _call(pl.Buffered(1))
    except Exception:
        # Fallback: default pipelining if single-buffering is not supported.
        out = _call(None)

    return out[:batch, :action_dim].astype(jnp.float32)


def init_params(key, state_dim, action_dim):
    """f32 params mimicking PyTorch Linear default U(-1/sqrt(in), 1/sqrt(in))."""
    dims = [(state_dim, HIDDEN1), (HIDDEN1, HIDDEN2), (HIDDEN2, action_dim)]
    params = {}
    for i, (fan_in, fan_out) in enumerate(dims, start=1):
        key, kw, kb = jax.random.split(key, 3)
        bound = 1.0 / (fan_in ** 0.5)
        params[f"w{i}"] = jax.random.uniform(
            kw, (fan_in, fan_out), jnp.float32, -bound, bound)
        # biases kept 2D (1, out) so they broadcast cleanly in VMEM
        params[f"b{i}"] = jax.random.uniform(
            kb, (1, fan_out), jnp.float32, -bound, bound)
    return params


def prepare_params(params):
    """Convert f32 params to kernel layout: bf16 weights, f32 biases, all
    hidden/output dims zero-padded to lane (128) multiples.  Zero padding is
    numerically exact for this network."""
    action_dim = params["w3"].shape[1]
    out_pad = _round_up(action_dim, LANE)
    p1 = H1_PAD - HIDDEN1
    p2 = H2_PAD - HIDDEN2
    p3 = out_pad - action_dim
    return {
        "action_dim": action_dim,
        "w1": jnp.pad(params["w1"], ((0, 0), (0, p1))).astype(jnp.bfloat16),
        "b1": jnp.pad(params["b1"], ((0, 0), (0, p1))),
        "w2": jnp.pad(params["w2"], ((0, p1), (0, p2))).astype(jnp.bfloat16),
        "b2": jnp.pad(params["b2"], ((0, 0), (0, p2))),
        "w3": jnp.pad(params["w3"], ((0, p2), (0, p3))).astype(jnp.bfloat16),
        "b3": jnp.pad(params["b3"], ((0, 0), (0, p3))),
    }


if __name__ == "__main__":
    state_dim = 16
    action_dim = 4
    max_action = 2.0
    batch = 2

    key = jax.random.PRNGKey(0)
    key, kx = jax.random.split(key)
    x = jax.random.normal(kx, (batch, state_dim), jnp.float32)

    params = init_params(key, state_dim, action_dim)
    kparams = prepare_params(params)

    out = actor_forward(x, kparams, max_action)
    out = jax.block_until_ready(out)

    # Reference check in plain JAX using the same bf16-rounded weights and the
    # same inter-layer bf16 round-trips as the kernel (f32 accumulation).
    xb = x.astype(jnp.bfloat16).astype(jnp.float32)
    w1f = kparams["w1"][:, :HIDDEN1].astype(jnp.float32)
    w2f = kparams["w2"][:HIDDEN1, :HIDDEN2].astype(jnp.float32)
    w3f = kparams["w3"][:HIDDEN2, :action_dim].astype(jnp.float32)
    b1f = kparams["b1"][:, :HIDDEN1]
    b2f = kparams["b2"][:, :HIDDEN2]
    b3f = kparams["b3"][:, :action_dim]

    h = xb @ w1f + b1f
    h = jnp.where(h >= 0, h, LEAKY_SLOPE * h)
    h = h.astype(jnp.bfloat16).astype(jnp.float32) @ w2f + b2f
    h = jnp.where(h >= 0, h, LEAKY_SLOPE * h)
    ref = max_action * jnp.tanh(
        h.astype(jnp.bfloat16).astype(jnp.float32) @ w3f + b3f)

    assert out.shape == (batch, action_dim)
    assert out.dtype == jnp.float32
    # Output went through a bf16 store -> allow ~0.5% relative slack.
    assert jnp.allclose(out, ref, atol=2e-2, rtol=2e-2)

    print("KERNEL_OK")
</pallas_src>

<mosaic_0001>
module attributes {stable_mosaic.version = 11 : i64} {
  func.func @actor_kernel(%arg0: i32, %arg1: memref<8x16xf32, #tpu.memory_space<vmem>>, %arg2: memref<16x1280xbf16, #tpu.memory_space<vmem>>, %arg3: memref<1x1280xf32, #tpu.memory_space<vmem>>, %arg4: memref<1280x640xbf16, #tpu.memory_space<vmem>>, %arg5: memref<1x640xf32, #tpu.memory_space<vmem>>, %arg6: memref<640x128xbf16, #tpu.memory_space<vmem>>, %arg7: memref<1x128xf32, #tpu.memory_space<vmem>>, %arg8: memref<8x128xbf16, #tpu.memory_space<vmem>>) attributes {dimension_semantics = [#tpu.dimension_semantics<parallel>], iteration_bounds = array<i64: 1>, scalar_prefetch = 0 : i64, scratch_operands = 0 : i64, tpu.core_type = #tpu.core_type<tc>, window_params = [{transform_indices = @transform_0, window_bounds = array<i64: 8, 16>}, {pipeline_mode = #tpu.pipeline_mode<synchronous>, transform_indices = @transform_1, window_bounds = array<i64: 16, 1280>}, {pipeline_mode = #tpu.pipeline_mode<synchronous>, transform_indices = @transform_2, window_bounds = array<i64: 1, 1280>}, {pipeline_mode = #tpu.pipeline_mode<synchronous>, transform_indices = @transform_3, window_bounds = array<i64: 1280, 640>}, {pipeline_mode = #tpu.pipeline_mode<synchronous>, transform_indices = @transform_4, window_bounds = array<i64: 1, 640>}, {pipeline_mode = #tpu.pipeline_mode<synchronous>, transform_indices = @transform_5, window_bounds = array<i64: 640, 128>}, {pipeline_mode = #tpu.pipeline_mode<synchronous>, transform_indices = @transform_6, window_bounds = array<i64: 1, 128>}, {transform_indices = @transform_7, window_bounds = array<i64: 8, 128>}]} {
    %c0 = arith.constant 0 : index
    %c0_0 = arith.constant 0 : index
    %0 = vector.load %arg1[%c0, %c0_0] : memref<8x16xf32, #tpu.memory_space<vmem>>, vector<8x16xf32>
    %1 = arith.truncf %0 : vector<8x16xf32> to vector<8x16xbf16>
    %c0_1 = arith.constant 0 : index
    %c0_2 = arith.constant 0 : index
    %2 = vector.load %arg2[%c0_1, %c0_2] : memref<16x1280xbf16, #tpu.memory_space<vmem>>, vector<16x1280xbf16>
    %cst = arith.constant dense<0.000000e+00> : vector<8x1280xf32>
    %3 = tpu.matmul %1, %2, %cst {dimension_numbers = #tpu.dot_dimension_numbers<[1], [0], [0], [1], [0, 0, 1, 1], [], []>} : vector<8x16xbf16>, vector<16x1280xbf16>, vector<8x1280xf32> -> vector<8x1280xf32>
    %c0_3 = arith.constant 0 : index
    %c0_4 = arith.constant 0 : index
    %4 = vector.load %arg3[%c0_3, %c0_4] : memref<1x1280xf32, #tpu.memory_space<vmem>>, vector<1x1280xf32>
    %5 = vector.broadcast %4 : vector<1x1280xf32> to vector<8x1280xf32>
    %6 = arith.addf %3, %5 : vector<8x1280xf32>
    %cst_5 = arith.constant 0.000000e+00 : f32
    %7 = vector.broadcast %cst_5 : f32 to vector<8x1280xf32>
    %8 = arith.cmpf oge, %6, %7 : vector<8x1280xf32>
    %cst_6 = arith.constant 0.00999999977 : f32
    %9 = vector.broadcast %cst_6 : f32 to vector<8x1280xf32>
    %10 = arith.mulf %9, %6 : vector<8x1280xf32>
    %11 = arith.select %8, %6, %10 : vector<8x1280xi1>, vector<8x1280xf32>
    %12 = arith.truncf %11 : vector<8x1280xf32> to vector<8x1280xbf16>
    %c0_7 = arith.constant 0 : index
    %c0_8 = arith.constant 0 : index
    %13 = vector.load %arg4[%c0_7, %c0_8] : memref<1280x640xbf16, #tpu.memory_space<vmem>>, vector<1280x640xbf16>
    %cst_9 = arith.constant dense<0.000000e+00> : vector<8x640xf32>
    %14 = tpu.matmul %12, %13, %cst_9 {dimension_numbers = #tpu.dot_dimension_numbers<[1], [0], [0], [1], [0, 0, 1, 1], [], []>} : vector<8x1280xbf16>, vector<1280x640xbf16>, vector<8x640xf32> -> vector<8x640xf32>
    %c0_10 = arith.constant 0 : index
    %c0_11 = arith.constant 0 : index
    %15 = vector.load %arg5[%c0_10, %c0_11] : memref<1x640xf32, #tpu.memory_space<vmem>>, vector<1x640xf32>
    %16 = vector.broadcast %15 : vector<1x640xf32> to vector<8x640xf32>
    %17 = arith.addf %14, %16 : vector<8x640xf32>
    %cst_12 = arith.constant 0.000000e+00 : f32
    %18 = vector.broadcast %cst_12 : f32 to vector<8x640xf32>
    %19 = arith.cmpf oge, %17, %18 : vector<8x640xf32>
    %cst_13 = arith.constant 0.00999999977 : f32
    %20 = vector.broadcast %cst_13 : f32 to vector<8x640xf32>
    %21 = arith.mulf %20, %17 : vector<8x640xf32>
    %22 = arith.select %19, %17, %21 : vector<8x640xi1>, vector<8x640xf32>
    %23 = arith.truncf %22 : vector<8x640xf32> to vector<8x640xbf16>
    %c0_14 = arith.constant 0 : index
    %c0_15 = arith.constant 0 : index
    %24 = vector.load %arg6[%c0_14, %c0_15] : memref<640x128xbf16, #tpu.memory_space<vmem>>, vector<640x128xbf16>
    %cst_16 = arith.constant dense<0.000000e+00> : vector<8x128xf32>
    %25 = tpu.matmul %23, %24, %cst_16 {dimension_numbers = #tpu.dot_dimension_numbers<[1], [0], [0], [1], [0, 0, 1, 1], [], []>} : vector<8x640xbf16>, vector<640x128xbf16>, vector<8x128xf32> -> vector<8x128xf32>
    %c0_17 = arith.constant 0 : index
    %c0_18 = arith.constant 0 : index
    %26 = vector.load %arg7[%c0_17, %c0_18] : memref<1x128xf32, #tpu.memory_space<vmem>>, vector<1x128xf32>
    %27 = vector.broadcast %26 : vector<1x128xf32> to vector<8x128xf32>
    %28 = arith.addf %25, %27 : vector<8x128xf32>
    %29 = math.tanh %28 : vector<8x128xf32>
    %cst_19 = arith.constant 2.000000e+00 : f32
    %30 = vector.broadcast %cst_19 : f32 to vector<8x128xf32>
    %31 = arith.mulf %30, %29 : vector<8x128xf32>
    %32 = arith.truncf %31 : vector<8x128xf32> to vector<8x128xbf16>
    %c0_20 = arith.constant 0 : index
    %c0_21 = arith.constant 0 : index
    %33 = vector.load %arg8[%c0_20, %c0_21] : memref<8x128xbf16, #tpu.memory_space<vmem>>, vector<8x128xbf16>
    tpu.vector_store %arg8[%c0_20, %c0_21], %32 {strides = array<i32>} : memref<8x128xbf16, #tpu.memory_space<vmem>>, vector<8x128xbf16>,
    return
  }
  func.func @transform_0(%arg0: i32) -> (i32, i32) {
    %c0_i32 = arith.constant 0 : i32
    %c0_i32_0 = arith.constant 0 : i32
    return %arg0, %c0_i32 : i32, i32
  }
  func.func @transform_1(%arg0: i32) -> (i32, i32) {
    %c0_i32 = arith.constant 0 : i32
    %c0_i32_0 = arith.constant 0 : i32
    %c0_i32_1 = arith.constant 0 : i32
    return %c0_i32, %c0_i32_0 : i32, i32
  }
  func.func @transform_2(%arg0: i32) -> (i32, i32) {
    %c0_i32 = arith.constant 0 : i32
    %c0_i32_0 = arith.constant 0 : i32
    %c0_i32_1 = arith.constant 0 : i32
    return %c0_i32, %c0_i32_0 : i32, i32
  }
  func.func @transform_3(%arg0: i32) -> (i32, i32) {
    %c0_i32 = arith.constant 0 : i32
    %c0_i32_0 = arith.constant 0 : i32
    %c0_i32_1 = arith.constant 0 : i32
    return %c0_i32, %c0_i32_0 : i32, i32
  }
  func.func @transform_4(%arg0: i32) -> (i32, i32) {
    %c0_i32 = arith.constant 0 : i32
    %c0_i32_0 = arith.constant 0 : i32
    %c0_i32_1 = arith.constant 0 : i32
    return %c0_i32, %c0_i32_0 : i32, i32
  }
  func.func @transform_5(%arg0: i32) -> (i32, i32) {
    %c0_i32 = arith.constant 0 : i32
    %c0_i32_0 = arith.constant 0 : i32
    %c0_i32_1 = arith.constant 0 : i32
    return %c0_i32, %c0_i32_0 : i32, i32
  }
  func.func @transform_6(%arg0: i32) -> (i32, i32) {
    %c0_i32 = arith.constant 0 : i32
    %c0_i32_0 = arith.constant 0 : i32
    %c0_i32_1 = arith.constant 0 : i32
    return %c0_i32, %c0_i32_0 : i32, i32
  }
  func.func @transform_7(%arg0: i32) -> (i32, i32) {
    %c0_i32 = arith.constant 0 : i32
    %c0_i32_0 = arith.constant 0 : i32
    return %arg0, %c0_i32 : i32, i32
  }
}

module attributes {stable_mosaic.version = 11 : i64} {
  func.func @actor_kernel(%arg0: i32, %arg1: memref<8x16xf32, #tpu.memory_space<vmem>>, %arg2: memref<16x1280xbf16, #tpu.memory_space<vmem>>, %arg3: memref<1x1280xf32, #tpu.memory_space<vmem>>, %arg4: memref<1280x640xbf16, #tpu.memory_space<vmem>>, %arg5: memref<1x640xf32, #tpu.memory_space<vmem>>, %arg6: memref<640x128xbf16, #tpu.memory_space<vmem>>, %arg7: memref<1x128xf32, #tpu.memory_space<vmem>>, %arg8: memref<8x128xbf16, #tpu.memory_space<vmem>>) attributes {dimension_semantics = [#tpu.dimension_semantics<parallel>], iteration_bounds = array<i64: 1>, scalar_prefetch = 0 : i64, scratch_operands = 0 : i64, tpu.core_type = #tpu.core_type<tc>, window_params = [{transform_indices = @transform_0, window_bounds = array<i64: 8, 16>}, {pipeline_mode = #tpu.pipeline_mode<synchronous>, transform_indices = @transform_1, window_bounds = array<i64: 16, 1280>}, {pipeline_mode = #tpu.pipeline_mode<synchronous>, transform_indices = @transform_2, window_bounds = array<i64: 1, 1280>}, {pipeline_mode = #tpu.pipeline_mode<synchronous>, transform_indices = @transform_3, window_bounds = array<i64: 1280, 640>}, {pipeline_mode = #tpu.pipeline_mode<synchronous>, transform_indices = @transform_4, window_bounds = array<i64: 1, 640>}, {pipeline_mode = #tpu.pipeline_mode<synchronous>, transform_indices = @transform_5, window_bounds = array<i64: 640, 128>}, {pipeline_mode = #tpu.pipeline_mode<synchronous>, transform_indices = @transform_6, window_bounds = array<i64: 1, 128>}, {transform_indices = @transform_7, window_bounds = array<i64: 8, 128>}]} {
    %c0 = arith.constant 0 : index
    %c0_0 = arith.constant 0 : index
    %0 = vector.load %arg1[%c0, %c0_0] : memref<8x16xf32, #tpu.memory_space<vmem>>, vector<8x16xf32>
    %1 = arith.truncf %0 : vector<8x16xf32> to vector<8x16xbf16>
    %c0_1 = arith.constant 0 : index
    %c0_2 = arith.constant 0 : index
    %2 = vector.load %arg2[%c0_1, %c0_2] : memref<16x1280xbf16, #tpu.memory_space<vmem>>, vector<16x1280xbf16>
    %cst = arith.constant dense<0.000000e+00> : vector<8x1280xf32>
    %3 = tpu.matmul %1, %2, %cst {dimension_numbers = #tpu.dot_dimension_numbers<[1], [0], [0], [1], [0, 0, 1, 1], [], []>} : vector<8x16xbf16>, vector<16x1280xbf16>, vector<8x1280xf32> -> vector<8x1280xf32>
    %c0_3 = arith.constant 0 : index
    %c0_4 = arith.constant 0 : index
    %4 = vector.load %arg3[%c0_3, %c0_4] : memref<1x1280xf32, #tpu.memory_space<vmem>>, vector<1x1280xf32>
    %5 = vector.broadcast %4 : vector<1x1280xf32> to vector<8x1280xf32>
    %6 = arith.addf %3, %5 : vector<8x1280xf32>
    %cst_5 = arith.constant 0.000000e+00 : f32
    %7 = vector.broadcast %cst_5 : f32 to vector<8x1280xf32>
    %8 = arith.cmpf oge, %6, %7 : vector<8x1280xf32>
    %cst_6 = arith.constant 0.00999999977 : f32
    %9 = vector.broadcast %cst_6 : f32 to vector<8x1280xf32>
    %10 = arith.mulf %9, %6 : vector<8x1280xf32>
    %11 = arith.select %8, %6, %10 : vector<8x1280xi1>, vector<8x1280xf32>
    %12 = arith.truncf %11 : vector<8x1280xf32> to vector<8x1280xbf16>
    %c0_7 = arith.constant 0 : index
    %c0_8 = arith.constant 0 : index
    %13 = vector.load %arg4[%c0_7, %c0_8] : memref<1280x640xbf16, #tpu.memory_space<vmem>>, vector<1280x640xbf16>
    %cst_9 = arith.constant dense<0.000000e+00> : vector<8x640xf32>
    %14 = tpu.matmul %12, %13, %cst_9 {dimension_numbers = #tpu.dot_dimension_numbers<[1], [0], [0], [1], [0, 0, 1, 1], [], []>} : vector<8x1280xbf16>, vector<1280x640xbf16>, vector<8x640xf32> -> vector<8x640xf32>
    %c0_10 = arith.constant 0 : index
    %c0_11 = arith.constant 0 : index
    %15 = vector.load %arg5[%c0_10, %c0_11] : memref<1x640xf32, #tpu.memory_space<vmem>>, vector<1x640xf32>
    %16 = vector.broadcast %15 : vector<1x640xf32> to vector<8x640xf32>
    %17 = arith.addf %14, %16 : vector<8x640xf32>
    %cst_12 = arith.constant 0.000000e+00 : f32
    %18 = vector.broadcast %cst_12 : f32 to vector<8x640xf32>
    %19 = arith.cmpf oge, %17, %18 : vector<8x640xf32>
    %cst_13 = arith.constant 0.00999999977 : f32
    %20 = vector.broadcast %cst_13 : f32 to vector<8x640xf32>
    %21 = arith.mulf %20, %17 : vector<8x640xf32>
    %22 = arith.select %19, %17, %21 : vector<8x640xi1>, vector<8x640xf32>
    %23 = arith.truncf %22 : vector<8x640xf32> to vector<8x640xbf16>
    %c0_14 = arith.constant 0 : index
    %c0_15 = arith.constant 0 : index
    %24 = vector.load %arg6[%c0_14, %c0_15] : memref<640x128xbf16, #tpu.memory_space<vmem>>, vector<640x128xbf16>
    %cst_16 = arith.constant dense<0.000000e+00> : vector<8x128xf32>
    %25 = tpu.matmul %23, %24, %cst_16 {dimension_numbers = #tpu.dot_dimension_numbers<[1], [0], [0], [1], [0, 0, 1, 1], [], []>} : vector<8x640xbf16>, vector<640x128xbf16>, vector<8x128xf32> -> vector<8x128xf32>
    %c0_17 = arith.constant 0 : index
    %c0_18 = arith.constant 0 : index
    %26 = vector.load %arg7[%c0_17, %c0_18] : memref<1x128xf32, #tpu.memory_space<vmem>>, vector<1x128xf32>
    %27 = vector.broadcast %26 : vector<1x128xf32> to vector<8x128xf32>
    %28 = arith.addf %25, %27 : vector<8x128xf32>
    %29 = math.tanh %28 : vector<8x128xf32>
    %cst_19 = arith.constant 2.000000e+00 : f32
    %30 = vector.broadcast %cst_19 : f32 to vector<8x128xf32>
    %31 = arith.mulf %30, %29 : vector<8x128xf32>
    %32 = arith.truncf %31 : vector<8x128xf32> to vector<8x128xbf16>
    %c0_20 = arith.constant 0 : index
    %c0_21 = arith.constant 0 : index
    %33 = vector.load %arg8[%c0_20, %c0_21] : memref<8x128xbf16, #tpu.memory_space<vmem>>, vector<8x128xbf16>
    tpu.vector_store %arg8[%c0_20, %c0_21], %32 {strides = array<i32>} : memref<8x128xbf16, #tpu.memory_space<vmem>>, vector<8x128xbf16>,
    return
  }
  func.func @transform_0(%arg0: i32) -> (i32, i32) {
    %c0_i32 = arith.constant 0 : i32
    %c0_i32_0 = arith.constant 0 : i32
    return %arg0, %c0_i32 : i32, i32
  }
  func.func @transform_1(%arg0: i32) -> (i32, i32) {
    %c0_i32 = arith.constant 0 : i32
    %c0_i32_0 = arith.constant 0 : i32
    %c0_i32_1 = arith.constant 0 : i32
    return %c0_i32, %c0_i32_0 : i32, i32
  }
  func.func @transform_2(%arg0: i32) -> (i32, i32) {
    %c0_i32 = arith.constant 0 : i32
    %c0_i32_0 = arith.constant 0 : i32
    %c0_i32_1 = arith.constant 0 : i32
    return %c0_i32, %c0_i32_0 : i32, i32
  }
  func.func @transform_3(%arg0: i32) -> (i32, i32) {
    %c0_i32 = arith.constant 0 : i32
    %c0_i32_0 = arith.constant 0 : i32
    %c0_i32_1 = arith.constant 0 : i32
    return %c0_i32, %c0_i32_0 : i32, i32
  }
  func.func @transform_4(%arg0: i32) -> (i32, i32) {
    %c0_i32 = arith.constant 0 : i32
    %c0_i32_0 = arith.constant 0 : i32
    %c0_i32_1 = arith.constant 0 : i32
    return %c0_i32, %c0_i32_0 : i32, i32
  }
  func.func @transform_5(%arg0: i32) -> (i32, i32) {
    %c0_i32 = arith.constant 0 : i32
    %c0_i32_0 = arith.constant 0 : i32
    %c0_i32_1 = arith.constant 0 : i32
    return %c0_i32, %c0_i32_0 : i32, i32
  }
  func.func @transform_6(%arg0: i32) -> (i32, i32) {
    %c0_i32 = arith.constant 0 : i32
    %c0_i32_0 = arith.constant 0 : i32
    %c0_i32_1 = arith.constant 0 : i32
    return %c0_i32, %c0_i32_0 : i32, i32
  }
  func.func @transform_7(%arg0: i32) -> (i32, i32) {
    %c0_i32 = arith.constant 0 : i32
    %c0_i32_0 = arith.constant 0 : i32
    return %arg0, %c0_i32 : i32, i32
  }
}

</mosaic_0001>

<bundles_post_ra>
// kernel: tpu_custom_call.1
= control target key start
LH: loop header
LB: loop body
LE: loop exit
PB: predicated region body
PF: predicated region fallthrough
CT: control target
= control target key end

     0   :  { %12 = vsyncpa [#allocation3], 0  ;;  %s6796_s0 = inlined_call_operand.hbm [shape: f32[8,16], index: 0, kind: input, shape index: {}]   ;;  %s6797_s1 = inlined_call_operand.hbm [shape: bf16[16,1280], index: 1, kind: input, shape index: {}]   ;;  %s6798_s2 = inlined_call_operand.hbm [shape: f32[1,1280], index: 2, kind: input, shape index: {}]   ;;  %s6799_s3 = inlined_call_operand.hbm [shape: bf16[1280,640], index: 3, kind: input, shape index: {}]   ;;  %s6800_s4 = inlined_call_operand.hbm [shape: f32[1,640], index: 4, kind: input, shape index: {}]   ;;  %s6801_s5 = inlined_call_operand.hbm [shape: bf16[640,128], index: 5, kind: input, shape index: {}]   ;;  %s6802_s6 = inlined_call_operand.hbm [shape: f32[1,128], index: 6, kind: input, shape index: {}]   ;;  %s6803_s7 = inlined_call_operand.hbm [shape: bf16[8,128], index: 7, kind: output, shape index: {}]  }
   0x1   :  { %13 = vsyncpa [#allocation6], 0 }
   0x2   :  { %14 = vsyncpa [#allocation9], 0 }
   0x3   :  { %15 = vsyncpa [#allocation12], 0  ;;  %s32_s26 = sshll.u32 %s6797_s1, 4  ;;  %s33_s26 = int_to_ptr.hbm [resolvable:$true] %s32_s26 }
   0x4   :  { %16 = vsyncpa [#allocation4], 0  ;;  %s6524_s27 = smov [#allocation5]   ;;  %s56_s8 = sshll.u32 %s6799_s3, 4  ;;  %s57_s8 = int_to_ptr.hbm [resolvable:$true] %s56_s8 }
   0x5   :  { %s34_s28 = sshll.u32 %s6524_s27, 4  ;;  %s6525_s9 = smov 640   ;;  %s35_s28 = int_to_ptr.vmem [resolvable:$true] %s34_s28 }
   0x6   :  { %s6526_s10 = smov 40   ;;  %s6527_s11 = smov [#allocation8]  }
   0x7   :  { %40 = dma.hbm_to_vmem [thread:$0]  %s33_s26, 1280, %s35_s28, [#allocation6], %s6525_s9, %s6525_s9, %s6526_s10  }
   0x8   :  { %s58_s12 = sshll.u32 %s6527_s11, 4  ;;  %s6528_s13 = smov 320   ;;  %s59_s12 = int_to_ptr.vmem [resolvable:$true] %s58_s12 }
   0x9   :  { %s6529_s14 = smov 20   ;;  %s80_s16 = sshll.u32 %s6801_s5, 4  ;;  %s81_s16 = int_to_ptr.hbm [resolvable:$true] %s80_s16 }
   0xa   :  { %64 = dma.hbm_to_vmem [thread:$0]  %s57_s8, 51200, %s59_s12, [#allocation9], %s6528_s13, %s6528_s13, %s6529_s14  }
   0xb   :  { %s6530_s17 = smov [#allocation11]   ;;  %s22_s20 = sshll.u32 %s6796_s0, 4  ;;  %s23_s20 = int_to_ptr.hbm [resolvable:$true] %s22_s20 }
   0xc   :  { %s82_s18 = sshll.u32 %s6530_s17, 4  ;;  %s6531_s21 = smov 64   ;;  %s83_s18 = int_to_ptr.vmem [resolvable:$true] %s82_s18 }
   0xd   :  { %s6532_s22 = smov 4   ;;  %s6533_s23 = smov [#allocation2]  }
   0xe   :  { %88 = dma.hbm_to_vmem [thread:$0]  %s81_s16, 5120, %s83_s18, [#allocation12], %s6531_s21, %s6531_s21, %s6532_s22  }
   0xf   :  { %s24_s24 = sshll.u32 %s6533_s23, 4  ;;  %s46_s27 = sshll.u32 %s6798_s2, 4  ;;  %s25_s24 = int_to_ptr.vmem [resolvable:$true] %s24_s24  ;;  %s47_s27 = int_to_ptr.hbm [resolvable:$true] %s46_s27 }
  0x10   :  { %27 = dma.hbm_to_vmem [thread:$0]  %s23_s20, 128, %s25_s24, [#allocation3]  }
  0x11   :  { %s70_s29 = sshll.u32 %s6800_s4, 4  ;;  %s6534_s30 = smov [#allocation7]   ;;  %s71_s29 = int_to_ptr.hbm [resolvable:$true] %s70_s29 }
  0x12   :  { %s48_s8 = sshll.u32 %s6534_s30, 4  ;;  %s6535_s0 = smov [#allocation10]   ;;  %s49_s8 = int_to_ptr.vmem [resolvable:$true] %s48_s8 }
  0x13   :  { %51 = dma.hbm_to_vmem [thread:$0]  %s47_s27, 160, %s49_s8, [#allocation6]  }
  0x14   :  { %s72_s9 = sshll.u32 %s6535_s0, 4  ;;  %s94_s12 = sshll.u32 %s6802_s6, 4  ;;  %s73_s9 = int_to_ptr.vmem [resolvable:$true] %s72_s9  ;;  %s95_s12 = int_to_ptr.hbm [resolvable:$true] %s94_s12 }
  0x15   :  { %75 = dma.hbm_to_vmem [thread:$0]  %s71_s29, 80, %s73_s9, [#allocation9]  }
  0x16   :  { %s6536_s2 = smov [#allocation13]  }
  0x17   :  { %s96_s13 = sshll.u32 %s6536_s2, 4  ;;  %s97_s13 = int_to_ptr.vmem [resolvable:$true] %s96_s13 }
  0x18   :  { %99 = dma.hbm_to_vmem [thread:$0]  %s95_s12, 16, %s97_s13, [#allocation12]  }
  0x19   :  { %6514 = dma.done.wait [#allocation3], 128  }
  0x1a   :  { %6515 = vsyncadd [#allocation3], 4294967168 }
  0x1b   :  { %6516 = dma.done.wait [#allocation6], 1440  }
  0x1c   :  { %6517 = vsyncadd [#allocation6], 4294965856 }
  0x1d   :  { %6518 = dma.done.wait [#allocation9], 51280  }
  0x1e   :  { %6519 = vsyncadd [#allocation9], 4294916016 }
  0x1f   :  { %6520 = dma.done.wait [#allocation12], 5136  }
  0x20   :  { %6521 = vsyncadd [#allocation12], 4294962160  ;;  %v4046_v0 = vld [vmem:[#allocation5] sm:$0xf]  ;;  %v5859_v1 = vld [vmem:[#allocation5 + $0x24] sm:$0xf0] }
  0x21   :  { %v4054_v2 = vld [vmem:[#allocation5 + $0x8] sm:$0xf]  ;;  %v4047_v3 = vor.u32 %v5859_v1, %v4046_v0  ;;  %v5860_v4 = vld [vmem:[#allocation5 + $0x2c] sm:$0xf0]  ;;  %v5855_v5 = vld [vmem:[#allocation5 + $0xc] sm:$0xf] }
  0x22   :  { %v4056_v6 = vld [vmem:[#allocation5 + $0x30] sm:$0xf0]  ;;  %v4055_v7 = vor.u32 %v5860_v4, %v4054_v2  ;;  %v129_v9 = vld [vmem:[#allocation2] sm:$0xff]  ;;  %vm215_vm0 = vcmask 130048   ;;  %v5854_v10 = vld [vmem:[#allocation5 + $0x4] sm:$0xf] }
  0x23   :  { %v4059_v8 = vor.u32 %v5855_v5, %v4056_v6  ;;  %v4048_v11 = vld [vmem:[#allocation5 + $0x28] sm:$0xf0]  ;;  %226 = vmatpush.bf16.msra.mxu1 %v4047_v3  ;;  %v6599_v12 = vpack.c.bf16 %v129_v9, %v129_v9  ;;  %v4070_v14 = vld [vmem:[#allocation5 + $0x18] sm:$0xf]  ;;  %v5862_v15 = vld [vmem:[#allocation5 + $0x3c] sm:$0xf0] }
  0x24   :  { %v4051_v13 = vor.u32 %v5854_v10, %v4048_v11  ;;  %v5857_v16 = vld [vmem:[#allocation5 + $0x1c] sm:$0xf]  ;;  %252 = vmatpush.bf16.msra.mxu2 %v4055_v7  ;;  %v4071_v17 = vor.u32 %v5862_v15, %v4070_v14  ;;  %v4072_v18 = vld [vmem:[#allocation5 + $0x40] sm:$0xf0]  ;;  %v4062_v19 = vld [vmem:[#allocation5 + $0x10] sm:$0xf] }
  0x25   :  { %265 = vmatpush.bf16.msra.mxu3 %v4059_v8  ;;  %v5861_v20 = vld [vmem:[#allocation5 + $0x34] sm:$0xf0]  ;;  %v4075_v21 = vor.u32 %v5857_v16, %v4072_v18  ;;  %v5856_v23 = vld [vmem:[#allocation5 + $0x14] sm:$0xf]  ;;  %v4064_v24 = vld [vmem:[#allocation5 + $0x38] sm:$0xf0] }
  0x26   :  { %v4063_v22 = vor.u32 %v5861_v20, %v4062_v19  ;;  %4084 = vmatmul.msk.bf16.vlgmr.msra.gmra.mxu1 %vm215_vm0, %v6599_v12  ;;  %v4067_v25 = vor.u32 %v5856_v23, %v4064_v24  ;;  %v4078_v26 = vld [vmem:[#allocation5 + $0x20] sm:$0xf]  ;;  %v5863_v27 = vld [vmem:[#allocation5 + $0x44] sm:$0xf0]  ;;  %v5858_v29 = vld [vmem:[#allocation5 + $0x24] sm:$0xf] }
  0x27   :  { %239 = vmatpush.bf16.msrb.mxu1 %v4051_v13  ;;  %4086 = vmatmul.msk.bf16.vlgmr.msra.gmra.mxu2 %vm215_vm0, %v6599_v12  ;;  %v4079_v28 = vor.u32 %v5863_v27, %v4078_v26  ;;  %v4080_v30 = vld [vmem:[#allocation5 + $0x48] sm:$0xf0]  ;;  %v4236_v32 = vld [vmem:[#allocation8 + $0x118] sm:$0xf]  ;;  %v5901_v33 = vld [vmem:[#allocation8 + $0x128] sm:$0xf0] }
  0x28   :  { %304 = vmatpush.bf16.msrb.mxu2 %v4071_v17  ;;  %4087 = vmatmul.msk.bf16.vlgmr.msra.gmra.mxu3 %vm215_vm0, %v6599_v12  ;;  %v4083_v31 = vor.u32 %v5858_v29, %v4080_v30  ;;  %v4216_v34 = vld [vmem:[#allocation8 + $0xf0] sm:$0xf]  ;;  %v4237_v35 = vor.u32 %v5901_v33, %v4236_v32  ;;  %v5896_v36 = vld [vmem:[#allocation8 + $0x100] sm:$0xf0]  ;;  %v4556_v37 = vld [vmem:[#allocation8 + $0x398] sm:$0xf] }
  0x29   :  { %317 = vmatpush.bf16.msrb.mxu3 %v4075_v21  ;;  %278 = vmatpush.bf16.msra.mxu0 %v4063_v22  ;;  %v5981_v38 = vld [vmem:[#allocation8 + $0x3a8] sm:$0xf0]  ;;  %v4217_v40 = vor.u32 %v5896_v36, %v4216_v34  ;;  %v4536_v41 = vld [vmem:[#allocation8 + $0x370] sm:$0xf]  ;;  %v5976_v42 = vld [vmem:[#allocation8 + $0x380] sm:$0xf0] }
  0x2a   :  { %v4557_v39 = vor.u32 %v5981_v38, %v4556_v37  ;;  %v4196_v43 = vld [vmem:[#allocation8 + $0xc8] sm:$0xf]  ;;  %v5891_v44 = vld [vmem:[#allocation8 + $0xd8] sm:$0xf0]  ;;  %v4537_v45 = vor.u32 %v5976_v42, %v4536_v41  ;;  %v4396_v49 = vld [vmem:[#allocation8 + $0x258] sm:$0xf] }
  0x2b   :  { %291 = vmatpush.bf16.msra.mxu1 %v4067_v25  ;;  %v4516_v46 = vld [vmem:[#allocation8 + $0x348] sm:$0xf]  ;;  %v5971_v47 = vld [vmem:[#allocation8 + $0x358] sm:$0xf0]  ;;  %v4197_v48 = vor.u32 %v5891_v44, %v4196_v43  ;;  %v5941_v50 = vld [vmem:[#allocation8 + $0x268] sm:$0xf0] }
  0x2c   :  { %4088 = vmatmul.msk.bf16.vlgmr.msra.gmra.mxu0 %vm215_vm0, %v6599_v12  ;;  %2961 = vmatpush.bf16.msra.mxu2 %v4237_v35  ;;  %v4176_v51 = vld [vmem:[#allocation8 + $0xa0] sm:$0xf]  ;;  %v5886_v52 = vld [vmem:[#allocation8 + $0xb0] sm:$0xf0]  ;;  %v4517_v53 = vor.u32 %v5971_v47, %v4516_v46  ;;  %v4397_v54 = vor.u32 %v5941_v50, %v4396_v49  ;;  %v4716_v55 = vld [vmem:[#allocation8 + $0x4d8] sm:$0xf] }
  0x2d   :  { %330 = vmatpush.bf16.msrb.mxu0 %v4079_v28  ;;  %v4496_v56 = vld [vmem:[#allocation8 + $0x320] sm:$0xf]  ;;  %v5966_v57 = vld [vmem:[#allocation8 + $0x330] sm:$0xf0]  ;;  %v6021_v58 = vld [vmem:[#allocation8 + $0x4e8] sm:$0xf0]  ;;  %v4177_v61 = vor.u32 %v5886_v52, %v4176_v51 }
  0x2e   :  { %2974 = vmatpush.bf16.msra.mxu3 %v4397_v54  ;;  %v4376_v59 = vld [vmem:[#allocation8 + $0x230] sm:$0xf]  ;;  %v5936_v60 = vld [vmem:[#allocation8 + $0x240] sm:$0xf0]  ;;  %v4156_v63 = vld [vmem:[#allocation8 + $0x78] sm:$0xf]  ;;  %v4497_v1 = vor.u32 %v5966_v57, %v4496_v56  ;;  %v4717_v3 = vor.u32 %v6021_v58, %v4716_v55 }
  0x2f   :  { %v4377_v62 = vor.u32 %v5936_v60, %v4376_v59  ;;  %v5881_v0 = vld [vmem:[#allocation8 + $0x88] sm:$0xf0]  ;;  %v4356_v2 = vld [vmem:[#allocation8 + $0x208] sm:$0xf]  ;;  %v4476_v4 = vld [vmem:[#allocation8 + $0x2f8] sm:$0xf] }
  0x30   :  { %2962 = vmatpush.bf16.msra.mxu2 %v4217_v40  ;;  %v5961_v5 = vld [vmem:[#allocation8 + $0x308] sm:$0xf0]  ;;  %v5931_v6 = vld [vmem:[#allocation8 + $0x218] sm:$0xf0]  ;;  %v4696_v7 = vld [vmem:[#allocation8 + $0x4b0] sm:$0xf]  ;;  %v4157_v10 = vor.u32 %v5881_v0, %v4156_v63 }
  0x31   :  { %2987 = vmatpush.bf16.msra.mxu0 %v4557_v39  ;;  %v6016_v8 = vld [vmem:[#allocation8 + $0x4c0] sm:$0xf0]  ;;  %v4357_v9 = vor.u32 %v5931_v6, %v4356_v2  ;;  %v4336_v11 = vld [vmem:[#allocation8 + $0x1e0] sm:$0xf]  ;;  %v5926_v13 = vld [vmem:[#allocation8 + $0x1f0] sm:$0xf0]  ;;  %v4477_v16 = vor.u32 %v5961_v5, %v4476_v4 }
  0x32   :  { %2975 = vmatpush.bf16.msra.mxu3 %v4377_v62  ;;  %v4136_v14 = vld [vmem:[#allocation8 + $0x50] sm:$0xf]  ;;  %v5876_v15 = vld [vmem:[#allocation8 + $0x60] sm:$0xf0]  ;;  %v4697_v17 = vor.u32 %v6016_v8, %v4696_v7  ;;  %v4676_v20 = vld [vmem:[#allocation8 + $0x488] sm:$0xf]  ;;  %v4337_v22 = vor.u32 %v5926_v13, %v4336_v11 }
  0x33   :  { %v4456_v18 = vld [vmem:[#allocation8 + $0x2d0] sm:$0xf]  ;;  %v5956_v19 = vld [vmem:[#allocation8 + $0x2e0] sm:$0xf0]  ;;  %v6011_v21 = vld [vmem:[#allocation8 + $0x498] sm:$0xf0]  ;;  %v4137_v23 = vor.u32 %v5876_v15, %v4136_v14 }
  0x34   :  { %2963 = vmatpush.bf16.msra.mxu2 %v4197_v48  ;;  %v4316_v24 = vld [vmem:[#allocation8 + $0x1b8] sm:$0xf]  ;;  %v5921_v25 = vld [vmem:[#allocation8 + $0x1c8] sm:$0xf0]  ;;  %v4116_v26 = vld [vmem:[#allocation8 + $0x28] sm:$0xf]  ;;  %v4457_v28 = vor.u32 %v5956_v19, %v4456_v18  ;;  %v4677_v29 = vor.u32 %v6011_v21, %v4676_v20 }
  0x35   :  { %2988 = vmatpush.bf16.msra.mxu0 %v4537_v45  ;;  %v5871_v27 = vld [vmem:[#allocation8 + $0x38] sm:$0xf0]  ;;  %v4436_v30 = vld [vmem:[#allocation8 + $0x2a8] sm:$0xf]  ;;  %v4656_v32 = vld [vmem:[#allocation8 + $0x460] sm:$0xf]  ;;  %v4317_v34 = vor.u32 %v5921_v25, %v4316_v24 }
  0x36   :  { %4085 = vmatmul.msk.bf16.vlgmr.msrb.gmra.mxu1 %vm215_vm0, %v6599_v12  ;;  %2976 = vmatpush.bf16.msra.mxu3 %v4357_v9  ;;  %v6006_v33 = vld [vmem:[#allocation8 + $0x470] sm:$0xf0]  ;;  %v4117_v35 = vor.u32 %v5871_v27, %v4116_v26  ;;  %v4296_v36 = vld [vmem:[#allocation8 + $0x190] sm:$0xf]  ;;  %v5916_v37 = vld [vmem:[#allocation8 + $0x1a0] sm:$0xf0] }
  0x37   :  { %4090 = vmatmul.msk.bf16.vlgmr.msrb.gmra.mxu2 %vm215_vm0, %v6599_v12  ;;  %343 = vmatpush.bf16.msrb.mxu1 %v4083_v31  ;;  %v5951_v31 = vld [vmem:[#allocation8 + $0x2b8] sm:$0xf0]  ;;  %v4636_v38 = vld [vmem:[#allocation8 + $0x438] sm:$0xf]  ;;  %v4096_v39 = vld [vmem:[#allocation8] sm:$0xf]  ;;  %v4657_v42 = vor.u32 %v6006_v33, %v4656_v32  ;;  %v4297_v49 = vor.u32 %v5916_v37, %v4296_v36 }
  0x38   :  { %4091 = vmatmul.msk.bf16.vlgmr.msrb.gmra.mxu3 %vm215_vm0, %v6599_v12  ;;  %2964 = vmatpush.bf16.msra.mxu2 %v4177_v61  ;;  %v5866_v40 = vld [vmem:[#allocation8 + $0x10] sm:$0xf0]  ;;  %v4437_v41 = vor.u32 %v5951_v31, %v4436_v30  ;;  %v6001_v43 = vld [vmem:[#allocation8 + $0x448] sm:$0xf0]  ;;  %v4876_v44 = vld [vmem:[#allocation8 + $0x618] sm:$0xf] }
  0x39   :  { %2989 = vmatpush.bf16.msra.mxu0 %v4517_v53  ;;  %v6061_v45 = vld [vmem:[#allocation8 + $0x628] sm:$0xf0]  ;;  %v4416_v46 = vld [vmem:[#allocation8 + $0x280] sm:$0xf]  ;;  %v5946_v47 = vld [vmem:[#allocation8 + $0x290] sm:$0xf0]  ;;  %v4097_v50 = vor.u32 %v5866_v40, %v4096_v39  ;;  %v4637_v55 = vor.u32 %v6001_v43, %v4636_v38 }
  0x3a   :  { %2977 = vmatpush.bf16.msra.mxu3 %v4337_v22  ;;  %v5196_v48 = vld [vmem:[#allocation8 + $0x898] sm:$0xf]  ;;  %v6141_v51 = vld [vmem:[#allocation8 + $0x8a8] sm:$0xf0]  ;;  %v4276_v52 = vld [vmem:[#allocation8 + $0x168] sm:$0xf]  ;;  %v4877_v54 = vor.u32 %v6061_v45, %v4876_v44  ;;  %v4417_v58 = vor.u32 %v5946_v47, %v4416_v46 }
  0x3b   :  { %v5911_v53 = vld [vmem:[#allocation8 + $0x178] sm:$0xf0]  ;;  %v4856_v56 = vld [vmem:[#allocation8 + $0x5f0] sm:$0xf]  ;;  %v6056_v57 = vld [vmem:[#allocation8 + $0x600] sm:$0xf0]  ;;  %v5197_v61 = vor.u32 %v6141_v51, %v5196_v48 }
  0x3c   :  { %4092 = vmatmul.msk.bf16.vlgmr.msrb.gmra.mxu0 %vm215_vm0, %v6599_v12  ;;  %2965 = vmatpush.bf16.msra.mxu2 %v4157_v10  ;;  %v4616_v59 = vld [vmem:[#allocation8 + $0x410] sm:$0xf]  ;;  %v5996_v60 = vld [vmem:[#allocation8 + $0x420] sm:$0xf0]  ;;  %v4277_v63 = vor.u32 %v5911_v53, %v4276_v52  ;;  %v5906_v2 = vld [vmem:[#allocation8 + $0x150] sm:$0xf0] }
  0x3d   :  { %2990 = vmatpush.bf16.msra.mxu0 %v4497_v1  ;;  %v5176_v62 = vld [vmem:[#allocation8 + $0x870] sm:$0xf]  ;;  %v6136_v0 = vld [vmem:[#allocation8 + $0x880] sm:$0xf0]  ;;  %v4256_v1 = vld [vmem:[#allocation8 + $0x140] sm:$0xf]  ;;  %v4617_v6 = vor.u32 %v5996_v60, %v4616_v59 }
  0x3e   :  { %2978 = vmatpush.bf16.msra.mxu3 %v4317_v34  ;;  %v5036_v4 = vld [vmem:[#allocation8 + $0x758] sm:$0xf]  ;;  %v6101_v5 = vld [vmem:[#allocation8 + $0x768] sm:$0xf0]  ;;  %v4836_v7 = vld [vmem:[#allocation8 + $0x5c8] sm:$0xf]  ;;  %v5177_v11 = vor.u32 %v6136_v0, %v5176_v62  ;;  %v4257_v13 = vor.u32 %v5906_v2, %v4256_v1 }
  0x3f   :  { %v6051_v8 = vld [vmem:[#allocation8 + $0x5d8] sm:$0xf0]  ;;  %v4596_v9 = vld [vmem:[#allocation8 + $0x3e8] sm:$0xf]  ;;  %v6096_v18 = vld [vmem:[#allocation8 + $0x740] sm:$0xf0] }
  0x40   :  { %2966 = vmatpush.bf16.msra.mxu2 %v4137_v23  ;;  %v5991_v10 = vld [vmem:[#allocation8 + $0x3f8] sm:$0xf0]  ;;  %v5156_v14 = vld [vmem:[#allocation8 + $0x848] sm:$0xf]  ;;  %v4816_v20 = vld [vmem:[#allocation8 + $0x5a0] sm:$0xf] }
  0x41   :  { %2991 = vmatpush.bf16.msra.mxu0 %v4477_v16  ;;  %v6131_v15 = vld [vmem:[#allocation8 + $0x858] sm:$0xf0]  ;;  %v5037_v16 = vor.u32 %v6101_v5, %v5036_v4  ;;  %v4597_v19 = vor.u32 %v5991_v10, %v4596_v9  ;;  %v6046_v21 = vld [vmem:[#allocation8 + $0x5b0] sm:$0xf0]  ;;  %v4576_v22 = vld [vmem:[#allocation8 + $0x3c0] sm:$0xf] }
  0x42   :  { %2979 = vmatpush.bf16.msra.mxu3 %v4297_v49  ;;  %v5986_v23 = vld [vmem:[#allocation8 + $0x3d0] sm:$0xf0]  ;;  %v5356_v24 = vld [vmem:[#allocation8 + $0x9d8] sm:$0xf]  ;;  %v5157_v25 = vor.u32 %v6131_v15, %v5156_v14  ;;  %v6181_v26 = vld [vmem:[#allocation8 + $0x9e8] sm:$0xf0]  ;;  %v4817_v30 = vor.u32 %v6046_v21, %v4816_v20 }
  0x43   :  { %v5136_v27 = vld [vmem:[#allocation8 + $0x820] sm:$0xf]  ;;  %v4577_v31 = vor.u32 %v5986_v23, %v4576_v22  ;;  %v4796_v32 = vld [vmem:[#allocation8 + $0x578] sm:$0xf]  ;;  %v6041_v33 = vld [vmem:[#allocation8 + $0x588] sm:$0xf0]  ;;  %v5357_v34 = vor.u32 %v6181_v26, %v5356_v24 }
  0x44   :  { %2967 = vmatpush.bf16.msra.mxu2 %v4117_v35  ;;  %v5336_v36 = vld [vmem:[#allocation8 + $0x9b0] sm:$0xf]  ;;  %v6176_v37 = vld [vmem:[#allocation8 + $0x9c0] sm:$0xf0]  ;;  %v4797_v38 = vor.u32 %v6041_v33, %v4796_v32  ;;  %v6171_v43 = vld [vmem:[#allocation8 + $0x998] sm:$0xf0] }
  0x45   :  { %2992 = vmatpush.bf16.msra.mxu0 %v4457_v28  ;;  %v6126_v28 = vld [vmem:[#allocation8 + $0x830] sm:$0xf0]  ;;  %v4776_v39 = vld [vmem:[#allocation8 + $0x550] sm:$0xf]  ;;  %v6036_v40 = vld [vmem:[#allocation8 + $0x560] sm:$0xf0] }
  0x46   :  { %4089 = vmatmul.msk.bf16.vlgmr.msra.gmra.mxu1 %vm215_vm0, %v6599_v12  ;;  %2980 = vmatpush.bf16.msra.mxu3 %v4277_v63  ;;  %v5137_v35 = vor.u32 %v6126_v28, %v5136_v27  ;;  %v4777_v44 = vor.u32 %v6036_v40, %v4776_v39  ;;  %v5296_v46 = vld [vmem:[#allocation8 + $0x960] sm:$0xf]  ;;  %v6166_v47 = vld [vmem:[#allocation8 + $0x970] sm:$0xf0]  ;;  %v5116_v49 = vld [vmem:[#allocation8 + $0x7f8] sm:$0xf] }
  0x47   :  { %3000 = vmatpush.bf16.msra.mxu1 %v4717_v3  ;;  %v4857_v3 = vor.u32 %v6056_v57, %v4856_v56  ;;  %v5297_v48 = vor.u32 %v6166_v47, %v5296_v46  ;;  %v5276_v51 = vld [vmem:[#allocation8 + $0x938] sm:$0xf]  ;;  %v6161_v53 = vld [vmem:[#allocation8 + $0x948] sm:$0xf0]  ;;  %v6031_v56 = vld [vmem:[#allocation8 + $0x538] sm:$0xf0] }
  0x48   :  { %2968 = vmatpush.bf16.msra.mxu2 %v4097_v50  ;;  %v6121_v50 = vld [vmem:[#allocation8 + $0x808] sm:$0xf0]  ;;  %v4996_v57 = vld [vmem:[#allocation8 + $0x708] sm:$0xf]  ;;  %v6091_v59 = vld [vmem:[#allocation8 + $0x718] sm:$0xf0] }
  0x49   :  { %2993 = vmatpush.bf16.msra.mxu0 %v4437_v41  ;;  %v5337_v41 = vor.u32 %v6176_v37, %v5336_v36  ;;  %v5117_v52 = vor.u32 %v6121_v50, %v5116_v49  ;;  %v4997_v60 = vor.u32 %v6091_v59, %v4996_v57  ;;  %v6116_v62 = vld [vmem:[#allocation8 + $0x7e0] sm:$0xf0]  ;;  %v5256_v63 = vld [vmem:[#allocation8 + $0x910] sm:$0xf]  ;;  %v6026_v4 = vld [vmem:[#allocation8 + $0x510] sm:$0xf0] }
  0x4a   :  { %2981 = vmatpush.bf16.msra.mxu3 %v4257_v13  ;;  %v6156_v1 = vld [vmem:[#allocation8 + $0x920] sm:$0xf0]  ;;  %v4976_v5 = vld [vmem:[#allocation8 + $0x6e0] sm:$0xf]  ;;  %v5076_v9 = vld [vmem:[#allocation8 + $0x7a8] sm:$0xf] }
  0x4b   :  { %3001 = vmatpush.bf16.msra.mxu1 %v4697_v17  ;;  %v5016_v17 = vld [vmem:[#allocation8 + $0x730] sm:$0xf]  ;;  %v5257_v2 = vor.u32 %v6156_v1, %v5256_v63  ;;  %v6111_v10 = vld [vmem:[#allocation8 + $0x7b8] sm:$0xf0]  ;;  %v5236_v13 = vld [vmem:[#allocation8 + $0x8e8] sm:$0xf] }
  0x4c   :  { %3013 = vmatpush.bf16.msrb.mxu2 %v4877_v54  ;;  %v5277_v54 = vor.u32 %v6161_v53, %v5276_v51  ;;  %v6151_v14 = vld [vmem:[#allocation8 + $0x8f8] sm:$0xf0]  ;;  %v5216_v20 = vld [vmem:[#allocation8 + $0x8c0] sm:$0xf]  ;;  %v6146_v22 = vld [vmem:[#allocation8 + $0x8d0] sm:$0xf0] }
  0x4d   :  { %2994 = vmatpush.bf16.msra.mxu0 %v4417_v58  ;;  %v5237_v15 = vor.u32 %v6151_v14, %v5236_v13  ;;  %v5217_v23 = vor.u32 %v6146_v22, %v5216_v20  ;;  %v4936_v24 = vld [vmem:[#allocation8 + $0x690] sm:$0xf]  ;;  %v4916_v27 = vld [vmem:[#allocation8 + $0x668] sm:$0xf]  ;;  %v6071_v28 = vld [vmem:[#allocation8 + $0x678] sm:$0xf0] }
  0x4e   :  { %3026 = vmatpush.bf16.msrb.mxu3 %v5037_v16  ;;  %v4956_v16 = vld [vmem:[#allocation8 + $0x6b8] sm:$0xf]  ;;  %v5496_v46 = vld [vmem:[#allocation8 + $0xaf0] sm:$0xf]  ;;  %v6216_v47 = vld [vmem:[#allocation8 + $0xb00] sm:$0xf0] }
  0x4f   :  { %3002 = vmatpush.bf16.msra.mxu1 %v4677_v29  ;;  %v5017_v29 = vor.u32 %v6096_v18, %v5016_v17  ;;  %v5056_v18 = vld [vmem:[#allocation8 + $0x780] sm:$0xf]  ;;  %v6621_v33 = vld [vmem:[#allocation7] sm:$0xff]  ;;  %v5497_v57 = vor.u32 %v6216_v47, %v5496_v46  ;;  %v5476_v59 = vld [vmem:[#allocation8 + $0xac8] sm:$0xf]  ;;  %s6537_s4 = smov [#allocation14]  }
  0x50   :  { %3014 = vmatpush.bf16.msrb.mxu2 %v4857_v3  ;;  %v4736_v3 = vld [vmem:[#allocation8 + $0x500] sm:$0xf]  ;;  %v5516_v37 = vld [vmem:[#allocation8 + $0xb18] sm:$0xf]  ;;  %v147_v40 = vperm.slane %v6621_v33, 2  ;;  %v149_v50 = vperm.slane %v6621_v33, 4 }
  0x51   :  { %3039 = vmatpush.bf16.msrb.mxu0 %v5197_v61  ;;  %v5096_v61 = vld [vmem:[#allocation8 + $0x7d0] sm:$0xf]  ;;  %v5456_v14 = vld [vmem:[#allocation8 + $0xaa0] sm:$0xf]  ;;  %v6639_v46 = vld [vmem:[#allocation7 + $0x8] sm:$0x3] }
  0x52   :  { %3027 = vmatpush.bf16.msrb.mxu3 %v5017_v29  ;;  %v5097_v0 = vor.u32 %v6116_v62, %v5096_v61  ;;  %v4917_v29 = vor.u32 %v6071_v28, %v4916_v27  ;;  %v4198_v22 = vld [vmem:[#allocation8 + $0xdc] sm:$0xf0]  ;;  %v5436_v28 = vld [vmem:[#allocation8 + $0xa78] sm:$0xf]  ;;  %s4029_s6 = sshll.u32 %s6537_s4, 4  ;;  %s4031_s15 = sshll.u32 %s6803_s7, 4  ;;  %s4030_s6 = int_to_ptr.vmem [resolvable:$true] %s4029_s6  ;;  %s4032_s15 = int_to_ptr.hbm [resolvable:$true] %s4031_s15 }
  0x53   :  { %3003 = vmatpush.bf16.msra.mxu1 %v4657_v42  ;;  %v5316_v42 = vld [vmem:[#allocation8 + $0x988] sm:$0xf]  ;;  %v4358_v27 = vld [vmem:[#allocation8 + $0x21c] sm:$0xf0] }
  0x54   :  { %v5317_v45 = vor.u32 %v6171_v43, %v5316_v42 }
  0x55   :  { %3040 = vmatpush.bf16.msrb.mxu0 %v5177_v11  ;;  %v5077_v11 = vor.u32 %v6111_v10, %v5076_v9  ;;  %v4218_v9 = vld [vmem:[#allocation8 + $0x104] sm:$0xf0]  ;;  %v5934_v10 = vld [vmem:[#allocation8 + $0x234] sm:$0xf] }
  0x56   :  { %4093 = vmatmul.msk.bf16.vlgmr.msrb.gmra.mxu1 %vm215_vm0, %v6599_v12  ;;  %v4837_v12 = vor.u32 %v6051_v8, %v4836_v7  ;;  %3028 = vmatpush.bf16.msrb.mxu3 %v4997_v60  ;;  %v6086_v7 = vld [vmem:[#allocation8 + $0x6f0] sm:$0xf0]  ;;  %v6211_v60 = vld [vmem:[#allocation8 + $0xad8] sm:$0xf0] }
  0x57   :  { %3004 = vmatpush.bf16.msra.mxu1 %v4637_v55  ;;  %v4756_v55 = vld [vmem:[#allocation8 + $0x528] sm:$0xf]  ;;  %v4977_v8 = vor.u32 %v6086_v7, %v4976_v5  ;;  %v5894_v5 = vld [vmem:[#allocation8 + $0xf4] sm:$0xf] }
  0x58   :  { %3015 = vmatpush.bf16.msrb.mxu2 %v4837_v12  ;;  %v4757_v58 = vor.u32 %v6031_v56, %v4756_v55  ;;  %v6081_v12 = vld [vmem:[#allocation8 + $0x6c8] sm:$0xf0]  ;;  %v4238_v55 = vld [vmem:[#allocation8 + $0x12c] sm:$0xf0]  ;;  %v5939_v56 = vld [vmem:[#allocation8 + $0x25c] sm:$0xf] }
  0x59   :  { %3041 = vmatpush.bf16.msrb.mxu0 %v5157_v25  ;;  %v4957_v17 = vor.u32 %v6081_v12, %v4956_v16  ;;  %v6076_v25 = vld [vmem:[#allocation8 + $0x6a0] sm:$0xf0] }
  0x5a   :  { %3029 = vmatpush.bf16.msrb.mxu3 %v4977_v8  ;;  %v4937_v26 = vor.u32 %v6076_v25, %v4936_v24  ;;  %v5477_v8 = vor.u32 %v6211_v60, %v5476_v59  ;;  %v151_v25 = vperm.slane %v6621_v33, 6 }
  0x5b   :  { %3005 = vmatpush.bf16.msra.mxu1 %v4617_v6  ;;  %v4737_v6 = vor.u32 %v6026_v4, %v4736_v3  ;;  %v146_v4 = vperm.slane %v6621_v33, 1 }
  0x5c   :  { %3016 = vmatpush.bf16.msrb.mxu2 %v4817_v30  ;;  %v4896_v30 = vld [vmem:[#allocation8 + $0x640] sm:$0xf] }
  0x5d   :  { %3042 = vmatpush.bf16.msrb.mxu0 %v5137_v35 }
  0x5e   :  { %3030 = vmatpush.bf16.msrb.mxu3 %v4957_v17 }
  0x5f   :  { %3006 = vmatpush.bf16.msra.mxu1 %v4597_v19  ;;  %v6106_v19 = vld [vmem:[#allocation8 + $0x790] sm:$0xf0] }
  0x60   :  { %3017 = vmatpush.bf16.msrb.mxu2 %v4797_v38  ;;  %v5057_v21 = vor.u32 %v6106_v19, %v5056_v18  ;;  %v6221_v38 = vld [vmem:[#allocation8 + $0xb28] sm:$0xf0]  ;;  %v4221_v19 = vor.u32 %v5894_v5, %v4218_v9  ;;  %v6191_v5 = vld [vmem:[#allocation8 + $0xa38] sm:$0xf0] }
  0x61   :  { %3043 = vmatpush.bf16.msrb.mxu0 %v5117_v52  ;;  %v5517_v43 = vor.u32 %v6221_v38, %v5516_v37  ;;  %v5884_v38 = vld [vmem:[#allocation8 + $0xa4] sm:$0xf] }
  0x62   :  { %3031 = vmatpush.bf16.msrb.mxu3 %v4937_v26  ;;  %v5929_v26 = vld [vmem:[#allocation8 + $0x20c] sm:$0xf] }
  0x63   :  { %3007 = vmatpush.bf16.msra.mxu1 %v4577_v31  ;;  %v6066_v31 = vld [vmem:[#allocation8 + $0x650] sm:$0xf0]  ;;  %v4361_v37 = vor.u32 %v5929_v26, %v4358_v27  ;;  %v5376_v27 = vld [vmem:[#allocation8 + $0xa00] sm:$0xf] }
  0x64   :  { %3018 = vmatpush.bf16.msrb.mxu2 %v4777_v44  ;;  %v4897_v32 = vor.u32 %v6066_v31, %v4896_v30  ;;  %v5676_v30 = vld [vmem:[#allocation8 + $0xc58] sm:$0xf] }
  0x65   :  { %3044 = vmatpush.bf16.msrb.mxu0 %v5097_v0 }
  0x66   :  { %3032 = vmatpush.bf16.msrb.mxu3 %v4917_v29  ;;  %v6201_v29 = vld [vmem:[#allocation8 + $0xa88] sm:$0xf0] }
  0x67   :  { %3052 = vmatpush.bf16.msrb.mxu1 %v5357_v34  ;;  %v145_v34 = vperm.slane %v6621_v33, 0 }
  0x68   :  { %3019 = vmatpush.bf16.msrb.mxu2 %v4757_v58  ;;  %v4398_v58 = vld [vmem:[#allocation8 + $0x26c] sm:$0xf0] }
  0x69   :  { %3045 = vmatpush.bf16.msrb.mxu0 %v5077_v11  ;;  %v4401_v3 = vor.u32 %v5939_v56, %v4398_v58  ;;  %v4378_v11 = vld [vmem:[#allocation8 + $0x244] sm:$0xf0]  ;;  %v4158_v58 = vld [vmem:[#allocation8 + $0x8c] sm:$0xf0] }
  0x6a   :  { %3033 = vmatpush.bf16.msrb.mxu3 %v4897_v32  ;;  %v4381_v20 = vor.u32 %v5934_v10, %v4378_v11 }
  0x6b   :  { %3053 = vmatpush.bf16.msrb.mxu1 %v5337_v41  ;;  %v148_v41 = vperm.slane %v6621_v33, 3 }
  0x6c   :  { %3020 = vmatpush.bf16.msrb.mxu2 %v4737_v6 }
  0x6d   :  { %3046 = vmatpush.bf16.msrb.mxu0 %v5057_v21  ;;  %v5889_v21 = vld [vmem:[#allocation8 + $0xcc] sm:$0xf] }
  0x6f   :  { %3054 = vmatpush.bf16.msrb.mxu1 %v5317_v45 }
  0x73   :  { %3055 = vmatpush.bf16.msrb.mxu1 %v5297_v48 }
  0x77   :  { %3056 = vmatpush.bf16.msrb.mxu1 %v5277_v54  ;;  %v5899_v54 = vld [vmem:[#allocation8 + $0x11c] sm:$0xf] }
  0x78   :  { %v4241_v63 = vor.u32 %v5899_v54, %v4238_v55 }
  0x7b   :  { %3057 = vmatpush.bf16.msrb.mxu1 %v5257_v2 }
  0x7f   :  { %3058 = vmatpush.bf16.msrb.mxu1 %v5237_v15  ;;  %v6206_v15 = vld [vmem:[#allocation8 + $0xab0] sm:$0xf0] }
  0x80   :  { %v5457_v24 = vor.u32 %v6206_v15, %v5456_v14  ;;  %v6251_v14 = vld [vmem:[#allocation8 + $0xc18] sm:$0xf0] }
  0x83   :  { %3059 = vmatpush.bf16.msrb.mxu1 %v5217_v23 }
  0xa3   :  { %v228_v35 = vpop.f32.mrf.mxu1 }
  0xa4   :  { %v229_v36 = vadd.f32 %v228_v35, %v145_v34  ;;  %v152_v34 = vperm.slane %v6621_v33, 7  ;;  %v6261_v35 = vld [vmem:[#allocation8 + $0xc68] sm:$0xf0] }
  0xa6   :  { %vm349_vm1 = vcmp.ge.f32.partialorder %v229_v36, 0.0  ;;  %v359_v39 = vmul.f32 0.01, %v229_v36 }
  0xa8   :  { %v369_v42 = vsel %vm349_vm1, %v229_v36, %v359_v39  ;;  %v4201_v36 = vor.u32 %v5889_v21, %v4198_v22  ;;  %v4178_v39 = vld [vmem:[#allocation8 + $0xb4] sm:$0xf0]  ;;  %v4138_v22 = vld [vmem:[#allocation8 + $0x64] sm:$0xf0] }
  0xa9   :  { %v280_v44 = vpop.f32.mrf.mxu0  ;;  %v6626_v45 = vpack.c.bf16 %v369_v42, %v369_v42  ;;  %v5437_v42 = vor.u32 %v6201_v29, %v5436_v28  ;;  %v4181_v56 = vor.u32 %v5884_v38, %v4178_v39  ;;  %v6186_v28 = vld [vmem:[#allocation8 + $0xa10] sm:$0xf0]  ;;  %v5616_v29 = vld [vmem:[#allocation8 + $0xbe0] sm:$0xf]  ;;  %v5869_v39 = vld [vmem:[#allocation8 + $0x2c] sm:$0xf] }
  0xaa   :  { %v254_v48 = vpop.f32.mrf.mxu2  ;;  %v281_v0 = vadd.f32 %v280_v44, %v149_v50  ;;  %v5416_v44 = vld [vmem:[#allocation8 + $0xa50] sm:$0xf]  ;;  %v5677_v50 = vor.u32 %v6261_v35, %v5676_v30  ;;  %v5979_v30 = vld [vmem:[#allocation8 + $0x39c] sm:$0xf] }
  0xab   :  { %v267_v49 = vpop.f32.mrf.mxu3  ;;  %v255_v51 = vadd.f32 %v254_v48, %v147_v40  ;;  %v230_v53 = vpop.f32.mrf.mxu1  ;;  %2969 = vmatmul.bf16.vlgmr.msra.gmra.mxu2 %v6626_v45  ;;  %v5924_v40 = vld [vmem:[#allocation8 + $0x1e4] sm:$0xf] }
  0xac   :  { %v268_v52 = vadd.f32 %v267_v49, %v148_v41  ;;  %3065 = vmatpush.bf16.msra.mxu2 %v5517_v43  ;;  %v363_v17 = vmul.f32 0.01, %v281_v0  ;;  %vm353_vm4 = vcmp.ge.f32.partialorder %v281_v0, 0.0  ;;  %v4338_v43 = vld [vmem:[#allocation8 + $0x1f4] sm:$0xf0] }
  0xad   :  { %vm351_vm2 = vcmp.ge.f32.partialorder %v255_v51, 0.0  ;;  %v361_v61 = vmul.f32 0.01, %v255_v51  ;;  %v6256_v53 = vld [vmem:[#allocation8 + $0xc40] sm:$0xf0] }
  0xae   :  { %vm352_vm3 = vcmp.ge.f32.partialorder %v268_v52, 0.0  ;;  %v362_v62 = vmul.f32 0.01, %v268_v52  ;;  %v373_v32 = vsel %vm353_vm4, %v281_v0, %v363_v17  ;;  %v4318_v0 = vld [vmem:[#allocation8 + $0x1cc] sm:$0xf0] }
  0xaf   :  { %v371_v1 = vsel %vm351_vm2, %v255_v51, %v361_v61  ;;  %v6643_v49 = vpack.c.bf16 %v373_v32, %v373_v32  ;;  %v6196_v51 = vld [vmem:[#allocation8 + $0xa60] sm:$0xf0]  ;;  %v5874_v17 = vld [vmem:[#allocation8 + $0x54] sm:$0xf] }
  0xb0   :  { %v372_v2 = vsel %vm352_vm3, %v268_v52, %v362_v62  ;;  %v6631_v6 = vpack.c.bf16 %v371_v1, %v371_v1  ;;  %3066 = vmatpush.bf16.msra.mxu2 %v5497_v57  ;;  %v5656_v52 = vld [vmem:[#allocation8 + $0xc30] sm:$0xf]  ;;  %v5879_v57 = vld [vmem:[#allocation8 + $0x7c] sm:$0xf]  ;;  %v4341_v62 = vor.u32 %v5924_v40, %v4338_v43  ;;  %v153_v1 = vperm.slane %v6639_v46, 0 }
  0xb1   :  { %v6633_v7 = vpack.c.bf16 %v372_v2, %v372_v2  ;;  %v282_v13 = vpop.f32.mrf.mxu0  ;;  %v5417_v2 = vor.u32 %v6196_v51, %v5416_v44  ;;  %v4161_v10 = vor.u32 %v5879_v57, %v4158_v58  ;;  %v4118_v40 = vld [vmem:[#allocation8 + $0x3c] sm:$0xf0]  ;;  %v5909_v43 = vld [vmem:[#allocation8 + $0x16c] sm:$0xf]  ;;  %v5596_v51 = vld [vmem:[#allocation8 + $0xbb8] sm:$0xf] }
  0xb2   :  { %v256_v16 = vpop.f32.mrf.mxu2  ;;  %2995 = vmatmul.bf16.vlgmr.msra.gmra.mxu0 %v6631_v6  ;;  %v5636_v13 = vld [vmem:[#allocation8 + $0xc08] sm:$0xf]  ;;  %v4278_v44 = vld [vmem:[#allocation8 + $0x17c] sm:$0xf0]  ;;  %v4121_v57 = vor.u32 %v5869_v39, %v4118_v40 }
  0xb3   :  { %v269_v12 = vpop.f32.mrf.mxu3  ;;  %3008 = vmatmul.bf16.vlgmr.msra.gmra.mxu1 %v6633_v7  ;;  %3091 = vmatpush.bf16.msra.mxu0 %v4241_v63  ;;  %v241_v18 = vpop.f32.mrf.mxu1  ;;  %v5919_v63 = vld [vmem:[#allocation8 + $0x1bc] sm:$0xf]  ;;  %v5637_v26 = vor.u32 %v6251_v14, %v5636_v13  ;;  %v4281_v58 = vor.u32 %v5909_v43, %v4278_v44  ;;  %v5969_v13 = vld [vmem:[#allocation8 + $0x34c] sm:$0xf]  ;;  %v4518_v14 = vld [vmem:[#allocation8 + $0x35c] sm:$0xf0] }
  0xb4   :  { %3104 = vmatpush.bf16.msra.mxu1 %v4401_v3  ;;  %v242_v23 = vadd.f32 %v241_v18, %v146_v4  ;;  %3067 = vmatpush.bf16.msra.mxu2 %v5477_v8  ;;  %v5657_v3 = vor.u32 %v6256_v53, %v5656_v52  ;;  %v5396_v4 = vld [vmem:[#allocation8 + $0xa28] sm:$0xf]  ;;  %v4321_v11 = vor.u32 %v5919_v63, %v4318_v0  ;;  %v150_v12 = vperm.slane %v6621_v33, 5  ;;  %v6246_v33 = vld [vmem:[#allocation8 + $0xbf0] sm:$0xf0] }
  0xb5   :  { %v5397_v21 = vor.u32 %v6191_v5, %v5396_v4  ;;  %v6241_v52 = vld [vmem:[#allocation8 + $0xbc8] sm:$0xf0]  ;;  %v5974_v53 = vld [vmem:[#allocation8 + $0x374] sm:$0xf]  ;;  %v4258_v63 = vld [vmem:[#allocation8 + $0x154] sm:$0xf0] }
  0xb6   :  { %vm350_vm5 = vcmp.ge.f32.partialorder %v242_v23, 0.0  ;;  %v360_v31 = vmul.f32 0.01, %v242_v23  ;;  %v6059_v0 = vld [vmem:[#allocation8 + $0x61c] sm:$0xf] }
  0xb7   :  { %3092 = vmatpush.bf16.msra.mxu0 %v4221_v19  ;;  %v6099_v5 = vld [vmem:[#allocation8 + $0x75c] sm:$0xf]  ;;  %v4998_v39 = vld [vmem:[#allocation8 + $0x71c] sm:$0xf0]  ;;  %v4478_v43 = vld [vmem:[#allocation8 + $0x30c] sm:$0xf0] }
  0xb8   :  { %3105 = vmatpush.bf16.msra.mxu1 %v4381_v20  ;;  %v370_v41 = vsel %vm350_vm5, %v242_v23, %v360_v31  ;;  %3068 = vmatpush.bf16.msra.mxu2 %v5457_v24  ;;  %v5914_v23 = vld [vmem:[#allocation8 + $0x194] sm:$0xf]  ;;  %v4298_v24 = vld [vmem:[#allocation8 + $0x1a4] sm:$0xf0]  ;;  %v4558_v31 = vld [vmem:[#allocation8 + $0x3ac] sm:$0xf0] }
  0xb9   :  { %v332_v47 = vpop.f32.mrf.mxu0  ;;  %v6641_v48 = vpack.c.bf16 %v370_v41, %v370_v41  ;;  %v5536_v40 = vld [vmem:[#allocation8 + $0xb40] sm:$0xf] }
  0xba   :  { %v306_v54 = vpop.f32.mrf.mxu2  ;;  %v333_v18 = vadd.f32 %v332_v47, %v153_v1  ;;  %v5617_v47 = vor.u32 %v6246_v33, %v5616_v29  ;;  %v4878_v1 = vld [vmem:[#allocation8 + $0x62c] sm:$0xf0]  ;;  %v5964_v29 = vld [vmem:[#allocation8 + $0x324] sm:$0xf]  ;;  %v4498_v33 = vld [vmem:[#allocation8 + $0x334] sm:$0xf0] }
  0xbb   :  { %v319_v55 = vpop.f32.mrf.mxu3  ;;  %v307_v59 = vadd.f32 %v306_v54, %v151_v25  ;;  %3093 = vmatpush.bf16.msra.mxu0 %v4201_v36  ;;  %v243_v61 = vpop.f32.mrf.mxu1  ;;  %2982 = vmatmul.bf16.vlgmr.msra.gmra.mxu3 %v6641_v48  ;;  %v4141_v36 = vor.u32 %v5874_v17, %v4138_v22  ;;  %v4881_v17 = vor.u32 %v6059_v0, %v4878_v1  ;;  %v4858_v22 = vld [vmem:[#allocation8 + $0x604] sm:$0xf0] }
  0xbc   :  { %v320_v60 = vadd.f32 %v319_v55, %v152_v34  ;;  %3106 = vmatpush.bf16.msra.mxu1 %v4361_v37  ;;  %3069 = vmatpush.bf16.msra.mxu2 %v5437_v42  ;;  %v4301_v37 = vor.u32 %v5914_v23, %v4298_v24  ;;  %v367_v38 = vmul.f32 0.01, %v333_v18  ;;  %v5377_v42 = vor.u32 %v6186_v28, %v5376_v27  ;;  %v4538_v55 = vld [vmem:[#allocation8 + $0x384] sm:$0xf0]  ;;  %v5904_v61 = vld [vmem:[#allocation8 + $0x144] sm:$0xf] }
  0xbd   :  { %vm355_vm6 = vcmp.ge.f32.partialorder %v307_v59, 0.0  ;;  %v365_v8 = vmul.f32 0.01, %v307_v59  ;;  %3078 = vmatpush.bf16.msra.mxu3 %v5677_v50  ;;  %3021 = vmatmul.bf16.vlgmr.msrb.gmra.mxu2 %v6643_v49  ;;  %vm357_vm8 = vcmp.ge.f32.partialorder %v333_v18, 0.0  ;;  %v4561_v50 = vor.u32 %v5979_v30, %v4558_v31  ;;  %v5556_v27 = vld [vmem:[#allocation8 + $0xb68] sm:$0xf] }
  0xbe   :  { %vm356_vm7 = vcmp.ge.f32.partialorder %v320_v60, 0.0  ;;  %v366_v9 = vmul.f32 0.01, %v320_v60  ;;  %v4541_v4 = vor.u32 %v5974_v53, %v4538_v55  ;;  %v4521_v24 = vor.u32 %v5969_v13, %v4518_v14  ;;  %v6231_v28 = vld [vmem:[#allocation8 + $0xb78] sm:$0xf0] }
  0xbf   :  { %v375_v15 = vsel %vm355_vm6, %v307_v59, %v365_v8  ;;  %3094 = vmatpush.bf16.msra.mxu0 %v4181_v56  ;;  %v377_v56 = vsel %vm357_vm8, %v333_v18, %v367_v38  ;;  %v5864_v59 = vld [vmem:[#allocation8 + $0x4] sm:$0xf]  ;;  %v5038_v8 = vld [vmem:[#allocation8 + $0x76c] sm:$0xf0]  ;;  %v6089_v38 = vld [vmem:[#allocation8 + $0x70c] sm:$0xf] }
  0xc0   :  { %v376_v16 = vsel %vm356_vm7, %v320_v60, %v366_v9  ;;  %3107 = vmatpush.bf16.msra.mxu1 %v4341_v62  ;;  %v6649_v19 = vpack.c.bf16 %v375_v15, %v375_v15  ;;  %3070 = vmatpush.bf16.msra.mxu2 %v5417_v2  ;;  %v4098_v60 = vld [vmem:[#allocation8 + $0x14] sm:$0xf0]  ;;  %v5576_v9 = vld [vmem:[#allocation8 + $0xb90] sm:$0xf]  ;;  %v5041_v18 = vor.u32 %v6099_v5, %v5038_v8  ;;  %v6044_v53 = vld [vmem:[#allocation8 + $0x5a4] sm:$0xf] }
  0xc1   :  { %v6651_v20 = vpack.c.bf16 %v376_v16, %v376_v16  ;;  %v334_v25 = vpop.f32.mrf.mxu0  ;;  %3079 = vmatpush.bf16.msra.mxu3 %v5657_v3  ;;  %v5597_v3 = vor.u32 %v6241_v52, %v5596_v51  ;;  %v4101_v16 = vor.u32 %v5864_v59, %v4098_v60  ;;  %v5001_v52 = vor.u32 %v6089_v38, %v4998_v39  ;;  %v5954_v59 = vld [vmem:[#allocation8 + $0x2d4] sm:$0xf]  ;;  %v4698_v0 = vld [vmem:[#allocation8 + $0x4c4] sm:$0xf0]  ;;  %v6039_v5 = vld [vmem:[#allocation8 + $0x57c] sm:$0xf] }
  0xc2   :  { %3047 = vmatmul.bf16.vlgmr.msrb.gmra.mxu0 %v6649_v19  ;;  %v308_v32 = vpop.f32.mrf.mxu2  ;;  %v6094_v25 = vld [vmem:[#allocation8 + $0x734] sm:$0xf]  ;;  %v6079_v13 = vld [vmem:[#allocation8 + $0x6bc] sm:$0xf]  ;;  %v4958_v14 = vld [vmem:[#allocation8 + $0x6cc] sm:$0xf0] }
  0xc3   :  { %3060 = vmatmul.bf16.vlgmr.msrb.gmra.mxu1 %v6651_v20  ;;  %v321_v34 = vpop.f32.mrf.mxu3  ;;  %3095 = vmatpush.bf16.msra.mxu0 %v4161_v10  ;;  %v293_v35 = vpop.f32.mrf.mxu1  ;;  %v6657_v10 = vpack.c.bf16 %v377_v56, %v377_v56  ;;  %v154_v32 = vperm.slane %v6639_v46, 1  ;;  %v6029_v38 = vld [vmem:[#allocation8 + $0x52c] sm:$0xf] }
  0xc4   :  { %3108 = vmatpush.bf16.msra.mxu1 %v4321_v11  ;;  %v294_v41 = vadd.f32 %v293_v35, %v150_v12  ;;  %3071 = vmatpush.bf16.msra.mxu2 %v5397_v21  ;;  %v6236_v11 = vld [vmem:[#allocation8 + $0xba0] sm:$0xf0]  ;;  %v4261_v12 = vor.u32 %v5904_v61, %v4258_v63  ;;  %v6054_v21 = vld [vmem:[#allocation8 + $0x5f4] sm:$0xf]  ;;  %v6049_v34 = vld [vmem:[#allocation8 + $0x5cc] sm:$0xf] }
  0xc5   :  { %3080 = vmatpush.bf16.msra.mxu3 %v5637_v26  ;;  %v5577_v23 = vor.u32 %v6236_v11, %v5576_v9  ;;  %v5018_v26 = vld [vmem:[#allocation8 + $0x744] sm:$0xf0]  ;;  %v4861_v30 = vor.u32 %v6054_v21, %v4858_v22  ;;  %v4838_v35 = vld [vmem:[#allocation8 + $0x5dc] sm:$0xf0]  ;;  %v6014_v63 = vld [vmem:[#allocation8 + $0x4b4] sm:$0xf] }
  0xc6   :  { %vm354_vm9 = vcmp.ge.f32.partialorder %v294_v41, 0.0  ;;  %v364_v54 = vmul.f32 0.01, %v294_v41  ;;  %v5021_v31 = vor.u32 %v6094_v25, %v5018_v26  ;;  %v4841_v51 = vor.u32 %v6049_v34, %v4838_v35  ;;  %v4798_v11 = vld [vmem:[#allocation8 + $0x58c] sm:$0xf0] }
  0xc7   :  { %3096 = vmatpush.bf16.msra.mxu0 %v4141_v36  ;;  %v5557_v36 = vor.u32 %v6231_v28, %v5556_v27  ;;  %v4801_v22 = vor.u32 %v6039_v5, %v4798_v11  ;;  %v4778_v26 = vld [vmem:[#allocation8 + $0x564] sm:$0xf0]  ;;  %v6074_v27 = vld [vmem:[#allocation8 + $0x694] sm:$0xf]  ;;  %v6139_v34 = vld [vmem:[#allocation8 + $0x89c] sm:$0xf] }
  0xc8   :  { %3109 = vmatpush.bf16.msra.mxu1 %v4301_v37  ;;  %v374_v62 = vsel %vm354_vm9, %v294_v41, %v364_v54  ;;  %3072 = vmatpush.bf16.msra.mxu2 %v5377_v42  ;;  %v4501_v37 = vor.u32 %v5964_v29, %v4498_v33  ;;  %v6226_v41 = vld [vmem:[#allocation8 + $0xb50] sm:$0xf0]  ;;  %v5959_v42 = vld [vmem:[#allocation8 + $0x2fc] sm:$0xf]  ;;  %v4818_v54 = vld [vmem:[#allocation8 + $0x5b4] sm:$0xf0] }
  0xc9   :  { %v6655_v2 = vpack.c.bf16 %v374_v62, %v374_v62  ;;  %3081 = vmatpush.bf16.msra.mxu3 %v5617_v47  ;;  %v6019_v47 = vld [vmem:[#allocation8 + $0x4dc] sm:$0xf]  ;;  %v5537_v55 = vor.u32 %v6226_v41, %v5536_v40  ;;  %v4481_v56 = vor.u32 %v5959_v42, %v4478_v43  ;;  %v4458_v62 = vld [vmem:[#allocation8 + $0x2e4] sm:$0xf0]  ;;  %v5944_v33 = vld [vmem:[#allocation8 + $0x284] sm:$0xf] }
  0xca   :  { %v4461_v9 = vor.u32 %v5954_v59, %v4458_v62  ;;  %v4938_v28 = vld [vmem:[#allocation8 + $0x6a4] sm:$0xf0]  ;;  %v5198_v35 = vld [vmem:[#allocation8 + $0x8ac] sm:$0xf0]  ;;  %v4758_v40 = vld [vmem:[#allocation8 + $0x53c] sm:$0xf0] }
  0xcb   :  { %3097 = vmatpush.bf16.msra.mxu0 %v4121_v57  ;;  %v295_v15 = vpop.f32.mrf.mxu1  ;;  %3034 = vmatmul.bf16.vlgmr.msrb.gmra.mxu3 %v6655_v2  ;;  %v6084_v57 = vld [vmem:[#allocation8 + $0x6e4] sm:$0xf]  ;;  %v6069_v41 = vld [vmem:[#allocation8 + $0x66c] sm:$0xf]  ;;  %v4918_v42 = vld [vmem:[#allocation8 + $0x67c] sm:$0xf0] }
  0xcc   :  { %3117 = vmatpush.bf16.msrb.mxu2 %v4561_v50  ;;  %3110 = vmatpush.bf16.msra.mxu1 %v4281_v58  ;;  %v4718_v50 = vld [vmem:[#allocation8 + $0x4ec] sm:$0xf0]  ;;  %v4978_v58 = vld [vmem:[#allocation8 + $0x6f4] sm:$0xf0]  ;;  %v4701_v15 = vor.u32 %v6014_v63, %v4698_v0  ;;  %v6259_v62 = vld [vmem:[#allocation8 + $0xc5c] sm:$0xf] }
  0xcd   :  { %3082 = vmatpush.bf16.msra.mxu3 %v5597_v3  ;;  %3073 = vmatmul.bf16.vlgmr.msra.gmra.mxu2 %v6657_v10  ;;  %v4721_v61 = vor.u32 %v6019_v47, %v4718_v50  ;;  %v4821_v3 = vor.u32 %v6044_v53, %v4818_v54  ;;  %v5999_v47 = vld [vmem:[#allocation8 + $0x43c] sm:$0xf]  ;;  %v4638_v50 = vld [vmem:[#allocation8 + $0x44c] sm:$0xf0]  ;;  %v4921_v53 = vor.u32 %v6069_v41, %v4918_v42  ;;  %v6024_v54 = vld [vmem:[#allocation8 + $0x504] sm:$0xf] }
  0xce   :  { %v5518_v59 = vld [vmem:[#allocation8 + $0xb2c] sm:$0xf0]  ;;  %v5994_v0 = vld [vmem:[#allocation8 + $0x414] sm:$0xf] }
  0xcf   :  { %3098 = vmatpush.bf16.msra.mxu0 %v4101_v16  ;;  %v5949_v16 = vld [vmem:[#allocation8 + $0x2ac] sm:$0xf]  ;;  %v5678_v63 = vld [vmem:[#allocation8 + $0xc6c] sm:$0xf0] }
  0xd0   :  { %3118 = vmatpush.bf16.msrb.mxu2 %v4541_v4  ;;  %3111 = vmatpush.bf16.msra.mxu1 %v4261_v12  ;;  %v4981_v4 = vor.u32 %v6084_v57, %v4978_v58  ;;  %v4438_v12 = vld [vmem:[#allocation8 + $0x2bc] sm:$0xf0]  ;;  %v4898_v57 = vld [vmem:[#allocation8 + $0x654] sm:$0xf0]  ;;  %v6219_v58 = vld [vmem:[#allocation8 + $0xb1c] sm:$0xf] }
  0xd1   :  { %3083 = vmatpush.bf16.msra.mxu3 %v5577_v23  ;;  %v4961_v23 = vor.u32 %v6079_v13, %v4958_v14  ;;  %v4441_v25 = vor.u32 %v5949_v16, %v4438_v12  ;;  %v5521_v11 = vor.u32 %v6219_v58, %v5518_v59  ;;  %v5681_v13 = vor.u32 %v6259_v62, %v5678_v63  ;;  %v6214_v14 = vld [vmem:[#allocation8 + $0xaf4] sm:$0xf]  ;;  %v6199_v58 = vld [vmem:[#allocation8 + $0xa7c] sm:$0xf]  ;;  %v5438_v59 = vld [vmem:[#allocation8 + $0xa8c] sm:$0xf0] }
  0xd2   :  { %3099 = vmatmul.bf16.vlgmr.msra.gmra.mxu0 %v6626_v45  ;;  %v5598_v62 = vld [vmem:[#allocation8 + $0xbcc] sm:$0xf0]  ;;  %v6109_v63 = vld [vmem:[#allocation8 + $0x7ac] sm:$0xf] }
  0xd3   :  { %3143 = vmatpush.bf16.msrb.mxu0 %v4881_v17  ;;  %3112 = vmatmul.bf16.vlgmr.msra.gmra.mxu1 %v6641_v48  ;;  %v345_v44 = vpop.f32.mrf.mxu1  ;;  %v6009_v17 = vld [vmem:[#allocation8 + $0x48c] sm:$0xf] }
  0xd4   :  { %3156 = vmatpush.bf16.msrb.mxu1 %v5041_v18  ;;  %3119 = vmatpush.bf16.msrb.mxu2 %v4521_v24  ;;  %v346_v46 = vadd.f32 %v345_v44, %v154_v32  ;;  %v4678_v18 = vld [vmem:[#allocation8 + $0x49c] sm:$0xf0]  ;;  %v6034_v24 = vld [vmem:[#allocation8 + $0x554] sm:$0xf]  ;;  %v4658_v32 = vld [vmem:[#allocation8 + $0x474] sm:$0xf0]  ;;  %v5201_v44 = vor.u32 %v6139_v34, %v5198_v35 }
  0xd5   :  { %3084 = vmatpush.bf16.msra.mxu3 %v5557_v36  ;;  %v4681_v29 = vor.u32 %v6009_v17, %v4678_v18  ;;  %v4781_v36 = vor.u32 %v6034_v24, %v4778_v26  ;;  %v6254_v17 = vld [vmem:[#allocation8 + $0xc34] sm:$0xf]  ;;  %v5658_v18 = vld [vmem:[#allocation8 + $0xc44] sm:$0xf0]  ;;  %v5138_v24 = vld [vmem:[#allocation8 + $0x834] sm:$0xf0] }
  0xd6   :  { %vm358_vm10 = vcmp.ge.f32.partialorder %v346_v46, 0.0  ;;  %v368_v60 = vmul.f32 0.01, %v346_v46  ;;  %v5661_v26 = vor.u32 %v6254_v17, %v5658_v18  ;;  %v4578_v34 = vld [vmem:[#allocation8 + $0x3d4] sm:$0xf0] }
  0xd7   :  { %3144 = vmatpush.bf16.msrb.mxu0 %v4861_v30  ;;  %v4418_v30 = vld [vmem:[#allocation8 + $0x294] sm:$0xf0]  ;;  %v6119_v35 = vld [vmem:[#allocation8 + $0x7fc] sm:$0xf]  ;;  %v6164_v18 = vld [vmem:[#allocation8 + $0x964] sm:$0xf] }
  0xd8   :  { %3157 = vmatpush.bf16.msrb.mxu1 %v5021_v31  ;;  %3120 = vmatpush.bf16.msrb.mxu2 %v4501_v37  ;;  %v378_v1 = vsel %vm358_vm10, %v346_v46, %v368_v60  ;;  %v6004_v31 = vld [vmem:[#allocation8 + $0x464] sm:$0xf]  ;;  %v4941_v37 = vor.u32 %v6074_v27, %v4938_v28  ;;  %v4421_v39 = vor.u32 %v5944_v33, %v4418_v30  ;;  %v6134_v46 = vld [vmem:[#allocation8 + $0x874] sm:$0xf]  ;;  %v6209_v27 = vld [vmem:[#allocation8 + $0xacc] sm:$0xf] }
  0xd9   :  { %v6664_v8 = vpack.c.bf16 %v378_v1, %v378_v1  ;;  %3085 = vmatpush.bf16.msra.mxu3 %v5537_v55  ;;  %v4661_v43 = vor.u32 %v6004_v31, %v4658_v32  ;;  %v4738_v55 = vld [vmem:[#allocation8 + $0x514] sm:$0xf0]  ;;  %v4641_v60 = vor.u32 %v5999_v47, %v4638_v50  ;;  %v4618_v1 = vld [vmem:[#allocation8 + $0x424] sm:$0xf0]  ;;  %v5478_v28 = vld [vmem:[#allocation8 + $0xadc] sm:$0xf0] }
  0xda   :  { %v4741_v5 = vor.u32 %v6024_v54, %v4738_v55  ;;  %v4621_v16 = vor.u32 %v5994_v0, %v4618_v1  ;;  %v6249_v30 = vld [vmem:[#allocation8 + $0xc0c] sm:$0xf]  ;;  %v5638_v31 = vld [vmem:[#allocation8 + $0xc1c] sm:$0xf0]  ;;  %v5984_v32 = vld [vmem:[#allocation8 + $0x3c4] sm:$0xf] }
  0xdb   :  { %3145 = vmatpush.bf16.msrb.mxu0 %v4841_v51  ;;  %v347_v21 = vpop.f32.mrf.mxu1  ;;  %v5178_v51 = vld [vmem:[#allocation8 + $0x884] sm:$0xf0]  ;;  %v4581_v41 = vor.u32 %v5984_v32, %v4578_v34  ;;  %v6244_v47 = vld [vmem:[#allocation8 + $0xbe4] sm:$0xf]  ;;  %v5078_v0 = vld [vmem:[#allocation8 + $0x7bc] sm:$0xf0] }
  0xdc   :  { %3158 = vmatpush.bf16.msrb.mxu1 %v5001_v52  ;;  %3121 = vmatpush.bf16.msrb.mxu2 %v4481_v56  ;;  %v4761_v52 = vor.u32 %v6029_v38, %v4758_v40  ;;  %v6064_v56 = vld [vmem:[#allocation8 + $0x644] sm:$0xf]  ;;  %v5989_v21 = vld [vmem:[#allocation8 + $0x3ec] sm:$0xf]  ;;  %v5358_v38 = vld [vmem:[#allocation8 + $0x9ec] sm:$0xf0]  ;;  %v5641_v40 = vor.u32 %v6249_v30, %v5638_v31 }
  0xdd   :  { %3130 = vmatpush.bf16.msrb.mxu3 %v4721_v61  ;;  %v5181_v61 = vor.u32 %v6134_v46, %v5178_v51  ;;  %v5618_v46 = vld [vmem:[#allocation8 + $0xbf4] sm:$0xf0]  ;;  %v6114_v51 = vld [vmem:[#allocation8 + $0x7d4] sm:$0xf]  ;;  %v5338_v54 = vld [vmem:[#allocation8 + $0x9c4] sm:$0xf0] }
  0xde   :  { %3086 = vmatmul.bf16.vlgmr.msra.gmra.mxu3 %v6664_v8  ;;  %v6169_v1 = vld [vmem:[#allocation8 + $0x98c] sm:$0xf]  ;;  %v5058_v17 = vld [vmem:[#allocation8 + $0x794] sm:$0xf0]  ;;  %v5558_v31 = vld [vmem:[#allocation8 + $0xb7c] sm:$0xf0] }
  0xdf   :  { %3146 = vmatpush.bf16.msrb.mxu0 %v4821_v3  ;;  %v6129_v3 = vld [vmem:[#allocation8 + $0x84c] sm:$0xf]  ;;  %v6159_v32 = vld [vmem:[#allocation8 + $0x93c] sm:$0xf]  ;;  %v5278_v34 = vld [vmem:[#allocation8 + $0x94c] sm:$0xf0] }
  0xe0   :  { %3159 = vmatpush.bf16.msrb.mxu1 %v4981_v4  ;;  %3122 = vmatpush.bf16.msrb.mxu2 %v4461_v9  ;;  %v5158_v4 = vld [vmem:[#allocation8 + $0x85c] sm:$0xf0]  ;;  %v4901_v9 = vor.u32 %v6064_v56, %v4898_v57  ;;  %v5621_v56 = vor.u32 %v6244_v47, %v5618_v46  ;;  %v6229_v30 = vld [vmem:[#allocation8 + $0xb6c] sm:$0xf] }
  0xe1   :  { %3131 = vmatpush.bf16.msrb.mxu3 %v4701_v15  ;;  %v5498_v15 = vld [vmem:[#allocation8 + $0xb04] sm:$0xf0]  ;;  %v5161_v12 = vor.u32 %v6129_v3, %v5158_v4  ;;  %v5318_v3 = vld [vmem:[#allocation8 + $0x99c] sm:$0xf0]  ;;  %v5441_v4 = vor.u32 %v6199_v58, %v5438_v59 }
  0xe2   :  { %v4564_v47 = vld [vmem:[#allocation8 + $0x3a0] sm:$0xf] }
  0xe3   :  { %3147 = vmatpush.bf16.msrb.mxu0 %v4801_v22  ;;  %v4598_v22 = vld [vmem:[#allocation8 + $0x3fc] sm:$0xf0] }
  0xe4   :  { %3160 = vmatpush.bf16.msrb.mxu1 %v4961_v23  ;;  %3123 = vmatpush.bf16.msrb.mxu2 %v4441_v25  ;;  %v6124_v23 = vld [vmem:[#allocation8 + $0x824] sm:$0xf]  ;;  %v5501_v25 = vor.u32 %v6214_v14, %v5498_v15  ;;  %v6234_v14 = vld [vmem:[#allocation8 + $0xb94] sm:$0xf]  ;;  %v5578_v15 = vld [vmem:[#allocation8 + $0xba4] sm:$0xf0] }
  0xe5   :  { %3132 = vmatpush.bf16.msrb.mxu3 %v4681_v29  ;;  %v4601_v29 = vor.u32 %v5989_v21, %v4598_v22  ;;  %v5141_v33 = vor.u32 %v6124_v23, %v5138_v24  ;;  %v5298_v21 = vld [vmem:[#allocation8 + $0x974] sm:$0xf0]  ;;  %v4244_v22 = vld [vmem:[#allocation8 + $0x120] sm:$0xf]  ;;  %v5902_v23 = vld [vmem:[#allocation8 + $0x130] sm:$0xf0] }
  0xe6   :  { %v4724_v46 = vld [vmem:[#allocation8 + $0x4e0] sm:$0xf] }
  0xe7   :  { %3148 = vmatpush.bf16.msrb.mxu0 %v4781_v36  ;;  %v5118_v36 = vld [vmem:[#allocation8 + $0x80c] sm:$0xf0] }
  0xe8   :  { %3161 = vmatpush.bf16.msrb.mxu1 %v4941_v37  ;;  %3124 = vmatpush.bf16.msrb.mxu2 %v4421_v39  ;;  %v6179_v37 = vld [vmem:[#allocation8 + $0x9dc] sm:$0xf]  ;;  %v5481_v39 = vor.u32 %v6209_v27, %v5478_v28  ;;  %v5121_v42 = vor.u32 %v6119_v35, %v5118_v36  ;;  %v6189_v27 = vld [vmem:[#allocation8 + $0xa2c] sm:$0xf]  ;;  %v5398_v28 = vld [vmem:[#allocation8 + $0xa3c] sm:$0xf0] }
  0xe9   :  { %3133 = vmatpush.bf16.msrb.mxu3 %v4661_v43  ;;  %v6204_v43 = vld [vmem:[#allocation8 + $0xaa4] sm:$0xf]  ;;  %v5361_v50 = vor.u32 %v6179_v37, %v5358_v38  ;;  %v4224_v35 = vld [vmem:[#allocation8 + $0xf8] sm:$0xf]  ;;  %v5897_v36 = vld [vmem:[#allocation8 + $0x108] sm:$0xf0]  ;;  %v5401_v37 = vor.u32 %v6189_v27, %v5398_v28 }
  0xea   :  { %v6184_v38 = vld [vmem:[#allocation8 + $0xa04] sm:$0xf] }
  0xeb   :  { %3149 = vmatpush.bf16.msrb.mxu0 %v4761_v52  ;;  %3125 = vmatmul.bf16.vlgmr.msrb.gmra.mxu2 %v6631_v6  ;;  %v5098_v52 = vld [vmem:[#allocation8 + $0x7e4] sm:$0xf0] }
  0xec   :  { %3169 = vmatpush.bf16.msra.mxu2 %v5201_v44  ;;  %3162 = vmatpush.bf16.msrb.mxu1 %v4921_v53  ;;  %v5458_v44 = vld [vmem:[#allocation8 + $0xab4] sm:$0xf0]  ;;  %v6174_v53 = vld [vmem:[#allocation8 + $0x9b4] sm:$0xf]  ;;  %v5101_v57 = vor.u32 %v6114_v51, %v5098_v52 }
  0xed   :  { %3134 = vmatpush.bf16.msrb.mxu3 %v4641_v60  ;;  %v5461_v55 = vor.u32 %v6204_v43, %v5458_v44  ;;  %v6239_v60 = vld [vmem:[#allocation8 + $0xbbc] sm:$0xf]  ;;  %v5281_v43 = vor.u32 %v6159_v32, %v5278_v34  ;;  %v4225_v44 = vor.u32 %v5897_v36, %v4224_v35  ;;  %v6022_v51 = vld [vmem:[#allocation8 + $0x4f0] sm:$0xf0]  ;;  %v4664_v34 = vld [vmem:[#allocation8 + $0x468] sm:$0xf] }
  0xee   :  { %v6154_v52 = vld [vmem:[#allocation8 + $0x914] sm:$0xf]  ;;  %v4725_v59 = vor.u32 %v6022_v51, %v4724_v46  ;;  %v6007_v35 = vld [vmem:[#allocation8 + $0x478] sm:$0xf0]  ;;  %v4144_v36 = vld [vmem:[#allocation8 + $0x58] sm:$0xf] }
  0xef   :  { %3150 = vmatpush.bf16.msrb.mxu0 %v4741_v5  ;;  %v6194_v5 = vld [vmem:[#allocation8 + $0xa54] sm:$0xf]  ;;  %v4124_v51 = vld [vmem:[#allocation8 + $0x30] sm:$0xf] }
  0xf0   :  { %3170 = vmatpush.bf16.msra.mxu2 %v5181_v61  ;;  %3163 = vmatpush.bf16.msrb.mxu1 %v4901_v9  ;;  %v5341_v61 = vor.u32 %v6174_v53, %v5338_v54  ;;  %v5601_v9 = vor.u32 %v6239_v60, %v5598_v62  ;;  %v5258_v53 = vld [vmem:[#allocation8 + $0x924] sm:$0xf0]  ;;  %v5977_v62 = vld [vmem:[#allocation8 + $0x388] sm:$0xf0]  ;;  %v6002_v46 = vld [vmem:[#allocation8 + $0x450] sm:$0xf0] }
  0xf1   :  { %3135 = vmatpush.bf16.msrb.mxu3 %v4621_v16  ;;  %v5321_v16 = vor.u32 %v6169_v1, %v5318_v3  ;;  %v5261_v60 = vor.u32 %v6154_v52, %v5258_v53  ;;  %v6017_v1 = vld [vmem:[#allocation8 + $0x4c8] sm:$0xf0]  ;;  %v5872_v52 = vld [vmem:[#allocation8 + $0x40] sm:$0xf0]  ;;  %v4364_v53 = vld [vmem:[#allocation8 + $0x210] sm:$0xf] }
  0xf2   :  { %3151 = vmatmul.bf16.vlgmr.msrb.gmra.mxu0 %v6643_v49  ;;  %v6149_v3 = vld [vmem:[#allocation8 + $0x8ec] sm:$0xf] }
  0xf3   :  { %3195 = vmatpush.bf16.msra.mxu0 %v5521_v11  ;;  %3164 = vmatmul.bf16.vlgmr.msrb.gmra.mxu1 %v6655_v2  ;;  %v5081_v11 = vor.u32 %v6109_v63, %v5078_v0  ;;  %v4704_v63 = vld [vmem:[#allocation8 + $0x4b8] sm:$0xf] }
  0xf4   :  { %3208 = vmatpush.bf16.msra.mxu1 %v5681_v13  ;;  %3171 = vmatpush.bf16.msra.mxu2 %v5161_v12  ;;  %v5418_v13 = vld [vmem:[#allocation8 + $0xa64] sm:$0xf0]  ;;  %v6104_v12 = vld [vmem:[#allocation8 + $0x784] sm:$0xf] }
  0xf5   :  { %3136 = vmatpush.bf16.msrb.mxu3 %v4601_v29  ;;  %v5421_v24 = vor.u32 %v6194_v5, %v5418_v13  ;;  %v5301_v29 = vor.u32 %v6164_v18, %v5298_v21  ;;  %v4184_v5 = vld [vmem:[#allocation8 + $0xa8] sm:$0xf]  ;;  %v4524_v13 = vld [vmem:[#allocation8 + $0x350] sm:$0xf]  ;;  %v6144_v21 = vld [vmem:[#allocation8 + $0x8c4] sm:$0xf] }
  0xf7   :  { %3196 = vmatpush.bf16.msra.mxu0 %v5501_v25  ;;  %v5581_v25 = vor.u32 %v6234_v14, %v5578_v15  ;;  %v4705_v14 = vor.u32 %v6017_v1, %v4704_v63  ;;  %v4104_v63 = vld [vmem:[#allocation8 + $0x8] sm:$0xf] }
  0xf8   :  { %3209 = vmatpush.bf16.msra.mxu1 %v5661_v26  ;;  %3172 = vmatpush.bf16.msra.mxu2 %v5141_v33  ;;  %v5061_v26 = vor.u32 %v6104_v12, %v5058_v17  ;;  %v4245_v33 = vor.u32 %v5902_v23, %v4244_v22  ;;  %v4684_v12 = vld [vmem:[#allocation8 + $0x490] sm:$0xf]  ;;  %v6012_v17 = vld [vmem:[#allocation8 + $0x4a0] sm:$0xf0]  ;;  %v5218_v22 = vld [vmem:[#allocation8 + $0x8d4] sm:$0xf0] }
  0xf9   :  { %3137 = vmatpush.bf16.msrb.mxu3 %v4581_v41  ;;  %v6224_v41 = vld [vmem:[#allocation8 + $0xb44] sm:$0xf]  ;;  %v4164_v23 = vld [vmem:[#allocation8 + $0x80] sm:$0xf]  ;;  %v4685_v28 = vor.u32 %v6012_v17, %v4684_v12  ;;  %v4344_v1 = vld [vmem:[#allocation8 + $0x1e8] sm:$0xf] }
  0xfa   :  { %v4604_v12 = vld [vmem:[#allocation8 + $0x3f0] sm:$0xf]  ;;  %v5992_v17 = vld [vmem:[#allocation8 + $0x400] sm:$0xf0] }
  0xfb   :  { %3197 = vmatpush.bf16.msra.mxu0 %v5481_v39  ;;  %v5561_v39 = vor.u32 %v6229_v30, %v5558_v31  ;;  %v5967_v30 = vld [vmem:[#allocation8 + $0x338] sm:$0xf0] }
  0xfc   :  { %3210 = vmatpush.bf16.msra.mxu1 %v5641_v40  ;;  %3173 = vmatpush.bf16.msra.mxu2 %v5121_v42  ;;  %v5378_v40 = vld [vmem:[#allocation8 + $0xa14] sm:$0xf0] }
  0xfd   :  { %3182 = vmatpush.bf16.msra.mxu3 %v5361_v50  ;;  %v5538_v42 = vld [vmem:[#allocation8 + $0xb54] sm:$0xf0]  ;;  %v5982_v50 = vld [vmem:[#allocation8 + $0x3b0] sm:$0xf0]  ;;  %v5381_v54 = vor.u32 %v6184_v38, %v5378_v40 }
  0xfe   :  { %3138 = vmatmul.bf16.vlgmr.msrb.gmra.mxu3 %v6633_v7  ;;  %v4565_v58 = vor.u32 %v5982_v50, %v4564_v47  ;;  %v4384_v38 = vld [vmem:[#allocation8 + $0x238] sm:$0xf]  ;;  %v4644_v50 = vld [vmem:[#allocation8 + $0x440] sm:$0xf] }
  0xff   :  { %3198 = vmatpush.bf16.msra.mxu0 %v5461_v55  ;;  %v4204_v55 = vld [vmem:[#allocation8 + $0xd0] sm:$0xf] }
 0x100   :  { %3211 = vmatpush.bf16.msra.mxu1 %v5621_v56  ;;  %3174 = vmatpush.bf16.msra.mxu2 %v5101_v57  ;;  %v5892_v56 = vld [vmem:[#allocation8 + $0xe0] sm:$0xf0]  ;;  %v5541_v57 = vor.u32 %v6224_v41, %v5538_v42  ;;  %v4665_v41 = vor.u32 %v6007_v35, %v4664_v34  ;;  %v4484_v42 = vld [vmem:[#allocation8 + $0x300] sm:$0xf] }
 0x101   :  { %3183 = vmatpush.bf16.msra.mxu3 %v5341_v61  ;;  %v4544_v61 = vld [vmem:[#allocation8 + $0x378] sm:$0xf]  ;;  %v4205_v0 = vor.u32 %v5892_v56, %v4204_v55  ;;  %v4645_v56 = vor.u32 %v6002_v46, %v4644_v50  ;;  %v5364_v34 = vld [vmem:[#allocation8 + $0x9e0] sm:$0xf]  ;;  %v6137_v46 = vld [vmem:[#allocation8 + $0x888] sm:$0xf0] }
 0x102   :  { %v5184_v50 = vld [vmem:[#allocation8 + $0x878] sm:$0xf] }
 0x103   :  { %3199 = vmatpush.bf16.msra.mxu0 %v5441_v4  ;;  %v5238_v4 = vld [vmem:[#allocation8 + $0x8fc] sm:$0xf0] }
 0x104   :  { %3212 = vmatpush.bf16.msra.mxu1 %v5601_v9  ;;  %3175 = vmatpush.bf16.msra.mxu2 %v5081_v11  ;;  %v5887_v9 = vld [vmem:[#allocation8 + $0xb8] sm:$0xf0]  ;;  %v4545_v11 = vor.u32 %v5977_v62, %v4544_v61  ;;  %v5241_v15 = vor.u32 %v6149_v3, %v5238_v4  ;;  %v4624_v61 = vld [vmem:[#allocation8 + $0x418] sm:$0xf]  ;;  %v5997_v62 = vld [vmem:[#allocation8 + $0x428] sm:$0xf0] }
 0x105   :  { %3184 = vmatpush.bf16.msra.mxu3 %v5321_v16  ;;  %v5972_v16 = vld [vmem:[#allocation8 + $0x360] sm:$0xf0]  ;;  %v4185_v18 = vor.u32 %v5887_v9, %v4184_v5  ;;  %v5927_v3 = vld [vmem:[#allocation8 + $0x1f8] sm:$0xf0]  ;;  %v4884_v5 = vld [vmem:[#allocation8 + $0x620] sm:$0xf] }
 0x106   :  { %v4525_v27 = vor.u32 %v5972_v16, %v4524_v13  ;;  %v6062_v9 = vld [vmem:[#allocation8 + $0x630] sm:$0xf0]  ;;  %v4444_v13 = vld [vmem:[#allocation8 + $0x2b0] sm:$0xf]  ;;  %v4345_v16 = vor.u32 %v5927_v3, %v4344_v1  ;;  %v4264_v3 = vld [vmem:[#allocation8 + $0x148] sm:$0xf] }
 0x107   :  { %3200 = vmatpush.bf16.msra.mxu0 %v5421_v24  ;;  %v5882_v24 = vld [vmem:[#allocation8 + $0x90] sm:$0xf0] }
 0x108   :  { %3213 = vmatpush.bf16.msra.mxu1 %v5581_v25  ;;  %3176 = vmatpush.bf16.msra.mxu2 %v5061_v26  ;;  %v4404_v25 = vld [vmem:[#allocation8 + $0x260] sm:$0xf]  ;;  %v5942_v26 = vld [vmem:[#allocation8 + $0x270] sm:$0xf0]  ;;  %v4165_v31 = vor.u32 %v5882_v24, %v4164_v23  ;;  %v4864_v24 = vld [vmem:[#allocation8 + $0x5f8] sm:$0xf] }
 0x109   :  { %3185 = vmatpush.bf16.msra.mxu3 %v5301_v29  ;;  %v5221_v29 = vor.u32 %v6144_v21, %v5218_v22  ;;  %v4405_v32 = vor.u32 %v5942_v26, %v4404_v25  ;;  %v4324_v21 = vld [vmem:[#allocation8 + $0x1c0] sm:$0xf]  ;;  %v5922_v22 = vld [vmem:[#allocation8 + $0x1d0] sm:$0xf0]  ;;  %v6057_v25 = vld [vmem:[#allocation8 + $0x608] sm:$0xf0] }
 0x10a   :  { %v4424_v26 = vld [vmem:[#allocation8 + $0x288] sm:$0xf]  ;;  %v4865_v35 = vor.u32 %v6057_v25, %v4864_v24  ;;  %v4784_v24 = vld [vmem:[#allocation8 + $0x558] sm:$0xf] }
 0x10b   :  { %3201 = vmatpush.bf16.msra.mxu0 %v5401_v37  ;;  %3177 = vmatmul.bf16.vlgmr.msra.gmra.mxu2 %v6649_v19  ;;  %v5877_v37 = vld [vmem:[#allocation8 + $0x68] sm:$0xf0] }
 0x10c   :  { %3221 = vmatpush.bf16.msrb.mxu2 %v4245_v33  ;;  %3214 = vmatpush.bf16.msra.mxu1 %v5561_v39  ;;  %v4504_v33 = vld [vmem:[#allocation8 + $0x328] sm:$0xf]  ;;  %v5937_v39 = vld [vmem:[#allocation8 + $0x248] sm:$0xf0] }
 0x10d   :  { %3186 = vmatpush.bf16.msra.mxu3 %v5281_v43  ;;  %v4505_v40 = vor.u32 %v5967_v30, %v4504_v33  ;;  %v5962_v43 = vld [vmem:[#allocation8 + $0x310] sm:$0xf0]  ;;  %v4385_v47 = vor.u32 %v5937_v39, %v4384_v38  ;;  %v5987_v33 = vld [vmem:[#allocation8 + $0x3d8] sm:$0xf0]  ;;  %v4325_v30 = vor.u32 %v5922_v22, %v4324_v21  ;;  %v5917_v38 = vld [vmem:[#allocation8 + $0x1a8] sm:$0xf0] }
 0x10e   :  { %v4485_v55 = vor.u32 %v5962_v43, %v4484_v42  ;;  %v5304_v22 = vld [vmem:[#allocation8 + $0x968] sm:$0xf] }
 0x10f   :  { %3202 = vmatpush.bf16.msra.mxu0 %v5381_v54  ;;  %v5932_v54 = vld [vmem:[#allocation8 + $0x220] sm:$0xf0] }
 0x110   :  { %3222 = vmatpush.bf16.msrb.mxu2 %v4225_v44  ;;  %3215 = vmatpush.bf16.msra.mxu1 %v5541_v57  ;;  %v4145_v44 = vor.u32 %v5877_v37, %v4144_v36  ;;  %v4464_v57 = vld [vmem:[#allocation8 + $0x2d8] sm:$0xf]  ;;  %v6182_v36 = vld [vmem:[#allocation8 + $0x9f0] sm:$0xf0] }
 0x111   :  { %3187 = vmatpush.bf16.msra.mxu3 %v5261_v60  ;;  %v4365_v60 = vor.u32 %v5932_v54, %v4364_v53  ;;  %v4304_v37 = vld [vmem:[#allocation8 + $0x198] sm:$0xf]  ;;  %v6177_v53 = vld [vmem:[#allocation8 + $0x9c8] sm:$0xf0]  ;;  %v4284_v54 = vld [vmem:[#allocation8 + $0x170] sm:$0xf] }
 0x112   :  { %3203 = vmatmul.bf16.vlgmr.msra.gmra.mxu0 %v6657_v10 }
 0x113   :  { %3247 = vmatpush.bf16.msrb.mxu0 %v4565_v58  ;;  %3216 = vmatmul.bf16.vlgmr.msra.gmra.mxu1 %v6664_v8  ;;  %v5957_v58 = vld [vmem:[#allocation8 + $0x2e8] sm:$0xf0] }
 0x114   :  { %3260 = vmatpush.bf16.msrb.mxu1 %v4725_v59  ;;  %3223 = vmatpush.bf16.msrb.mxu2 %v4205_v0  ;;  %v4125_v59 = vor.u32 %v5872_v52, %v4124_v51  ;;  %v5867_v0 = vld [vmem:[#allocation8 + $0x18] sm:$0xf0]  ;;  %v4465_v4 = vor.u32 %v5957_v58, %v4464_v57  ;;  %v5344_v51 = vld [vmem:[#allocation8 + $0x9b8] sm:$0xf]  ;;  %v5185_v58 = vor.u32 %v6137_v46, %v5184_v50  ;;  %v6117_v50 = vld [vmem:[#allocation8 + $0x7e8] sm:$0xf0] }
 0x115   :  { %3188 = vmatpush.bf16.msra.mxu3 %v5241_v15  ;;  %v4105_v15 = vor.u32 %v5867_v0, %v4104_v63  ;;  %v6047_v57 = vld [vmem:[#allocation8 + $0x5b8] sm:$0xf0]  ;;  %v5324_v63 = vld [vmem:[#allocation8 + $0x990] sm:$0xf]  ;;  %v6172_v0 = vld [vmem:[#allocation8 + $0x9a0] sm:$0xf0] }
 0x117   :  { %3248 = vmatpush.bf16.msrb.mxu0 %v4545_v11  ;;  %v4625_v11 = vor.u32 %v5997_v62, %v4624_v61  ;;  %v6132_v62 = vld [vmem:[#allocation8 + $0x860] sm:$0xf0] }
 0x118   :  { %3261 = vmatpush.bf16.msrb.mxu1 %v4705_v14  ;;  %3224 = vmatpush.bf16.msrb.mxu2 %v4185_v18  ;;  %v5952_v14 = vld [vmem:[#allocation8 + $0x2c0] sm:$0xf0]  ;;  %v4885_v18 = vor.u32 %v6062_v9, %v4884_v5  ;;  %v4804_v5 = vld [vmem:[#allocation8 + $0x580] sm:$0xf]  ;;  %v6042_v9 = vld [vmem:[#allocation8 + $0x590] sm:$0xf0] }
 0x119   :  { %3189 = vmatpush.bf16.msra.mxu3 %v5221_v29  ;;  %v4445_v23 = vor.u32 %v5952_v14, %v4444_v13  ;;  %v4584_v29 = vld [vmem:[#allocation8 + $0x3c8] sm:$0xf]  ;;  %v6102_v13 = vld [vmem:[#allocation8 + $0x770] sm:$0xf0] }
 0x11a   :  { %v4585_v42 = vor.u32 %v5987_v33, %v4584_v29 }
 0x11b   :  { %3249 = vmatpush.bf16.msrb.mxu0 %v4525_v27  ;;  %v4605_v27 = vor.u32 %v5992_v17, %v4604_v12  ;;  %v5144_v12 = vld [vmem:[#allocation8 + $0x828] sm:$0xf]  ;;  %v6127_v17 = vld [vmem:[#allocation8 + $0x838] sm:$0xf0] }
 0x11c   :  { %3262 = vmatpush.bf16.msrb.mxu1 %v4685_v28  ;;  %3225 = vmatpush.bf16.msrb.mxu2 %v4165_v31  ;;  %v5947_v28 = vld [vmem:[#allocation8 + $0x298] sm:$0xf0]  ;;  %v5204_v31 = vld [vmem:[#allocation8 + $0x8a0] sm:$0xf] }
 0x11d   :  { %3234 = vmatpush.bf16.msrb.mxu3 %v4405_v32  ;;  %v6142_v32 = vld [vmem:[#allocation8 + $0x8b0] sm:$0xf0]  ;;  %v4425_v39 = vor.u32 %v5947_v28, %v4424_v26  ;;  %v6037_v26 = vld [vmem:[#allocation8 + $0x568] sm:$0xf0] }
 0x11e   :  { %3190 = vmatmul.bf16.vlgmr.msra.gmra.mxu3 %v6651_v20  ;;  %v5205_v43 = vor.u32 %v6142_v32, %v5204_v31  ;;  %v6097_v28 = vld [vmem:[#allocation8 + $0x748] sm:$0xf0]  ;;  %v5124_v32 = vld [vmem:[#allocation8 + $0x800] sm:$0xf] }
 0x11f   :  { %3250 = vmatpush.bf16.msrb.mxu0 %v4505_v40  ;;  %v4844_v40 = vld [vmem:[#allocation8 + $0x5d0] sm:$0xf] }
 0x120   :  { %3263 = vmatpush.bf16.msrb.mxu1 %v4665_v41  ;;  %3226 = vmatpush.bf16.msrb.mxu2 %v4145_v44  ;;  %v6052_v41 = vld [vmem:[#allocation8 + $0x5e0] sm:$0xf0]  ;;  %v5365_v44 = vor.u32 %v6182_v36, %v5364_v34  ;;  %v6122_v34 = vld [vmem:[#allocation8 + $0x810] sm:$0xf0] }
 0x121   :  { %3235 = vmatpush.bf16.msrb.mxu3 %v4385_v47  ;;  %v4305_v47 = vor.u32 %v5917_v38, %v4304_v37  ;;  %v4845_v52 = vor.u32 %v6052_v41, %v4844_v40  ;;  %v5284_v37 = vld [vmem:[#allocation8 + $0x940] sm:$0xf]  ;;  %v6162_v38 = vld [vmem:[#allocation8 + $0x950] sm:$0xf0]  ;;  %v6032_v40 = vld [vmem:[#allocation8 + $0x540] sm:$0xf0] }
 0x122   :  { %v5004_v41 = vld [vmem:[#allocation8 + $0x710] sm:$0xf] }
 0x123   :  { %3251 = vmatpush.bf16.msrb.mxu0 %v4485_v55  ;;  %v5912_v55 = vld [vmem:[#allocation8 + $0x180] sm:$0xf0] }
 0x124   :  { %3264 = vmatpush.bf16.msrb.mxu1 %v4645_v56  ;;  %3227 = vmatpush.bf16.msrb.mxu2 %v4125_v59  ;;  %v4824_v56 = vld [vmem:[#allocation8 + $0x5a8] sm:$0xf]  ;;  %v5164_v59 = vld [vmem:[#allocation8 + $0x850] sm:$0xf]  ;;  %v4285_v61 = vor.u32 %v5912_v55, %v4284_v54 }
 0x125   :  { %3236 = vmatpush.bf16.msrb.mxu3 %v4365_v60  ;;  %v5345_v60 = vor.u32 %v6177_v53, %v5344_v51  ;;  %v4825_v1 = vor.u32 %v6047_v57, %v4824_v56  ;;  %v5165_v14 = vor.u32 %v6132_v62, %v5164_v59  ;;  %v6157_v53 = vld [vmem:[#allocation8 + $0x928] sm:$0xf0]  ;;  %v4744_v54 = vld [vmem:[#allocation8 + $0x508] sm:$0xf]  ;;  %v6027_v56 = vld [vmem:[#allocation8 + $0x518] sm:$0xf0] }
 0x126   :  { %v4984_v57 = vld [vmem:[#allocation8 + $0x6e8] sm:$0xf]  ;;  %v6685_v59 = vld [vmem:[#allocation10] sm:$0x1f] }
 0x127   :  { %3252 = vmatpush.bf16.msrb.mxu0 %v4465_v4  ;;  %v5907_v4 = vld [vmem:[#allocation8 + $0x158] sm:$0xf0] }
 0x128   :  { %3265 = vmatpush.bf16.msrb.mxu1 %v4625_v11  ;;  %3228 = vmatpush.bf16.msrb.mxu2 %v4105_v15  ;;  %v5044_v11 = vld [vmem:[#allocation8 + $0x760] sm:$0xf]  ;;  %v5325_v15 = vor.u32 %v6172_v0, %v5324_v63  ;;  %v6222_v0 = vld [vmem:[#allocation8 + $0xb30] sm:$0xf0] }
 0x129   :  { %3237 = vmatpush.bf16.msrb.mxu3 %v4345_v16  ;;  %v4265_v16 = vor.u32 %v5907_v4, %v4264_v3  ;;  %v5045_v21 = vor.u32 %v6102_v13, %v5044_v11  ;;  %v5524_v63 = vld [vmem:[#allocation8 + $0xb20] sm:$0xf]  ;;  %v5084_v3 = vld [vmem:[#allocation8 + $0x7b0] sm:$0xf]  ;;  %v6112_v4 = vld [vmem:[#allocation8 + $0x7c0] sm:$0xf0] }
 0x12a   :  { %v5244_v11 = vld [vmem:[#allocation8 + $0x8f0] sm:$0xf]  ;;  %v6152_v13 = vld [vmem:[#allocation8 + $0x900] sm:$0xf0] }
 0x12b   :  { %3253 = vmatpush.bf16.msrb.mxu0 %v4445_v23  ;;  %3229 = vmatmul.bf16.vlgmr.msrb.gmra.mxu2 %v6626_v45  ;;  %v6167_v23 = vld [vmem:[#allocation8 + $0x978] sm:$0xf0] }
 0x12c   :  { %3273 = vmatpush.bf16.msra.mxu2 %v4885_v18  ;;  %3266 = vmatpush.bf16.msrb.mxu1 %v4605_v27  ;;  %v4805_v18 = vor.u32 %v6042_v9, %v4804_v5  ;;  %v5024_v27 = vld [vmem:[#allocation8 + $0x738] sm:$0xf]  ;;  %v5305_v31 = vor.u32 %v6167_v23, %v5304_v22  ;;  %v4745_v5 = vor.u32 %v6027_v56, %v4744_v54  ;;  %v5064_v22 = vld [vmem:[#allocation8 + $0x788] sm:$0xf]  ;;  %v4226_v54 = vld [vmem:[#allocation8 + $0x10c] sm:$0xf0] }
 0x12d   :  { %3238 = vmatpush.bf16.msrb.mxu3 %v4325_v30  ;;  %v5145_v30 = vor.u32 %v6127_v17, %v5144_v12  ;;  %v5025_v36 = vor.u32 %v6097_v28, %v5024_v27  ;;  %v6082_v12 = vld [vmem:[#allocation8 + $0x6d0] sm:$0xf0]  ;;  %v5085_v17 = vor.u32 %v6112_v4, %v5084_v3  ;;  %v5245_v23 = vor.u32 %v6152_v13, %v5244_v11  ;;  %v6147_v27 = vld [vmem:[#allocation8 + $0x8d8] sm:$0xf0]  ;;  %v4366_v11 = vld [vmem:[#allocation8 + $0x224] sm:$0xf0] }
 0x12e   :  { %v6678_v25 = vpop.f32.mrf.mxu2  ;;  %v5890_v3 = vld [vmem:[#allocation8 + $0xd4] sm:$0xf] }
 0x12f   :  { %3254 = vmatpush.bf16.msrb.mxu0 %v4425_v39  ;;  %v6680_v29 = vpop.f32.mrf.mxu0  ;;  %v4764_v39 = vld [vmem:[#allocation8 + $0x530] sm:$0xf] }
 0x130   :  { %3274 = vmatpush.bf16.msra.mxu2 %v4865_v35  ;;  %3267 = vmatpush.bf16.msrb.mxu1 %v4585_v42  ;;  %v6682_v33 = vpop.f32.mrf.mxu1  ;;  %v4785_v35 = vor.u32 %v6037_v26, %v4784_v24  ;;  %v6092_v42 = vld [vmem:[#allocation8 + $0x720] sm:$0xf0]  ;;  %v4765_v46 = vor.u32 %v6032_v40, %v4764_v39  ;;  %v6107_v24 = vld [vmem:[#allocation8 + $0x798] sm:$0xf0]  ;;  %v5224_v26 = vld [vmem:[#allocation8 + $0x8c8] sm:$0xf] }
 0x131   :  { %3239 = vmatpush.bf16.msrb.mxu3 %v4305_v47  ;;  %v5104_v47 = vld [vmem:[#allocation8 + $0x7d8] sm:$0xf]  ;;  %v5005_v51 = vor.u32 %v6092_v42, %v5004_v41  ;;  %v5065_v41 = vor.u32 %v6107_v24, %v5064_v22  ;;  %v5484_v42 = vld [vmem:[#allocation8 + $0xad0] sm:$0xf]  ;;  %v6262_v22 = vld [vmem:[#allocation8 + $0xc70] sm:$0xf0] }
 0x132   :  { %3255 = vmatmul.bf16.vlgmr.msrb.gmra.mxu0 %v6631_v6  ;;  %v5105_v62 = vor.u32 %v6117_v50, %v5104_v47  ;;  %v5225_v50 = vor.u32 %v6147_v27, %v5224_v26 }
 0x133   :  { %3299 = vmatpush.bf16.msra.mxu0 %v5205_v43  ;;  %3268 = vmatmul.bf16.vlgmr.msrb.gmra.mxu1 %v6633_v7  ;;  %v5125_v43 = vor.u32 %v6122_v34, %v5124_v32  ;;  %v5940_v32 = vld [vmem:[#allocation8 + $0x264] sm:$0xf] }
 0x134   :  { %3312 = vmatpush.bf16.msra.mxu1 %v5365_v44  ;;  %3275 = vmatpush.bf16.msra.mxu2 %v4845_v52  ;;  %v5285_v44 = vor.u32 %v6162_v38, %v5284_v37  ;;  %v5264_v52 = vld [vmem:[#allocation8 + $0x918] sm:$0xf]  ;;  %v6077_v38 = vld [vmem:[#allocation8 + $0x6a8] sm:$0xf0] }
 0x135   :  { %3240 = vmatpush.bf16.msrb.mxu3 %v4285_v61  ;;  %v4944_v37 = vld [vmem:[#allocation8 + $0x698] sm:$0xf] }
 0x136   :  { %v2972_v55 = vpop.f32.mrf.mxu2 }
 0x137   :  { %3300 = vmatpush.bf16.msra.mxu0 %v5185_v58  ;;  %v6087_v58 = vld [vmem:[#allocation8 + $0x6f8] sm:$0xf0] }
 0x138   :  { %3313 = vmatpush.bf16.msra.mxu1 %v5345_v60  ;;  %3276 = vmatpush.bf16.msra.mxu2 %v4825_v1  ;;  %v2998_v60 = vpop.f32.mrf.mxu0  ;;  %v3011_v61 = vpop.f32.mrf.mxu1  ;;  %v5265_v1 = vor.u32 %v6157_v53, %v5264_v52  ;;  %v4985_v9 = vor.u32 %v6087_v58, %v4984_v57  ;;  %v4945_v52 = vor.u32 %v6077_v38, %v4944_v37  ;;  %v5895_v53 = vld [vmem:[#allocation8 + $0xfc] sm:$0xf]  ;;  %v4386_v58 = vld [vmem:[#allocation8 + $0x24c] sm:$0xf0]  ;;  %v5424_v37 = vld [vmem:[#allocation8 + $0xa58] sm:$0xf] }
 0x139   :  { %3241 = vmatpush.bf16.msrb.mxu3 %v4265_v16  ;;  %v4964_v16 = vld [vmem:[#allocation8 + $0x6c0] sm:$0xf]  ;;  %v5935_v55 = vld [vmem:[#allocation8 + $0x23c] sm:$0xf]  ;;  %v4924_v60 = vld [vmem:[#allocation8 + $0x670] sm:$0xf] }
 0x13a   :  { %v4965_v28 = vor.u32 %v6082_v12, %v4964_v16  ;;  %v6072_v61 = vld [vmem:[#allocation8 + $0x680] sm:$0xf0]  ;;  %v4389_v4 = vor.u32 %v5935_v55, %v4386_v58  ;;  %v6067_v16 = vld [vmem:[#allocation8 + $0x658] sm:$0xf0]  ;;  %v5444_v12 = vld [vmem:[#allocation8 + $0xa80] sm:$0xf] }
 0x13b   :  { %3301 = vmatpush.bf16.msra.mxu0 %v5165_v14  ;;  %v871_v14 = vperm.slane %v6685_v59, 0  ;;  %v6197_v38 = vld [vmem:[#allocation8 + $0xa68] sm:$0xf0]  ;;  %v6192_v55 = vld [vmem:[#allocation8 + $0xa40] sm:$0xf0] }
 0x13c   :  { %3314 = vmatpush.bf16.msra.mxu1 %v5325_v15  ;;  %3277 = vmatpush.bf16.msra.mxu2 %v4805_v18  ;;  %v5525_v15 = vor.u32 %v6222_v0, %v5524_v63  ;;  %v5504_v18 = vld [vmem:[#allocation8 + $0xaf8] sm:$0xf]  ;;  %v6207_v63 = vld [vmem:[#allocation8 + $0xab8] sm:$0xf0]  ;;  %v5644_v58 = vld [vmem:[#allocation8 + $0xc10] sm:$0xf] }
 0x13d   :  { %3286 = vmatpush.bf16.msra.mxu3 %v5045_v21  ;;  %v6217_v21 = vld [vmem:[#allocation8 + $0xb08] sm:$0xf0]  ;;  %v2971_v34 = vadd.f32 %v6678_v25, %v871_v14 }
 0x13e   :  { %3242 = vmatmul.bf16.vlgmr.msrb.gmra.mxu3 %v6641_v48  ;;  %v2983_v39 = vpop.f32.mrf.mxu3 }
 0x13f   :  { %3302 = vmatpush.bf16.msra.mxu0 %v5145_v30  ;;  %v5900_v30 = vld [vmem:[#allocation8 + $0x124] sm:$0xf] }
 0x140   :  { %3315 = vmatpush.bf16.msra.mxu1 %v5305_v31  ;;  %3278 = vmatpush.bf16.msra.mxu2 %v4785_v35  ;;  %v4246_v31 = vld [vmem:[#allocation8 + $0x134] sm:$0xf0]  ;;  %v5505_v35 = vor.u32 %v6217_v21, %v5504_v18  ;;  %v6689_v40 = vpop.f32.mrf.mxu0  ;;  %v6691_v47 = vpop.f32.mrf.mxu1  ;;  %v6202_v18 = vld [vmem:[#allocation8 + $0xa90] sm:$0xf0]  ;;  %v5684_v21 = vld [vmem:[#allocation8 + $0xc60] sm:$0xf] }
 0x141   :  { %3287 = vmatpush.bf16.msra.mxu3 %v5025_v36  ;;  %v4406_v36 = vld [vmem:[#allocation8 + $0x274] sm:$0xf0]  ;;  %v4249_v25 = vor.u32 %v5900_v30, %v4246_v31  ;;  %v5885_v30 = vld [vmem:[#allocation8 + $0xac] sm:$0xf]  ;;  %v4186_v31 = vld [vmem:[#allocation8 + $0xbc] sm:$0xf0] }
 0x143   :  { %3303 = vmatpush.bf16.msra.mxu0 %v5125_v43  ;;  %v6212_v43 = vld [vmem:[#allocation8 + $0xae0] sm:$0xf0] }
 0x144   :  { %3316 = vmatpush.bf16.msra.mxu1 %v5285_v44  ;;  %3279 = vmatpush.bf16.msra.mxu2 %v4765_v46  ;;  %v2984_v44 = vadd.f32 %v2983_v39, %v2971_v34  ;;  %v3022_v46 = vpop.f32.mrf.mxu2  ;;  %v5485_v57 = vor.u32 %v6212_v43, %v5484_v42  ;;  %v5685_v34 = vor.u32 %v6262_v22, %v5684_v21  ;;  %v5664_v39 = vld [vmem:[#allocation8 + $0xc38] sm:$0xf]  ;;  %v872_v42 = vperm.slane %v6685_v59, 1  ;;  %v5980_v21 = vld [vmem:[#allocation8 + $0x3a4] sm:$0xf] }
 0x145   :  { %3288 = vmatpush.bf16.msra.mxu3 %v5005_v51  ;;  %v4409_v51 = vor.u32 %v5940_v32, %v4406_v36  ;;  %v5445_v32 = vor.u32 %v6202_v18, %v5444_v12  ;;  %v4346_v36 = vld [vmem:[#allocation8 + $0x1fc] sm:$0xf0]  ;;  %v4189_v43 = vor.u32 %v5885_v30, %v4186_v31  ;;  %v5624_v12 = vld [vmem:[#allocation8 + $0xbe8] sm:$0xf]  ;;  %v4566_v22 = vld [vmem:[#allocation8 + $0x3b4] sm:$0xf0] }
 0x146   :  { %v2997_v56 = vadd.f32 %v6680_v29, %v2984_v44  ;;  %v5930_v29 = vld [vmem:[#allocation8 + $0x214] sm:$0xf]  ;;  %v4286_v31 = vld [vmem:[#allocation8 + $0x184] sm:$0xf0] }
 0x147   :  { %3304 = vmatpush.bf16.msra.mxu0 %v5105_v62  ;;  %v5464_v62 = vld [vmem:[#allocation8 + $0xaa8] sm:$0xf]  ;;  %v4369_v27 = vor.u32 %v5930_v29, %v4366_v11  ;;  %v5910_v30 = vld [vmem:[#allocation8 + $0x174] sm:$0xf] }
 0x148   :  { %3317 = vmatpush.bf16.msra.mxu1 %v5265_v1  ;;  %3280 = vmatpush.bf16.msra.mxu2 %v4745_v5  ;;  %v3010_v0 = vadd.f32 %v6682_v33, %v2997_v56  ;;  %v4229_v1 = vor.u32 %v5895_v53, %v4226_v54  ;;  %v4925_v5 = vor.u32 %v6072_v61, %v4924_v60  ;;  %v2985_v33 = vpop.f32.mrf.mxu3  ;;  %v4326_v53 = vld [vmem:[#allocation8 + $0x1d4] sm:$0xf0]  ;;  %v5404_v54 = vld [vmem:[#allocation8 + $0xa30] sm:$0xf]  ;;  %v6252_v60 = vld [vmem:[#allocation8 + $0xc20] sm:$0xf0] }
 0x149   :  { %3289 = vmatpush.bf16.msra.mxu3 %v4985_v9  ;;  %v4206_v9 = vld [vmem:[#allocation8 + $0xe4] sm:$0xf0]  ;;  %v5465_v14 = vor.u32 %v6207_v63, %v5464_v62  ;;  %v5645_v11 = vor.u32 %v6252_v60, %v5644_v58  ;;  %v6247_v33 = vld [vmem:[#allocation8 + $0xbf8] sm:$0xf0]  ;;  %v6237_v58 = vld [vmem:[#allocation8 + $0xba8] sm:$0xf0] }
 0x14a   :  { %v3023_v13 = vadd.f32 %v3022_v46, %v3010_v0  ;;  %v4209_v24 = vor.u32 %v5890_v3, %v4206_v9  ;;  %v5920_v46 = vld [vmem:[#allocation8 + $0x1c4] sm:$0xf]  ;;  %v5405_v3 = vor.u32 %v6192_v55, %v5404_v54 }
 0x14b   :  { %3305 = vmatpush.bf16.msra.mxu0 %v5085_v17  ;;  %3281 = vmatmul.bf16.vlgmr.msra.gmra.mxu2 %v6643_v49  ;;  %v3050_v17 = vpop.f32.mrf.mxu0  ;;  %v4329_v0 = vor.u32 %v5920_v46, %v4326_v53  ;;  %v4886_v53 = vld [vmem:[#allocation8 + $0x634] sm:$0xf0]  ;;  %v6100_v54 = vld [vmem:[#allocation8 + $0x764] sm:$0xf] }
 0x14c   :  { %3325 = vmatpush.bf16.msrb.mxu2 %v5525_v15  ;;  %3318 = vmatpush.bf16.msra.mxu1 %v5245_v23  ;;  %v4904_v15 = vld [vmem:[#allocation8 + $0x648] sm:$0xf]  ;;  %v3063_v23 = vpop.f32.mrf.mxu1  ;;  %v3024_v26 = vpop.f32.mrf.mxu2 }
 0x14d   :  { %3290 = vmatpush.bf16.msra.mxu3 %v4965_v28  ;;  %v4905_v28 = vor.u32 %v6067_v16, %v4904_v15  ;;  %v5384_v15 = vld [vmem:[#allocation8 + $0xa08] sm:$0xf]  ;;  %v6187_v16 = vld [vmem:[#allocation8 + $0xa18] sm:$0xf0] }
 0x14f   :  { %3306 = vmatpush.bf16.msra.mxu0 %v5065_v41  ;;  %v6257_v41 = vld [vmem:[#allocation8 + $0xc48] sm:$0xf0] }
 0x150   :  { %3326 = vmatpush.bf16.msrb.mxu2 %v5505_v35  ;;  %3319 = vmatpush.bf16.msra.mxu1 %v5225_v50  ;;  %v5925_v35 = vld [vmem:[#allocation8 + $0x1ec] sm:$0xf]  ;;  %v5880_v50 = vld [vmem:[#allocation8 + $0x84] sm:$0xf]  ;;  %v3035_v56 = vpop.f32.mrf.mxu3 }
 0x151   :  { %3291 = vmatpush.bf16.msra.mxu3 %v4945_v52  ;;  %v4349_v44 = vor.u32 %v5925_v35, %v4346_v36  ;;  %v5665_v52 = vor.u32 %v6257_v41, %v5664_v39  ;;  %v3036_v61 = vadd.f32 %v3035_v56, %v3023_v13  ;;  %v5915_v13 = vld [vmem:[#allocation8 + $0x19c] sm:$0xf]  ;;  %v4569_v35 = vor.u32 %v5980_v21, %v4566_v22  ;;  %v5604_v36 = vld [vmem:[#allocation8 + $0xbc0] sm:$0xf]  ;;  %v4546_v41 = vld [vmem:[#allocation8 + $0x38c] sm:$0xf0] }
 0x152   :  { %3307 = vmatmul.bf16.vlgmr.msra.gmra.mxu0 %v6649_v19  ;;  %v5975_v39 = vld [vmem:[#allocation8 + $0x37c] sm:$0xf]  ;;  %v5046_v56 = vld [vmem:[#allocation8 + $0x774] sm:$0xf0] }
 0x153   :  { %3351 = vmatpush.bf16.msrb.mxu0 %v4249_v25  ;;  %3320 = vmatmul.bf16.vlgmr.msra.gmra.mxu1 %v6651_v20  ;;  %v4166_v25 = vld [vmem:[#allocation8 + $0x94] sm:$0xf0]  ;;  %v3049_v9 = vadd.f32 %v6689_v40, %v3036_v61  ;;  %v5870_v40 = vld [vmem:[#allocation8 + $0x34] sm:$0xf]  ;;  %v4549_v55 = vor.u32 %v5975_v39, %v4546_v41 }
 0x154   :  { %3364 = vmatpush.bf16.msrb.mxu1 %v4409_v51  ;;  %3327 = vmatpush.bf16.msrb.mxu2 %v5485_v57  ;;  %v5425_v51 = vor.u32 %v6197_v38, %v5424_v37  ;;  %v3100_v57 = vpop.f32.mrf.mxu0  ;;  %v3113_v62 = vpop.f32.mrf.mxu1  ;;  %v4169_v63 = vor.u32 %v5880_v50, %v4166_v25  ;;  %v6242_v37 = vld [vmem:[#allocation8 + $0xbd0] sm:$0xf0]  ;;  %v5905_v50 = vld [vmem:[#allocation8 + $0x14c] sm:$0xf]  ;;  %v4266_v25 = vld [vmem:[#allocation8 + $0x15c] sm:$0xf0] }
 0x155   :  { %3292 = vmatpush.bf16.msra.mxu3 %v4925_v5  ;;  %v3101_v59 = vadd.f32 %v3100_v57, %v872_v42  ;;  %v4146_v5 = vld [vmem:[#allocation8 + $0x6c] sm:$0xf0]  ;;  %v3062_v17 = vadd.f32 %v6691_v47, %v3049_v9  ;;  %v5865_v42 = vld [vmem:[#allocation8 + $0xc] sm:$0xf]  ;;  %v5584_v57 = vld [vmem:[#allocation8 + $0xb98] sm:$0xf] }
 0x156   :  { %v5970_v61 = vld [vmem:[#allocation8 + $0x354] sm:$0xf] }
 0x157   :  { %3352 = vmatpush.bf16.msrb.mxu0 %v4229_v1  ;;  %v3074_v1 = vpop.f32.mrf.mxu2  ;;  %v6701_v29 = vadd.f32 %v3113_v62, %v3101_v59  ;;  %v4526_v59 = vld [vmem:[#allocation8 + $0x364] sm:$0xf0]  ;;  %v4269_v62 = vor.u32 %v5905_v50, %v4266_v25  ;;  %v4466_v50 = vld [vmem:[#allocation8 + $0x2ec] sm:$0xf0]  ;;  %v6015_v25 = vld [vmem:[#allocation8 + $0x4bc] sm:$0xf] }
 0x158   :  { %3365 = vmatpush.bf16.msrb.mxu1 %v4389_v4  ;;  %3328 = vmatpush.bf16.msrb.mxu2 %v5465_v14  ;;  %v5875_v4 = vld [vmem:[#allocation8 + $0x5c] sm:$0xf]  ;;  %v4306_v14 = vld [vmem:[#allocation8 + $0x1ac] sm:$0xf0]  ;;  %v3075_v26 = vadd.f32 %v3074_v1, %v3062_v17  ;;  %v5585_v1 = vor.u32 %v6237_v58, %v5584_v57  ;;  %v4529_v9 = vor.u32 %v5970_v61, %v4526_v59  ;;  %v6080_v58 = vld [vmem:[#allocation8 + $0x6c4] sm:$0xf] }
 0x159   :  { %3293 = vmatpush.bf16.msra.mxu3 %v4905_v28  ;;  %v4149_v18 = vor.u32 %v5875_v4, %v4146_v5  ;;  %v4309_v23 = vor.u32 %v5915_v13, %v4306_v14  ;;  %v5625_v28 = vor.u32 %v6247_v33, %v5624_v12  ;;  %v4866_v4 = vld [vmem:[#allocation8 + $0x60c] sm:$0xf0]  ;;  %v6095_v5 = vld [vmem:[#allocation8 + $0x73c] sm:$0xf]  ;;  %v6232_v14 = vld [vmem:[#allocation8 + $0xb80] sm:$0xf0] }
 0x15a   :  { %v5564_v13 = vld [vmem:[#allocation8 + $0xb70] sm:$0xf]  ;;  %v4506_v12 = vld [vmem:[#allocation8 + $0x33c] sm:$0xf0]  ;;  %v5950_v61 = vld [vmem:[#allocation8 + $0x2b4] sm:$0xf] }
 0x15b   :  { %3353 = vmatpush.bf16.msrb.mxu0 %v4209_v24  ;;  %v4126_v24 = vld [vmem:[#allocation8 + $0x44] sm:$0xf0]  ;;  %v5565_v22 = vor.u32 %v6232_v14, %v5564_v13  ;;  %v4786_v13 = vld [vmem:[#allocation8 + $0x56c] sm:$0xf0] }
 0x15c   :  { %3366 = vmatpush.bf16.msrb.mxu1 %v4369_v27  ;;  %3329 = vmatpush.bf16.msrb.mxu2 %v5445_v32  ;;  %v5385_v27 = vor.u32 %v6187_v16, %v5384_v15  ;;  %v3037_v32 = vpop.f32.mrf.mxu3  ;;  %v3115_v47 = vpop.f32.mrf.mxu1  ;;  %v4129_v38 = vor.u32 %v5870_v40, %v4126_v24  ;;  %v5965_v16 = vld [vmem:[#allocation8 + $0x32c] sm:$0xf]  ;;  %v6090_v40 = vld [vmem:[#allocation8 + $0x714] sm:$0xf]  ;;  %v5006_v24 = vld [vmem:[#allocation8 + $0x724] sm:$0xf0] }
 0x15d   :  { %3338 = vmatpush.bf16.msrb.mxu3 %v5685_v34  ;;  %v3102_v34 = vpop.f32.mrf.mxu0  ;;  %v6020_v32 = vld [vmem:[#allocation8 + $0x4e4] sm:$0xf]  ;;  %v6045_v47 = vld [vmem:[#allocation8 + $0x5ac] sm:$0xf] }
 0x15e   :  { %3294 = vmatmul.bf16.vlgmr.msra.gmra.mxu3 %v6655_v2  ;;  %v4726_v34 = vld [vmem:[#allocation8 + $0x4f4] sm:$0xf0] }
 0x15f   :  { %3354 = vmatpush.bf16.msrb.mxu0 %v4189_v43  ;;  %v4289_v43 = vor.u32 %v5910_v30, %v4286_v31  ;;  %v3076_v46 = vpop.f32.mrf.mxu2  ;;  %v6227_v30 = vld [vmem:[#allocation8 + $0xb58] sm:$0xf0]  ;;  %v5960_v31 = vld [vmem:[#allocation8 + $0x304] sm:$0xf]  ;;  %v4729_v41 = vor.u32 %v6020_v32, %v4726_v34  ;;  %v4926_v32 = vld [vmem:[#allocation8 + $0x684] sm:$0xf0] }
 0x160   :  { %3367 = vmatpush.bf16.msrb.mxu1 %v4349_v44  ;;  %3330 = vmatpush.bf16.msrb.mxu2 %v5425_v51  ;;  %v4106_v44 = vld [vmem:[#allocation8 + $0x1c] sm:$0xf0]  ;;  %v5605_v51 = vor.u32 %v6242_v37, %v5604_v36  ;;  %v5009_v36 = vor.u32 %v6090_v40, %v5006_v24  ;;  %v4706_v46 = vld [vmem:[#allocation8 + $0x4cc] sm:$0xf0]  ;;  %v5206_v40 = vld [vmem:[#allocation8 + $0x8b4] sm:$0xf0] }
 0x161   :  { %3339 = vmatpush.bf16.msrb.mxu3 %v5665_v52  ;;  %v6060_v52 = vld [vmem:[#allocation8 + $0x624] sm:$0xf]  ;;  %v4109_v60 = vor.u32 %v5865_v42, %v4106_v44  ;;  %v6085_v42 = vld [vmem:[#allocation8 + $0x6ec] sm:$0xf]  ;;  %v5955_v44 = vld [vmem:[#allocation8 + $0x2dc] sm:$0xf]  ;;  %v4709_v57 = vor.u32 %v6015_v25, %v4706_v46 }
 0x162   :  { %v6065_v25 = vld [vmem:[#allocation8 + $0x64c] sm:$0xf]  ;;  %v4906_v46 = vld [vmem:[#allocation8 + $0x65c] sm:$0xf0] }
 0x163   :  { %3355 = vmatpush.bf16.msrb.mxu0 %v4169_v63  ;;  %v4889_v63 = vor.u32 %v6060_v52, %v4886_v53 }
 0x164   :  { %3368 = vmatpush.bf16.msrb.mxu1 %v4329_v0  ;;  %3331 = vmatpush.bf16.msrb.mxu2 %v5405_v3  ;;  %v5049_v0 = vor.u32 %v6100_v54, %v5046_v56  ;;  %v6055_v3 = vld [vmem:[#allocation8 + $0x5fc] sm:$0xf]  ;;  %v3087_v15 = vpop.f32.mrf.mxu3  ;;  %v6040_v54 = vld [vmem:[#allocation8 + $0x584] sm:$0xf]  ;;  %v4469_v56 = vor.u32 %v5955_v44, %v4466_v50  ;;  %v4746_v50 = vld [vmem:[#allocation8 + $0x51c] sm:$0xf0] }
 0x165   :  { %3340 = vmatpush.bf16.msrb.mxu3 %v5645_v11  ;;  %v5026_v11 = vld [vmem:[#allocation8 + $0x74c] sm:$0xf0]  ;;  %v6705_v33 = vadd.f32 %v3087_v15, %v3075_v26  ;;  %v4869_v17 = vor.u32 %v6055_v3, %v4866_v4  ;;  %v4486_v26 = vld [vmem:[#allocation8 + $0x314] sm:$0xf0] }
 0x166   :  { %v5029_v21 = vor.u32 %v6095_v5, %v5026_v11  ;;  %v4489_v39 = vor.u32 %v5960_v31, %v4486_v26  ;;  %v6035_v11 = vld [vmem:[#allocation8 + $0x55c] sm:$0xf]  ;;  %v6070_v26 = vld [vmem:[#allocation8 + $0x674] sm:$0xf] }
 0x167   :  { %3356 = vmatpush.bf16.msrb.mxu0 %v4149_v18  ;;  %v6050_v18 = vld [vmem:[#allocation8 + $0x5d4] sm:$0xf]  ;;  %v4929_v44 = vor.u32 %v6070_v26, %v4926_v32  ;;  %v5985_v26 = vld [vmem:[#allocation8 + $0x3cc] sm:$0xf]  ;;  %v4586_v32 = vld [vmem:[#allocation8 + $0x3dc] sm:$0xf0] }
 0x168   :  { %3369 = vmatpush.bf16.msrb.mxu1 %v4309_v23  ;;  %3332 = vmatpush.bf16.msrb.mxu2 %v5385_v27  ;;  %v4846_v23 = vld [vmem:[#allocation8 + $0x5e4] sm:$0xf0]  ;;  %v4509_v27 = vor.u32 %v5965_v16, %v4506_v12  ;;  %v6075_v16 = vld [vmem:[#allocation8 + $0x69c] sm:$0xf]  ;;  %v4946_v12 = vld [vmem:[#allocation8 + $0x6ac] sm:$0xf0] }
 0x169   :  { %3341 = vmatpush.bf16.msrb.mxu3 %v5625_v28  ;;  %v5544_v28 = vld [vmem:[#allocation8 + $0xb48] sm:$0xf]  ;;  %v4949_v24 = vor.u32 %v6075_v16, %v4946_v12  ;;  %v5666_v16 = vld [vmem:[#allocation8 + $0xc4c] sm:$0xf0]  ;;  %v5990_v12 = vld [vmem:[#allocation8 + $0x3f4] sm:$0xf] }
 0x16a   :  { %v5545_v37 = vor.u32 %v6227_v30, %v5544_v28  ;;  %v4766_v28 = vld [vmem:[#allocation8 + $0x544] sm:$0xf0]  ;;  %vm3611_vm11 = vcmp.ge.f32.partialorder %v6705_v33, 0.0 }
 0x16b   :  { %3357 = vmatpush.bf16.msrb.mxu0 %v4129_v38  ;;  %3333 = vmatmul.bf16.vlgmr.msrb.gmra.mxu2 %v6657_v10  ;;  %v4826_v38 = vld [vmem:[#allocation8 + $0x5bc] sm:$0xf0] }
 0x16c   :  { %3377 = vmatpush.bf16.msra.mxu2 %v4569_v35  ;;  %3370 = vmatpush.bf16.msrb.mxu1 %v4289_v43  ;;  %v4849_v35 = vor.u32 %v6050_v18, %v4846_v23  ;;  %v4986_v43 = vld [vmem:[#allocation8 + $0x6fc] sm:$0xf0]  ;;  %v4829_v52 = vor.u32 %v6045_v47, %v4826_v38  ;;  %v6140_v23 = vld [vmem:[#allocation8 + $0x8a4] sm:$0xf]  ;;  %v4646_v47 = vld [vmem:[#allocation8 + $0x454] sm:$0xf0] }
 0x16d   :  { %3342 = vmatpush.bf16.msrb.mxu3 %v5605_v51  ;;  %v3089_v51 = vpop.f32.mrf.mxu3  ;;  %v4989_v53 = vor.u32 %v6085_v42, %v4986_v43  ;;  %v4426_v18 = vld [vmem:[#allocation8 + $0x29c] sm:$0xf0]  ;;  %v5186_v42 = vld [vmem:[#allocation8 + $0x88c] sm:$0xf0]  ;;  %v6025_v43 = vld [vmem:[#allocation8 + $0x50c] sm:$0xf] }
 0x16e   :  { %v3126_v59 = vpop.f32.mrf.mxu2 }
 0x16f   :  { %3358 = vmatpush.bf16.msrb.mxu0 %v4109_v60  ;;  %v4966_v60 = vld [vmem:[#allocation8 + $0x6d4] sm:$0xf0]  ;;  %v6712_v3 = vadd.f32 %v3126_v59, %v6701_v29  ;;  %v6005_v29 = vld [vmem:[#allocation8 + $0x46c] sm:$0xf]  ;;  %v5166_v59 = vld [vmem:[#allocation8 + $0x864] sm:$0xf0] }
 0x170   :  { %3378 = vmatpush.bf16.msra.mxu2 %v4549_v55  ;;  %3371 = vmatpush.bf16.msrb.mxu1 %v4269_v62  ;;  %v4806_v55 = vld [vmem:[#allocation8 + $0x594] sm:$0xf0]  ;;  %v6709_v62 = vpop.f32.mrf.mxu0  ;;  %v6714_v4 = vpop.f32.mrf.mxu1 }
 0x171   :  { %3343 = vmatpush.bf16.msrb.mxu3 %v5585_v1  ;;  %v4686_v1 = vld [vmem:[#allocation8 + $0x4a4] sm:$0xf0]  ;;  %v4809_v5 = vor.u32 %v6040_v54, %v4806_v55  ;;  %v6260_v54 = vld [vmem:[#allocation8 + $0xc64] sm:$0xf] }
 0x172   :  { %3359 = vmatmul.bf16.vlgmr.msrb.gmra.mxu0 %v6626_v45 }
 0x173   :  { %3403 = vmatpush.bf16.msra.mxu0 %v4889_v63  ;;  %3372 = vmatmul.bf16.vlgmr.msrb.gmra.mxu1 %v6641_v48  ;;  %v4446_v63 = vld [vmem:[#allocation8 + $0x2c4] sm:$0xf0] }
 0x174   :  { %3416 = vmatpush.bf16.msra.mxu1 %v5049_v0  ;;  %3379 = vmatpush.bf16.msra.mxu2 %v4529_v9  ;;  %v6010_v0 = vld [vmem:[#allocation8 + $0x494] sm:$0xf]  ;;  %v4969_v9 = vor.u32 %v6080_v58, %v4966_v60  ;;  %v4449_v14 = vor.u32 %v5950_v61, %v4446_v63  ;;  %v4626_v58 = vld [vmem:[#allocation8 + $0x42c] sm:$0xf0]  ;;  %v4749_v60 = vor.u32 %v6025_v43, %v4746_v50 }
 0x175   :  { %3344 = vmatpush.bf16.msrb.mxu3 %v5565_v22  ;;  %v4689_v15 = vor.u32 %v6010_v0, %v4686_v1  ;;  %v4789_v22 = vor.u32 %v6035_v11, %v4786_v13  ;;  %v6130_v61 = vld [vmem:[#allocation8 + $0x854] sm:$0xf]  ;;  %v4909_v63 = vor.u32 %v6065_v25, %v4906_v46  ;;  %v5506_v11 = vld [vmem:[#allocation8 + $0xb0c] sm:$0xf0]  ;;  %v6255_v13 = vld [vmem:[#allocation8 + $0xc3c] sm:$0xf] }
 0x176   :  { %v3128_v34 = vpop.f32.mrf.mxu2  ;;  %v6245_v25 = vld [vmem:[#allocation8 + $0xbec] sm:$0xf]  ;;  %v5626_v46 = vld [vmem:[#allocation8 + $0xbfc] sm:$0xf0] }
 0x177   :  { %3404 = vmatpush.bf16.msra.mxu0 %v4869_v17  ;;  %v5945_v17 = vld [vmem:[#allocation8 + $0x28c] sm:$0xf]  ;;  %v6120_v34 = vld [vmem:[#allocation8 + $0x804] sm:$0xf] }
 0x178   :  { %3417 = vmatpush.bf16.msra.mxu1 %v5029_v21  ;;  %3380 = vmatpush.bf16.msra.mxu2 %v4509_v27  ;;  %v4666_v21 = vld [vmem:[#allocation8 + $0x47c] sm:$0xf0]  ;;  %v6030_v27 = vld [vmem:[#allocation8 + $0x534] sm:$0xf]  ;;  %v4429_v30 = vor.u32 %v5945_v17, %v4426_v18  ;;  %v3167_v38 = vpop.f32.mrf.mxu1  ;;  %v4606_v17 = vld [vmem:[#allocation8 + $0x404] sm:$0xf0] }
 0x179   :  { %3345 = vmatpush.bf16.msrb.mxu3 %v5545_v37  ;;  %v4669_v31 = vor.u32 %v6005_v29, %v4666_v21  ;;  %v6000_v37 = vld [vmem:[#allocation8 + $0x444] sm:$0xf]  ;;  %v6125_v29 = vld [vmem:[#allocation8 + $0x82c] sm:$0xf]  ;;  %v5146_v21 = vld [vmem:[#allocation8 + $0x83c] sm:$0xf0] }
 0x17a   :  { %v4649_v51 = vor.u32 %v6000_v37, %v4646_v47  ;;  %v5366_v37 = vld [vmem:[#allocation8 + $0x9f4] sm:$0xf0] }
 0x17b   :  { %3405 = vmatpush.bf16.msra.mxu0 %v4849_v35  ;;  %v3154_v35 = vpop.f32.mrf.mxu0 }
 0x17c   :  { %3418 = vmatpush.bf16.msra.mxu1 %v5009_v36  ;;  %3381 = vmatpush.bf16.msra.mxu2 %v4489_v39  ;;  %v5209_v36 = vor.u32 %v6140_v23, %v5206_v40  ;;  %v4769_v39 = vor.u32 %v6030_v27, %v4766_v28  ;;  %v6210_v23 = vld [vmem:[#allocation8 + $0xad4] sm:$0xf]  ;;  %v4609_v27 = vor.u32 %v5990_v12, %v4606_v17  ;;  %v5486_v28 = vld [vmem:[#allocation8 + $0xae4] sm:$0xf0]  ;;  %v5126_v35 = vld [vmem:[#allocation8 + $0x814] sm:$0xf0] }
 0x17d   :  { %3390 = vmatpush.bf16.msra.mxu3 %v4729_v41  ;;  %v6135_v41 = vld [vmem:[#allocation8 + $0x87c] sm:$0xf]  ;;  %v5489_v47 = vor.u32 %v6210_v23, %v5486_v28  ;;  %v5426_v17 = vld [vmem:[#allocation8 + $0xa6c] sm:$0xf0]  ;;  %v6105_v23 = vld [vmem:[#allocation8 + $0x78c] sm:$0xf] }
 0x17e   :  { %3346 = vmatmul.bf16.vlgmr.msrb.gmra.mxu3 %v6664_v8  ;;  %v5189_v55 = vor.u32 %v6135_v41, %v5186_v42  ;;  %v6205_v41 = vld [vmem:[#allocation8 + $0xaac] sm:$0xf]  ;;  %v5466_v42 = vld [vmem:[#allocation8 + $0xabc] sm:$0xf0]  ;;  %v6195_v12 = vld [vmem:[#allocation8 + $0xa5c] sm:$0xf] }
 0x17f   :  { %3406 = vmatpush.bf16.msra.mxu0 %v4829_v52  ;;  %v6220_v52 = vld [vmem:[#allocation8 + $0xb24] sm:$0xf]  ;;  %v5429_v28 = vor.u32 %v6195_v12, %v5426_v17  ;;  %v5978_v12 = vld [vmem:[#allocation8 + $0x390] sm:$0xf0]  ;;  %v4712_v17 = vld [vmem:[#allocation8 + $0x4c0] sm:$0xf] }
 0x180   :  { %3419 = vmatpush.bf16.msra.mxu1 %v4989_v53  ;;  %3382 = vmatpush.bf16.msra.mxu2 %v4469_v56  ;;  %v5526_v53 = vld [vmem:[#allocation8 + $0xb34] sm:$0xf0] }
 0x181   :  { %3391 = vmatpush.bf16.msra.mxu3 %v4709_v57  ;;  %v5686_v56 = vld [vmem:[#allocation8 + $0xc74] sm:$0xf0]  ;;  %v5995_v57 = vld [vmem:[#allocation8 + $0x41c] sm:$0xf]  ;;  %v5529_v0 = vor.u32 %v6220_v52, %v5526_v53  ;;  %v5106_v52 = vld [vmem:[#allocation8 + $0x7ec] sm:$0xf0] }
 0x182   :  { %v5689_v1 = vor.u32 %v6260_v54, %v5686_v56  ;;  %v6175_v53 = vld [vmem:[#allocation8 + $0x9bc] sm:$0xf]  ;;  %v5346_v54 = vld [vmem:[#allocation8 + $0x9cc] sm:$0xf0]  ;;  %v6200_v56 = vld [vmem:[#allocation8 + $0xa84] sm:$0xf] }
 0x183   :  { %3407 = vmatpush.bf16.msra.mxu0 %v4809_v5  ;;  %v4629_v5 = vor.u32 %v5995_v57, %v4626_v58  ;;  %v5446_v57 = vld [vmem:[#allocation8 + $0xa94] sm:$0xf0] }
 0x184   :  { %3420 = vmatpush.bf16.msra.mxu1 %v4969_v9  ;;  %3383 = vmatpush.bf16.msra.mxu2 %v4449_v14  ;;  %v6215_v9 = vld [vmem:[#allocation8 + $0xafc] sm:$0xf]  ;;  %v3139_v14 = vpop.f32.mrf.mxu3 }
 0x185   :  { %3392 = vmatpush.bf16.msra.mxu3 %v4689_v15  ;;  %v5169_v15 = vor.u32 %v6130_v61, %v5166_v59  ;;  %v3140_v18 = vadd.f32 %v3139_v14, %v6712_v3  ;;  %v5149_v3 = vor.u32 %v6125_v29, %v5146_v21  ;;  %v5349_v61 = vor.u32 %v6175_v53, %v5346_v54  ;;  %v6240_v59 = vld [vmem:[#allocation8 + $0xbc4] sm:$0xf]  ;;  %v6235_v21 = vld [vmem:[#allocation8 + $0xb9c] sm:$0xf]  ;;  %v5546_v53 = vld [vmem:[#allocation8 + $0xb5c] sm:$0xf0] }
 0x187   :  { %3408 = vmatpush.bf16.msra.mxu0 %v4789_v22  ;;  %v5509_v22 = vor.u32 %v6215_v9, %v5506_v11  ;;  %v3153_v40 = vadd.f32 %v6709_v62, %v3140_v18  ;;  %v5086_v9 = vld [vmem:[#allocation8 + $0x7c4] sm:$0xf0]  ;;  %v6170_v11 = vld [vmem:[#allocation8 + $0x994] sm:$0xf] }
 0x188   :  { %3421 = vmatpush.bf16.msra.mxu1 %v4949_v24  ;;  %3384 = vmatpush.bf16.msra.mxu2 %v4429_v30  ;;  %v5669_v24 = vor.u32 %v6255_v13, %v5666_v16  ;;  %v6250_v30 = vld [vmem:[#allocation8 + $0xc14] sm:$0xf]  ;;  %v5326_v13 = vld [vmem:[#allocation8 + $0x9a4] sm:$0xf0] }
 0x189   :  { %3393 = vmatpush.bf16.msra.mxu3 %v4669_v31  ;;  %v5646_v31 = vld [vmem:[#allocation8 + $0xc24] sm:$0xf0]  ;;  %v3166_v62 = vadd.f32 %v6714_v4, %v3153_v40  ;;  %v5469_v4 = vor.u32 %v6205_v41, %v5466_v42  ;;  %v5329_v29 = vor.u32 %v6170_v11, %v5326_v13  ;;  %v5066_v40 = vld [vmem:[#allocation8 + $0x79c] sm:$0xf0]  ;;  %v5286_v41 = vld [vmem:[#allocation8 + $0x954] sm:$0xf0] }
 0x18a   :  { %v5649_v38 = vor.u32 %v6250_v30, %v5646_v31  ;;  %v4252_v30 = vld [vmem:[#allocation8 + $0x128] sm:$0xf]  ;;  %v5903_v31 = vld [vmem:[#allocation8 + $0x138] sm:$0xf0] }
 0x18b   :  { %3409 = vmatpush.bf16.msra.mxu0 %v4769_v39  ;;  %3385 = vmatmul.bf16.vlgmr.msra.gmra.mxu2 %v6631_v6  ;;  %v4589_v39 = vor.u32 %v5985_v26, %v4586_v32  ;;  %v6190_v26 = vld [vmem:[#allocation8 + $0xa34] sm:$0xf]  ;;  %v5406_v32 = vld [vmem:[#allocation8 + $0xa44] sm:$0xf0] }
 0x18c   :  { %3429 = vmatpush.bf16.msrb.mxu2 %v5209_v36  ;;  %3422 = vmatpush.bf16.msra.mxu1 %v4929_v44  ;;  %v6180_v36 = vld [vmem:[#allocation8 + $0x9e4] sm:$0xf]  ;;  %v3141_v43 = vpop.f32.mrf.mxu3  ;;  %v5129_v44 = vor.u32 %v6120_v34, %v5126_v35  ;;  %v5069_v35 = vor.u32 %v6105_v23, %v5066_v40  ;;  %v5246_v23 = vld [vmem:[#allocation8 + $0x904] sm:$0xf0] }
 0x18d   :  { %3394 = vmatpush.bf16.msra.mxu3 %v4649_v51  ;;  %v5369_v50 = vor.u32 %v6180_v36, %v5366_v37  ;;  %v6115_v51 = vld [vmem:[#allocation8 + $0x7dc] sm:$0xf]  ;;  %v6230_v37 = vld [vmem:[#allocation8 + $0xb74] sm:$0xf]  ;;  %v5409_v43 = vor.u32 %v6190_v26, %v5406_v32  ;;  %v5973_v32 = vld [vmem:[#allocation8 + $0x368] sm:$0xf0] }
 0x18e   :  { %v3178_v58 = vpop.f32.mrf.mxu2 }
 0x18f   :  { %3410 = vmatpush.bf16.msra.mxu0 %v4749_v60  ;;  %v5109_v60 = vor.u32 %v6115_v51, %v5106_v52  ;;  %v5386_v51 = vld [vmem:[#allocation8 + $0xa1c] sm:$0xf0]  ;;  %v6225_v52 = vld [vmem:[#allocation8 + $0xb4c] sm:$0xf] }
 0x190   :  { %3430 = vmatpush.bf16.msrb.mxu2 %v5189_v55  ;;  %3423 = vmatpush.bf16.msra.mxu1 %v4909_v63  ;;  %v5629_v55 = vor.u32 %v6245_v25, %v5626_v46  ;;  %v5606_v63 = vld [vmem:[#allocation8 + $0xbd4] sm:$0xf0]  ;;  %v6727_v14 = vpop.f32.mrf.mxu1  ;;  %v6185_v25 = vld [vmem:[#allocation8 + $0xa0c] sm:$0xf] }
 0x191   :  { %3395 = vmatpush.bf16.msra.mxu3 %v4629_v5  ;;  %v6725_v5 = vpop.f32.mrf.mxu0  ;;  %v5609_v16 = vor.u32 %v6240_v59, %v5606_v63  ;;  %v5389_v59 = vor.u32 %v6185_v25, %v5386_v51  ;;  %v4212_v63 = vld [vmem:[#allocation8 + $0xd8] sm:$0xf] }
 0x192   :  { %3411 = vmatmul.bf16.vlgmr.msra.gmra.mxu0 %v6643_v49 }
 0x193   :  { %3455 = vmatpush.bf16.msrb.mxu0 %v5529_v0  ;;  %3424 = vmatmul.bf16.vlgmr.msra.gmra.mxu1 %v6655_v2  ;;  %v6110_v0 = vld [vmem:[#allocation8 + $0x7b4] sm:$0xf] }
 0x194   :  { %3468 = vmatpush.bf16.msrb.mxu1 %v5689_v1  ;;  %3431 = vmatpush.bf16.msrb.mxu2 %v5169_v15  ;;  %v6723_v1 = vadd.f32 %v3178_v58, %v3166_v62  ;;  %v5449_v15 = vor.u32 %v6200_v56, %v5446_v57  ;;  %v5089_v18 = vor.u32 %v6110_v0, %v5086_v9  ;;  %v5566_v62 = vld [vmem:[#allocation8 + $0xb84] sm:$0xf0]  ;;  %v6023_v58 = vld [vmem:[#allocation8 + $0x4f8] sm:$0xf0]  ;;  %v5893_v0 = vld [vmem:[#allocation8 + $0xe8] sm:$0xf0] }
 0x195   :  { %3396 = vmatpush.bf16.msra.mxu3 %v4609_v27  ;;  %v5306_v27 = vld [vmem:[#allocation8 + $0x97c] sm:$0xf0]  ;;  %v5569_v46 = vor.u32 %v6230_v37, %v5566_v62  ;;  %v4732_v56 = vld [vmem:[#allocation8 + $0x4e8] sm:$0xf]  ;;  %v5549_v9 = vor.u32 %v6225_v52, %v5546_v53  ;;  %v4672_v52 = vld [vmem:[#allocation8 + $0x470] sm:$0xf] }
 0x196   :  { %v3180_v34 = vpop.f32.mrf.mxu2  ;;  %v4733_v13 = vor.u32 %v6023_v58, %v4732_v56  ;;  %v5226_v37 = vld [vmem:[#allocation8 + $0x8dc] sm:$0xf0]  ;;  %v4172_v62 = vld [vmem:[#allocation8 + $0x88] sm:$0xf] }
 0x197   :  { %3456 = vmatpush.bf16.msrb.mxu0 %v5509_v22  ;;  %v5586_v22 = vld [vmem:[#allocation8 + $0xbac] sm:$0xf0]  ;;  %v4692_v34 = vld [vmem:[#allocation8 + $0x498] sm:$0xf]  ;;  %v4152_v53 = vld [vmem:[#allocation8 + $0x60] sm:$0xf] }
 0x198   :  { %3469 = vmatpush.bf16.msrb.mxu1 %v5669_v24  ;;  %3432 = vmatpush.bf16.msrb.mxu2 %v5149_v3  ;;  %v6165_v24 = vld [vmem:[#allocation8 + $0x96c] sm:$0xf]  ;;  %v5589_v3 = vor.u32 %v6235_v21, %v5586_v22  ;;  %v3219_v42 = vpop.f32.mrf.mxu1  ;;  %v6018_v21 = vld [vmem:[#allocation8 + $0x4d0] sm:$0xf0]  ;;  %v4492_v58 = vld [vmem:[#allocation8 + $0x308] sm:$0xf] }
 0x199   :  { %3397 = vmatpush.bf16.msra.mxu3 %v4589_v39  ;;  %v5309_v36 = vor.u32 %v6165_v24, %v5306_v27  ;;  %v6160_v39 = vld [vmem:[#allocation8 + $0x944] sm:$0xf]  ;;  %v6150_v22 = vld [vmem:[#allocation8 + $0x8f4] sm:$0xf]  ;;  %v4192_v24 = vld [vmem:[#allocation8 + $0xb0] sm:$0xf] }
 0x19a   :  { %v5289_v54 = vor.u32 %v6160_v39, %v5286_v41  ;;  %v5888_v27 = vld [vmem:[#allocation8 + $0xc0] sm:$0xf0]  ;;  %v5249_v26 = vor.u32 %v6150_v22, %v5246_v23  ;;  %v5943_v39 = vld [vmem:[#allocation8 + $0x278] sm:$0xf0]  ;;  %v5958_v22 = vld [vmem:[#allocation8 + $0x2f0] sm:$0xf0] }
 0x19b   :  { %3457 = vmatpush.bf16.msrb.mxu0 %v5489_v47  ;;  %v3206_v47 = vpop.f32.mrf.mxu0 }
 0x19c   :  { %3470 = vmatpush.bf16.msrb.mxu1 %v5649_v38  ;;  %3433 = vmatpush.bf16.msrb.mxu2 %v5129_v44  ;;  %v4253_v38 = vor.u32 %v5903_v31, %v4252_v30  ;;  %v4232_v44 = vld [vmem:[#allocation8 + $0x100] sm:$0xf]  ;;  %v4532_v30 = vld [vmem:[#allocation8 + $0x358] sm:$0xf] }
 0x19d   :  { %3442 = vmatpush.bf16.msrb.mxu3 %v5369_v50  ;;  %v5898_v50 = vld [vmem:[#allocation8 + $0x110] sm:$0xf0]  ;;  %v4533_v41 = vor.u32 %v5973_v32, %v4532_v30  ;;  %v5868_v30 = vld [vmem:[#allocation8 + $0x20] sm:$0xf0]  ;;  %v4892_v32 = vld [vmem:[#allocation8 + $0x628] sm:$0xf] }
 0x19e   :  { %3398 = vmatmul.bf16.vlgmr.msra.gmra.mxu3 %v6633_v7  ;;  %v4233_v57 = vor.u32 %v5898_v50, %v4232_v44  ;;  %v4512_v44 = vld [vmem:[#allocation8 + $0x330] sm:$0xf]  ;;  %v5968_v50 = vld [vmem:[#allocation8 + $0x340] sm:$0xf0] }
 0x19f   :  { %3458 = vmatpush.bf16.msrb.mxu0 %v5469_v4  ;;  %v4572_v4 = vld [vmem:[#allocation8 + $0x3a8] sm:$0xf]  ;;  %v4513_v56 = vor.u32 %v5968_v50, %v4512_v44 }
 0x1a0   :  { %3471 = vmatpush.bf16.msrb.mxu1 %v5629_v55  ;;  %3434 = vmatpush.bf16.msrb.mxu2 %v5109_v60  ;;  %v5983_v55 = vld [vmem:[#allocation8 + $0x3b8] sm:$0xf0]  ;;  %v4332_v50 = vld [vmem:[#allocation8 + $0x1c8] sm:$0xf] }
 0x1a1   :  { %3443 = vmatpush.bf16.msrb.mxu3 %v5349_v61  ;;  %v6155_v60 = vld [vmem:[#allocation8 + $0x91c] sm:$0xf]  ;;  %v5266_v61 = vld [vmem:[#allocation8 + $0x92c] sm:$0xf0]  ;;  %v4573_v11 = vor.u32 %v5983_v55, %v4572_v4  ;;  %v4392_v4 = vld [vmem:[#allocation8 + $0x240] sm:$0xf] }
 0x1a2   :  { %v5938_v55 = vld [vmem:[#allocation8 + $0x250] sm:$0xf0] }
 0x1a3   :  { %3459 = vmatpush.bf16.msrb.mxu0 %v5449_v15  ;;  %v5269_v15 = vor.u32 %v6155_v60, %v5266_v61  ;;  %v5963_v60 = vld [vmem:[#allocation8 + $0x318] sm:$0xf0] }
 0x1a4   :  { %3472 = vmatpush.bf16.msrb.mxu1 %v5609_v16  ;;  %3435 = vmatpush.bf16.msrb.mxu2 %v5089_v18  ;;  %v4552_v16 = vld [vmem:[#allocation8 + $0x380] sm:$0xf]  ;;  %v3191_v18 = vpop.f32.mrf.mxu3 }
 0x1a5   :  { %3444 = vmatpush.bf16.msrb.mxu3 %v5329_v29  ;;  %v4213_v29 = vor.u32 %v5893_v0, %v4212_v63  ;;  %v3192_v40 = vadd.f32 %v3191_v18, %v6723_v1  ;;  %v4193_v1 = vor.u32 %v5888_v27, %v4192_v24  ;;  %v4652_v63 = vld [vmem:[#allocation8 + $0x448] sm:$0xf]  ;;  %v6003_v0 = vld [vmem:[#allocation8 + $0x458] sm:$0xf0]  ;;  %v4493_v18 = vor.u32 %v5963_v60, %v4492_v58  ;;  %v4632_v24 = vld [vmem:[#allocation8 + $0x420] sm:$0xf] }
 0x1a6   :  { %v5998_v27 = vld [vmem:[#allocation8 + $0x430] sm:$0xf0]  ;;  %v5212_v58 = vld [vmem:[#allocation8 + $0x8a8] sm:$0xf]  ;;  %v6143_v60 = vld [vmem:[#allocation8 + $0x8b8] sm:$0xf0] }
 0x1a7   :  { %3460 = vmatpush.bf16.msrb.mxu0 %v5429_v28  ;;  %v4553_v28 = vor.u32 %v5978_v12, %v4552_v16  ;;  %v3205_v31 = vadd.f32 %v6725_v5, %v3192_v40  ;;  %v5883_v5 = vld [vmem:[#allocation8 + $0x98] sm:$0xf0]  ;;  %v4372_v16 = vld [vmem:[#allocation8 + $0x218] sm:$0xf]  ;;  %v5933_v12 = vld [vmem:[#allocation8 + $0x228] sm:$0xf0] }
 0x1a8   :  { %3473 = vmatpush.bf16.msrb.mxu1 %v5589_v3  ;;  %3436 = vmatpush.bf16.msrb.mxu2 %v5069_v35  ;;  %v4713_v3 = vor.u32 %v6018_v21, %v4712_v17  ;;  %v6013_v35 = vld [vmem:[#allocation8 + $0x4a8] sm:$0xf0]  ;;  %v4472_v21 = vld [vmem:[#allocation8 + $0x2e0] sm:$0xf]  ;;  %v4373_v40 = vor.u32 %v5933_v12, %v4372_v16  ;;  %v4852_v16 = vld [vmem:[#allocation8 + $0x5d8] sm:$0xf] }
 0x1a9   :  { %3445 = vmatpush.bf16.msrb.mxu3 %v5309_v36  ;;  %v6145_v36 = vld [vmem:[#allocation8 + $0x8cc] sm:$0xf]  ;;  %v6735_v47 = vadd.f32 %v6727_v14, %v3205_v31  ;;  %v4693_v42 = vor.u32 %v6013_v35, %v4692_v34  ;;  %v6008_v14 = vld [vmem:[#allocation8 + $0x480] sm:$0xf0]  ;;  %v4352_v31 = vld [vmem:[#allocation8 + $0x1f0] sm:$0xf]  ;;  %v4633_v35 = vor.u32 %v5998_v27, %v4632_v24 }
 0x1aa   :  { %v6063_v34 = vld [vmem:[#allocation8 + $0x638] sm:$0xf0]  ;;  %v6053_v12 = vld [vmem:[#allocation8 + $0x5e8] sm:$0xf0]  ;;  %v6138_v24 = vld [vmem:[#allocation8 + $0x890] sm:$0xf0] }
 0x1ab   :  { %3461 = vmatpush.bf16.msrb.mxu0 %v5409_v43  ;;  %3437 = vmatmul.bf16.vlgmr.msrb.gmra.mxu2 %v6649_v19  ;;  %v5229_v43 = vor.u32 %v6145_v36, %v5226_v37  ;;  %v5953_v36 = vld [vmem:[#allocation8 + $0x2c8] sm:$0xf0]  ;;  %v4893_v44 = vor.u32 %v6063_v34, %v4892_v32  ;;  %v5352_v27 = vld [vmem:[#allocation8 + $0x9c0] sm:$0xf]  ;;  %v4832_v34 = vld [vmem:[#allocation8 + $0x5b0] sm:$0xf] }
 0x1ac   :  { %3481 = vmatpush.bf16.msra.mxu2 %v4253_v38  ;;  %3474 = vmatpush.bf16.msrb.mxu1 %v5569_v46  ;;  %v4412_v38 = vld [vmem:[#allocation8 + $0x268] sm:$0xf]  ;;  %v3193_v25 = vpop.f32.mrf.mxu3  ;;  %v4173_v46 = vor.u32 %v5883_v5, %v4172_v62  ;;  %v4612_v5 = vld [vmem:[#allocation8 + $0x3f8] sm:$0xf]  ;;  %vm3612_vm12 = vcmp.ge.f32.partialorder %v6735_v47, 0.0 }
 0x1ad   :  { %3446 = vmatpush.bf16.msrb.mxu3 %v5289_v54  ;;  %v4413_v51 = vor.u32 %v5943_v39, %v4412_v38  ;;  %v5878_v54 = vld [vmem:[#allocation8 + $0x70] sm:$0xf0]  ;;  %v5993_v38 = vld [vmem:[#allocation8 + $0x408] sm:$0xf0]  ;;  %v6745_v39 = vld [vmem:[#allocation10] sm:$0x1f] }
 0x1ae   :  { %v4153_v61 = vor.u32 %v5878_v54, %v4152_v53  ;;  %v5923_v25 = vld [vmem:[#allocation8 + $0x1d8] sm:$0xf0]  ;;  %v4432_v53 = vld [vmem:[#allocation8 + $0x290] sm:$0xf]  ;;  %v4613_v54 = vor.u32 %v5993_v38, %v4612_v5  ;;  %v5332_v5 = vld [vmem:[#allocation8 + $0x998] sm:$0xf] }
 0x1af   :  { %3462 = vmatpush.bf16.msrb.mxu0 %v5389_v59  ;;  %v4393_v59 = vor.u32 %v5938_v55, %v4392_v4  ;;  %v5948_v4 = vld [vmem:[#allocation8 + $0x2a0] sm:$0xf0]  ;;  %v4592_v55 = vld [vmem:[#allocation8 + $0x3d0] sm:$0xf]  ;;  %v6173_v38 = vld [vmem:[#allocation8 + $0x9a8] sm:$0xf0] }
 0x1b0   :  { %3482 = vmatpush.bf16.msra.mxu2 %v4233_v57  ;;  %3475 = vmatpush.bf16.msrb.mxu1 %v5549_v9  ;;  %v4673_v57 = vor.u32 %v6008_v14, %v4672_v52  ;;  %v4132_v9 = vld [vmem:[#allocation8 + $0x38] sm:$0xf]  ;;  %v6742_v17 = vpop.f32.mrf.mxu1  ;;  %v4872_v52 = vld [vmem:[#allocation8 + $0x600] sm:$0xf]  ;;  %v6058_v14 = vld [vmem:[#allocation8 + $0x610] sm:$0xf0] }
 0x1b1   :  { %3447 = vmatpush.bf16.msrb.mxu3 %v5269_v15  ;;  %v5873_v15 = vld [vmem:[#allocation8 + $0x48] sm:$0xf0] }
 0x1b2   :  { %3463 = vmatmul.bf16.vlgmr.msrb.gmra.mxu0 %v6657_v10  ;;  %v4133_v23 = vor.u32 %v5873_v15, %v4132_v9  ;;  %v5918_v9 = vld [vmem:[#allocation8 + $0x1b0] sm:$0xf0]  ;;  %v4433_v15 = vor.u32 %v5948_v4, %v4432_v53  ;;  %v6128_v53 = vld [vmem:[#allocation8 + $0x840] sm:$0xf0] }
 0x1b3   :  { %3507 = vmatpush.bf16.msra.mxu0 %v4573_v11  ;;  %3476 = vmatmul.bf16.vlgmr.msrb.gmra.mxu1 %v6664_v8  ;;  %v6738_v11 = vpop.f32.mrf.mxu2 }
 0x1b4   :  { %3520 = vmatpush.bf16.msra.mxu1 %v4733_v13  ;;  %3483 = vmatpush.bf16.msra.mxu2 %v4213_v29  ;;  %v6740_v13 = vpop.f32.mrf.mxu0  ;;  %v4653_v29 = vor.u32 %v6003_v0, %v4652_v63  ;;  %v6183_v63 = vld [vmem:[#allocation8 + $0x9f8] sm:$0xf0]  ;;  %v4312_v0 = vld [vmem:[#allocation8 + $0x1a0] sm:$0xf] }
 0x1b5   :  { %3448 = vmatpush.bf16.msrb.mxu3 %v5249_v26  ;;  %v4473_v26 = vor.u32 %v5958_v22, %v4472_v21 }
 0x1b7   :  { %3508 = vmatpush.bf16.msra.mxu0 %v4553_v28  ;;  %v4112_v28 = vld [vmem:[#allocation8 + $0x10] sm:$0xf] }
 0x1b8   :  { %3521 = vmatpush.bf16.msra.mxu1 %v4713_v3  ;;  %3484 = vmatpush.bf16.msra.mxu2 %v4193_v1  ;;  %v5928_v3 = vld [vmem:[#allocation8 + $0x200] sm:$0xf0]  ;;  %v4452_v1 = vld [vmem:[#allocation8 + $0x2b8] sm:$0xf]  ;;  %v4113_v37 = vor.u32 %v5868_v30, %v4112_v28  ;;  %v4853_v30 = vor.u32 %v6053_v12, %v4852_v16  ;;  %v5292_v16 = vld [vmem:[#allocation8 + $0x948] sm:$0xf] }
 0x1b9   :  { %3449 = vmatpush.bf16.msrb.mxu3 %v5229_v43  ;;  %v4353_v62 = vor.u32 %v5928_v3, %v4352_v31  ;;  %v6178_v31 = vld [vmem:[#allocation8 + $0x9d0] sm:$0xf0]  ;;  %v4292_v3 = vld [vmem:[#allocation8 + $0x178] sm:$0xf]  ;;  %v6163_v12 = vld [vmem:[#allocation8 + $0x958] sm:$0xf0] }
 0x1bb   :  { %3509 = vmatpush.bf16.msra.mxu0 %v4533_v41  ;;  %v873_v41 = vperm.slane %v6745_v39, 2 }
 0x1bc   :  { %3522 = vmatpush.bf16.msra.mxu1 %v4693_v42  ;;  %3485 = vmatpush.bf16.msra.mxu2 %v4173_v46  ;;  %v3232_v42 = vpop.f32.mrf.mxu2  ;;  %v3258_v43 = vpop.f32.mrf.mxu0 }
 0x1bd   :  { %3494 = vmatpush.bf16.msra.mxu3 %v4413_v51  ;;  %v3271_v46 = vpop.f32.mrf.mxu1  ;;  %v4453_v51 = vor.u32 %v5953_v36, %v4452_v1  ;;  %v3231_v21 = vadd.f32 %v6738_v11, %v873_v41  ;;  %v5172_v11 = vld [vmem:[#allocation8 + $0x858] sm:$0xf]  ;;  %v5353_v36 = vor.u32 %v6178_v31, %v5352_v27  ;;  %v4272_v42 = vld [vmem:[#allocation8 + $0x150] sm:$0xf]  ;;  %v5908_v43 = vld [vmem:[#allocation8 + $0x160] sm:$0xf0] }
 0x1be   :  { %3450 = vmatmul.bf16.vlgmr.msrb.gmra.mxu3 %v6651_v20  ;;  %v6103_v46 = vld [vmem:[#allocation8 + $0x778] sm:$0xf0]  ;;  %v6118_v31 = vld [vmem:[#allocation8 + $0x7f0] sm:$0xf0] }
 0x1bf   :  { %3510 = vmatpush.bf16.msra.mxu0 %v4513_v56  ;;  %v5988_v56 = vld [vmem:[#allocation8 + $0x3e0] sm:$0xf0] }
 0x1c0   :  { %3523 = vmatpush.bf16.msra.mxu1 %v4673_v57  ;;  %3486 = vmatpush.bf16.msra.mxu2 %v4153_v61  ;;  %v4333_v57 = vor.u32 %v5923_v25, %v4332_v50  ;;  %v5372_v61 = vld [vmem:[#allocation8 + $0x9e8] sm:$0xf]  ;;  %v6043_v50 = vld [vmem:[#allocation8 + $0x598] sm:$0xf0] }
 0x1c1   :  { %3495 = vmatpush.bf16.msra.mxu3 %v4393_v59  ;;  %v4873_v59 = vor.u32 %v6058_v14, %v4872_v52  ;;  %v5373_v22 = vor.u32 %v6183_v63, %v5372_v61  ;;  %v3243_v28 = vpop.f32.mrf.mxu3  ;;  %v5052_v25 = vld [vmem:[#allocation8 + $0x768] sm:$0xf]  ;;  %v5333_v52 = vor.u32 %v6173_v38, %v5332_v5  ;;  %v4273_v14 = vor.u32 %v5908_v43, %v4272_v42  ;;  %v6098_v61 = vld [vmem:[#allocation8 + $0x750] sm:$0xf0]  ;;  %v5092_v5 = vld [vmem:[#allocation8 + $0x7b8] sm:$0xf] }
 0x1c2   :  { %v3244_v32 = vadd.f32 %v3243_v28, %v3231_v21  ;;  %v5132_v63 = vld [vmem:[#allocation8 + $0x808] sm:$0xf]  ;;  %v5293_v28 = vor.u32 %v6163_v12, %v5292_v16  ;;  %v6113_v38 = vld [vmem:[#allocation8 + $0x7c8] sm:$0xf0]  ;;  %v5252_v43 = vld [vmem:[#allocation8 + $0x8f8] sm:$0xf] }
 0x1c3   :  { %3511 = vmatpush.bf16.msra.mxu0 %v4493_v18  ;;  %v4593_v18 = vor.u32 %v5988_v56, %v4592_v55  ;;  %v5053_v55 = vor.u32 %v6103_v46, %v5052_v25  ;;  %v5312_v56 = vld [vmem:[#allocation8 + $0x970] sm:$0xf]  ;;  %v6279_v16 = vld [vmem:[#allocation11 + $0x78] sm:$0xff] }
 0x1c4   :  { %3524 = vmatpush.bf16.msra.mxu1 %v4653_v29  ;;  %3487 = vmatpush.bf16.msra.mxu2 %v4133_v23  ;;  %v5213_v29 = vor.u32 %v6143_v60, %v5212_v58  ;;  %v4313_v23 = vor.u32 %v5918_v9, %v4312_v0  ;;  %v3257_v1 = vadd.f32 %v6740_v13, %v3244_v32  ;;  %v6038_v58 = vld [vmem:[#allocation8 + $0x570] sm:$0xf0]  ;;  %v5032_v60 = vld [vmem:[#allocation8 + $0x740] sm:$0xf]  ;;  %v6123_v0 = vld [vmem:[#allocation8 + $0x818] sm:$0xf0] }
 0x1c5   :  { %3496 = vmatpush.bf16.msra.mxu3 %v4373_v40  ;;  %v5192_v40 = vld [vmem:[#allocation8 + $0x880] sm:$0xf]  ;;  %v5133_v27 = vor.u32 %v6123_v0, %v5132_v63  ;;  %v5492_v63 = vld [vmem:[#allocation8 + $0xad8] sm:$0xf]  ;;  %v6213_v0 = vld [vmem:[#allocation8 + $0xae8] sm:$0xf0] }
 0x1c6   :  { %v6754_v13 = vadd.f32 %v6742_v17, %v3257_v1  ;;  %v5272_v32 = vld [vmem:[#allocation8 + $0x920] sm:$0xf]  ;;  %v6088_v1 = vld [vmem:[#allocation8 + $0x700] sm:$0xf0] }
 0x1c7   :  { %3512 = vmatpush.bf16.msra.mxu0 %v4473_v26  ;;  %v5913_v26 = vld [vmem:[#allocation8 + $0x188] sm:$0xf0] }
 0x1c8   :  { %3525 = vmatpush.bf16.msra.mxu1 %v4633_v35  ;;  %3488 = vmatpush.bf16.msra.mxu2 %v4113_v37  ;;  %v5193_v35 = vor.u32 %v6138_v24, %v5192_v40  ;;  %v4293_v37 = vor.u32 %v5913_v26, %v4292_v3  ;;  %v6093_v40 = vld [vmem:[#allocation8 + $0x728] sm:$0xf0] }
 0x1c9   :  { %3497 = vmatpush.bf16.msra.mxu3 %v4353_v62  ;;  %v6133_v62 = vld [vmem:[#allocation8 + $0x868] sm:$0xf0] }
 0x1cb   :  { %3513 = vmatpush.bf16.msra.mxu0 %v4453_v51  ;;  %3489 = vmatmul.bf16.vlgmr.msra.gmra.mxu2 %v6626_v45  ;;  %v6048_v45 = vld [vmem:[#allocation8 + $0x5c0] sm:$0xf0]  ;;  %v5173_v51 = vor.u32 %v6133_v62, %v5172_v11  ;;  %v4992_v11 = vld [vmem:[#allocation8 + $0x6f0] sm:$0xf] }
 0x1cc   :  { %3533 = vmatpush.bf16.msrb.mxu2 %v4893_v44  ;;  %3526 = vmatpush.bf16.msra.mxu1 %v4613_v54  ;;  %v4833_v41 = vor.u32 %v6048_v45, %v4832_v34  ;;  %v4812_v44 = vld [vmem:[#allocation8 + $0x588] sm:$0xf]  ;;  %v3245_v54 = vpop.f32.mrf.mxu3  ;;  %v6158_v34 = vld [vmem:[#allocation8 + $0x930] sm:$0xf0]  ;;  %v4752_v45 = vld [vmem:[#allocation8 + $0x510] sm:$0xf]  ;;  %v4993_v42 = vor.u32 %v6088_v1, %v4992_v11 }
 0x1cd   :  { %3498 = vmatpush.bf16.msra.mxu3 %v4333_v57  ;;  %v4813_v4 = vor.u32 %v6043_v50, %v4812_v44  ;;  %v4792_v57 = vld [vmem:[#allocation8 + $0x560] sm:$0xf]  ;;  %v5273_v62 = vor.u32 %v6158_v34, %v5272_v32  ;;  %v6153_v44 = vld [vmem:[#allocation8 + $0x908] sm:$0xf0]  ;;  %v6218_v54 = vld [vmem:[#allocation8 + $0xb10] sm:$0xf0] }
 0x1ce   :  { %v4793_v9 = vor.u32 %v6038_v58, %v4792_v57  ;;  %v5232_v57 = vld [vmem:[#allocation8 + $0x8d0] sm:$0xf]  ;;  %v6148_v58 = vld [vmem:[#allocation8 + $0x8e0] sm:$0xf0]  ;;  %v5452_v34 = vld [vmem:[#allocation8 + $0xa88] sm:$0xf] }
 0x1cf   :  { %3514 = vmatpush.bf16.msra.mxu0 %v4433_v15  ;;  %v5033_v15 = vor.u32 %v6098_v61, %v5032_v60  ;;  %v6758_v21 = vpop.f32.mrf.mxu0  ;;  %v4952_v61 = vld [vmem:[#allocation8 + $0x6a0] sm:$0xf]  ;;  %v6068_v32 = vld [vmem:[#allocation8 + $0x660] sm:$0xf0]  ;;  %v6263_v11 = vld [vmem:[#allocation8 + $0xc78] sm:$0xf0] }
 0x1d0   :  { %3534 = vmatpush.bf16.msrb.mxu2 %v4873_v59  ;;  %3527 = vmatpush.bf16.msra.mxu1 %v4593_v18  ;;  %v4772_v18 = vld [vmem:[#allocation8 + $0x538] sm:$0xf]  ;;  %v6760_v24 = vpop.f32.mrf.mxu1  ;;  %v6269_v1 = vld [vmem:[#allocation11 + $0x28] sm:$0xff] }
 0x1d1   :  { %3499 = vmatpush.bf16.msra.mxu3 %v4313_v23  ;;  %v5012_v23 = vld [vmem:[#allocation8 + $0x718] sm:$0xf] }
 0x1d2   :  { %3515 = vmatmul.bf16.vlgmr.msra.gmra.mxu0 %v6631_v6  ;;  %v5152_v6 = vld [vmem:[#allocation8 + $0x830] sm:$0xf]  ;;  %v5013_v26 = vor.u32 %v6093_v40, %v5012_v23  ;;  %v4932_v23 = vld [vmem:[#allocation8 + $0x678] sm:$0xf]  ;;  %v6073_v40 = vld [vmem:[#allocation8 + $0x688] sm:$0xf0] }
 0x1d3   :  { %3559 = vmatpush.bf16.msrb.mxu0 %v5213_v29  ;;  %3528 = vmatmul.bf16.vlgmr.msra.gmra.mxu1 %v6633_v7  ;;  %v6168_v7 = vld [vmem:[#allocation8 + $0x980] sm:$0xf0]  ;;  %v5153_v17 = vor.u32 %v6128_v53, %v5152_v6  ;;  %v6756_v29 = vpop.f32.mrf.mxu2  ;;  %v5093_v6 = vor.u32 %v6113_v38, %v5092_v5  ;;  %v5512_v53 = vld [vmem:[#allocation8 + $0xb00] sm:$0xf]  ;;  %v6198_v38 = vld [vmem:[#allocation8 + $0xa70] sm:$0xf0] }
 0x1d4   :  { %3572 = vmatpush.bf16.msrb.mxu1 %v5373_v22  ;;  %3535 = vmatpush.bf16.msrb.mxu2 %v4853_v30  ;;  %v5313_v59 = vor.u32 %v6168_v7, %v5312_v56  ;;  %v6033_v22 = vld [vmem:[#allocation8 + $0x548] sm:$0xf0]  ;;  %v5112_v30 = vld [vmem:[#allocation8 + $0x7e0] sm:$0xf]  ;;  %v6108_v56 = vld [vmem:[#allocation8 + $0x7a0] sm:$0xf0]  ;;  %v5513_v60 = vor.u32 %v6218_v54, %v5512_v53 }
 0x1d5   :  { %3500 = vmatpush.bf16.msra.mxu3 %v4293_v37  ;;  %v4773_v3 = vor.u32 %v6033_v22, %v4772_v18  ;;  %v5532_v37 = vld [vmem:[#allocation8 + $0xb28] sm:$0xf]  ;;  %v5493_v22 = vor.u32 %v6213_v0, %v5492_v63  ;;  %v5432_v5 = vld [vmem:[#allocation8 + $0xa60] sm:$0xf] }
 0x1d6   :  { %v6267_v54 = vld [vmem:[#allocation11 + $0x18] sm:$0xff] }
 0x1d7   :  { %3560 = vmatpush.bf16.msrb.mxu0 %v5193_v35  ;;  %v6028_v35 = vld [vmem:[#allocation8 + $0x520] sm:$0xf0]  ;;  %v3310_v25 = vpop.f32.mrf.mxu0 }
 0x1d8   :  { %3573 = vmatpush.bf16.msrb.mxu1 %v5353_v36  ;;  %3536 = vmatpush.bf16.msrb.mxu2 %v4833_v41  ;;  %v5113_v36 = vor.u32 %v6118_v31, %v5112_v30  ;;  %v4753_v41 = vor.u32 %v6028_v35, %v4752_v45  ;;  %v6270_v30 = vld [vmem:[#allocation11 + $0x30] sm:$0xff]  ;;  %v4933_v31 = vor.u32 %v6073_v40, %v4932_v23  ;;  %v5692_v35 = vld [vmem:[#allocation8 + $0xc68] sm:$0xf]  ;;  %v6273_v23 = vld [vmem:[#allocation11 + $0x48] sm:$0xff]  ;;  %v3616_v40 = vmul.f32 0.01, %v6705_v33 }
 0x1d9   :  { %3501 = vmatpush.bf16.msra.mxu3 %v4273_v14  ;;  %v3323_v14 = vpop.f32.mrf.mxu1  ;;  %v6203_v45 = vld [vmem:[#allocation8 + $0xa98] sm:$0xf0]  ;;  %v5412_v25 = vld [vmem:[#allocation8 + $0xa38] sm:$0xf] }
 0x1da   :  { %v5652_v14 = vld [vmem:[#allocation8 + $0xc18] sm:$0xf] }
 0x1db   :  { %3561 = vmatpush.bf16.msrb.mxu0 %v5173_v51  ;;  %v3284_v50 = vpop.f32.mrf.mxu2  ;;  %v4972_v51 = vld [vmem:[#allocation8 + $0x6c8] sm:$0xf] }
 0x1dc   :  { %3574 = vmatpush.bf16.msrb.mxu1 %v5333_v52  ;;  %3537 = vmatpush.bf16.msrb.mxu2 %v4813_v4  ;;  %v6083_v52 = vld [vmem:[#allocation8 + $0x6d8] sm:$0xf0]  ;;  %v5253_v4 = vor.u32 %v6153_v44, %v5252_v43  ;;  %v6268_v43 = vld [vmem:[#allocation11 + $0x20] sm:$0xff]  ;;  %v5433_v44 = vor.u32 %v6198_v38, %v5432_v5 }
 0x1dd   :  { %3546 = vmatpush.bf16.msrb.mxu3 %v5053_v55  ;;  %v5072_v55 = vld [vmem:[#allocation8 + $0x790] sm:$0xf]  ;;  %v4973_v7 = vor.u32 %v6083_v52, %v4972_v51  ;;  %v6193_v52 = vld [vmem:[#allocation8 + $0xa48] sm:$0xf0]  ;;  %v6228_v5 = vld [vmem:[#allocation8 + $0xb60] sm:$0xf0] }
 0x1de   :  { %3502 = vmatmul.bf16.vlgmr.msra.gmra.mxu3 %v6641_v48  ;;  %v6223_v48 = vld [vmem:[#allocation8 + $0xb38] sm:$0xf0] }
 0x1df   :  { %3562 = vmatpush.bf16.msrb.mxu0 %v5153_v17  ;;  %v5533_v46 = vor.u32 %v6223_v48, %v5532_v37  ;;  %v6078_v17 = vld [vmem:[#allocation8 + $0x6b0] sm:$0xf0] }
 0x1e0   :  { %3575 = vmatpush.bf16.msrb.mxu1 %v5313_v59  ;;  %3538 = vmatpush.bf16.msrb.mxu2 %v4793_v9  ;;  %v5073_v59 = vor.u32 %v6108_v56, %v5072_v55  ;;  %v5233_v9 = vor.u32 %v6148_v58, %v5232_v57  ;;  %v4953_v12 = vor.u32 %v6078_v17, %v4952_v61  ;;  %v6188_v57 = vld [vmem:[#allocation8 + $0xa20] sm:$0xf0]  ;;  %v5632_v58 = vld [vmem:[#allocation8 + $0xbf0] sm:$0xf]  ;;  %v6266_v61 = vld [vmem:[#allocation11 + $0x10] sm:$0xff] }
 0x1e1   :  { %3547 = vmatpush.bf16.msrb.mxu3 %v5033_v15  ;;  %v6271_v15 = vld [vmem:[#allocation11 + $0x38] sm:$0xff]  ;;  %v6764_v18 = vpop.f32.mrf.mxu3  ;;  %v5413_v55 = vor.u32 %v6193_v52, %v5412_v25  ;;  %v6274_v17 = vld [vmem:[#allocation11 + $0x50] sm:$0xff] }
 0x1e3   :  { %3563 = vmatpush.bf16.msrb.mxu0 %v5133_v27  ;;  %v5472_v27 = vld [vmem:[#allocation8 + $0xab0] sm:$0xf] }
 0x1e4   :  { %3576 = vmatpush.bf16.msrb.mxu1 %v5293_v28  ;;  %3539 = vmatpush.bf16.msrb.mxu2 %v4773_v3  ;;  %v6208_v28 = vld [vmem:[#allocation8 + $0xac0] sm:$0xf0] }
 0x1e5   :  { %3548 = vmatpush.bf16.msrb.mxu3 %v5013_v26  ;;  %v5473_v3 = vor.u32 %v6208_v28, %v5472_v27  ;;  %v4912_v26 = vld [vmem:[#allocation8 + $0x650] sm:$0xf]  ;;  %v3617_v27 = vmul.f32 0.01, %v6735_v47 }
 0x1e6   :  { %v4913_v37 = vor.u32 %v6068_v32, %v4912_v26  ;;  %v6272_v26 = vld [vmem:[#allocation11 + $0x40] sm:$0xff]  ;;  %v3621_v32 = vsel %vm3611_vm11, %v6705_v33, %v3616_v40 }
 0x1e7   :  { %3564 = vmatpush.bf16.msrb.mxu0 %v5113_v36  ;;  %v6277_v36 = vld [vmem:[#allocation11 + $0x68] sm:$0xff] }
 0x1e8   :  { %3577 = vmatpush.bf16.msrb.mxu1 %v5273_v62  ;;  %3540 = vmatpush.bf16.msrb.mxu2 %v4753_v41  ;;  %v5453_v62 = vor.u32 %v6203_v45, %v5452_v34  ;;  %v5672_v41 = vld [vmem:[#allocation8 + $0xc40] sm:$0xf]  ;;  %v3622_v45 = vsel %vm3612_vm12, %v6735_v47, %v3617_v27  ;;  %v5552_v47 = vld [vmem:[#allocation8 + $0xb50] sm:$0xf] }
 0x1e9   :  { %3549 = vmatpush.bf16.msrb.mxu3 %v4993_v42  ;;  %v3297_v48 = vpop.f32.mrf.mxu3  ;;  %v6258_v42 = vld [vmem:[#allocation8 + $0xc50] sm:$0xf0] }
 0x1ea   :  { %v5673_v50 = vor.u32 %v6258_v42, %v5672_v41  ;;  %v3626_v48 = vpack.c.bf16 %v3621_v32, %v3621_v32  ;;  %v6283_v41 = vld [vmem:[#allocation11 + $0x98] sm:$0xff] }
 0x1eb   :  { %3565 = vmatpush.bf16.msrb.mxu0 %v5093_v6  ;;  %3541 = vmatmul.bf16.vlgmr.msrb.gmra.mxu2 %v6643_v49  ;;  %v6278_v49 = vld [vmem:[#allocation11 + $0x70] sm:$0xff]  ;;  %v6253_v6 = vld [vmem:[#allocation8 + $0xc28] sm:$0xf0]  ;;  %v6295_v42 = vld [vmem:[#allocation11 + $0xf8] sm:$0xff] }
 0x1ec   :  { %3585 = vmatpush.bf16.msra.mxu2 %v5533_v46  ;;  %3578 = vmatpush.bf16.msrb.mxu1 %v5253_v4  ;;  %v6275_v4 = vld [vmem:[#allocation11 + $0x58] sm:$0xff]  ;;  %v5653_v56 = vor.u32 %v6253_v6, %v5652_v14  ;;  %v6293_v6 = vld [vmem:[#allocation11 + $0xe8] sm:$0xff] }
 0x1ed   :  { %3550 = vmatpush.bf16.msrb.mxu3 %v4973_v7  ;;  %v5392_v7 = vld [vmem:[#allocation8 + $0xa10] sm:$0xf] }
 0x1ee   :  { %v6768_v46 = vpop.f32.mrf.mxu2 }
 0x1ef   :  { %3566 = vmatpush.bf16.msrb.mxu0 %v5073_v59  ;;  %v6770_v51 = vpop.f32.mrf.mxu0  ;;  %v5393_v59 = vor.u32 %v6188_v57, %v5392_v7  ;;  %v6291_v57 = vld [vmem:[#allocation11 + $0xd8] sm:$0xff] }
 0x1f0   :  { %3586 = vmatpush.bf16.msra.mxu2 %v5513_v60  ;;  %3579 = vmatpush.bf16.msrb.mxu1 %v5233_v9  ;;  %v6772_v53 = vpop.f32.mrf.mxu1  ;;  %v6248_v60 = vld [vmem:[#allocation8 + $0xc00] sm:$0xf0] }
 0x1f1   :  { %3551 = vmatpush.bf16.msrb.mxu3 %v4953_v12  ;;  %v6287_v9 = vld [vmem:[#allocation11 + $0xb8] sm:$0xff] }
 0x1f2   :  { %3567 = vmatmul.bf16.vlgmr.msrb.gmra.mxu0 %v6649_v19  ;;  %v5693_v19 = vor.u32 %v6263_v11, %v5692_v35  ;;  %v3283_v35 = vadd.f32 %v6756_v29, %v6754_v13  ;;  %v5553_v29 = vor.u32 %v6228_v5, %v5552_v47  ;;  %v6301_v47 = vld [vmem:[#allocation11 + $0x128] sm:$0xff] }
 0x1f3   :  { %3955 = vmatpush.bf16.msra.mxu0 %v6271_v15  ;;  %3580 = vmatmul.bf16.vlgmr.msrb.gmra.mxu1 %v6651_v20  ;;  %v6276_v20 = vld [vmem:[#allocation11 + $0x60] sm:$0xff] }
 0x1f4   :  { %3968 = vmatpush.bf16.msra.mxu1 %v6279_v16  ;;  %3587 = vmatpush.bf16.msra.mxu2 %v5493_v22  ;;  %v5612_v15 = vld [vmem:[#allocation8 + $0xbc8] sm:$0xf]  ;;  %v6243_v16 = vld [vmem:[#allocation8 + $0xbd8] sm:$0xf0]  ;;  %v6265_v22 = vld [vmem:[#allocation11 + $0x8] sm:$0xff] }
 0x1f5   :  { %3552 = vmatpush.bf16.msrb.mxu3 %v4933_v31  ;;  %v5613_v28 = vor.u32 %v6243_v16, %v5612_v15  ;;  %v6238_v31 = vld [vmem:[#allocation8 + $0xbb0] sm:$0xf0] }
 0x1f6   :  { %v3336_v63 = vpop.f32.mrf.mxu2 }
 0x1f7   :  { %3956 = vmatpush.bf16.msra.mxu0 %v6270_v30  ;;  %v3362_v0 = vpop.f32.mrf.mxu0  ;;  %v6286_v30 = vld [vmem:[#allocation11 + $0xb0] sm:$0xff] }
 0x1f8   :  { %3969 = vmatpush.bf16.msra.mxu1 %v6278_v49  ;;  %3588 = vmatpush.bf16.msra.mxu2 %v5473_v3  ;;  %v3375_v12 = vpop.f32.mrf.mxu1  ;;  %v5592_v49 = vld [vmem:[#allocation8 + $0xba0] sm:$0xf]  ;;  %v6264_v3 = vld [vmem:[#allocation11] sm:$0xff] }
 0x1f9   :  { %3553 = vmatpush.bf16.msrb.mxu3 %v4913_v37  ;;  %v5593_v34 = vor.u32 %v6238_v31, %v5592_v49  ;;  %v6233_v37 = vld [vmem:[#allocation8 + $0xb88] sm:$0xf0] }
 0x1fb   :  { %3957 = vmatpush.bf16.msra.mxu0 %v6269_v1  ;;  %v6285_v1 = vld [vmem:[#allocation11 + $0xa8] sm:$0xff] }
 0x1fc   :  { %3970 = vmatpush.bf16.msra.mxu1 %v6277_v36  ;;  %3589 = vmatpush.bf16.msra.mxu2 %v5453_v62  ;;  %v5572_v36 = vld [vmem:[#allocation8 + $0xb78] sm:$0xf]  ;;  %v3296_v62 = vadd.f32 %v6764_v18, %v3283_v35 }
 0x1fd   :  { %3598 = vmatpush.bf16.msra.mxu3 %v5693_v19  ;;  %v5573_v33 = vor.u32 %v6233_v37, %v5572_v36  ;;  %v6284_v19 = vld [vmem:[#allocation11 + $0xa0] sm:$0xff] }
 0x1fe   :  { %3554 = vmatmul.bf16.vlgmr.msrb.gmra.mxu3 %v6655_v2  ;;  %v5633_v2 = vor.u32 %v6248_v60, %v5632_v58  ;;  %v3309_v13 = vadd.f32 %v6758_v21, %v3296_v62  ;;  %v6281_v21 = vld [vmem:[#allocation11 + $0x88] sm:$0xff] }
 0x1ff   :  { %3958 = vmatpush.bf16.msra.mxu0 %v6268_v43 }
 0x200   :  { %3971 = vmatpush.bf16.msra.mxu1 %v6276_v20  ;;  %3590 = vmatpush.bf16.msra.mxu2 %v5433_v44  ;;  %v3322_v18 = vadd.f32 %v6760_v24, %v3309_v13  ;;  %v6282_v20 = vld [vmem:[#allocation11 + $0x90] sm:$0xff]  ;;  %v6280_v24 = vld [vmem:[#allocation11 + $0x80] sm:$0xff] }
 0x201   :  { %3599 = vmatpush.bf16.msra.mxu3 %v5673_v50  ;;  %v3347_v11 = vpop.f32.mrf.mxu3  ;;  %v6294_v44 = vld [vmem:[#allocation11 + $0xf0] sm:$0xff] }
 0x202   :  { %v3335_v43 = vadd.f32 %v6768_v46, %v3322_v18  ;;  %v6292_v46 = vld [vmem:[#allocation11 + $0xe0] sm:$0xff] }
 0x203   :  { %3959 = vmatpush.bf16.msra.mxu0 %v6267_v54 }
 0x204   :  { %3972 = vmatpush.bf16.msra.mxu1 %v6275_v4  ;;  %3591 = vmatpush.bf16.msra.mxu2 %v5413_v55  ;;  %v3348_v52 = vadd.f32 %v3347_v11, %v3335_v43 }
 0x205   :  { %3600 = vmatpush.bf16.msra.mxu3 %v5653_v56 }
 0x206   :  { %v3618_v54 = vmul.f32 0.01, %v3348_v52  ;;  %vm3613_vm13 = vcmp.ge.f32.partialorder %v3348_v52, 0.0 }
 0x207   :  { %3960 = vmatpush.bf16.msra.mxu0 %v6266_v61  ;;  %v6289_v61 = vld [vmem:[#allocation11 + $0xc8] sm:$0xff] }
 0x208   :  { %3973 = vmatpush.bf16.msra.mxu1 %v6274_v17  ;;  %3592 = vmatpush.bf16.msra.mxu2 %v5393_v59  ;;  %v3623_v56 = vsel %vm3613_vm13, %v3348_v52, %v3618_v54  ;;  %v874_v17 = vperm.slane %v6745_v39, 3  ;;  %v6288_v59 = vld [vmem:[#allocation11 + $0xc0] sm:$0xff] }
 0x209   :  { %3601 = vmatpush.bf16.msra.mxu3 %v5633_v2  ;;  %v3349_v38 = vpop.f32.mrf.mxu3  ;;  %v3628_v58 = vpack.c.bf16 %v3623_v56, %v3623_v56  ;;  %v6296_v52 = vld [vmem:[#allocation11 + $0x100] sm:$0xff] }
 0x20a   :  { %v3361_v63 = vadd.f32 %v6770_v51, %v874_v17 }
 0x20b   :  { %3961 = vmatpush.bf16.msra.mxu0 %v6265_v22  ;;  %3593 = vmatmul.bf16.vlgmr.msra.gmra.mxu2 %v6657_v10  ;;  %v3627_v10 = vpack.c.bf16 %v3622_v45, %v3622_v45 }
 0x20c   :  { %3981 = vmatpush.bf16.msrb.mxu2 %v6287_v9  ;;  %3974 = vmatpush.bf16.msra.mxu1 %v6273_v23  ;;  %v3374_v15 = vadd.f32 %v6772_v53, %v3361_v63 }
 0x20d   :  { %3602 = vmatpush.bf16.msra.mxu3 %v5613_v28 }
 0x20e   :  { %v3386_v50 = vpop.f32.mrf.mxu2 }
 0x20f   :  { %3962 = vmatpush.bf16.msra.mxu0 %v6264_v3  ;;  %v3412_v25 = vpop.f32.mrf.mxu0  ;;  %v3387_v12 = vadd.f32 %v3386_v50, %v3374_v15  ;;  %v875_v50 = vperm.slane %v6745_v39, 4 }
 0x210   :  { %3982 = vmatpush.bf16.msrb.mxu2 %v6286_v30  ;;  %3975 = vmatpush.bf16.msra.mxu1 %v6272_v26  ;;  %v3425_v14 = vpop.f32.mrf.mxu1 }
 0x211   :  { %3603 = vmatpush.bf16.msra.mxu3 %v5593_v34 }
 0x212   :  { %3963 = vmatmul.bf16.vlgmr.msra.gmra.mxu0 %v3626_v48 }
 0x213   :  { %3976 = vmatmul.bf16.vlgmr.msra.gmra.mxu1 %v3627_v10  ;;  %v6303_v10 = vld [vmem:[#allocation11 + $0x138] sm:$0xff] }
 0x214   :  { %3983 = vmatpush.bf16.msrb.mxu2 %v6285_v1  ;;  %4007 = vmatpush.bf16.msrb.mxu0 %v6303_v10 }
 0x215   :  { %3604 = vmatpush.bf16.msra.mxu3 %v5573_v33  ;;  %v6302_v33 = vld [vmem:[#allocation11 + $0x130] sm:$0xff] }
 0x216   :  { %v3388_v4 = vpop.f32.mrf.mxu2 }
 0x217   :  { %v3414_v55 = vpop.f32.mrf.mxu0 }
 0x218   :  { %3984 = vmatpush.bf16.msrb.mxu2 %v6284_v19  ;;  %v3427_v7 = vpop.f32.mrf.mxu1  ;;  %4008 = vmatpush.bf16.msrb.mxu0 %v6302_v33 }
 0x219   :  { %3605 = vmatpush.bf16.msra.mxu3 %v5553_v29  ;;  %v6300_v29 = vld [vmem:[#allocation11 + $0x120] sm:$0xff] }
 0x21c   :  { %3985 = vmatpush.bf16.msrb.mxu2 %v6283_v41  ;;  %3606 = vmatmul.bf16.vlgmr.msra.gmra.mxu3 %v6664_v8  ;;  %v6290_v8 = vld [vmem:[#allocation11 + $0xd0] sm:$0xff]  ;;  %v6299_v41 = vld [vmem:[#allocation11 + $0x118] sm:$0xff] }
 0x21d   :  { %3994 = vmatpush.bf16.msrb.mxu3 %v6295_v42  ;;  %4009 = vmatpush.bf16.msrb.mxu0 %v6301_v47  ;;  %v6298_v42 = vld [vmem:[#allocation11 + $0x110] sm:$0xff] }
 0x220   :  { %3986 = vmatpush.bf16.msrb.mxu2 %v6282_v20 }
 0x221   :  { %3995 = vmatpush.bf16.msrb.mxu3 %v6294_v44  ;;  %v3399_v60 = vpop.f32.mrf.mxu3  ;;  %4010 = vmatpush.bf16.msrb.mxu0 %v6300_v29  ;;  %v6297_v44 = vld [vmem:[#allocation11 + $0x108] sm:$0xff] }
 0x222   :  { %v3400_v22 = vadd.f32 %v3399_v60, %v3387_v12 }
 0x224   :  { %3987 = vmatpush.bf16.msrb.mxu2 %v6281_v21  ;;  %v3413_v27 = vadd.f32 %v3412_v25, %v3400_v22 }
 0x225   :  { %3996 = vmatpush.bf16.msrb.mxu3 %v6293_v6  ;;  %4011 = vmatpush.bf16.msrb.mxu0 %v6299_v41 }
 0x226   :  { %v3426_v30 = vadd.f32 %v3425_v14, %v3413_v27 }
 0x228   :  { %3988 = vmatpush.bf16.msrb.mxu2 %v6280_v24  ;;  %v6318_v24 = vld [vmem:[#allocation13] ss:$0 sm:$0xff] }
 0x229   :  { %3997 = vmatpush.bf16.msrb.mxu3 %v6292_v46  ;;  %v3401_v2 = vpop.f32.mrf.mxu3  ;;  %4012 = vmatpush.bf16.msrb.mxu0 %v6298_v42 }
 0x22b   :  { %3989 = vmatmul.bf16.vlgmr.msrb.gmra.mxu2 %v3628_v58 }
 0x22d   :  { %3998 = vmatpush.bf16.msrb.mxu3 %v6291_v57  ;;  %4013 = vmatpush.bf16.msrb.mxu0 %v6297_v44 }
 0x22e   :  { %v3438_v0 = vpop.f32.mrf.mxu2 }
 0x22f   :  { %v3464_v9 = vpop.f32.mrf.mxu0  ;;  %v3439_v49 = vadd.f32 %v3438_v0, %v3426_v30 }
 0x230   :  { %v3477_v16 = vpop.f32.mrf.mxu1 }
 0x231   :  { %3999 = vmatpush.bf16.msrb.mxu3 %v6290_v8  ;;  %4014 = vmatpush.bf16.msrb.mxu0 %v6296_v52 }
 0x235   :  { %4000 = vmatpush.bf16.msrb.mxu3 %v6289_v61 }
 0x236   :  { %v3440_v23 = vpop.f32.mrf.mxu2 }
 0x237   :  { %v3466_v40 = vpop.f32.mrf.mxu0 }
 0x238   :  { %v3479_v28 = vpop.f32.mrf.mxu1 }
 0x239   :  { %4001 = vmatpush.bf16.msrb.mxu3 %v6288_v59 }
 0x241   :  { %v3451_v31 = vpop.f32.mrf.mxu3 }
 0x242   :  { %v3452_v3 = vadd.f32 %v3451_v31, %v3439_v49 }
 0x244   :  { %v3465_v26 = vadd.f32 %v3464_v9, %v3452_v3 }
 0x246   :  { %v3478_v32 = vadd.f32 %v3477_v16, %v3465_v26 }
 0x248   :  { %vm3614_vm14 = vcmp.ge.f32.partialorder %v3478_v32, 0.0  ;;  %v3619_v51 = vmul.f32 0.01, %v3478_v32 }
 0x249   :  { %v3453_v34 = vpop.f32.mrf.mxu3 }
 0x24a   :  { %v3624_v45 = vsel %vm3614_vm14, %v3478_v32, %v3619_v51 }
 0x24b   :  { %v3629_v35 = vpack.c.bf16 %v3624_v45, %v3624_v45 }
 0x24d   :  { %4002 = vmatmul.bf16.vlgmr.msrb.gmra.mxu3 %v3629_v35 }
 0x24e   :  { %v3490_v53 = vpop.f32.mrf.mxu2 }
 0x24f   :  { %v3516_v11 = vpop.f32.mrf.mxu0  ;;  %v3491_v14 = vadd.f32 %v3490_v53, %v875_v50 }
 0x250   :  { %v3529_v1 = vpop.f32.mrf.mxu1 }
 0x256   :  { %v3492_v36 = vpop.f32.mrf.mxu2 }
 0x257   :  { %v3518_v37 = vpop.f32.mrf.mxu0 }
 0x258   :  { %v3531_v48 = vpop.f32.mrf.mxu1 }
 0x261   :  { %v3503_v62 = vpop.f32.mrf.mxu3 }
 0x262   :  { %v3504_v21 = vadd.f32 %v3503_v62, %v3491_v14 }
 0x264   :  { %v3517_v54 = vadd.f32 %v3516_v11, %v3504_v21 }
 0x266   :  { %v3530_v55 = vadd.f32 %v3529_v1, %v3517_v54 }
 0x269   :  { %v3505_v19 = vpop.f32.mrf.mxu3 }
 0x26e   :  { %v3542_v5 = vpop.f32.mrf.mxu2 }
 0x26f   :  { %v3568_v13 = vpop.f32.mrf.mxu0  ;;  %v3543_v57 = vadd.f32 %v3542_v5, %v3530_v55 }
 0x270   :  { %v3581_v38 = vpop.f32.mrf.mxu1 }
 0x276   :  { %v3544_v18 = vpop.f32.mrf.mxu2 }
 0x277   :  { %v3570_v43 = vpop.f32.mrf.mxu0 }
 0x278   :  { %v3583_v20 = vpop.f32.mrf.mxu1 }
 0x281   :  { %v3555_v25 = vpop.f32.mrf.mxu3 }
 0x282   :  { %v3556_v8 = vadd.f32 %v3555_v25, %v3543_v57 }
 0x284   :  { %v3569_v17 = vadd.f32 %v3568_v13, %v3556_v8 }
 0x286   :  { %v3582_v59 = vadd.f32 %v3581_v38, %v3569_v17 }
 0x289   :  { %v3557_v6 = vpop.f32.mrf.mxu3 }
 0x28e   :  { %v3594_v46 = vpop.f32.mrf.mxu2 }
 0x28f   :  { %v3964_v4 = vpop.f32.mrf.mxu0  ;;  %v3595_v2 = vadd.f32 %v3594_v46, %v3582_v59 }
 0x290   :  { %v3965_v56 = vadd.f32 %v6318_v24, %v3964_v4  ;;  %v3977_v7 = vpop.f32.mrf.mxu1 }
 0x292   :  { %v3978_v58 = vadd.f32 %v3977_v7, %v3965_v56 }
 0x296   :  { %v3596_v60 = vpop.f32.mrf.mxu2 }
 0x297   :  { %v3966_v61 = vpop.f32.mrf.mxu0 }
 0x298   :  { %v3979_v39 = vpop.f32.mrf.mxu1 }
 0x29f   :  { %v3607_v63 = vpop.f32.mrf.mxu3 }
 0x2a0   :  { %v3608_v0 = vadd.f32 %v3607_v63, %v3595_v2 }
 0x2a2   :  { %vm3615_vm15 = vcmp.ge.f32.partialorder %v3608_v0, 0.0  ;;  %v3620_v9 = vmul.f32 0.01, %v3608_v0 }
 0x2a4   :  { %v3625_v15 = vsel %vm3615_vm15, %v3608_v0, %v3620_v9 }
 0x2a5   :  { %v3630_v16 = vpack.c.bf16 %v3625_v15, %v3625_v15 }
 0x2a7   :  { %v3609_v12 = vpop.f32.mrf.mxu3  ;;  %4015 = vmatmul.bf16.vlgmr.msrb.gmra.mxu0 %v3630_v16 }
 0x2ae   :  { %v3990_v22 = vpop.f32.mrf.mxu2 }
 0x2af   :  { %v3991_v23 = vadd.f32 %v3990_v22, %v3978_v58 }
 0x2b6   :  { %v3992_v40 = vpop.f32.mrf.mxu2 }
 0x2d0   :  { %v4003_v27 = vpop.f32.mrf.mxu3 }
 0x2d1   :  { %v4004_v28 = vadd.f32 %v4003_v27, %v3991_v23 }
 0x2d8   :  { %v4005_v30 = vpop.f32.mrf.mxu3 }
 0x324   :  { %v4016_v49 = vpop.f32.mrf.mxu0 }
 0x325   :  { %v4017_v31 = vadd.f32 %v4016_v49, %v4004_v28 }
 0x327   :  { %6319 = vtanh.f32 %v4017_v31 }
 0x32c   :  { %v4018_v3 = vpop.f32.mrf.mxu0 }
 0x32d   :  { %v6320_v26 = vpop.eup %6319 }
 0x32e   :  { %v4021_v32 = vmul.f32 2.0, %v6320_v26 }
 0x330   :  { %v4022_v51 = vpack.c.bf16 %v4021_v32, %v4021_v32 }
 0x332   :  { %4023 = vst [vmem:[#allocation14] sm:$0xf] %v4022_v51 }
 0x333   :  { %4034 = dma.vmem_to_hbm [thread:$0]  %s4030_s6, 64, %s4032_s15, [#allocation4]  }
 0x334   :  { %6522 = dma.done.wait [#allocation4], 64  }
 0x335   :  { %6523 = vsyncadd [#allocation4], 4294967232 }
 0x336   :  { %4039 = vsyncpa [#allocation3], 1 }
 0x337   :  { %4040 = vsyncpa [#allocation6], 1 }
 0x338   :  { %4041 = vsyncpa [#allocation9], 1 }
 0x339   :  { %4042 = vsyncpa [#allocation12], 1 }
 0x33a   :  { %4043 = vsyncpa [#allocation4], 1 }

// kernel: tpu_custom_call.1
= control target key start
LH: loop header
LB: loop body
LE: loop exit
PB: predicated region body
PF: predicated region fallthrough
CT: control target
= control target key end

     0   :  { %12 = vsyncpa [#allocation3], 0  ;;  %s6796_s0 = inlined_call_operand.hbm [shape: f32[8,16], index: 0, kind: input, shape index: {}]   ;;  %s6797_s1 = inlined_call_operand.hbm [shape: bf16[16,1280], index: 1, kind: input, shape index: {}]   ;;  %s6798_s2 = inlined_call_operand.hbm [shape: f32[1,1280], index: 2, kind: input, shape index: {}]   ;;  %s6799_s3 = inlined_call_operand.hbm [shape: bf16[1280,640], index: 3, kind: input, shape index: {}]   ;;  %s6800_s4 = inlined_call_operand.hbm [shape: f32[1,640], index: 4, kind: input, shape index: {}]   ;;  %s6801_s5 = inlined_call_operand.hbm [shape: bf16[640,128], index: 5, kind: input, shape index: {}]   ;;  %s6802_s6 = inlined_call_operand.hbm [shape: f32[1,128], index: 6, kind: input, shape index: {}]   ;;  %s6803_s7 = inlined_call_operand.hbm [shape: bf16[8,128], index: 7, kind: output, shape index: {}]  }
   0x1   :  { %13 = vsyncpa [#allocation6], 0 }
   0x2   :  { %14 = vsyncpa [#allocation9], 0 }
   0x3   :  { %15 = vsyncpa [#allocation12], 0  ;;  %s32_s26 = sshll.u32 %s6797_s1, 4  ;;  %s33_s26 = int_to_ptr.hbm [resolvable:$true] %s32_s26 }
   0x4   :  { %16 = vsyncpa [#allocation4], 0  ;;  %s6524_s27 = smov [#allocation5]   ;;  %s56_s8 = sshll.u32 %s6799_s3, 4  ;;  %s57_s8 = int_to_ptr.hbm [resolvable:$true] %s56_s8 }
   0x5   :  { %s34_s28 = sshll.u32 %s6524_s27, 4  ;;  %s6525_s9 = smov 640   ;;  %s35_s28 = int_to_ptr.vmem [resolvable:$true] %s34_s28 }
   0x6   :  { %s6526_s10 = smov 40   ;;  %s6527_s11 = smov [#allocation8]  }
   0x7   :  { %40 = dma.hbm_to_vmem [thread:$0]  %s33_s26, 1280, %s35_s28, [#allocation6], %s6525_s9, %s6525_s9, %s6526_s10  }
   0x8   :  { %s58_s12 = sshll.u32 %s6527_s11, 4  ;;  %s6528_s13 = smov 320   ;;  %s59_s12 = int_to_ptr.vmem [resolvable:$true] %s58_s12 }
   0x9   :  { %s6529_s14 = smov 20   ;;  %s80_s16 = sshll.u32 %s6801_s5, 4  ;;  %s81_s16 = int_to_ptr.hbm [resolvable:$true] %s80_s16 }
   0xa   :  { %64 = dma.hbm_to_vmem [thread:$0]  %s57_s8, 51200, %s59_s12, [#allocation9], %s6528_s13, %s6528_s13, %s6529_s14  }
   0xb   :  { %s6530_s17 = smov [#allocation11]   ;;  %s22_s20 = sshll.u32 %s6796_s0, 4  ;;  %s23_s20 = int_to_ptr.hbm [resolvable:$true] %s22_s20 }
   0xc   :  { %s82_s18 = sshll.u32 %s6530_s17, 4  ;;  %s6531_s21 = smov 64   ;;  %s83_s18 = int_to_ptr.vmem [resolvable:$true] %s82_s18 }
   0xd   :  { %s6532_s22 = smov 4   ;;  %s6533_s23 = smov [#allocation2]  }
   0xe   :  { %88 = dma.hbm_to_vmem [thread:$0]  %s81_s16, 5120, %s83_s18, [#allocation12], %s6531_s21, %s6531_s21, %s6532_s22  }
   0xf   :  { %s24_s24 = sshll.u32 %s6533_s23, 4  ;;  %s46_s27 = sshll.u32 %s6798_s2, 4  ;;  %s25_s24 = int_to_ptr.vmem [resolvable:$true] %s24_s24  ;;  %s47_s27 = int_to_ptr.hbm [resolvable:$true] %s46_s27 }
  0x10   :  { %27 = dma.hbm_to_vmem [thread:$0]  %s23_s20, 128, %s25_s24, [#allocation3]  }
  0x11   :  { %s70_s29 = sshll.u32 %s6800_s4, 4  ;;  %s6534_s30 = smov [#allocation7]   ;;  %s71_s29 = int_to_ptr.hbm [resolvable:$true] %s70_s29 }
  0x12   :  { %s48_s8 = sshll.u32 %s6534_s30, 4  ;;  %s6535_s0 = smov [#allocation10]   ;;  %s49_s8 = int_to_ptr.vmem [resolvable:$true] %s48_s8 }
  0x13   :  { %51 = dma.hbm_to_vmem [thread:$0]  %s47_s27, 160, %s49_s8, [#allocation6]  }
  0x14   :  { %s72_s9 = sshll.u32 %s6535_s0, 4  ;;  %s94_s12 = sshll.u32 %s6802_s6, 4  ;;  %s73_s9 = int_to_ptr.vmem [resolvable:$true] %s72_s9  ;;  %s95_s12 = int_to_ptr.hbm [resolvable:$true] %s94_s12 }
  0x15   :  { %75 = dma.hbm_to_vmem [thread:$0]  %s71_s29, 80, %s73_s9, [#allocation9]  }
  0x16   :  { %s6536_s2 = smov [#allocation13]  }
  0x17   :  { %s96_s13 = sshll.u32 %s6536_s2, 4  ;;  %s97_s13 = int_to_ptr.vmem [resolvable:$true] %s96_s13 }
  0x18   :  { %99 = dma.hbm_to_vmem [thread:$0]  %s95_s12, 16, %s97_s13, [#allocation12]  }
  0x19   :  { %6514 = dma.done.wait [#allocation3], 128  }
  0x1a   :  { %6515 = vsyncadd [#allocation3], 4294967168 }
  0x1b   :  { %6516 = dma.done.wait [#allocation6], 1440  }
  0x1c   :  { %6517 = vsyncadd [#allocation6], 4294965856 }
  0x1d   :  { %6518 = dma.done.wait [#allocation9], 51280  }
  0x1e   :  { %6519 = vsyncadd [#allocation9], 4294916016 }
  0x1f   :  { %6520 = dma.done.wait [#allocation12], 5136  }
  0x20   :  { %6521 = vsyncadd [#allocation12], 4294962160  ;;  %v4046_v0 = vld [vmem:[#allocation5] sm:$0xf]  ;;  %v5859_v1 = vld [vmem:[#allocation5 + $0x24] sm:$0xf0] }
  0x21   :  { %v4054_v2 = vld [vmem:[#allocation5 + $0x8] sm:$0xf]  ;;  %v4047_v3 = vor.u32 %v5859_v1, %v4046_v0  ;;  %v5860_v4 = vld [vmem:[#allocation5 + $0x2c] sm:$0xf0]  ;;  %v5855_v5 = vld [vmem:[#allocation5 + $0xc] sm:$0xf] }
  0x22   :  { %v4056_v6 = vld [vmem:[#allocation5 + $0x30] sm:$0xf0]  ;;  %v4055_v7 = vor.u32 %v5860_v4, %v4054_v2  ;;  %v129_v9 = vld [vmem:[#allocation2] sm:$0xff]  ;;  %vm215_vm0 = vcmask 130048   ;;  %v5854_v10 = vld [vmem:[#allocation5 + $0x4] sm:$0xf] }
  0x23   :  { %v4059_v8 = vor.u32 %v5855_v5, %v4056_v6  ;;  %v4048_v11 = vld [vmem:[#allocation5 + $0x28] sm:$0xf0]  ;;  %226 = vmatpush.bf16.msra.mxu1 %v4047_v3  ;;  %v6599_v12 = vpack.c.bf16 %v129_v9, %v129_v9  ;;  %v4070_v14 = vld [vmem:[#allocation5 + $0x18] sm:$0xf]  ;;  %v5862_v15 = vld [vmem:[#allocation5 + $0x3c] sm:$0xf0] }
  0x24   :  { %v4051_v13 = vor.u32 %v5854_v10, %v4048_v11  ;;  %v5857_v16 = vld [vmem:[#allocation5 + $0x1c] sm:$0xf]  ;;  %252 = vmatpush.bf16.msra.mxu2 %v4055_v7  ;;  %v4071_v17 = vor.u32 %v5862_v15, %v4070_v14  ;;  %v4072_v18 = vld [vmem:[#allocation5 + $0x40] sm:$0xf0]  ;;  %v4062_v19 = vld [vmem:[#allocation5 + $0x10] sm:$0xf] }
  0x25   :  { %265 = vmatpush.bf16.msra.mxu3 %v4059_v8  ;;  %v5861_v20 = vld [vmem:[#allocation5 + $0x34] sm:$0xf0]  ;;  %v4075_v21 = vor.u32 %v5857_v16, %v4072_v18  ;;  %v5856_v23 = vld [vmem:[#allocation5 + $0x14] sm:$0xf]  ;;  %v4064_v24 = vld [vmem:[#allocation5 + $0x38] sm:$0xf0] }
  0x26   :  { %v4063_v22 = vor.u32 %v5861_v20, %v4062_v19  ;;  %4084 = vmatmul.msk.bf16.vlgmr.msra.gmra.mxu1 %vm215_vm0, %v6599_v12  ;;  %v4067_v25 = vor.u32 %v5856_v23, %v4064_v24  ;;  %v4078_v26 = vld [vmem:[#allocation5 + $0x20] sm:$0xf]  ;;  %v5863_v27 = vld [vmem:[#allocation5 + $0x44] sm:$0xf0]  ;;  %v5858_v29 = vld [vmem:[#allocation5 + $0x24] sm:$0xf] }
  0x27   :  { %239 = vmatpush.bf16.msrb.mxu1 %v4051_v13  ;;  %4086 = vmatmul.msk.bf16.vlgmr.msra.gmra.mxu2 %vm215_vm0, %v6599_v12  ;;  %v4079_v28 = vor.u32 %v5863_v27, %v4078_v26  ;;  %v4080_v30 = vld [vmem:[#allocation5 + $0x48] sm:$0xf0]  ;;  %v4236_v32 = vld [vmem:[#allocation8 + $0x118] sm:$0xf]  ;;  %v5901_v33 = vld [vmem:[#allocation8 + $0x128] sm:$0xf0] }
  0x28   :  { %304 = vmatpush.bf16.msrb.mxu2 %v4071_v17  ;;  %4087 = vmatmul.msk.bf16.vlgmr.msra.gmra.mxu3 %vm215_vm0, %v6599_v12  ;;  %v4083_v31 = vor.u32 %v5858_v29, %v4080_v30  ;;  %v4216_v34 = vld [vmem:[#allocation8 + $0xf0] sm:$0xf]  ;;  %v4237_v35 = vor.u32 %v5901_v33, %v4236_v32  ;;  %v5896_v36 = vld [vmem:[#allocation8 + $0x100] sm:$0xf0]  ;;  %v4556_v37 = vld [vmem:[#allocation8 + $0x398] sm:$0xf] }
  0x29   :  { %317 = vmatpush.bf16.msrb.mxu3 %v4075_v21  ;;  %278 = vmatpush.bf16.msra.mxu0 %v4063_v22  ;;  %v5981_v38 = vld [vmem:[#allocation8 + $0x3a8] sm:$0xf0]  ;;  %v4217_v40 = vor.u32 %v5896_v36, %v4216_v34  ;;  %v4536_v41 = vld [vmem:[#allocation8 + $0x370] sm:$0xf]  ;;  %v5976_v42 = vld [vmem:[#allocation8 + $0x380] sm:$0xf0] }
  0x2a   :  { %v4557_v39 = vor.u32 %v5981_v38, %v4556_v37  ;;  %v4196_v43 = vld [vmem:[#allocation8 + $0xc8] sm:$0xf]  ;;  %v5891_v44 = vld [vmem:[#allocation8 + $0xd8] sm:$0xf0]  ;;  %v4537_v45 = vor.u32 %v5976_v42, %v4536_v41  ;;  %v4396_v49 = vld [vmem:[#allocation8 + $0x258] sm:$0xf] }
  0x2b   :  { %291 = vmatpush.bf16.msra.mxu1 %v4067_v25  ;;  %v4516_v46 = vld [vmem:[#allocation8 + $0x348] sm:$0xf]  ;;  %v5971_v47 = vld [vmem:[#allocation8 + $0x358] sm:$0xf0]  ;;  %v4197_v48 = vor.u32 %v5891_v44, %v4196_v43  ;;  %v5941_v50 = vld [vmem:[#allocation8 + $0x268] sm:$0xf0] }
  0x2c   :  { %4088 = vmatmul.msk.bf16.vlgmr.msra.gmra.mxu0 %vm215_vm0, %v6599_v12  ;;  %2961 = vmatpush.bf16.msra.mxu2 %v4237_v35  ;;  %v4176_v51 = vld [vmem:[#allocation8 + $0xa0] sm:$0xf]  ;;  %v5886_v52 = vld [vmem:[#allocation8 + $0xb0] sm:$0xf0]  ;;  %v4517_v53 = vor.u32 %v5971_v47, %v4516_v46  ;;  %v4397_v54 = vor.u32 %v5941_v50, %v4396_v49  ;;  %v4716_v55 = vld [vmem:[#allocation8 + $0x4d8] sm:$0xf] }
  0x2d   :  { %330 = vmatpush.bf16.msrb.mxu0 %v4079_v28  ;;  %v4496_v56 = vld [vmem:[#allocation8 + $0x320] sm:$0xf]  ;;  %v5966_v57 = vld [vmem:[#allocation8 + $0x330] sm:$0xf0]  ;;  %v6021_v58 = vld [vmem:[#allocation8 + $0x4e8] sm:$0xf0]  ;;  %v4177_v61 = vor.u32 %v5886_v52, %v4176_v51 }
  0x2e   :  { %2974 = vmatpush.bf16.msra.mxu3 %v4397_v54  ;;  %v4376_v59 = vld [vmem:[#allocation8 + $0x230] sm:$0xf]  ;;  %v5936_v60 = vld [vmem:[#allocation8 + $0x240] sm:$0xf0]  ;;  %v4156_v63 = vld [vmem:[#allocation8 + $0x78] sm:$0xf]  ;;  %v4497_v1 = vor.u32 %v5966_v57, %v4496_v56  ;;  %v4717_v3 = vor.u32 %v6021_v58, %v4716_v55 }
  0x2f   :  { %v4377_v62 = vor.u32 %v5936_v60, %v4376_v59  ;;  %v5881_v0 = vld [vmem:[#allocation8 + $0x88] sm:$0xf0]  ;;  %v4356_v2 = vld [vmem:[#allocation8 + $0x208] sm:$0xf]  ;;  %v4476_v4 = vld [vmem:[#allocation8 + $0x2f8] sm:$0xf] }
  0x30   :  { %2962 = vmatpush.bf16.msra.mxu2 %v4217_v40  ;;  %v5961_v5 = vld [vmem:[#allocation8 + $0x308] sm:$0xf0]  ;;  %v5931_v6 = vld [vmem:[#allocation8 + $0x218] sm:$0xf0]  ;;  %v4696_v7 = vld [vmem:[#allocation8 + $0x4b0] sm:$0xf]  ;;  %v4157_v10 = vor.u32 %v5881_v0, %v4156_v63 }
  0x31   :  { %2987 = vmatpush.bf16.msra.mxu0 %v4557_v39  ;;  %v6016_v8 = vld [vmem:[#allocation8 + $0x4c0] sm:$0xf0]  ;;  %v4357_v9 = vor.u32 %v5931_v6, %v4356_v2  ;;  %v4336_v11 = vld [vmem:[#allocation8 + $0x1e0] sm:$0xf]  ;;  %v5926_v13 = vld [vmem:[#allocation8 + $0x1f0] sm:$0xf0]  ;;  %v4477_v16 = vor.u32 %v5961_v5, %v4476_v4 }
  0x32   :  { %2975 = vmatpush.bf16.msra.mxu3 %v4377_v62  ;;  %v4136_v14 = vld [vmem:[#allocation8 + $0x50] sm:$0xf]  ;;  %v5876_v15 = vld [vmem:[#allocation8 + $0x60] sm:$0xf0]  ;;  %v4697_v17 = vor.u32 %v6016_v8, %v4696_v7  ;;  %v4676_v20 = vld [vmem:[#allocation8 + $0x488] sm:$0xf]  ;;  %v4337_v22 = vor.u32 %v5926_v13, %v4336_v11 }
  0x33   :  { %v4456_v18 = vld [vmem:[#allocation8 + $0x2d0] sm:$0xf]  ;;  %v5956_v19 = vld [vmem:[#allocation8 + $0x2e0] sm:$0xf0]  ;;  %v6011_v21 = vld [vmem:[#allocation8 + $0x498] sm:$0xf0]  ;;  %v4137_v23 = vor.u32 %v5876_v15, %v4136_v14 }
  0x34   :  { %2963 = vmatpush.bf16.msra.mxu2 %v4197_v48  ;;  %v4316_v24 = vld [vmem:[#allocation8 + $0x1b8] sm:$0xf]  ;;  %v5921_v25 = vld [vmem:[#allocation8 + $0x1c8] sm:$0xf0]  ;;  %v4116_v26 = vld [vmem:[#allocation8 + $0x28] sm:$0xf]  ;;  %v4457_v28 = vor.u32 %v5956_v19, %v4456_v18  ;;  %v4677_v29 = vor.u32 %v6011_v21, %v4676_v20 }
  0x35   :  { %2988 = vmatpush.bf16.msra.mxu0 %v4537_v45  ;;  %v5871_v27 = vld [vmem:[#allocation8 + $0x38] sm:$0xf0]  ;;  %v4436_v30 = vld [vmem:[#allocation8 + $0x2a8] sm:$0xf]  ;;  %v4656_v32 = vld [vmem:[#allocation8 + $0x460] sm:$0xf]  ;;  %v4317_v34 = vor.u32 %v5921_v25, %v4316_v24 }
  0x36   :  { %4085 = vmatmul.msk.bf16.vlgmr.msrb.gmra.mxu1 %vm215_vm0, %v6599_v12  ;;  %2976 = vmatpush.bf16.msra.mxu3 %v4357_v9  ;;  %v6006_v33 = vld [vmem:[#allocation8 + $0x470] sm:$0xf0]  ;;  %v4117_v35 = vor.u32 %v5871_v27, %v4116_v26  ;;  %v4296_v36 = vld [vmem:[#allocation8 + $0x190] sm:$0xf]  ;;  %v5916_v37 = vld [vmem:[#allocation8 + $0x1a0] sm:$0xf0] }
  0x37   :  { %4090 = vmatmul.msk.bf16.vlgmr.msrb.gmra.mxu2 %vm215_vm0, %v6599_v12  ;;  %343 = vmatpush.bf16.msrb.mxu1 %v4083_v31  ;;  %v5951_v31 = vld [vmem:[#allocation8 + $0x2b8] sm:$0xf0]  ;;  %v4636_v38 = vld [vmem:[#allocation8 + $0x438] sm:$0xf]  ;;  %v4096_v39 = vld [vmem:[#allocation8] sm:$0xf]  ;;  %v4657_v42 = vor.u32 %v6006_v33, %v4656_v32  ;;  %v4297_v49 = vor.u32 %v5916_v37, %v4296_v36 }
  0x38   :  { %4091 = vmatmul.msk.bf16.vlgmr.msrb.gmra.mxu3 %vm215_vm0, %v6599_v12  ;;  %2964 = vmatpush.bf16.msra.mxu2 %v4177_v61  ;;  %v5866_v40 = vld [vmem:[#allocation8 + $0x10] sm:$0xf0]  ;;  %v4437_v41 = vor.u32 %v5951_v31, %v4436_v30  ;;  %v6001_v43 = vld [vmem:[#allocation8 + $0x448] sm:$0xf0]  ;;  %v4876_v44 = vld [vmem:[#allocation8 + $0x618] sm:$0xf] }
  0x39   :  { %2989 = vmatpush.bf16.msra.mxu0 %v4517_v53  ;;  %v6061_v45 = vld [vmem:[#allocation8 + $0x628] sm:$0xf0]  ;;  %v4416_v46 = vld [vmem:[#allocation8 + $0x280] sm:$0xf]  ;;  %v5946_v47 = vld [vmem:[#allocation8 + $0x290] sm:$0xf0]  ;;  %v4097_v50 = vor.u32 %v5866_v40, %v4096_v39  ;;  %v4637_v55 = vor.u32 %v6001_v43, %v4636_v38 }
  0x3a   :  { %2977 = vmatpush.bf16.msra.mxu3 %v4337_v22  ;;  %v5196_v48 = vld [vmem:[#allocation8 + $0x898] sm:$0xf]  ;;  %v6141_v51 = vld [vmem:[#allocation8 + $0x8a8] sm:$0xf0]  ;;  %v4276_v52 = vld [vmem:[#allocation8 + $0x168] sm:$0xf]  ;;  %v4877_v54 = vor.u32 %v6061_v45, %v4876_v44  ;;  %v4417_v58 = vor.u32 %v5946_v47, %v4416_v46 }
  0x3b   :  { %v5911_v53 = vld [vmem:[#allocation8 + $0x178] sm:$0xf0]  ;;  %v4856_v56 = vld [vmem:[#allocation8 + $0x5f0] sm:$0xf]  ;;  %v6056_v57 = vld [vmem:[#allocation8 + $0x600] sm:$0xf0]  ;;  %v5197_v61 = vor.u32 %v6141_v51, %v5196_v48 }
  0x3c   :  { %4092 = vmatmul.msk.bf16.vlgmr.msrb.gmra.mxu0 %vm215_vm0, %v6599_v12  ;;  %2965 = vmatpush.bf16.msra.mxu2 %v4157_v10  ;;  %v4616_v59 = vld [vmem:[#allocation8 + $0x410] sm:$0xf]  ;;  %v5996_v60 = vld [vmem:[#allocation8 + $0x420] sm:$0xf0]  ;;  %v4277_v63 = vor.u32 %v5911_v53, %v4276_v52  ;;  %v5906_v2 = vld [vmem:[#allocation8 + $0x150] sm:$0xf0] }
  0x3d   :  { %2990 = vmatpush.bf16.msra.mxu0 %v4497_v1  ;;  %v5176_v62 = vld [vmem:[#allocation8 + $0x870] sm:$0xf]  ;;  %v6136_v0 = vld [vmem:[#allocation8 + $0x880] sm:$0xf0]  ;;  %v4256_v1 = vld [vmem:[#allocation8 + $0x140] sm:$0xf]  ;;  %v4617_v6 = vor.u32 %v5996_v60, %v4616_v59 }
  0x3e   :  { %2978 = vmatpush.bf16.msra.mxu3 %v4317_v34  ;;  %v5036_v4 = vld [vmem:[#allocation8 + $0x758] sm:$0xf]  ;;  %v6101_v5 = vld [vmem:[#allocation8 + $0x768] sm:$0xf0]  ;;  %v4836_v7 = vld [vmem:[#allocation8 + $0x5c8] sm:$0xf]  ;;  %v5177_v11 = vor.u32 %v6136_v0, %v5176_v62  ;;  %v4257_v13 = vor.u32 %v5906_v2, %v4256_v1 }
  0x3f   :  { %v6051_v8 = vld [vmem:[#allocation8 + $0x5d8] sm:$0xf0]  ;;  %v4596_v9 = vld [vmem:[#allocation8 + $0x3e8] sm:$0xf]  ;;  %v6096_v18 = vld [vmem:[#allocation8 + $0x740] sm:$0xf0] }
  0x40   :  { %2966 = vmatpush.bf16.msra.mxu2 %v4137_v23  ;;  %v5991_v10 = vld [vmem:[#allocation8 + $0x3f8] sm:$0xf0]  ;;  %v5156_v14 = vld [vmem:[#allocation8 + $0x848] sm:$0xf]  ;;  %v4816_v20 = vld [vmem:[#allocation8 + $0x5a0] sm:$0xf] }
  0x41   :  { %2991 = vmatpush.bf16.msra.mxu0 %v4477_v16  ;;  %v6131_v15 = vld [vmem:[#allocation8 + $0x858] sm:$0xf0]  ;;  %v5037_v16 = vor.u32 %v6101_v5, %v5036_v4  ;;  %v4597_v19 = vor.u32 %v5991_v10, %v4596_v9  ;;  %v6046_v21 = vld [vmem:[#allocation8 + $0x5b0] sm:$0xf0]  ;;  %v4576_v22 = vld [vmem:[#allocation8 + $0x3c0] sm:$0xf] }
  0x42   :  { %2979 = vmatpush.bf16.msra.mxu3 %v4297_v49  ;;  %v5986_v23 = vld [vmem:[#allocation8 + $0x3d0] sm:$0xf0]  ;;  %v5356_v24 = vld [vmem:[#allocation8 + $0x9d8] sm:$0xf]  ;;  %v5157_v25 = vor.u32 %v6131_v15, %v5156_v14  ;;  %v6181_v26 = vld [vmem:[#allocation8 + $0x9e8] sm:$0xf0]  ;;  %v4817_v30 = vor.u32 %v6046_v21, %v4816_v20 }
  0x43   :  { %v5136_v27 = vld [vmem:[#allocation8 + $0x820] sm:$0xf]  ;;  %v4577_v31 = vor.u32 %v5986_v23, %v4576_v22  ;;  %v4796_v32 = vld [vmem:[#allocation8 + $0x578] sm:$0xf]  ;;  %v6041_v33 = vld [vmem:[#allocation8 + $0x588] sm:$0xf0]  ;;  %v5357_v34 = vor.u32 %v6181_v26, %v5356_v24 }
  0x44   :  { %2967 = vmatpush.bf16.msra.mxu2 %v4117_v35  ;;  %v5336_v36 = vld [vmem:[#allocation8 + $0x9b0] sm:$0xf]  ;;  %v6176_v37 = vld [vmem:[#allocation8 + $0x9c0] sm:$0xf0]  ;;  %v4797_v38 = vor.u32 %v6041_v33, %v4796_v32  ;;  %v6171_v43 = vld [vmem:[#allocation8 + $0x998] sm:$0xf0] }
  0x45   :  { %2992 = vmatpush.bf16.msra.mxu0 %v4457_v28  ;;  %v6126_v28 = vld [vmem:[#allocation8 + $0x830] sm:$0xf0]  ;;  %v4776_v39 = vld [vmem:[#allocation8 + $0x550] sm:$0xf]  ;;  %v6036_v40 = vld [vmem:[#allocation8 + $0x560] sm:$0xf0] }
  0x46   :  { %4089 = vmatmul.msk.bf16.vlgmr.msra.gmra.mxu1 %vm215_vm0, %v6599_v12  ;;  %2980 = vmatpush.bf16.msra.mxu3 %v4277_v63  ;;  %v5137_v35 = vor.u32 %v6126_v28, %v5136_v27  ;;  %v4777_v44 = vor.u32 %v6036_v40, %v4776_v39  ;;  %v5296_v46 = vld [vmem:[#allocation8 + $0x960] sm:$0xf]  ;;  %v6166_v47 = vld [vmem:[#allocation8 + $0x970] sm:$0xf0]  ;;  %v5116_v49 = vld [vmem:[#allocation8 + $0x7f8] sm:$0xf] }
  0x47   :  { %3000 = vmatpush.bf16.msra.mxu1 %v4717_v3  ;;  %v4857_v3 = vor.u32 %v6056_v57, %v4856_v56  ;;  %v5297_v48 = vor.u32 %v6166_v47, %v5296_v46  ;;  %v5276_v51 = vld [vmem:[#allocation8 + $0x938] sm:$0xf]  ;;  %v6161_v53 = vld [vmem:[#allocation8 + $0x948] sm:$0xf0]  ;;  %v6031_v56 = vld [vmem:[#allocation8 + $0x538] sm:$0xf0] }
  0x48   :  { %2968 = vmatpush.bf16.msra.mxu2 %v4097_v50  ;;  %v6121_v50 = vld [vmem:[#allocation8 + $0x808] sm:$0xf0]  ;;  %v4996_v57 = vld [vmem:[#allocation8 + $0x708] sm:$0xf]  ;;  %v6091_v59 = vld [vmem:[#allocation8 + $0x718] sm:$0xf0] }
  0x49   :  { %2993 = vmatpush.bf16.msra.mxu0 %v4437_v41  ;;  %v5337_v41 = vor.u32 %v6176_v37, %v5336_v36  ;;  %v5117_v52 = vor.u32 %v6121_v50, %v5116_v49  ;;  %v4997_v60 = vor.u32 %v6091_v59, %v4996_v57  ;;  %v6116_v62 = vld [vmem:[#allocation8 + $0x7e0] sm:$0xf0]  ;;  %v5256_v63 = vld [vmem:[#allocation8 + $0x910] sm:$0xf]  ;;  %v6026_v4 = vld [vmem:[#allocation8 + $0x510] sm:$0xf0] }
  0x4a   :  { %2981 = vmatpush.bf16.msra.mxu3 %v4257_v13  ;;  %v6156_v1 = vld [vmem:[#allocation8 + $0x920] sm:$0xf0]  ;;  %v4976_v5 = vld [vmem:[#allocation8 + $0x6e0] sm:$0xf]  ;;  %v5076_v9 = vld [vmem:[#allocation8 + $0x7a8] sm:$0xf] }
  0x4b   :  { %3001 = vmatpush.bf16.msra.mxu1 %v4697_v17  ;;  %v5016_v17 = vld [vmem:[#allocation8 + $0x730] sm:$0xf]  ;;  %v5257_v2 = vor.u32 %v6156_v1, %v5256_v63  ;;  %v6111_v10 = vld [vmem:[#allocation8 + $0x7b8] sm:$0xf0]  ;;  %v5236_v13 = vld [vmem:[#allocation8 + $0x8e8] sm:$0xf] }
  0x4c   :  { %3013 = vmatpush.bf16.msrb.mxu2 %v4877_v54  ;;  %v5277_v54 = vor.u32 %v6161_v53, %v5276_v51  ;;  %v6151_v14 = vld [vmem:[#allocation8 + $0x8f8] sm:$0xf0]  ;;  %v5216_v20 = vld [vmem:[#allocation8 + $0x8c0] sm:$0xf]  ;;  %v6146_v22 = vld [vmem:[#allocation8 + $0x8d0] sm:$0xf0] }
  0x4d   :  { %2994 = vmatpush.bf16.msra.mxu0 %v4417_v58  ;;  %v5237_v15 = vor.u32 %v6151_v14, %v5236_v13  ;;  %v5217_v23 = vor.u32 %v6146_v22, %v5216_v20  ;;  %v4936_v24 = vld [vmem:[#allocation8 + $0x690] sm:$0xf]  ;;  %v4916_v27 = vld [vmem:[#allocation8 + $0x668] sm:$0xf]  ;;  %v6071_v28 = vld [vmem:[#allocation8 + $0x678] sm:$0xf0] }
  0x4e   :  { %3026 = vmatpush.bf16.msrb.mxu3 %v5037_v16  ;;  %v4956_v16 = vld [vmem:[#allocation8 + $0x6b8] sm:$0xf]  ;;  %v5496_v46 = vld [vmem:[#allocation8 + $0xaf0] sm:$0xf]  ;;  %v6216_v47 = vld [vmem:[#allocation8 + $0xb00] sm:$0xf0] }
  0x4f   :  { %3002 = vmatpush.bf16.msra.mxu1 %v4677_v29  ;;  %v5017_v29 = vor.u32 %v6096_v18, %v5016_v17  ;;  %v5056_v18 = vld [vmem:[#allocation8 + $0x780] sm:$0xf]  ;;  %v6621_v33 = vld [vmem:[#allocation7] sm:$0xff]  ;;  %v5497_v57 = vor.u32 %v6216_v47, %v5496_v46  ;;  %v5476_v59 = vld [vmem:[#allocation8 + $0xac8] sm:$0xf]  ;;  %s6537_s4 = smov [#allocation14]  }
  0x50   :  { %3014 = vmatpush.bf16.msrb.mxu2 %v4857_v3  ;;  %v4736_v3 = vld [vmem:[#allocation8 + $0x500] sm:$0xf]  ;;  %v5516_v37 = vld [vmem:[#allocation8 + $0xb18] sm:$0xf]  ;;  %v147_v40 = vperm.slane %v6621_v33, 2  ;;  %v149_v50 = vperm.slane %v6621_v33, 4 }
  0x51   :  { %3039 = vmatpush.bf16.msrb.mxu0 %v5197_v61  ;;  %v5096_v61 = vld [vmem:[#allocation8 + $0x7d0] sm:$0xf]  ;;  %v5456_v14 = vld [vmem:[#allocation8 + $0xaa0] sm:$0xf]  ;;  %v6639_v46 = vld [vmem:[#allocation7 + $0x8] sm:$0x3] }
  0x52   :  { %3027 = vmatpush.bf16.msrb.mxu3 %v5017_v29  ;;  %v5097_v0 = vor.u32 %v6116_v62, %v5096_v61  ;;  %v4917_v29 = vor.u32 %v6071_v28, %v4916_v27  ;;  %v4198_v22 = vld [vmem:[#allocation8 + $0xdc] sm:$0xf0]  ;;  %v5436_v28 = vld [vmem:[#allocation8 + $0xa78] sm:$0xf]  ;;  %s4029_s6 = sshll.u32 %s6537_s4, 4  ;;  %s4031_s15 = sshll.u32 %s6803_s7, 4  ;;  %s4030_s6 = int_to_ptr.vmem [resolvable:$true] %s4029_s6  ;;  %s4032_s15 = int_to_ptr.hbm [resolvable:$true] %s4031_s15 }
  0x53   :  { %3003 = vmatpush.bf16.msra.mxu1 %v4657_v42  ;;  %v5316_v42 = vld [vmem:[#allocation8 + $0x988] sm:$0xf]  ;;  %v4358_v27 = vld [vmem:[#allocation8 + $0x21c] sm:$0xf0] }
  0x54   :  { %v5317_v45 = vor.u32 %v6171_v43, %v5316_v42 }
  0x55   :  { %3040 = vmatpush.bf16.msrb.mxu0 %v5177_v11  ;;  %v5077_v11 = vor.u32 %v6111_v10, %v5076_v9  ;;  %v4218_v9 = vld [vmem:[#allocation8 + $0x104] sm:$0xf0]  ;;  %v5934_v10 = vld [vmem:[#allocation8 + $0x234] sm:$0xf] }
  0x56   :  { %4093 = vmatmul.msk.bf16.vlgmr.msrb.gmra.mxu1 %vm215_vm0, %v6599_v12  ;;  %v4837_v12 = vor.u32 %v6051_v8, %v4836_v7  ;;  %3028 = vmatpush.bf16.msrb.mxu3 %v4997_v60  ;;  %v6086_v7 = vld [vmem:[#allocation8 + $0x6f0] sm:$0xf0]  ;;  %v6211_v60 = vld [vmem:[#allocation8 + $0xad8] sm:$0xf0] }
  0x57   :  { %3004 = vmatpush.bf16.msra.mxu1 %v4637_v55  ;;  %v4756_v55 = vld [vmem:[#allocation8 + $0x528] sm:$0xf]  ;;  %v4977_v8 = vor.u32 %v6086_v7, %v4976_v5  ;;  %v5894_v5 = vld [vmem:[#allocation8 + $0xf4] sm:$0xf] }
  0x58   :  { %3015 = vmatpush.bf16.msrb.mxu2 %v4837_v12  ;;  %v4757_v58 = vor.u32 %v6031_v56, %v4756_v55  ;;  %v6081_v12 = vld [vmem:[#allocation8 + $0x6c8] sm:$0xf0]  ;;  %v4238_v55 = vld [vmem:[#allocation8 + $0x12c] sm:$0xf0]  ;;  %v5939_v56 = vld [vmem:[#allocation8 + $0x25c] sm:$0xf] }
  0x59   :  { %3041 = vmatpush.bf16.msrb.mxu0 %v5157_v25  ;;  %v4957_v17 = vor.u32 %v6081_v12, %v4956_v16  ;;  %v6076_v25 = vld [vmem:[#allocation8 + $0x6a0] sm:$0xf0] }
  0x5a   :  { %3029 = vmatpush.bf16.msrb.mxu3 %v4977_v8  ;;  %v4937_v26 = vor.u32 %v6076_v25, %v4936_v24  ;;  %v5477_v8 = vor.u32 %v6211_v60, %v5476_v59  ;;  %v151_v25 = vperm.slane %v6621_v33, 6 }
  0x5b   :  { %3005 = vmatpush.bf16.msra.mxu1 %v4617_v6  ;;  %v4737_v6 = vor.u32 %v6026_v4, %v4736_v3  ;;  %v146_v4 = vperm.slane %v6621_v33, 1 }
  0x5c   :  { %3016 = vmatpush.bf16.msrb.mxu2 %v4817_v30  ;;  %v4896_v30 = vld [vmem:[#allocation8 + $0x640] sm:$0xf] }
  0x5d   :  { %3042 = vmatpush.bf16.msrb.mxu0 %v5137_v35 }
  0x5e   :  { %3030 = vmatpush.bf16.msrb.mxu3 %v4957_v17 }
  0x5f   :  { %3006 = vmatpush.bf16.msra.mxu1 %v4597_v19  ;;  %v6106_v19 = vld [vmem:[#allocation8 + $0x790] sm:$0xf0] }
  0x60   :  { %3017 = vmatpush.bf16.msrb.mxu2 %v4797_v38  ;;  %v5057_v21 = vor.u32 %v6106_v19, %v5056_v18  ;;  %v6221_v38 = vld [vmem:[#allocation8 + $0xb28] sm:$0xf0]  ;;  %v4221_v19 = vor.u32 %v5894_v5, %v4218_v9  ;;  %v6191_v5 = vld [vmem:[#allocation8 + $0xa38] sm:$0xf0] }
  0x61   :  { %3043 = vmatpush.bf16.msrb.mxu0 %v5117_v52  ;;  %v5517_v43 = vor.u32 %v6221_v38, %v5516_v37  ;;  %v5884_v38 = vld [vmem:[#allocation8 + $0xa4] sm:$0xf] }
  0x62   :  { %3031 = vmatpush.bf16.msrb.mxu3 %v4937_v26  ;;  %v5929_v26 = vld [vmem:[#allocation8 + $0x20c] sm:$0xf] }
  0x63   :  { %3007 = vmatpush.bf16.msra.mxu1 %v4577_v31  ;;  %v6066_v31 = vld [vmem:[#allocation8 + $0x650] sm:$0xf0]  ;;  %v4361_v37 = vor.u32 %v5929_v26, %v4358_v27  ;;  %v5376_v27 = vld [vmem:[#allocation8 + $0xa00] sm:$0xf] }
  0x64   :  { %3018 = vmatpush.bf16.msrb.mxu2 %v4777_v44  ;;  %v4897_v32 = vor.u32 %v6066_v31, %v4896_v30  ;;  %v5676_v30 = vld [vmem:[#allocation8 + $0xc58] sm:$0xf] }
  0x65   :  { %3044 = vmatpush.bf16.msrb.mxu0 %v5097_v0 }
  0x66   :  { %3032 = vmatpush.bf16.msrb.mxu3 %v4917_v29  ;;  %v6201_v29 = vld [vmem:[#allocation8 + $0xa88] sm:$0xf0] }
  0x67   :  { %3052 = vmatpush.bf16.msrb.mxu1 %v5357_v34  ;;  %v145_v34 = vperm.slane %v6621_v33, 0 }
  0x68   :  { %3019 = vmatpush.bf16.msrb.mxu2 %v4757_v58  ;;  %v4398_v58 = vld [vmem:[#allocation8 + $0x26c] sm:$0xf0] }
  0x69   :  { %3045 = vmatpush.bf16.msrb.mxu0 %v5077_v11  ;;  %v4401_v3 = vor.u32 %v5939_v56, %v4398_v58  ;;  %v4378_v11 = vld [vmem:[#allocation8 + $0x244] sm:$0xf0]  ;;  %v4158_v58 = vld [vmem:[#allocation8 + $0x8c] sm:$0xf0] }
  0x6a   :  { %3033 = vmatpush.bf16.msrb.mxu3 %v4897_v32  ;;  %v4381_v20 = vor.u32 %v5934_v10, %v4378_v11 }
  0x6b   :  { %3053 = vmatpush.bf16.msrb.mxu1 %v5337_v41  ;;  %v148_v41 = vperm.slane %v6621_v33, 3 }
  0x6c   :  { %3020 = vmatpush.bf16.msrb.mxu2 %v4737_v6 }
  0x6d   :  { %3046 = vmatpush.bf16.msrb.mxu0 %v5057_v21  ;;  %v5889_v21 = vld [vmem:[#allocation8 + $0xcc] sm:$0xf] }
  0x6f   :  { %3054 = vmatpush.bf16.msrb.mxu1 %v5317_v45 }
  0x73   :  { %3055 = vmatpush.bf16.msrb.mxu1 %v5297_v48 }
  0x77   :  { %3056 = vmatpush.bf16.msrb.mxu1 %v5277_v54  ;;  %v5899_v54 = vld [vmem:[#allocation8 + $0x11c] sm:$0xf] }
  0x78   :  { %v4241_v63 = vor.u32 %v5899_v54, %v4238_v55 }
  0x7b   :  { %3057 = vmatpush.bf16.msrb.mxu1 %v5257_v2 }
  0x7f   :  { %3058 = vmatpush.bf16.msrb.mxu1 %v5237_v15  ;;  %v6206_v15 = vld [vmem:[#allocation8 + $0xab0] sm:$0xf0] }
  0x80   :  { %v5457_v24 = vor.u32 %v6206_v15, %v5456_v14  ;;  %v6251_v14 = vld [vmem:[#allocation8 + $0xc18] sm:$0xf0] }
  0x83   :  { %3059 = vmatpush.bf16.msrb.mxu1 %v5217_v23 }
  0xa3   :  { %v228_v35 = vpop.f32.mrf.mxu1 }
  0xa4   :  { %v229_v36 = vadd.f32 %v228_v35, %v145_v34  ;;  %v152_v34 = vperm.slane %v6621_v33, 7  ;;  %v6261_v35 = vld [vmem:[#allocation8 + $0xc68] sm:$0xf0] }
  0xa6   :  { %vm349_vm1 = vcmp.ge.f32.partialorder %v229_v36, 0.0  ;;  %v359_v39 = vmul.f32 0.01, %v229_v36 }
  0xa8   :  { %v369_v42 = vsel %vm349_vm1, %v229_v36, %v359_v39  ;;  %v4201_v36 = vor.u32 %v5889_v21, %v4198_v22  ;;  %v4178_v39 = vld [vmem:[#allocation8 + $0xb4] sm:$0xf0]  ;;  %v4138_v22 = vld [vmem:[#allocation8 + $0x64] sm:$0xf0] }
  0xa9   :  { %v280_v44 = vpop.f32.mrf.mxu0  ;;  %v6626_v45 = vpack.c.bf16 %v369_v42, %v369_v42  ;;  %v5437_v42 = vor.u32 %v6201_v29, %v5436_v28  ;;  %v4181_v56 = vor.u32 %v5884_v38, %v4178_v39  ;;  %v6186_v28 = vld [vmem:[#allocation8 + $0xa10] sm:$0xf0]  ;;  %v5616_v29 = vld [vmem:[#allocation8 + $0xbe0] sm:$0xf]  ;;  %v5869_v39 = vld [vmem:[#allocation8 + $0x2c] sm:$0xf] }
  0xaa   :  { %v254_v48 = vpop.f32.mrf.mxu2  ;;  %v281_v0 = vadd.f32 %v280_v44, %v149_v50  ;;  %v5416_v44 = vld [vmem:[#allocation8 + $0xa50] sm:$0xf]  ;;  %v5677_v50 = vor.u32 %v6261_v35, %v5676_v30  ;;  %v5979_v30 = vld [vmem:[#allocation8 + $0x39c] sm:$0xf] }
  0xab   :  { %v267_v49 = vpop.f32.mrf.mxu3  ;;  %v255_v51 = vadd.f32 %v254_v48, %v147_v40  ;;  %v230_v53 = vpop.f32.mrf.mxu1  ;;  %2969 = vmatmul.bf16.vlgmr.msra.gmra.mxu2 %v6626_v45  ;;  %v5924_v40 = vld [vmem:[#allocation8 + $0x1e4] sm:$0xf] }
  0xac   :  { %v268_v52 = vadd.f32 %v267_v49, %v148_v41  ;;  %3065 = vmatpush.bf16.msra.mxu2 %v5517_v43  ;;  %v363_v17 = vmul.f32 0.01, %v281_v0  ;;  %vm353_vm4 = vcmp.ge.f32.partialorder %v281_v0, 0.0  ;;  %v4338_v43 = vld [vmem:[#allocation8 + $0x1f4] sm:$0xf0] }
  0xad   :  { %vm351_vm2 = vcmp.ge.f32.partialorder %v255_v51, 0.0  ;;  %v361_v61 = vmul.f32 0.01, %v255_v51  ;;  %v6256_v53 = vld [vmem:[#allocation8 + $0xc40] sm:$0xf0] }
  0xae   :  { %vm352_vm3 = vcmp.ge.f32.partialorder %v268_v52, 0.0  ;;  %v362_v62 = vmul.f32 0.01, %v268_v52  ;;  %v373_v32 = vsel %vm353_vm4, %v281_v0, %v363_v17  ;;  %v4318_v0 = vld [vmem:[#allocation8 + $0x1cc] sm:$0xf0] }
  0xaf   :  { %v371_v1 = vsel %vm351_vm2, %v255_v51, %v361_v61  ;;  %v6643_v49 = vpack.c.bf16 %v373_v32, %v373_v32  ;;  %v6196_v51 = vld [vmem:[#allocation8 + $0xa60] sm:$0xf0]  ;;  %v5874_v17 = vld [vmem:[#allocation8 + $0x54] sm:$0xf] }
  0xb0   :  { %v372_v2 = vsel %vm352_vm3, %v268_v52, %v362_v62  ;;  %v6631_v6 = vpack.c.bf16 %v371_v1, %v371_v1  ;;  %3066 = vmatpush.bf16.msra.mxu2 %v5497_v57  ;;  %v5656_v52 = vld [vmem:[#allocation8 + $0xc30] sm:$0xf]  ;;  %v5879_v57 = vld [vmem:[#allocation8 + $0x7c] sm:$0xf]  ;;  %v4341_v62 = vor.u32 %v5924_v40, %v4338_v43  ;;  %v153_v1 = vperm.slane %v6639_v46, 0 }
  0xb1   :  { %v6633_v7 = vpack.c.bf16 %v372_v2, %v372_v2  ;;  %v282_v13 = vpop.f32.mrf.mxu0  ;;  %v5417_v2 = vor.u32 %v6196_v51, %v5416_v44  ;;  %v4161_v10 = vor.u32 %v5879_v57, %v4158_v58  ;;  %v4118_v40 = vld [vmem:[#allocation8 + $0x3c] sm:$0xf0]  ;;  %v5909_v43 = vld [vmem:[#allocation8 + $0x16c] sm:$0xf]  ;;  %v5596_v51 = vld [vmem:[#allocation8 + $0xbb8] sm:$0xf] }
  0xb2   :  { %v256_v16 = vpop.f32.mrf.mxu2  ;;  %2995 = vmatmul.bf16.vlgmr.msra.gmra.mxu0 %v6631_v6  ;;  %v5636_v13 = vld [vmem:[#allocation8 + $0xc08] sm:$0xf]  ;;  %v4278_v44 = vld [vmem:[#allocation8 + $0x17c] sm:$0xf0]  ;;  %v4121_v57 = vor.u32 %v5869_v39, %v4118_v40 }
  0xb3   :  { %v269_v12 = vpop.f32.mrf.mxu3  ;;  %3008 = vmatmul.bf16.vlgmr.msra.gmra.mxu1 %v6633_v7  ;;  %3091 = vmatpush.bf16.msra.mxu0 %v4241_v63  ;;  %v241_v18 = vpop.f32.mrf.mxu1  ;;  %v5919_v63 = vld [vmem:[#allocation8 + $0x1bc] sm:$0xf]  ;;  %v5637_v26 = vor.u32 %v6251_v14, %v5636_v13  ;;  %v4281_v58 = vor.u32 %v5909_v43, %v4278_v44  ;;  %v5969_v13 = vld [vmem:[#allocation8 + $0x34c] sm:$0xf]  ;;  %v4518_v14 = vld [vmem:[#allocation8 + $0x35c] sm:$0xf0] }
  0xb4   :  { %3104 = vmatpush.bf16.msra.mxu1 %v4401_v3  ;;  %v242_v23 = vadd.f32 %v241_v18, %v146_v4  ;;  %3067 = vmatpush.bf16.msra.mxu2 %v5477_v8  ;;  %v5657_v3 = vor.u32 %v6256_v53, %v5656_v52  ;;  %v5396_v4 = vld [vmem:[#allocation8 + $0xa28] sm:$0xf]  ;;  %v4321_v11 = vor.u32 %v5919_v63, %v4318_v0  ;;  %v150_v12 = vperm.slane %v6621_v33, 5  ;;  %v6246_v33 = vld [vmem:[#allocation8 + $0xbf0] sm:$0xf0] }
  0xb5   :  { %v5397_v21 = vor.u32 %v6191_v5, %v5396_v4  ;;  %v6241_v52 = vld [vmem:[#allocation8 + $0xbc8] sm:$0xf0]  ;;  %v5974_v53 = vld [vmem:[#allocation8 + $0x374] sm:$0xf]  ;;  %v4258_v63 = vld [vmem:[#allocation8 + $0x154] sm:$0xf0] }
  0xb6   :  { %vm350_vm5 = vcmp.ge.f32.partialorder %v242_v23, 0.0  ;;  %v360_v31 = vmul.f32 0.01, %v242_v23  ;;  %v6059_v0 = vld [vmem:[#allocation8 + $0x61c] sm:$0xf] }
  0xb7   :  { %3092 = vmatpush.bf16.msra.mxu0 %v4221_v19  ;;  %v6099_v5 = vld [vmem:[#allocation8 + $0x75c] sm:$0xf]  ;;  %v4998_v39 = vld [vmem:[#allocation8 + $0x71c] sm:$0xf0]  ;;  %v4478_v43 = vld [vmem:[#allocation8 + $0x30c] sm:$0xf0] }
  0xb8   :  { %3105 = vmatpush.bf16.msra.mxu1 %v4381_v20  ;;  %v370_v41 = vsel %vm350_vm5, %v242_v23, %v360_v31  ;;  %3068 = vmatpush.bf16.msra.mxu2 %v5457_v24  ;;  %v5914_v23 = vld [vmem:[#allocation8 + $0x194] sm:$0xf]  ;;  %v4298_v24 = vld [vmem:[#allocation8 + $0x1a4] sm:$0xf0]  ;;  %v4558_v31 = vld [vmem:[#allocation8 + $0x3ac] sm:$0xf0] }
  0xb9   :  { %v332_v47 = vpop.f32.mrf.mxu0  ;;  %v6641_v48 = vpack.c.bf16 %v370_v41, %v370_v41  ;;  %v5536_v40 = vld [vmem:[#allocation8 + $0xb40] sm:$0xf] }
  0xba   :  { %v306_v54 = vpop.f32.mrf.mxu2  ;;  %v333_v18 = vadd.f32 %v332_v47, %v153_v1  ;;  %v5617_v47 = vor.u32 %v6246_v33, %v5616_v29  ;;  %v4878_v1 = vld [vmem:[#allocation8 + $0x62c] sm:$0xf0]  ;;  %v5964_v29 = vld [vmem:[#allocation8 + $0x324] sm:$0xf]  ;;  %v4498_v33 = vld [vmem:[#allocation8 + $0x334] sm:$0xf0] }
  0xbb   :  { %v319_v55 = vpop.f32.mrf.mxu3  ;;  %v307_v59 = vadd.f32 %v306_v54, %v151_v25  ;;  %3093 = vmatpush.bf16.msra.mxu0 %v4201_v36  ;;  %v243_v61 = vpop.f32.mrf.mxu1  ;;  %2982 = vmatmul.bf16.vlgmr.msra.gmra.mxu3 %v6641_v48  ;;  %v4141_v36 = vor.u32 %v5874_v17, %v4138_v22  ;;  %v4881_v17 = vor.u32 %v6059_v0, %v4878_v1  ;;  %v4858_v22 = vld [vmem:[#allocation8 + $0x604] sm:$0xf0] }
  0xbc   :  { %v320_v60 = vadd.f32 %v319_v55, %v152_v34  ;;  %3106 = vmatpush.bf16.msra.mxu1 %v4361_v37  ;;  %3069 = vmatpush.bf16.msra.mxu2 %v5437_v42  ;;  %v4301_v37 = vor.u32 %v5914_v23, %v4298_v24  ;;  %v367_v38 = vmul.f32 0.01, %v333_v18  ;;  %v5377_v42 = vor.u32 %v6186_v28, %v5376_v27  ;;  %v4538_v55 = vld [vmem:[#allocation8 + $0x384] sm:$0xf0]  ;;  %v5904_v61 = vld [vmem:[#allocation8 + $0x144] sm:$0xf] }
  0xbd   :  { %vm355_vm6 = vcmp.ge.f32.partialorder %v307_v59, 0.0  ;;  %v365_v8 = vmul.f32 0.01, %v307_v59  ;;  %3078 = vmatpush.bf16.msra.mxu3 %v5677_v50  ;;  %3021 = vmatmul.bf16.vlgmr.msrb.gmra.mxu2 %v6643_v49  ;;  %vm357_vm8 = vcmp.ge.f32.partialorder %v333_v18, 0.0  ;;  %v4561_v50 = vor.u32 %v5979_v30, %v4558_v31  ;;  %v5556_v27 = vld [vmem:[#allocation8 + $0xb68] sm:$0xf] }
  0xbe   :  { %vm356_vm7 = vcmp.ge.f32.partialorder %v320_v60, 0.0  ;;  %v366_v9 = vmul.f32 0.01, %v320_v60  ;;  %v4541_v4 = vor.u32 %v5974_v53, %v4538_v55  ;;  %v4521_v24 = vor.u32 %v5969_v13, %v4518_v14  ;;  %v6231_v28 = vld [vmem:[#allocation8 + $0xb78] sm:$0xf0] }
  0xbf   :  { %v375_v15 = vsel %vm355_vm6, %v307_v59, %v365_v8  ;;  %3094 = vmatpush.bf16.msra.mxu0 %v4181_v56  ;;  %v377_v56 = vsel %vm357_vm8, %v333_v18, %v367_v38  ;;  %v5864_v59 = vld [vmem:[#allocation8 + $0x4] sm:$0xf]  ;;  %v5038_v8 = vld [vmem:[#allocation8 + $0x76c] sm:$0xf0]  ;;  %v6089_v38 = vld [vmem:[#allocation8 + $0x70c] sm:$0xf] }
  0xc0   :  { %v376_v16 = vsel %vm356_vm7, %v320_v60, %v366_v9  ;;  %3107 = vmatpush.bf16.msra.mxu1 %v4341_v62  ;;  %v6649_v19 = vpack.c.bf16 %v375_v15, %v375_v15  ;;  %3070 = vmatpush.bf16.msra.mxu2 %v5417_v2  ;;  %v4098_v60 = vld [vmem:[#allocation8 + $0x14] sm:$0xf0]  ;;  %v5576_v9 = vld [vmem:[#allocation8 + $0xb90] sm:$0xf]  ;;  %v5041_v18 = vor.u32 %v6099_v5, %v5038_v8  ;;  %v6044_v53 = vld [vmem:[#allocation8 + $0x5a4] sm:$0xf] }
  0xc1   :  { %v6651_v20 = vpack.c.bf16 %v376_v16, %v376_v16  ;;  %v334_v25 = vpop.f32.mrf.mxu0  ;;  %3079 = vmatpush.bf16.msra.mxu3 %v5657_v3  ;;  %v5597_v3 = vor.u32 %v6241_v52, %v5596_v51  ;;  %v4101_v16 = vor.u32 %v5864_v59, %v4098_v60  ;;  %v5001_v52 = vor.u32 %v6089_v38, %v4998_v39  ;;  %v5954_v59 = vld [vmem:[#allocation8 + $0x2d4] sm:$0xf]  ;;  %v4698_v0 = vld [vmem:[#allocation8 + $0x4c4] sm:$0xf0]  ;;  %v6039_v5 = vld [vmem:[#allocation8 + $0x57c] sm:$0xf] }
  0xc2   :  { %3047 = vmatmul.bf16.vlgmr.msrb.gmra.mxu0 %v6649_v19  ;;  %v308_v32 = vpop.f32.mrf.mxu2  ;;  %v6094_v25 = vld [vmem:[#allocation8 + $0x734] sm:$0xf]  ;;  %v6079_v13 = vld [vmem:[#allocation8 + $0x6bc] sm:$0xf]  ;;  %v4958_v14 = vld [vmem:[#allocation8 + $0x6cc] sm:$0xf0] }
  0xc3   :  { %3060 = vmatmul.bf16.vlgmr.msrb.gmra.mxu1 %v6651_v20  ;;  %v321_v34 = vpop.f32.mrf.mxu3  ;;  %3095 = vmatpush.bf16.msra.mxu0 %v4161_v10  ;;  %v293_v35 = vpop.f32.mrf.mxu1  ;;  %v6657_v10 = vpack.c.bf16 %v377_v56, %v377_v56  ;;  %v154_v32 = vperm.slane %v6639_v46, 1  ;;  %v6029_v38 = vld [vmem:[#allocation8 + $0x52c] sm:$0xf] }
  0xc4   :  { %3108 = vmatpush.bf16.msra.mxu1 %v4321_v11  ;;  %v294_v41 = vadd.f32 %v293_v35, %v150_v12  ;;  %3071 = vmatpush.bf16.msra.mxu2 %v5397_v21  ;;  %v6236_v11 = vld [vmem:[#allocation8 + $0xba0] sm:$0xf0]  ;;  %v4261_v12 = vor.u32 %v5904_v61, %v4258_v63  ;;  %v6054_v21 = vld [vmem:[#allocation8 + $0x5f4] sm:$0xf]  ;;  %v6049_v34 = vld [vmem:[#allocation8 + $0x5cc] sm:$0xf] }
  0xc5   :  { %3080 = vmatpush.bf16.msra.mxu3 %v5637_v26  ;;  %v5577_v23 = vor.u32 %v6236_v11, %v5576_v9  ;;  %v5018_v26 = vld [vmem:[#allocation8 + $0x744] sm:$0xf0]  ;;  %v4861_v30 = vor.u32 %v6054_v21, %v4858_v22  ;;  %v4838_v35 = vld [vmem:[#allocation8 + $0x5dc] sm:$0xf0]  ;;  %v6014_v63 = vld [vmem:[#allocation8 + $0x4b4] sm:$0xf] }
  0xc6   :  { %vm354_vm9 = vcmp.ge.f32.partialorder %v294_v41, 0.0  ;;  %v364_v54 = vmul.f32 0.01, %v294_v41  ;;  %v5021_v31 = vor.u32 %v6094_v25, %v5018_v26  ;;  %v4841_v51 = vor.u32 %v6049_v34, %v4838_v35  ;;  %v4798_v11 = vld [vmem:[#allocation8 + $0x58c] sm:$0xf0] }
  0xc7   :  { %3096 = vmatpush.bf16.msra.mxu0 %v4141_v36  ;;  %v5557_v36 = vor.u32 %v6231_v28, %v5556_v27  ;;  %v4801_v22 = vor.u32 %v6039_v5, %v4798_v11  ;;  %v4778_v26 = vld [vmem:[#allocation8 + $0x564] sm:$0xf0]  ;;  %v6074_v27 = vld [vmem:[#allocation8 + $0x694] sm:$0xf]  ;;  %v6139_v34 = vld [vmem:[#allocation8 + $0x89c] sm:$0xf] }
  0xc8   :  { %3109 = vmatpush.bf16.msra.mxu1 %v4301_v37  ;;  %v374_v62 = vsel %vm354_vm9, %v294_v41, %v364_v54  ;;  %3072 = vmatpush.bf16.msra.mxu2 %v5377_v42  ;;  %v4501_v37 = vor.u32 %v5964_v29, %v4498_v33  ;;  %v6226_v41 = vld [vmem:[#allocation8 + $0xb50] sm:$0xf0]  ;;  %v5959_v42 = vld [vmem:[#allocation8 + $0x2fc] sm:$0xf]  ;;  %v4818_v54 = vld [vmem:[#allocation8 + $0x5b4] sm:$0xf0] }
  0xc9   :  { %v6655_v2 = vpack.c.bf16 %v374_v62, %v374_v62  ;;  %3081 = vmatpush.bf16.msra.mxu3 %v5617_v47  ;;  %v6019_v47 = vld [vmem:[#allocation8 + $0x4dc] sm:$0xf]  ;;  %v5537_v55 = vor.u32 %v6226_v41, %v5536_v40  ;;  %v4481_v56 = vor.u32 %v5959_v42, %v4478_v43  ;;  %v4458_v62 = vld [vmem:[#allocation8 + $0x2e4] sm:$0xf0]  ;;  %v5944_v33 = vld [vmem:[#allocation8 + $0x284] sm:$0xf] }
  0xca   :  { %v4461_v9 = vor.u32 %v5954_v59, %v4458_v62  ;;  %v4938_v28 = vld [vmem:[#allocation8 + $0x6a4] sm:$0xf0]  ;;  %v5198_v35 = vld [vmem:[#allocation8 + $0x8ac] sm:$0xf0]  ;;  %v4758_v40 = vld [vmem:[#allocation8 + $0x53c] sm:$0xf0] }
  0xcb   :  { %3097 = vmatpush.bf16.msra.mxu0 %v4121_v57  ;;  %v295_v15 = vpop.f32.mrf.mxu1  ;;  %3034 = vmatmul.bf16.vlgmr.msrb.gmra.mxu3 %v6655_v2  ;;  %v6084_v57 = vld [vmem:[#allocation8 + $0x6e4] sm:$0xf]  ;;  %v6069_v41 = vld [vmem:[#allocation8 + $0x66c] sm:$0xf]  ;;  %v4918_v42 = vld [vmem:[#allocation8 + $0x67c] sm:$0xf0] }
  0xcc   :  { %3117 = vmatpush.bf16.msrb.mxu2 %v4561_v50  ;;  %3110 = vmatpush.bf16.msra.mxu1 %v4281_v58  ;;  %v4718_v50 = vld [vmem:[#allocation8 + $0x4ec] sm:$0xf0]  ;;  %v4978_v58 = vld [vmem:[#allocation8 + $0x6f4] sm:$0xf0]  ;;  %v4701_v15 = vor.u32 %v6014_v63, %v4698_v0  ;;  %v6259_v62 = vld [vmem:[#allocation8 + $0xc5c] sm:$0xf] }
  0xcd   :  { %3082 = vmatpush.bf16.msra.mxu3 %v5597_v3  ;;  %3073 = vmatmul.bf16.vlgmr.msra.gmra.mxu2 %v6657_v10  ;;  %v4721_v61 = vor.u32 %v6019_v47, %v4718_v50  ;;  %v4821_v3 = vor.u32 %v6044_v53, %v4818_v54  ;;  %v5999_v47 = vld [vmem:[#allocation8 + $0x43c] sm:$0xf]  ;;  %v4638_v50 = vld [vmem:[#allocation8 + $0x44c] sm:$0xf0]  ;;  %v4921_v53 = vor.u32 %v6069_v41, %v4918_v42  ;;  %v6024_v54 = vld [vmem:[#allocation8 + $0x504] sm:$0xf] }
  0xce   :  { %v5518_v59 = vld [vmem:[#allocation8 + $0xb2c] sm:$0xf0]  ;;  %v5994_v0 = vld [vmem:[#allocation8 + $0x414] sm:$0xf] }
  0xcf   :  { %3098 = vmatpush.bf16.msra.mxu0 %v4101_v16  ;;  %v5949_v16 = vld [vmem:[#allocation8 + $0x2ac] sm:$0xf]  ;;  %v5678_v63 = vld [vmem:[#allocation8 + $0xc6c] sm:$0xf0] }
  0xd0   :  { %3118 = vmatpush.bf16.msrb.mxu2 %v4541_v4  ;;  %3111 = vmatpush.bf16.msra.mxu1 %v4261_v12  ;;  %v4981_v4 = vor.u32 %v6084_v57, %v4978_v58  ;;  %v4438_v12 = vld [vmem:[#allocation8 + $0x2bc] sm:$0xf0]  ;;  %v4898_v57 = vld [vmem:[#allocation8 + $0x654] sm:$0xf0]  ;;  %v6219_v58 = vld [vmem:[#allocation8 + $0xb1c] sm:$0xf] }
  0xd1   :  { %3083 = vmatpush.bf16.msra.mxu3 %v5577_v23  ;;  %v4961_v23 = vor.u32 %v6079_v13, %v4958_v14  ;;  %v4441_v25 = vor.u32 %v5949_v16, %v4438_v12  ;;  %v5521_v11 = vor.u32 %v6219_v58, %v5518_v59  ;;  %v5681_v13 = vor.u32 %v6259_v62, %v5678_v63  ;;  %v6214_v14 = vld [vmem:[#allocation8 + $0xaf4] sm:$0xf]  ;;  %v6199_v58 = vld [vmem:[#allocation8 + $0xa7c] sm:$0xf]  ;;  %v5438_v59 = vld [vmem:[#allocation8 + $0xa8c] sm:$0xf0] }
  0xd2   :  { %3099 = vmatmul.bf16.vlgmr.msra.gmra.mxu0 %v6626_v45  ;;  %v5598_v62 = vld [vmem:[#allocation8 + $0xbcc] sm:$0xf0]  ;;  %v6109_v63 = vld [vmem:[#allocation8 + $0x7ac] sm:$0xf] }
  0xd3   :  { %3143 = vmatpush.bf16.msrb.mxu0 %v4881_v17  ;;  %3112 = vmatmul.bf16.vlgmr.msra.gmra.mxu1 %v6641_v48  ;;  %v345_v44 = vpop.f32.mrf.mxu1  ;;  %v6009_v17 = vld [vmem:[#allocation8 + $0x48c] sm:$0xf] }
  0xd4   :  { %3156 = vmatpush.bf16.msrb.mxu1 %v5041_v18  ;;  %3119 = vmatpush.bf16.msrb.mxu2 %v4521_v24  ;;  %v346_v46 = vadd.f32 %v345_v44, %v154_v32  ;;  %v4678_v18 = vld [vmem:[#allocation8 + $0x49c] sm:$0xf0]  ;;  %v6034_v24 = vld [vmem:[#allocation8 + $0x554] sm:$0xf]  ;;  %v4658_v32 = vld [vmem:[#allocation8 + $0x474] sm:$0xf0]  ;;  %v5201_v44 = vor.u32 %v6139_v34, %v5198_v35 }
  0xd5   :  { %3084 = vmatpush.bf16.msra.mxu3 %v5557_v36  ;;  %v4681_v29 = vor.u32 %v6009_v17, %v4678_v18  ;;  %v4781_v36 = vor.u32 %v6034_v24, %v4778_v26  ;;  %v6254_v17 = vld [vmem:[#allocation8 + $0xc34] sm:$0xf]  ;;  %v5658_v18 = vld [vmem:[#allocation8 + $0xc44] sm:$0xf0]  ;;  %v5138_v24 = vld [vmem:[#allocation8 + $0x834] sm:$0xf0] }
  0xd6   :  { %vm358_vm10 = vcmp.ge.f32.partialorder %v346_v46, 0.0  ;;  %v368_v60 = vmul.f32 0.01, %v346_v46  ;;  %v5661_v26 = vor.u32 %v6254_v17, %v5658_v18  ;;  %v4578_v34 = vld [vmem:[#allocation8 + $0x3d4] sm:$0xf0] }
  0xd7   :  { %3144 = vmatpush.bf16.msrb.mxu0 %v4861_v30  ;;  %v4418_v30 = vld [vmem:[#allocation8 + $0x294] sm:$0xf0]  ;;  %v6119_v35 = vld [vmem:[#allocation8 + $0x7fc] sm:$0xf]  ;;  %v6164_v18 = vld [vmem:[#allocation8 + $0x964] sm:$0xf] }
  0xd8   :  { %3157 = vmatpush.bf16.msrb.mxu1 %v5021_v31  ;;  %3120 = vmatpush.bf16.msrb.mxu2 %v4501_v37  ;;  %v378_v1 = vsel %vm358_vm10, %v346_v46, %v368_v60  ;;  %v6004_v31 = vld [vmem:[#allocation8 + $0x464] sm:$0xf]  ;;  %v4941_v37 = vor.u32 %v6074_v27, %v4938_v28  ;;  %v4421_v39 = vor.u32 %v5944_v33, %v4418_v30  ;;  %v6134_v46 = vld [vmem:[#allocation8 + $0x874] sm:$0xf]  ;;  %v6209_v27 = vld [vmem:[#allocation8 + $0xacc] sm:$0xf] }
  0xd9   :  { %v6664_v8 = vpack.c.bf16 %v378_v1, %v378_v1  ;;  %3085 = vmatpush.bf16.msra.mxu3 %v5537_v55  ;;  %v4661_v43 = vor.u32 %v6004_v31, %v4658_v32  ;;  %v4738_v55 = vld [vmem:[#allocation8 + $0x514] sm:$0xf0]  ;;  %v4641_v60 = vor.u32 %v5999_v47, %v4638_v50  ;;  %v4618_v1 = vld [vmem:[#allocation8 + $0x424] sm:$0xf0]  ;;  %v5478_v28 = vld [vmem:[#allocation8 + $0xadc] sm:$0xf0] }
  0xda   :  { %v4741_v5 = vor.u32 %v6024_v54, %v4738_v55  ;;  %v4621_v16 = vor.u32 %v5994_v0, %v4618_v1  ;;  %v6249_v30 = vld [vmem:[#allocation8 + $0xc0c] sm:$0xf]  ;;  %v5638_v31 = vld [vmem:[#allocation8 + $0xc1c] sm:$0xf0]  ;;  %v5984_v32 = vld [vmem:[#allocation8 + $0x3c4] sm:$0xf] }
  0xdb   :  { %3145 = vmatpush.bf16.msrb.mxu0 %v4841_v51  ;;  %v347_v21 = vpop.f32.mrf.mxu1  ;;  %v5178_v51 = vld [vmem:[#allocation8 + $0x884] sm:$0xf0]  ;;  %v4581_v41 = vor.u32 %v5984_v32, %v4578_v34  ;;  %v6244_v47 = vld [vmem:[#allocation8 + $0xbe4] sm:$0xf]  ;;  %v5078_v0 = vld [vmem:[#allocation8 + $0x7bc] sm:$0xf0] }
  0xdc   :  { %3158 = vmatpush.bf16.msrb.mxu1 %v5001_v52  ;;  %3121 = vmatpush.bf16.msrb.mxu2 %v4481_v56  ;;  %v4761_v52 = vor.u32 %v6029_v38, %v4758_v40  ;;  %v6064_v56 = vld [vmem:[#allocation8 + $0x644] sm:$0xf]  ;;  %v5989_v21 = vld [vmem:[#allocation8 + $0x3ec] sm:$0xf]  ;;  %v5358_v38 = vld [vmem:[#allocation8 + $0x9ec] sm:$0xf0]  ;;  %v5641_v40 = vor.u32 %v6249_v30, %v5638_v31 }
  0xdd   :  { %3130 = vmatpush.bf16.msrb.mxu3 %v4721_v61  ;;  %v5181_v61 = vor.u32 %v6134_v46, %v5178_v51  ;;  %v5618_v46 = vld [vmem:[#allocation8 + $0xbf4] sm:$0xf0]  ;;  %v6114_v51 = vld [vmem:[#allocation8 + $0x7d4] sm:$0xf]  ;;  %v5338_v54 = vld [vmem:[#allocation8 + $0x9c4] sm:$0xf0] }
  0xde   :  { %3086 = vmatmul.bf16.vlgmr.msra.gmra.mxu3 %v6664_v8  ;;  %v6169_v1 = vld [vmem:[#allocation8 + $0x98c] sm:$0xf]  ;;  %v5058_v17 = vld [vmem:[#allocation8 + $0x794] sm:$0xf0]  ;;  %v5558_v31 = vld [vmem:[#allocation8 + $0xb7c] sm:$0xf0] }
  0xdf   :  { %3146 = vmatpush.bf16.msrb.mxu0 %v4821_v3  ;;  %v6129_v3 = vld [vmem:[#allocation8 + $0x84c] sm:$0xf]  ;;  %v6159_v32 = vld [vmem:[#allocation8 + $0x93c] sm:$0xf]  ;;  %v5278_v34 = vld [vmem:[#allocation8 + $0x94c] sm:$0xf0] }
  0xe0   :  { %3159 = vmatpush.bf16.msrb.mxu1 %v4981_v4  ;;  %3122 = vmatpush.bf16.msrb.mxu2 %v4461_v9  ;;  %v5158_v4 = vld [vmem:[#allocation8 + $0x85c] sm:$0xf0]  ;;  %v4901_v9 = vor.u32 %v6064_v56, %v4898_v57  ;;  %v5621_v56 = vor.u32 %v6244_v47, %v5618_v46  ;;  %v6229_v30 = vld [vmem:[#allocation8 + $0xb6c] sm:$0xf] }
  0xe1   :  { %3131 = vmatpush.bf16.msrb.mxu3 %v4701_v15  ;;  %v5498_v15 = vld [vmem:[#allocation8 + $0xb04] sm:$0xf0]  ;;  %v5161_v12 = vor.u32 %v6129_v3, %v5158_v4  ;;  %v5318_v3 = vld [vmem:[#allocation8 + $0x99c] sm:$0xf0]  ;;  %v5441_v4 = vor.u32 %v6199_v58, %v5438_v59 }
  0xe2   :  { %v4564_v47 = vld [vmem:[#allocation8 + $0x3a0] sm:$0xf] }
  0xe3   :  { %3147 = vmatpush.bf16.msrb.mxu0 %v4801_v22  ;;  %v4598_v22 = vld [vmem:[#allocation8 + $0x3fc] sm:$0xf0] }
  0xe4   :  { %3160 = vmatpush.bf16.msrb.mxu1 %v4961_v23  ;;  %3123 = vmatpush.bf16.msrb.mxu2 %v4441_v25  ;;  %v6124_v23 = vld [vmem:[#allocation8 + $0x824] sm:$0xf]  ;;  %v5501_v25 = vor.u32 %v6214_v14, %v5498_v15  ;;  %v6234_v14 = vld [vmem:[#allocation8 + $0xb94] sm:$0xf]  ;;  %v5578_v15 = vld [vmem:[#allocation8 + $0xba4] sm:$0xf0] }
  0xe5   :  { %3132 = vmatpush.bf16.msrb.mxu3 %v4681_v29  ;;  %v4601_v29 = vor.u32 %v5989_v21, %v4598_v22  ;;  %v5141_v33 = vor.u32 %v6124_v23, %v5138_v24  ;;  %v5298_v21 = vld [vmem:[#allocation8 + $0x974] sm:$0xf0]  ;;  %v4244_v22 = vld [vmem:[#allocation8 + $0x120] sm:$0xf]  ;;  %v5902_v23 = vld [vmem:[#allocation8 + $0x130] sm:$0xf0] }
  0xe6   :  { %v4724_v46 = vld [vmem:[#allocation8 + $0x4e0] sm:$0xf] }
  0xe7   :  { %3148 = vmatpush.bf16.msrb.mxu0 %v4781_v36  ;;  %v5118_v36 = vld [vmem:[#allocation8 + $0x80c] sm:$0xf0] }
  0xe8   :  { %3161 = vmatpush.bf16.msrb.mxu1 %v4941_v37  ;;  %3124 = vmatpush.bf16.msrb.mxu2 %v4421_v39  ;;  %v6179_v37 = vld [vmem:[#allocation8 + $0x9dc] sm:$0xf]  ;;  %v5481_v39 = vor.u32 %v6209_v27, %v5478_v28  ;;  %v5121_v42 = vor.u32 %v6119_v35, %v5118_v36  ;;  %v6189_v27 = vld [vmem:[#allocation8 + $0xa2c] sm:$0xf]  ;;  %v5398_v28 = vld [vmem:[#allocation8 + $0xa3c] sm:$0xf0] }
  0xe9   :  { %3133 = vmatpush.bf16.msrb.mxu3 %v4661_v43  ;;  %v6204_v43 = vld [vmem:[#allocation8 + $0xaa4] sm:$0xf]  ;;  %v5361_v50 = vor.u32 %v6179_v37, %v5358_v38  ;;  %v4224_v35 = vld [vmem:[#allocation8 + $0xf8] sm:$0xf]  ;;  %v5897_v36 = vld [vmem:[#allocation8 + $0x108] sm:$0xf0]  ;;  %v5401_v37 = vor.u32 %v6189_v27, %v5398_v28 }
  0xea   :  { %v6184_v38 = vld [vmem:[#allocation8 + $0xa04] sm:$0xf] }
  0xeb   :  { %3149 = vmatpush.bf16.msrb.mxu0 %v4761_v52  ;;  %3125 = vmatmul.bf16.vlgmr.msrb.gmra.mxu2 %v6631_v6  ;;  %v5098_v52 = vld [vmem:[#allocation8 + $0x7e4] sm:$0xf0] }
  0xec   :  { %3169 = vmatpush.bf16.msra.mxu2 %v5201_v44  ;;  %3162 = vmatpush.bf16.msrb.mxu1 %v4921_v53  ;;  %v5458_v44 = vld [vmem:[#allocation8 + $0xab4] sm:$0xf0]  ;;  %v6174_v53 = vld [vmem:[#allocation8 + $0x9b4] sm:$0xf]  ;;  %v5101_v57 = vor.u32 %v6114_v51, %v5098_v52 }
  0xed   :  { %3134 = vmatpush.bf16.msrb.mxu3 %v4641_v60  ;;  %v5461_v55 = vor.u32 %v6204_v43, %v5458_v44  ;;  %v6239_v60 = vld [vmem:[#allocation8 + $0xbbc] sm:$0xf]  ;;  %v5281_v43 = vor.u32 %v6159_v32, %v5278_v34  ;;  %v4225_v44 = vor.u32 %v5897_v36, %v4224_v35  ;;  %v6022_v51 = vld [vmem:[#allocation8 + $0x4f0] sm:$0xf0]  ;;  %v4664_v34 = vld [vmem:[#allocation8 + $0x468] sm:$0xf] }
  0xee   :  { %v6154_v52 = vld [vmem:[#allocation8 + $0x914] sm:$0xf]  ;;  %v4725_v59 = vor.u32 %v6022_v51, %v4724_v46  ;;  %v6007_v35 = vld [vmem:[#allocation8 + $0x478] sm:$0xf0]  ;;  %v4144_v36 = vld [vmem:[#allocation8 + $0x58] sm:$0xf] }
  0xef   :  { %3150 = vmatpush.bf16.msrb.mxu0 %v4741_v5  ;;  %v6194_v5 = vld [vmem:[#allocation8 + $0xa54] sm:$0xf]  ;;  %v4124_v51 = vld [vmem:[#allocation8 + $0x30] sm:$0xf] }
  0xf0   :  { %3170 = vmatpush.bf16.msra.mxu2 %v5181_v61  ;;  %3163 = vmatpush.bf16.msrb.mxu1 %v4901_v9  ;;  %v5341_v61 = vor.u32 %v6174_v53, %v5338_v54  ;;  %v5601_v9 = vor.u32 %v6239_v60, %v5598_v62  ;;  %v5258_v53 = vld [vmem:[#allocation8 + $0x924] sm:$0xf0]  ;;  %v5977_v62 = vld [vmem:[#allocation8 + $0x388] sm:$0xf0]  ;;  %v6002_v46 = vld [vmem:[#allocation8 + $0x450] sm:$0xf0] }
  0xf1   :  { %3135 = vmatpush.bf16.msrb.mxu3 %v4621_v16  ;;  %v5321_v16 = vor.u32 %v6169_v1, %v5318_v3  ;;  %v5261_v60 = vor.u32 %v6154_v52, %v5258_v53  ;;  %v6017_v1 = vld [vmem:[#allocation8 + $0x4c8] sm:$0xf0]  ;;  %v5872_v52 = vld [vmem:[#allocation8 + $0x40] sm:$0xf0]  ;;  %v4364_v53 = vld [vmem:[#allocation8 + $0x210] sm:$0xf] }
  0xf2   :  { %3151 = vmatmul.bf16.vlgmr.msrb.gmra.mxu0 %v6643_v49  ;;  %v6149_v3 = vld [vmem:[#allocation8 + $0x8ec] sm:$0xf] }
  0xf3   :  { %3195 = vmatpush.bf16.msra.mxu0 %v5521_v11  ;;  %3164 = vmatmul.bf16.vlgmr.msrb.gmra.mxu1 %v6655_v2  ;;  %v5081_v11 = vor.u32 %v6109_v63, %v5078_v0  ;;  %v4704_v63 = vld [vmem:[#allocation8 + $0x4b8] sm:$0xf] }
  0xf4   :  { %3208 = vmatpush.bf16.msra.mxu1 %v5681_v13  ;;  %3171 = vmatpush.bf16.msra.mxu2 %v5161_v12  ;;  %v5418_v13 = vld [vmem:[#allocation8 + $0xa64] sm:$0xf0]  ;;  %v6104_v12 = vld [vmem:[#allocation8 + $0x784] sm:$0xf] }
  0xf5   :  { %3136 = vmatpush.bf16.msrb.mxu3 %v4601_v29  ;;  %v5421_v24 = vor.u32 %v6194_v5, %v5418_v13  ;;  %v5301_v29 = vor.u32 %v6164_v18, %v5298_v21  ;;  %v4184_v5 = vld [vmem:[#allocation8 + $0xa8] sm:$0xf]  ;;  %v4524_v13 = vld [vmem:[#allocation8 + $0x350] sm:$0xf]  ;;  %v6144_v21 = vld [vmem:[#allocation8 + $0x8c4] sm:$0xf] }
  0xf7   :  { %3196 = vmatpush.bf16.msra.mxu0 %v5501_v25  ;;  %v5581_v25 = vor.u32 %v6234_v14, %v5578_v15  ;;  %v4705_v14 = vor.u32 %v6017_v1, %v4704_v63  ;;  %v4104_v63 = vld [vmem:[#allocation8 + $0x8] sm:$0xf] }
  0xf8   :  { %3209 = vmatpush.bf16.msra.mxu1 %v5661_v26  ;;  %3172 = vmatpush.bf16.msra.mxu2 %v5141_v33  ;;  %v5061_v26 = vor.u32 %v6104_v12, %v5058_v17  ;;  %v4245_v33 = vor.u32 %v5902_v23, %v4244_v22  ;;  %v4684_v12 = vld [vmem:[#allocation8 + $0x490] sm:$0xf]  ;;  %v6012_v17 = vld [vmem:[#allocation8 + $0x4a0] sm:$0xf0]  ;;  %v5218_v22 = vld [vmem:[#allocation8 + $0x8d4] sm:$0xf0] }
  0xf9   :  { %3137 = vmatpush.bf16.msrb.mxu3 %v4581_v41  ;;  %v6224_v41 = vld [vmem:[#allocation8 + $0xb44] sm:$0xf]  ;;  %v4164_v23 = vld [vmem:[#allocation8 + $0x80] sm:$0xf]  ;;  %v4685_v28 = vor.u32 %v6012_v17, %v4684_v12  ;;  %v4344_v1 = vld [vmem:[#allocation8 + $0x1e8] sm:$0xf] }
  0xfa   :  { %v4604_v12 = vld [vmem:[#allocation8 + $0x3f0] sm:$0xf]  ;;  %v5992_v17 = vld [vmem:[#allocation8 + $0x400] sm:$0xf0] }
  0xfb   :  { %3197 = vmatpush.bf16.msra.mxu0 %v5481_v39  ;;  %v5561_v39 = vor.u32 %v6229_v30, %v5558_v31  ;;  %v5967_v30 = vld [vmem:[#allocation8 + $0x338] sm:$0xf0] }
  0xfc   :  { %3210 = vmatpush.bf16.msra.mxu1 %v5641_v40  ;;  %3173 = vmatpush.bf16.msra.mxu2 %v5121_v42  ;;  %v5378_v40 = vld [vmem:[#allocation8 + $0xa14] sm:$0xf0] }
  0xfd   :  { %3182 = vmatpush.bf16.msra.mxu3 %v5361_v50  ;;  %v5538_v42 = vld [vmem:[#allocation8 + $0xb54] sm:$0xf0]  ;;  %v5982_v50 = vld [vmem:[#allocation8 + $0x3b0] sm:$0xf0]  ;;  %v5381_v54 = vor.u32 %v6184_v38, %v5378_v40 }
  0xfe   :  { %3138 = vmatmul.bf16.vlgmr.msrb.gmra.mxu3 %v6633_v7  ;;  %v4565_v58 = vor.u32 %v5982_v50, %v4564_v47  ;;  %v4384_v38 = vld [vmem:[#allocation8 + $0x238] sm:$0xf]  ;;  %v4644_v50 = vld [vmem:[#allocation8 + $0x440] sm:$0xf] }
  0xff   :  { %3198 = vmatpush.bf16.msra.mxu0 %v5461_v55  ;;  %v4204_v55 = vld [vmem:[#allocation8 + $0xd0] sm:$0xf] }
 0x100   :  { %3211 = vmatpush.bf16.msra.mxu1 %v5621_v56  ;;  %3174 = vmatpush.bf16.msra.mxu2 %v5101_v57  ;;  %v5892_v56 = vld [vmem:[#allocation8 + $0xe0] sm:$0xf0]  ;;  %v5541_v57 = vor.u32 %v6224_v41, %v5538_v42  ;;  %v4665_v41 = vor.u32 %v6007_v35, %v4664_v34  ;;  %v4484_v42 = vld [vmem:[#allocation8 + $0x300] sm:$0xf] }
 0x101   :  { %3183 = vmatpush.bf16.msra.mxu3 %v5341_v61  ;;  %v4544_v61 = vld [vmem:[#allocation8 + $0x378] sm:$0xf]  ;;  %v4205_v0 = vor.u32 %v5892_v56, %v4204_v55  ;;  %v4645_v56 = vor.u32 %v6002_v46, %v4644_v50  ;;  %v5364_v34 = vld [vmem:[#allocation8 + $0x9e0] sm:$0xf]  ;;  %v6137_v46 = vld [vmem:[#allocation8 + $0x888] sm:$0xf0] }
 0x102   :  { %v5184_v50 = vld [vmem:[#allocation8 + $0x878] sm:$0xf] }
 0x103   :  { %3199 = vmatpush.bf16.msra.mxu0 %v5441_v4  ;;  %v5238_v4 = vld [vmem:[#allocation8 + $0x8fc] sm:$0xf0] }
 0x104   :  { %3212 = vmatpush.bf16.msra.mxu1 %v5601_v9  ;;  %3175 = vmatpush.bf16.msra.mxu2 %v5081_v11  ;;  %v5887_v9 = vld [vmem:[#allocation8 + $0xb8] sm:$0xf0]  ;;  %v4545_v11 = vor.u32 %v5977_v62, %v4544_v61  ;;  %v5241_v15 = vor.u32 %v6149_v3, %v5238_v4  ;;  %v4624_v61 = vld [vmem:[#allocation8 + $0x418] sm:$0xf]  ;;  %v5997_v62 = vld [vmem:[#allocation8 + $0x428] sm:$0xf0] }
 0x105   :  { %3184 = vmatpush.bf16.msra.mxu3 %v5321_v16  ;;  %v5972_v16 = vld [vmem:[#allocation8 + $0x360] sm:$0xf0]  ;;  %v4185_v18 = vor.u32 %v5887_v9, %v4184_v5  ;;  %v5927_v3 = vld [vmem:[#allocation8 + $0x1f8] sm:$0xf0]  ;;  %v4884_v5 = vld [vmem:[#allocation8 + $0x620] sm:$0xf] }
 0x106   :  { %v4525_v27 = vor.u32 %v5972_v16, %v4524_v13  ;;  %v6062_v9 = vld [vmem:[#allocation8 + $0x630] sm:$0xf0]  ;;  %v4444_v13 = vld [vmem:[#allocation8 + $0x2b0] sm:$0xf]  ;;  %v4345_v16 = vor.u32 %v5927_v3, %v4344_v1  ;;  %v4264_v3 = vld [vmem:[#allocation8 + $0x148] sm:$0xf] }
 0x107   :  { %3200 = vmatpush.bf16.msra.mxu0 %v5421_v24  ;;  %v5882_v24 = vld [vmem:[#allocation8 + $0x90] sm:$0xf0] }
 0x108   :  { %3213 = vmatpush.bf16.msra.mxu1 %v5581_v25  ;;  %3176 = vmatpush.bf16.msra.mxu2 %v5061_v26  ;;  %v4404_v25 = vld [vmem:[#allocation8 + $0x260] sm:$0xf]  ;;  %v5942_v26 = vld [vmem:[#allocation8 + $0x270] sm:$0xf0]  ;;  %v4165_v31 = vor.u32 %v5882_v24, %v4164_v23  ;;  %v4864_v24 = vld [vmem:[#allocation8 + $0x5f8] sm:$0xf] }
 0x109   :  { %3185 = vmatpush.bf16.msra.mxu3 %v5301_v29  ;;  %v5221_v29 = vor.u32 %v6144_v21, %v5218_v22  ;;  %v4405_v32 = vor.u32 %v5942_v26, %v4404_v25  ;;  %v4324_v21 = vld [vmem:[#allocation8 + $0x1c0] sm:$0xf]  ;;  %v5922_v22 = vld [vmem:[#allocation8 + $0x1d0] sm:$0xf0]  ;;  %v6057_v25 = vld [vmem:[#allocation8 + $0x608] sm:$0xf0] }
 0x10a   :  { %v4424_v26 = vld [vmem:[#allocation8 + $0x288] sm:$0xf]  ;;  %v4865_v35 = vor.u32 %v6057_v25, %v4864_v24  ;;  %v4784_v24 = vld [vmem:[#allocation8 + $0x558] sm:$0xf] }
 0x10b   :  { %3201 = vmatpush.bf16.msra.mxu0 %v5401_v37  ;;  %3177 = vmatmul.bf16.vlgmr.msra.gmra.mxu2 %v6649_v19  ;;  %v5877_v37 = vld [vmem:[#allocation8 + $0x68] sm:$0xf0] }
 0x10c   :  { %3221 = vmatpush.bf16.msrb.mxu2 %v4245_v33  ;;  %3214 = vmatpush.bf16.msra.mxu1 %v5561_v39  ;;  %v4504_v33 = vld [vmem:[#allocation8 + $0x328] sm:$0xf]  ;;  %v5937_v39 = vld [vmem:[#allocation8 + $0x248] sm:$0xf0] }
 0x10d   :  { %3186 = vmatpush.bf16.msra.mxu3 %v5281_v43  ;;  %v4505_v40 = vor.u32 %v5967_v30, %v4504_v33  ;;  %v5962_v43 = vld [vmem:[#allocation8 + $0x310] sm:$0xf0]  ;;  %v4385_v47 = vor.u32 %v5937_v39, %v4384_v38  ;;  %v5987_v33 = vld [vmem:[#allocation8 + $0x3d8] sm:$0xf0]  ;;  %v4325_v30 = vor.u32 %v5922_v22, %v4324_v21  ;;  %v5917_v38 = vld [vmem:[#allocation8 + $0x1a8] sm:$0xf0] }
 0x10e   :  { %v4485_v55 = vor.u32 %v5962_v43, %v4484_v42  ;;  %v5304_v22 = vld [vmem:[#allocation8 + $0x968] sm:$0xf] }
 0x10f   :  { %3202 = vmatpush.bf16.msra.mxu0 %v5381_v54  ;;  %v5932_v54 = vld [vmem:[#allocation8 + $0x220] sm:$0xf0] }
 0x110   :  { %3222 = vmatpush.bf16.msrb.mxu2 %v4225_v44  ;;  %3215 = vmatpush.bf16.msra.mxu1 %v5541_v57  ;;  %v4145_v44 = vor.u32 %v5877_v37, %v4144_v36  ;;  %v4464_v57 = vld [vmem:[#allocation8 + $0x2d8] sm:$0xf]  ;;  %v6182_v36 = vld [vmem:[#allocation8 + $0x9f0] sm:$0xf0] }
 0x111   :  { %3187 = vmatpush.bf16.msra.mxu3 %v5261_v60  ;;  %v4365_v60 = vor.u32 %v5932_v54, %v4364_v53  ;;  %v4304_v37 = vld [vmem:[#allocation8 + $0x198] sm:$0xf]  ;;  %v6177_v53 = vld [vmem:[#allocation8 + $0x9c8] sm:$0xf0]  ;;  %v4284_v54 = vld [vmem:[#allocation8 + $0x170] sm:$0xf] }
 0x112   :  { %3203 = vmatmul.bf16.vlgmr.msra.gmra.mxu0 %v6657_v10 }
 0x113   :  { %3247 = vmatpush.bf16.msrb.mxu0 %v4565_v58  ;;  %3216 = vmatmul.bf16.vlgmr.msra.gmra.mxu1 %v6664_v8  ;;  %v5957_v58 = vld [vmem:[#allocation8 + $0x2e8] sm:$0xf0] }
 0x114   :  { %3260 = vmatpush.bf16.msrb.mxu1 %v4725_v59  ;;  %3223 = vmatpush.bf16.msrb.mxu2 %v4205_v0  ;;  %v4125_v59 = vor.u32 %v5872_v52, %v4124_v51  ;;  %v5867_v0 = vld [vmem:[#allocation8 + $0x18] sm:$0xf0]  ;;  %v4465_v4 = vor.u32 %v5957_v58, %v4464_v57  ;;  %v5344_v51 = vld [vmem:[#allocation8 + $0x9b8] sm:$0xf]  ;;  %v5185_v58 = vor.u32 %v6137_v46, %v5184_v50  ;;  %v6117_v50 = vld [vmem:[#allocation8 + $0x7e8] sm:$0xf0] }
 0x115   :  { %3188 = vmatpush.bf16.msra.mxu3 %v5241_v15  ;;  %v4105_v15 = vor.u32 %v5867_v0, %v4104_v63  ;;  %v6047_v57 = vld [vmem:[#allocation8 + $0x5b8] sm:$0xf0]  ;;  %v5324_v63 = vld [vmem:[#allocation8 + $0x990] sm:$0xf]  ;;  %v6172_v0 = vld [vmem:[#allocation8 + $0x9a0] sm:$0xf0] }
 0x117   :  { %3248 = vmatpush.bf16.msrb.mxu0 %v4545_v11  ;;  %v4625_v11 = vor.u32 %v5997_v62, %v4624_v61  ;;  %v6132_v62 = vld [vmem:[#allocation8 + $0x860] sm:$0xf0] }
 0x118   :  { %3261 = vmatpush.bf16.msrb.mxu1 %v4705_v14  ;;  %3224 = vmatpush.bf16.msrb.mxu2 %v4185_v18  ;;  %v5952_v14 = vld [vmem:[#allocation8 + $0x2c0] sm:$0xf0]  ;;  %v4885_v18 = vor.u32 %v6062_v9, %v4884_v5  ;;  %v4804_v5 = vld [vmem:[#allocation8 + $0x580] sm:$0xf]  ;;  %v6042_v9 = vld [vmem:[#allocation8 + $0x590] sm:$0xf0] }
 0x119   :  { %3189 = vmatpush.bf16.msra.mxu3 %v5221_v29  ;;  %v4445_v23 = vor.u32 %v5952_v14, %v4444_v13  ;;  %v4584_v29 = vld [vmem:[#allocation8 + $0x3c8] sm:$0xf]  ;;  %v6102_v13 = vld [vmem:[#allocation8 + $0x770] sm:$0xf0] }
 0x11a   :  { %v4585_v42 = vor.u32 %v5987_v33, %v4584_v29 }
 0x11b   :  { %3249 = vmatpush.bf16.msrb.mxu0 %v4525_v27  ;;  %v4605_v27 = vor.u32 %v5992_v17, %v4604_v12  ;;  %v5144_v12 = vld [vmem:[#allocation8 + $0x828] sm:$0xf]  ;;  %v6127_v17 = vld [vmem:[#allocation8 + $0x838] sm:$0xf0] }
 0x11c   :  { %3262 = vmatpush.bf16.msrb.mxu1 %v4685_v28  ;;  %3225 = vmatpush.bf16.msrb.mxu2 %v4165_v31  ;;  %v5947_v28 = vld [vmem:[#allocation8 + $0x298] sm:$0xf0]  ;;  %v5204_v31 = vld [vmem:[#allocation8 + $0x8a0] sm:$0xf] }
 0x11d   :  { %3234 = vmatpush.bf16.msrb.mxu3 %v4405_v32  ;;  %v6142_v32 = vld [vmem:[#allocation8 + $0x8b0] sm:$0xf0]  ;;  %v4425_v39 = vor.u32 %v5947_v28, %v4424_v26  ;;  %v6037_v26 = vld [vmem:[#allocation8 + $0x568] sm:$0xf0] }
 0x11e   :  { %3190 = vmatmul.bf16.vlgmr.msra.gmra.mxu3 %v6651_v20  ;;  %v5205_v43 = vor.u32 %v6142_v32, %v5204_v31  ;;  %v6097_v28 = vld [vmem:[#allocation8 + $0x748] sm:$0xf0]  ;;  %v5124_v32 = vld [vmem:[#allocation8 + $0x800] sm:$0xf] }
 0x11f   :  { %3250 = vmatpush.bf16.msrb.mxu0 %v4505_v40  ;;  %v4844_v40 = vld [vmem:[#allocation8 + $0x5d0] sm:$0xf] }
 0x120   :  { %3263 = vmatpush.bf16.msrb.mxu1 %v4665_v41  ;;  %3226 = vmatpush.bf16.msrb.mxu2 %v4145_v44  ;;  %v6052_v41 = vld [vmem:[#allocation8 + $0x5e0] sm:$0xf0]  ;;  %v5365_v44 = vor.u32 %v6182_v36, %v5364_v34  ;;  %v6122_v34 = vld [vmem:[#allocation8 + $0x810] sm:$0xf0] }
 0x121   :  { %3235 = vmatpush.bf16.msrb.mxu3 %v4385_v47  ;;  %v4305_v47 = vor.u32 %v5917_v38, %v4304_v37  ;;  %v4845_v52 = vor.u32 %v6052_v41, %v4844_v40  ;;  %v5284_v37 = vld [vmem:[#allocation8 + $0x940] sm:$0xf]  ;;  %v6162_v38 = vld [vmem:[#allocation8 + $0x950] sm:$0xf0]  ;;  %v6032_v40 = vld [vmem:[#allocation8 + $0x540] sm:$0xf0] }
 0x122   :  { %v5004_v41 = vld [vmem:[#allocation8 + $0x710] sm:$0xf] }
 0x123   :  { %3251 = vmatpush.bf16.msrb.mxu0 %v4485_v55  ;;  %v5912_v55 = vld [vmem:[#allocation8 + $0x180] sm:$0xf0] }
 0x124   :  { %3264 = vmatpush.bf16.msrb.mxu1 %v4645_v56  ;;  %3227 = vmatpush.bf16.msrb.mxu2 %v4125_v59  ;;  %v4824_v56 = vld [vmem:[#allocation8 + $0x5a8] sm:$0xf]  ;;  %v5164_v59 = vld [vmem:[#allocation8 + $0x850] sm:$0xf]  ;;  %v4285_v61 = vor.u32 %v5912_v55, %v4284_v54 }
 0x125   :  { %3236 = vmatpush.bf16.msrb.mxu3 %v4365_v60  ;;  %v5345_v60 = vor.u32 %v6177_v53, %v5344_v51  ;;  %v4825_v1 = vor.u32 %v6047_v57, %v4824_v56  ;;  %v5165_v14 = vor.u32 %v6132_v62, %v5164_v59  ;;  %v6157_v53 = vld [vmem:[#allocation8 + $0x928] sm:$0xf0]  ;;  %v4744_v54 = vld [vmem:[#allocation8 + $0x508] sm:$0xf]  ;;  %v6027_v56 = vld [vmem:[#allocation8 + $0x518] sm:$0xf0] }
 0x126   :  { %v4984_v57 = vld [vmem:[#allocation8 + $0x6e8] sm:$0xf]  ;;  %v6685_v59 = vld [vmem:[#allocation10] sm:$0x1f] }
 0x127   :  { %3252 = vmatpush.bf16.msrb.mxu0 %v4465_v4  ;;  %v5907_v4 = vld [vmem:[#allocation8 + $0x158] sm:$0xf0] }
 0x128   :  { %3265 = vmatpush.bf16.msrb.mxu1 %v4625_v11  ;;  %3228 = vmatpush.bf16.msrb.mxu2 %v4105_v15  ;;  %v5044_v11 = vld [vmem:[#allocation8 + $0x760] sm:$0xf]  ;;  %v5325_v15 = vor.u32 %v6172_v0, %v5324_v63  ;;  %v6222_v0 = vld [vmem:[#allocation8 + $0xb30] sm:$0xf0] }
 0x129   :  { %3237 = vmatpush.bf16.msrb.mxu3 %v4345_v16  ;;  %v4265_v16 = vor.u32 %v5907_v4, %v4264_v3  ;;  %v5045_v21 = vor.u32 %v6102_v13, %v5044_v11  ;;  %v5524_v63 = vld [vmem:[#allocation8 + $0xb20] sm:$0xf]  ;;  %v5084_v3 = vld [vmem:[#allocation8 + $0x7b0] sm:$0xf]  ;;  %v6112_v4 = vld [vmem:[#allocation8 + $0x7c0] sm:$0xf0] }
 0x12a   :  { %v5244_v11 = vld [vmem:[#allocation8 + $0x8f0] sm:$0xf]  ;;  %v6152_v13 = vld [vmem:[#allocation8 + $0x900] sm:$0xf0] }
 0x12b   :  { %3253 = vmatpush.bf16.msrb.mxu0 %v4445_v23  ;;  %3229 = vmatmul.bf16.vlgmr.msrb.gmra.mxu2 %v6626_v45  ;;  %v6167_v23 = vld [vmem:[#allocation8 + $0x978] sm:$0xf0] }
 0x12c   :  { %3273 = vmatpush.bf16.msra.mxu2 %v4885_v18  ;;  %3266 = vmatpush.bf16.msrb.mxu1 %v4605_v27  ;;  %v4805_v18 = vor.u32 %v6042_v9, %v4804_v5  ;;  %v5024_v27 = vld [vmem:[#allocation8 + $0x738] sm:$0xf]  ;;  %v5305_v31 = vor.u32 %v6167_v23, %v5304_v22  ;;  %v4745_v5 = vor.u32 %v6027_v56, %v4744_v54  ;;  %v5064_v22 = vld [vmem:[#allocation8 + $0x788] sm:$0xf]  ;;  %v4226_v54 = vld [vmem:[#allocation8 + $0x10c] sm:$0xf0] }
 0x12d   :  { %3238 = vmatpush.bf16.msrb.mxu3 %v4325_v30  ;;  %v5145_v30 = vor.u32 %v6127_v17, %v5144_v12  ;;  %v5025_v36 = vor.u32 %v6097_v28, %v5024_v27  ;;  %v6082_v12 = vld [vmem:[#allocation8 + $0x6d0] sm:$0xf0]  ;;  %v5085_v17 = vor.u32 %v6112_v4, %v5084_v3  ;;  %v5245_v23 = vor.u32 %v6152_v13, %v5244_v11  ;;  %v6147_v27 = vld [vmem:[#allocation8 + $0x8d8] sm:$0xf0]  ;;  %v4366_v11 = vld [vmem:[#allocation8 + $0x224] sm:$0xf0] }
 0x12e   :  { %v6678_v25 = vpop.f32.mrf.mxu2  ;;  %v5890_v3 = vld [vmem:[#allocation8 + $0xd4] sm:$0xf] }
 0x12f   :  { %3254 = vmatpush.bf16.msrb.mxu0 %v4425_v39  ;;  %v6680_v29 = vpop.f32.mrf.mxu0  ;;  %v4764_v39 = vld [vmem:[#allocation8 + $0x530] sm:$0xf] }
 0x130   :  { %3274 = vmatpush.bf16.msra.mxu2 %v4865_v35  ;;  %3267 = vmatpush.bf16.msrb.mxu1 %v4585_v42  ;;  %v6682_v33 = vpop.f32.mrf.mxu1  ;;  %v4785_v35 = vor.u32 %v6037_v26, %v4784_v24  ;;  %v6092_v42 = vld [vmem:[#allocation8 + $0x720] sm:$0xf0]  ;;  %v4765_v46 = vor.u32 %v6032_v40, %v4764_v39  ;;  %v6107_v24 = vld [vmem:[#allocation8 + $0x798] sm:$0xf0]  ;;  %v5224_v26 = vld [vmem:[#allocation8 + $0x8c8] sm:$0xf] }
 0x131   :  { %3239 = vmatpush.bf16.msrb.mxu3 %v4305_v47  ;;  %v5104_v47 = vld [vmem:[#allocation8 + $0x7d8] sm:$0xf]  ;;  %v5005_v51 = vor.u32 %v6092_v42, %v5004_v41  ;;  %v5065_v41 = vor.u32 %v6107_v24, %v5064_v22  ;;  %v5484_v42 = vld [vmem:[#allocation8 + $0xad0] sm:$0xf]  ;;  %v6262_v22 = vld [vmem:[#allocation8 + $0xc70] sm:$0xf0] }
 0x132   :  { %3255 = vmatmul.bf16.vlgmr.msrb.gmra.mxu0 %v6631_v6  ;;  %v5105_v62 = vor.u32 %v6117_v50, %v5104_v47  ;;  %v5225_v50 = vor.u32 %v6147_v27, %v5224_v26 }
 0x133   :  { %3299 = vmatpush.bf16.msra.mxu0 %v5205_v43  ;;  %3268 = vmatmul.bf16.vlgmr.msrb.gmra.mxu1 %v6633_v7  ;;  %v5125_v43 = vor.u32 %v6122_v34, %v5124_v32  ;;  %v5940_v32 = vld [vmem:[#allocation8 + $0x264] sm:$0xf] }
 0x134   :  { %3312 = vmatpush.bf16.msra.mxu1 %v5365_v44  ;;  %3275 = vmatpush.bf16.msra.mxu2 %v4845_v52  ;;  %v5285_v44 = vor.u32 %v6162_v38, %v5284_v37  ;;  %v5264_v52 = vld [vmem:[#allocation8 + $0x918] sm:$0xf]  ;;  %v6077_v38 = vld [vmem:[#allocation8 + $0x6a8] sm:$0xf0] }
 0x135   :  { %3240 = vmatpush.bf16.msrb.mxu3 %v4285_v61  ;;  %v4944_v37 = vld [vmem:[#allocation8 + $0x698] sm:$0xf] }
 0x136   :  { %v2972_v55 = vpop.f32.mrf.mxu2 }
 0x137   :  { %3300 = vmatpush.bf16.msra.mxu0 %v5185_v58  ;;  %v6087_v58 = vld [vmem:[#allocation8 + $0x6f8] sm:$0xf0] }
 0x138   :  { %3313 = vmatpush.bf16.msra.mxu1 %v5345_v60  ;;  %3276 = vmatpush.bf16.msra.mxu2 %v4825_v1  ;;  %v2998_v60 = vpop.f32.mrf.mxu0  ;;  %v3011_v61 = vpop.f32.mrf.mxu1  ;;  %v5265_v1 = vor.u32 %v6157_v53, %v5264_v52  ;;  %v4985_v9 = vor.u32 %v6087_v58, %v4984_v57  ;;  %v4945_v52 = vor.u32 %v6077_v38, %v4944_v37  ;;  %v5895_v53 = vld [vmem:[#allocation8 + $0xfc] sm:$0xf]  ;;  %v4386_v58 = vld [vmem:[#allocation8 + $0x24c] sm:$0xf0]  ;;  %v5424_v37 = vld [vmem:[#allocation8 + $0xa58] sm:$0xf] }
 0x139   :  { %3241 = vmatpush.bf16.msrb.mxu3 %v4265_v16  ;;  %v4964_v16 = vld [vmem:[#allocation8 + $0x6c0] sm:$0xf]  ;;  %v5935_v55 = vld [vmem:[#allocation8 + $0x23c] sm:$0xf]  ;;  %v4924_v60 = vld [vmem:[#allocation8 + $0x670] sm:$0xf] }
 0x13a   :  { %v4965_v28 = vor.u32 %v6082_v12, %v4964_v16  ;;  %v6072_v61 = vld [vmem:[#allocation8 + $0x680] sm:$0xf0]  ;;  %v4389_v4 = vor.u32 %v5935_v55, %v4386_v58  ;;  %v6067_v16 = vld [vmem:[#allocation8 + $0x658] sm:$0xf0]  ;;  %v5444_v12 = vld [vmem:[#allocation8 + $0xa80] sm:$0xf] }
 0x13b   :  { %3301 = vmatpush.bf16.msra.mxu0 %v5165_v14  ;;  %v871_v14 = vperm.slane %v6685_v59, 0  ;;  %v6197_v38 = vld [vmem:[#allocation8 + $0xa68] sm:$0xf0]  ;;  %v6192_v55 = vld [vmem:[#allocation8 + $0xa40] sm:$0xf0] }
 0x13c   :  { %3314 = vmatpush.bf16.msra.mxu1 %v5325_v15  ;;  %3277 = vmatpush.bf16.msra.mxu2 %v4805_v18  ;;  %v5525_v15 = vor.u32 %v6222_v0, %v5524_v63  ;;  %v5504_v18 = vld [vmem:[#allocation8 + $0xaf8] sm:$0xf]  ;;  %v6207_v63 = vld [vmem:[#allocation8 + $0xab8] sm:$0xf0]  ;;  %v5644_v58 = vld [vmem:[#allocation8 + $0xc10] sm:$0xf] }
 0x13d   :  { %3286 = vmatpush.bf16.msra.mxu3 %v5045_v21  ;;  %v6217_v21 = vld [vmem:[#allocation8 + $0xb08] sm:$0xf0]  ;;  %v2971_v34 = vadd.f32 %v6678_v25, %v871_v14 }
 0x13e   :  { %3242 = vmatmul.bf16.vlgmr.msrb.gmra.mxu3 %v6641_v48  ;;  %v2983_v39 = vpop.f32.mrf.mxu3 }
 0x13f   :  { %3302 = vmatpush.bf16.msra.mxu0 %v5145_v30  ;;  %v5900_v30 = vld [vmem:[#allocation8 + $0x124] sm:$0xf] }
 0x140   :  { %3315 = vmatpush.bf16.msra.mxu1 %v5305_v31  ;;  %3278 = vmatpush.bf16.msra.mxu2 %v4785_v35  ;;  %v4246_v31 = vld [vmem:[#allocation8 + $0x134] sm:$0xf0]  ;;  %v5505_v35 = vor.u32 %v6217_v21, %v5504_v18  ;;  %v6689_v40 = vpop.f32.mrf.mxu0  ;;  %v6691_v47 = vpop.f32.mrf.mxu1  ;;  %v6202_v18 = vld [vmem:[#allocation8 + $0xa90] sm:$0xf0]  ;;  %v5684_v21 = vld [vmem:[#allocation8 + $0xc60] sm:$0xf] }
 0x141   :  { %3287 = vmatpush.bf16.msra.mxu3 %v5025_v36  ;;  %v4406_v36 = vld [vmem:[#allocation8 + $0x274] sm:$0xf0]  ;;  %v4249_v25 = vor.u32 %v5900_v30, %v4246_v31  ;;  %v5885_v30 = vld [vmem:[#allocation8 + $0xac] sm:$0xf]  ;;  %v4186_v31 = vld [vmem:[#allocation8 + $0xbc] sm:$0xf0] }
 0x143   :  { %3303 = vmatpush.bf16.msra.mxu0 %v5125_v43  ;;  %v6212_v43 = vld [vmem:[#allocation8 + $0xae0] sm:$0xf0] }
 0x144   :  { %3316 = vmatpush.bf16.msra.mxu1 %v5285_v44  ;;  %3279 = vmatpush.bf16.msra.mxu2 %v4765_v46  ;;  %v2984_v44 = vadd.f32 %v2983_v39, %v2971_v34  ;;  %v3022_v46 = vpop.f32.mrf.mxu2  ;;  %v5485_v57 = vor.u32 %v6212_v43, %v5484_v42  ;;  %v5685_v34 = vor.u32 %v6262_v22, %v5684_v21  ;;  %v5664_v39 = vld [vmem:[#allocation8 + $0xc38] sm:$0xf]  ;;  %v872_v42 = vperm.slane %v6685_v59, 1  ;;  %v5980_v21 = vld [vmem:[#allocation8 + $0x3a4] sm:$0xf] }
 0x145   :  { %3288 = vmatpush.bf16.msra.mxu3 %v5005_v51  ;;  %v4409_v51 = vor.u32 %v5940_v32, %v4406_v36  ;;  %v5445_v32 = vor.u32 %v6202_v18, %v5444_v12  ;;  %v4346_v36 = vld [vmem:[#allocation8 + $0x1fc] sm:$0xf0]  ;;  %v4189_v43 = vor.u32 %v5885_v30, %v4186_v31  ;;  %v5624_v12 = vld [vmem:[#allocation8 + $0xbe8] sm:$0xf]  ;;  %v4566_v22 = vld [vmem:[#allocation8 + $0x3b4] sm:$0xf0] }
 0x146   :  { %v2997_v56 = vadd.f32 %v6680_v29, %v2984_v44  ;;  %v5930_v29 = vld [vmem:[#allocation8 + $0x214] sm:$0xf]  ;;  %v4286_v31 = vld [vmem:[#allocation8 + $0x184] sm:$0xf0] }
 0x147   :  { %3304 = vmatpush.bf16.msra.mxu0 %v5105_v62  ;;  %v5464_v62 = vld [vmem:[#allocation8 + $0xaa8] sm:$0xf]  ;;  %v4369_v27 = vor.u32 %v5930_v29, %v4366_v11  ;;  %v5910_v30 = vld [vmem:[#allocation8 + $0x174] sm:$0xf] }
 0x148   :  { %3317 = vmatpush.bf16.msra.mxu1 %v5265_v1  ;;  %3280 = vmatpush.bf16.msra.mxu2 %v4745_v5  ;;  %v3010_v0 = vadd.f32 %v6682_v33, %v2997_v56  ;;  %v4229_v1 = vor.u32 %v5895_v53, %v4226_v54  ;;  %v4925_v5 = vor.u32 %v6072_v61, %v4924_v60  ;;  %v2985_v33 = vpop.f32.mrf.mxu3  ;;  %v4326_v53 = vld [vmem:[#allocation8 + $0x1d4] sm:$0xf0]  ;;  %v5404_v54 = vld [vmem:[#allocation8 + $0xa30] sm:$0xf]  ;;  %v6252_v60 = vld [vmem:[#allocation8 + $0xc20] sm:$0xf0] }
 0x149   :  { %3289 = vmatpush.bf16.msra.mxu3 %v4985_v9  ;;  %v4206_v9 = vld [vmem:[#allocation8 + $0xe4] sm:$0xf0]  ;;  %v5465_v14 = vor.u32 %v6207_v63, %v5464_v62  ;;  %v5645_v11 = vor.u32 %v6252_v60, %v5644_v58  ;;  %v6247_v33 = vld [vmem:[#allocation8 + $0xbf8] sm:$0xf0]  ;;  %v6237_v58 = vld [vmem:[#allocation8 + $0xba8] sm:$0xf0] }
 0x14a   :  { %v3023_v13 = vadd.f32 %v3022_v46, %v3010_v0  ;;  %v4209_v24 = vor.u32 %v5890_v3, %v4206_v9  ;;  %v5920_v46 = vld [vmem:[#allocation8 + $0x1c4] sm:$0xf]  ;;  %v5405_v3 = vor.u32 %v6192_v55, %v5404_v54 }
 0x14b   :  { %3305 = vmatpush.bf16.msra.mxu0 %v5085_v17  ;;  %3281 = vmatmul.bf16.vlgmr.msra.gmra.mxu2 %v6643_v49  ;;  %v3050_v17 = vpop.f32.mrf.mxu0  ;;  %v4329_v0 = vor.u32 %v5920_v46, %v4326_v53  ;;  %v4886_v53 = vld [vmem:[#allocation8 + $0x634] sm:$0xf0]  ;;  %v6100_v54 = vld [vmem:[#allocation8 + $0x764] sm:$0xf] }
 0x14c   :  { %3325 = vmatpush.bf16.msrb.mxu2 %v5525_v15  ;;  %3318 = vmatpush.bf16.msra.mxu1 %v5245_v23  ;;  %v4904_v15 = vld [vmem:[#allocation8 + $0x648] sm:$0xf]  ;;  %v3063_v23 = vpop.f32.mrf.mxu1  ;;  %v3024_v26 = vpop.f32.mrf.mxu2 }
 0x14d   :  { %3290 = vmatpush.bf16.msra.mxu3 %v4965_v28  ;;  %v4905_v28 = vor.u32 %v6067_v16, %v4904_v15  ;;  %v5384_v15 = vld [vmem:[#allocation8 + $0xa08] sm:$0xf]  ;;  %v6187_v16 = vld [vmem:[#allocation8 + $0xa18] sm:$0xf0] }
 0x14f   :  { %3306 = vmatpush.bf16.msra.mxu0 %v5065_v41  ;;  %v6257_v41 = vld [vmem:[#allocation8 + $0xc48] sm:$0xf0] }
 0x150   :  { %3326 = vmatpush.bf16.msrb.mxu2 %v5505_v35  ;;  %3319 = vmatpush.bf16.msra.mxu1 %v5225_v50  ;;  %v5925_v35 = vld [vmem:[#allocation8 + $0x1ec] sm:$0xf]  ;;  %v5880_v50 = vld [vmem:[#allocation8 + $0x84] sm:$0xf]  ;;  %v3035_v56 = vpop.f32.mrf.mxu3 }
 0x151   :  { %3291 = vmatpush.bf16.msra.mxu3 %v4945_v52  ;;  %v4349_v44 = vor.u32 %v5925_v35, %v4346_v36  ;;  %v5665_v52 = vor.u32 %v6257_v41, %v5664_v39  ;;  %v3036_v61 = vadd.f32 %v3035_v56, %v3023_v13  ;;  %v5915_v13 = vld [vmem:[#allocation8 + $0x19c] sm:$0xf]  ;;  %v4569_v35 = vor.u32 %v5980_v21, %v4566_v22  ;;  %v5604_v36 = vld [vmem:[#allocation8 + $0xbc0] sm:$0xf]  ;;  %v4546_v41 = vld [vmem:[#allocation8 + $0x38c] sm:$0xf0] }
 0x152   :  { %3307 = vmatmul.bf16.vlgmr.msra.gmra.mxu0 %v6649_v19  ;;  %v5975_v39 = vld [vmem:[#allocation8 + $0x37c] sm:$0xf]  ;;  %v5046_v56 = vld [vmem:[#allocation8 + $0x774] sm:$0xf0] }
 0x153   :  { %3351 = vmatpush.bf16.msrb.mxu0 %v4249_v25  ;;  %3320 = vmatmul.bf16.vlgmr.msra.gmra.mxu1 %v6651_v20  ;;  %v4166_v25 = vld [vmem:[#allocation8 + $0x94] sm:$0xf0]  ;;  %v3049_v9 = vadd.f32 %v6689_v40, %v3036_v61  ;;  %v5870_v40 = vld [vmem:[#allocation8 + $0x34] sm:$0xf]  ;;  %v4549_v55 = vor.u32 %v5975_v39, %v4546_v41 }
 0x154   :  { %3364 = vmatpush.bf16.msrb.mxu1 %v4409_v51  ;;  %3327 = vmatpush.bf16.msrb.mxu2 %v5485_v57  ;;  %v5425_v51 = vor.u32 %v6197_v38, %v5424_v37  ;;  %v3100_v57 = vpop.f32.mrf.mxu0  ;;  %v3113_v62 = vpop.f32.mrf.mxu1  ;;  %v4169_v63 = vor.u32 %v5880_v50, %v4166_v25  ;;  %v6242_v37 = vld [vmem:[#allocation8 + $0xbd0] sm:$0xf0]  ;;  %v5905_v50 = vld [vmem:[#allocation8 + $0x14c] sm:$0xf]  ;;  %v4266_v25 = vld [vmem:[#allocation8 + $0x15c] sm:$0xf0] }
 0x155   :  { %3292 = vmatpush.bf16.msra.mxu3 %v4925_v5  ;;  %v3101_v59 = vadd.f32 %v3100_v57, %v872_v42  ;;  %v4146_v5 = vld [vmem:[#allocation8 + $0x6c] sm:$0xf0]  ;;  %v3062_v17 = vadd.f32 %v6691_v47, %v3049_v9  ;;  %v5865_v42 = vld [vmem:[#allocation8 + $0xc] sm:$0xf]  ;;  %v5584_v57 = vld [vmem:[#allocation8 + $0xb98] sm:$0xf] }
 0x156   :  { %v5970_v61 = vld [vmem:[#allocation8 + $0x354] sm:$0xf] }
 0x157   :  { %3352 = vmatpush.bf16.msrb.mxu0 %v4229_v1  ;;  %v3074_v1 = vpop.f32.mrf.mxu2  ;;  %v6701_v29 = vadd.f32 %v3113_v62, %v3101_v59  ;;  %v4526_v59 = vld [vmem:[#allocation8 + $0x364] sm:$0xf0]  ;;  %v4269_v62 = vor.u32 %v5905_v50, %v4266_v25  ;;  %v4466_v50 = vld [vmem:[#allocation8 + $0x2ec] sm:$0xf0]  ;;  %v6015_v25 = vld [vmem:[#allocation8 + $0x4bc] sm:$0xf] }
 0x158   :  { %3365 = vmatpush.bf16.msrb.mxu1 %v4389_v4  ;;  %3328 = vmatpush.bf16.msrb.mxu2 %v5465_v14  ;;  %v5875_v4 = vld [vmem:[#allocation8 + $0x5c] sm:$0xf]  ;;  %v4306_v14 = vld [vmem:[#allocation8 + $0x1ac] sm:$0xf0]  ;;  %v3075_v26 = vadd.f32 %v3074_v1, %v3062_v17  ;;  %v5585_v1 = vor.u32 %v6237_v58, %v5584_v57  ;;  %v4529_v9 = vor.u32 %v5970_v61, %v4526_v59  ;;  %v6080_v58 = vld [vmem:[#allocation8 + $0x6c4] sm:$0xf] }
 0x159   :  { %3293 = vmatpush.bf16.msra.mxu3 %v4905_v28  ;;  %v4149_v18 = vor.u32 %v5875_v4, %v4146_v5  ;;  %v4309_v23 = vor.u32 %v5915_v13, %v4306_v14  ;;  %v5625_v28 = vor.u32 %v6247_v33, %v5624_v12  ;;  %v4866_v4 = vld [vmem:[#allocation8 + $0x60c] sm:$0xf0]  ;;  %v6095_v5 = vld [vmem:[#allocation8 + $0x73c] sm:$0xf]  ;;  %v6232_v14 = vld [vmem:[#allocation8 + $0xb80] sm:$0xf0] }
 0x15a   :  { %v5564_v13 = vld [vmem:[#allocation8 + $0xb70] sm:$0xf]  ;;  %v4506_v12 = vld [vmem:[#allocation8 + $0x33c] sm:$0xf0]  ;;  %v5950_v61 = vld [vmem:[#allocation8 + $0x2b4] sm:$0xf] }
 0x15b   :  { %3353 = vmatpush.bf16.msrb.mxu0 %v4209_v24  ;;  %v4126_v24 = vld [vmem:[#allocation8 + $0x44] sm:$0xf0]  ;;  %v5565_v22 = vor.u32 %v6232_v14, %v5564_v13  ;;  %v4786_v13 = vld [vmem:[#allocation8 + $0x56c] sm:$0xf0] }
 0x15c   :  { %3366 = vmatpush.bf16.msrb.mxu1 %v4369_v27  ;;  %3329 = vmatpush.bf16.msrb.mxu2 %v5445_v32  ;;  %v5385_v27 = vor.u32 %v6187_v16, %v5384_v15  ;;  %v3037_v32 = vpop.f32.mrf.mxu3  ;;  %v3115_v47 = vpop.f32.mrf.mxu1  ;;  %v4129_v38 = vor.u32 %v5870_v40, %v4126_v24  ;;  %v5965_v16 = vld [vmem:[#allocation8 + $0x32c] sm:$0xf]  ;;  %v6090_v40 = vld [vmem:[#allocation8 + $0x714] sm:$0xf]  ;;  %v5006_v24 = vld [vmem:[#allocation8 + $0x724] sm:$0xf0] }
 0x15d   :  { %3338 = vmatpush.bf16.msrb.mxu3 %v5685_v34  ;;  %v3102_v34 = vpop.f32.mrf.mxu0  ;;  %v6020_v32 = vld [vmem:[#allocation8 + $0x4e4] sm:$0xf]  ;;  %v6045_v47 = vld [vmem:[#allocation8 + $0x5ac] sm:$0xf] }
 0x15e   :  { %3294 = vmatmul.bf16.vlgmr.msra.gmra.mxu3 %v6655_v2  ;;  %v4726_v34 = vld [vmem:[#allocation8 + $0x4f4] sm:$0xf0] }
 0x15f   :  { %3354 = vmatpush.bf16.msrb.mxu0 %v4189_v43  ;;  %v4289_v43 = vor.u32 %v5910_v30, %v4286_v31  ;;  %v3076_v46 = vpop.f32.mrf.mxu2  ;;  %v6227_v30 = vld [vmem:[#allocation8 + $0xb58] sm:$0xf0]  ;;  %v5960_v31 = vld [vmem:[#allocation8 + $0x304] sm:$0xf]  ;;  %v4729_v41 = vor.u32 %v6020_v32, %v4726_v34  ;;  %v4926_v32 = vld [vmem:[#allocation8 + $0x684] sm:$0xf0] }
 0x160   :  { %3367 = vmatpush.bf16.msrb.mxu1 %v4349_v44  ;;  %3330 = vmatpush.bf16.msrb.mxu2 %v5425_v51  ;;  %v4106_v44 = vld [vmem:[#allocation8 + $0x1c] sm:$0xf0]  ;;  %v5605_v51 = vor.u32 %v6242_v37, %v5604_v36  ;;  %v5009_v36 = vor.u32 %v6090_v40, %v5006_v24  ;;  %v4706_v46 = vld [vmem:[#allocation8 + $0x4cc] sm:$0xf0]  ;;  %v5206_v40 = vld [vmem:[#allocation8 + $0x8b4] sm:$0xf0] }
 0x161   :  { %3339 = vmatpush.bf16.msrb.mxu3 %v5665_v52  ;;  %v6060_v52 = vld [vmem:[#allocation8 + $0x624] sm:$0xf]  ;;  %v4109_v60 = vor.u32 %v5865_v42, %v4106_v44  ;;  %v6085_v42 = vld [vmem:[#allocation8 + $0x6ec] sm:$0xf]  ;;  %v5955_v44 = vld [vmem:[#allocation8 + $0x2dc] sm:$0xf]  ;;  %v4709_v57 = vor.u32 %v6015_v25, %v4706_v46 }
 0x162   :  { %v6065_v25 = vld [vmem:[#allocation8 + $0x64c] sm:$0xf]  ;;  %v4906_v46 = vld [vmem:[#allocation8 + $0x65c] sm:$0xf0] }
 0x163   :  { %3355 = vmatpush.bf16.msrb.mxu0 %v4169_v63  ;;  %v4889_v63 = vor.u32 %v6060_v52, %v4886_v53 }
 0x164   :  { %3368 = vmatpush.bf16.msrb.mxu1 %v4329_v0  ;;  %3331 = vmatpush.bf16.msrb.mxu2 %v5405_v3  ;;  %v5049_v0 = vor.u32 %v6100_v54, %v5046_v56  ;;  %v6055_v3 = vld [vmem:[#allocation8 + $0x5fc] sm:$0xf]  ;;  %v3087_v15 = vpop.f32.mrf.mxu3  ;;  %v6040_v54 = vld [vmem:[#allocation8 + $0x584] sm:$0xf]  ;;  %v4469_v56 = vor.u32 %v5955_v44, %v4466_v50  ;;  %v4746_v50 = vld [vmem:[#allocation8 + $0x51c] sm:$0xf0] }
 0x165   :  { %3340 = vmatpush.bf16.msrb.mxu3 %v5645_v11  ;;  %v5026_v11 = vld [vmem:[#allocation8 + $0x74c] sm:$0xf0]  ;;  %v6705_v33 = vadd.f32 %v3087_v15, %v3075_v26  ;;  %v4869_v17 = vor.u32 %v6055_v3, %v4866_v4  ;;  %v4486_v26 = vld [vmem:[#allocation8 + $0x314] sm:$0xf0] }
 0x166   :  { %v5029_v21 = vor.u32 %v6095_v5, %v5026_v11  ;;  %v4489_v39 = vor.u32 %v5960_v31, %v4486_v26  ;;  %v6035_v11 = vld [vmem:[#allocation8 + $0x55c] sm:$0xf]  ;;  %v6070_v26 = vld [vmem:[#allocation8 + $0x674] sm:$0xf] }
 0x167   :  { %3356 = vmatpush.bf16.msrb.mxu0 %v4149_v18  ;;  %v6050_v18 = vld [vmem:[#allocation8 + $0x5d4] sm:$0xf]  ;;  %v4929_v44 = vor.u32 %v6070_v26, %v4926_v32  ;;  %v5985_v26 = vld [vmem:[#allocation8 + $0x3cc] sm:$0xf]  ;;  %v4586_v32 = vld [vmem:[#allocation8 + $0x3dc] sm:$0xf0] }
 0x168   :  { %3369 = vmatpush.bf16.msrb.mxu1 %v4309_v23  ;;  %3332 = vmatpush.bf16.msrb.mxu2 %v5385_v27  ;;  %v4846_v23 = vld [vmem:[#allocation8 + $0x5e4] sm:$0xf0]  ;;  %v4509_v27 = vor.u32 %v5965_v16, %v4506_v12  ;;  %v6075_v16 = vld [vmem:[#allocation8 + $0x69c] sm:$0xf]  ;;  %v4946_v12 = vld [vmem:[#allocation8 + $0x6ac] sm:$0xf0] }
 0x169   :  { %3341 = vmatpush.bf16.msrb.mxu3 %v5625_v28  ;;  %v5544_v28 = vld [vmem:[#allocation8 + $0xb48] sm:$0xf]  ;;  %v4949_v24 = vor.u32 %v6075_v16, %v4946_v12  ;;  %v5666_v16 = vld [vmem:[#allocation8 + $0xc4c] sm:$0xf0]  ;;  %v5990_v12 = vld [vmem:[#allocation8 + $0x3f4] sm:$0xf] }
 0x16a   :  { %v5545_v37 = vor.u32 %v6227_v30, %v5544_v28  ;;  %v4766_v28 = vld [vmem:[#allocation8 + $0x544] sm:$0xf0]  ;;  %vm3611_vm11 = vcmp.ge.f32.partialorder %v6705_v33, 0.0 }
 0x16b   :  { %3357 = vmatpush.bf16.msrb.mxu0 %v4129_v38  ;;  %3333 = vmatmul.bf16.vlgmr.msrb.gmra.mxu2 %v6657_v10  ;;  %v4826_v38 = vld [vmem:[#allocation8 + $0x5bc] sm:$0xf0] }
 0x16c   :  { %3377 = vmatpush.bf16.msra.mxu2 %v4569_v35  ;;  %3370 = vmatpush.bf16.msrb.mxu1 %v4289_v43  ;;  %v4849_v35 = vor.u32 %v6050_v18, %v4846_v23  ;;  %v4986_v43 = vld [vmem:[#allocation8 + $0x6fc] sm:$0xf0]  ;;  %v4829_v52 = vor.u32 %v6045_v47, %v4826_v38  ;;  %v6140_v23 = vld [vmem:[#allocation8 + $0x8a4] sm:$0xf]  ;;  %v4646_v47 = vld [vmem:[#allocation8 + $0x454] sm:$0xf0] }
 0x16d   :  { %3342 = vmatpush.bf16.msrb.mxu3 %v5605_v51  ;;  %v3089_v51 = vpop.f32.mrf.mxu3  ;;  %v4989_v53 = vor.u32 %v6085_v42, %v4986_v43  ;;  %v4426_v18 = vld [vmem:[#allocation8 + $0x29c] sm:$0xf0]  ;;  %v5186_v42 = vld [vmem:[#allocation8 + $0x88c] sm:$0xf0]  ;;  %v6025_v43 = vld [vmem:[#allocation8 + $0x50c] sm:$0xf] }
 0x16e   :  { %v3126_v59 = vpop.f32.mrf.mxu2 }
 0x16f   :  { %3358 = vmatpush.bf16.msrb.mxu0 %v4109_v60  ;;  %v4966_v60 = vld [vmem:[#allocation8 + $0x6d4] sm:$0xf0]  ;;  %v6712_v3 = vadd.f32 %v3126_v59, %v6701_v29  ;;  %v6005_v29 = vld [vmem:[#allocation8 + $0x46c] sm:$0xf]  ;;  %v5166_v59 = vld [vmem:[#allocation8 + $0x864] sm:$0xf0] }
 0x170   :  { %3378 = vmatpush.bf16.msra.mxu2 %v4549_v55  ;;  %3371 = vmatpush.bf16.msrb.mxu1 %v4269_v62  ;;  %v4806_v55 = vld [vmem:[#allocation8 + $0x594] sm:$0xf0]  ;;  %v6709_v62 = vpop.f32.mrf.mxu0  ;;  %v6714_v4 = vpop.f32.mrf.mxu1 }
 0x171   :  { %3343 = vmatpush.bf16.msrb.mxu3 %v5585_v1  ;;  %v4686_v1 = vld [vmem:[#allocation8 + $0x4a4] sm:$0xf0]  ;;  %v4809_v5 = vor.u32 %v6040_v54, %v4806_v55  ;;  %v6260_v54 = vld [vmem:[#allocation8 + $0xc64] sm:$0xf] }
 0x172   :  { %3359 = vmatmul.bf16.vlgmr.msrb.gmra.mxu0 %v6626_v45 }
 0x173   :  { %3403 = vmatpush.bf16.msra.mxu0 %v4889_v63  ;;  %3372 = vmatmul.bf16.vlgmr.msrb.gmra.mxu1 %v6641_v48  ;;  %v4446_v63 = vld [vmem:[#allocation8 + $0x2c4] sm:$0xf0] }
 0x174   :  { %3416 = vmatpush.bf16.msra.mxu1 %v5049_v0  ;;  %3379 = vmatpush.bf16.msra.mxu2 %v4529_v9  ;;  %v6010_v0 = vld [vmem:[#allocation8 + $0x494] sm:$0xf]  ;;  %v4969_v9 = vor.u32 %v6080_v58, %v4966_v60  ;;  %v4449_v14 = vor.u32 %v5950_v61, %v4446_v63  ;;  %v4626_v58 = vld [vmem:[#allocation8 + $0x42c] sm:$0xf0]  ;;  %v4749_v60 = vor.u32 %v6025_v43, %v4746_v50 }
 0x175   :  { %3344 = vmatpush.bf16.msrb.mxu3 %v5565_v22  ;;  %v4689_v15 = vor.u32 %v6010_v0, %v4686_v1  ;;  %v4789_v22 = vor.u32 %v6035_v11, %v4786_v13  ;;  %v6130_v61 = vld [vmem:[#allocation8 + $0x854] sm:$0xf]  ;;  %v4909_v63 = vor.u32 %v6065_v25, %v4906_v46  ;;  %v5506_v11 = vld [vmem:[#allocation8 + $0xb0c] sm:$0xf0]  ;;  %v6255_v13 = vld [vmem:[#allocation8 + $0xc3c] sm:$0xf] }
 0x176   :  { %v3128_v34 = vpop.f32.mrf.mxu2  ;;  %v6245_v25 = vld [vmem:[#allocation8 + $0xbec] sm:$0xf]  ;;  %v5626_v46 = vld [vmem:[#allocation8 + $0xbfc] sm:$0xf0] }
 0x177   :  { %3404 = vmatpush.bf16.msra.mxu0 %v4869_v17  ;;  %v5945_v17 = vld [vmem:[#allocation8 + $0x28c] sm:$0xf]  ;;  %v6120_v34 = vld [vmem:[#allocation8 + $0x804] sm:$0xf] }
 0x178   :  { %3417 = vmatpush.bf16.msra.mxu1 %v5029_v21  ;;  %3380 = vmatpush.bf16.msra.mxu2 %v4509_v27  ;;  %v4666_v21 = vld [vmem:[#allocation8 + $0x47c] sm:$0xf0]  ;;  %v6030_v27 = vld [vmem:[#allocation8 + $0x534] sm:$0xf]  ;;  %v4429_v30 = vor.u32 %v5945_v17, %v4426_v18  ;;  %v3167_v38 = vpop.f32.mrf.mxu1  ;;  %v4606_v17 = vld [vmem:[#allocation8 + $0x404] sm:$0xf0] }
 0x179   :  { %3345 = vmatpush.bf16.msrb.mxu3 %v5545_v37  ;;  %v4669_v31 = vor.u32 %v6005_v29, %v4666_v21  ;;  %v6000_v37 = vld [vmem:[#allocation8 + $0x444] sm:$0xf]  ;;  %v6125_v29 = vld [vmem:[#allocation8 + $0x82c] sm:$0xf]  ;;  %v5146_v21 = vld [vmem:[#allocation8 + $0x83c] sm:$0xf0] }
 0x17a   :  { %v4649_v51 = vor.u32 %v6000_v37, %v4646_v47  ;;  %v5366_v37 = vld [vmem:[#allocation8 + $0x9f4] sm:$0xf0] }
 0x17b   :  { %3405 = vmatpush.bf16.msra.mxu0 %v4849_v35  ;;  %v3154_v35 = vpop.f32.mrf.mxu0 }
 0x17c   :  { %3418 = vmatpush.bf16.msra.mxu1 %v5009_v36  ;;  %3381 = vmatpush.bf16.msra.mxu2 %v4489_v39  ;;  %v5209_v36 = vor.u32 %v6140_v23, %v5206_v40  ;;  %v4769_v39 = vor.u32 %v6030_v27, %v4766_v28  ;;  %v6210_v23 = vld [vmem:[#allocation8 + $0xad4] sm:$0xf]  ;;  %v4609_v27 = vor.u32 %v5990_v12, %v4606_v17  ;;  %v5486_v28 = vld [vmem:[#allocation8 + $0xae4] sm:$0xf0]  ;;  %v5126_v35 = vld [vmem:[#allocation8 + $0x814] sm:$0xf0] }
 0x17d   :  { %3390 = vmatpush.bf16.msra.mxu3 %v4729_v41  ;;  %v6135_v41 = vld [vmem:[#allocation8 + $0x87c] sm:$0xf]  ;;  %v5489_v47 = vor.u32 %v6210_v23, %v5486_v28  ;;  %v5426_v17 = vld [vmem:[#allocation8 + $0xa6c] sm:$0xf0]  ;;  %v6105_v23 = vld [vmem:[#allocation8 + $0x78c] sm:$0xf] }
 0x17e   :  { %3346 = vmatmul.bf16.vlgmr.msrb.gmra.mxu3 %v6664_v8  ;;  %v5189_v55 = vor.u32 %v6135_v41, %v5186_v42  ;;  %v6205_v41 = vld [vmem:[#allocation8 + $0xaac] sm:$0xf]  ;;  %v5466_v42 = vld [vmem:[#allocation8 + $0xabc] sm:$0xf0]  ;;  %v6195_v12 = vld [vmem:[#allocation8 + $0xa5c] sm:$0xf] }
 0x17f   :  { %3406 = vmatpush.bf16.msra.mxu0 %v4829_v52  ;;  %v6220_v52 = vld [vmem:[#allocation8 + $0xb24] sm:$0xf]  ;;  %v5429_v28 = vor.u32 %v6195_v12, %v5426_v17  ;;  %v5978_v12 = vld [vmem:[#allocation8 + $0x390] sm:$0xf0]  ;;  %v4712_v17 = vld [vmem:[#allocation8 + $0x4c0] sm:$0xf] }
 0x180   :  { %3419 = vmatpush.bf16.msra.mxu1 %v4989_v53  ;;  %3382 = vmatpush.bf16.msra.mxu2 %v4469_v56  ;;  %v5526_v53 = vld [vmem:[#allocation8 + $0xb34] sm:$0xf0] }
 0x181   :  { %3391 = vmatpush.bf16.msra.mxu3 %v4709_v57  ;;  %v5686_v56 = vld [vmem:[#allocation8 + $0xc74] sm:$0xf0]  ;;  %v5995_v57 = vld [vmem:[#allocation8 + $0x41c] sm:$0xf]  ;;  %v5529_v0 = vor.u32 %v6220_v52, %v5526_v53  ;;  %v5106_v52 = vld [vmem:[#allocation8 + $0x7ec] sm:$0xf0] }
 0x182   :  { %v5689_v1 = vor.u32 %v6260_v54, %v5686_v56  ;;  %v6175_v53 = vld [vmem:[#allocation8 + $0x9bc] sm:$0xf]  ;;  %v5346_v54 = vld [vmem:[#allocation8 + $0x9cc] sm:$0xf0]  ;;  %v6200_v56 = vld [vmem:[#allocation8 + $0xa84] sm:$0xf] }
 0x183   :  { %3407 = vmatpush.bf16.msra.mxu0 %v4809_v5  ;;  %v4629_v5 = vor.u32 %v5995_v57, %v4626_v58  ;;  %v5446_v57 = vld [vmem:[#allocation8 + $0xa94] sm:$0xf0] }
 0x184   :  { %3420 = vmatpush.bf16.msra.mxu1 %v4969_v9  ;;  %3383 = vmatpush.bf16.msra.mxu2 %v4449_v14  ;;  %v6215_v9 = vld [vmem:[#allocation8 + $0xafc] sm:$0xf]  ;;  %v3139_v14 = vpop.f32.mrf.mxu3 }
 0x185   :  { %3392 = vmatpush.bf16.msra.mxu3 %v4689_v15  ;;  %v5169_v15 = vor.u32 %v6130_v61, %v5166_v59  ;;  %v3140_v18 = vadd.f32 %v3139_v14, %v6712_v3  ;;  %v5149_v3 = vor.u32 %v6125_v29, %v5146_v21  ;;  %v5349_v61 = vor.u32 %v6175_v53, %v5346_v54  ;;  %v6240_v59 = vld [vmem:[#allocation8 + $0xbc4] sm:$0xf]  ;;  %v6235_v21 = vld [vmem:[#allocation8 + $0xb9c] sm:$0xf]  ;;  %v5546_v53 = vld [vmem:[#allocation8 + $0xb5c] sm:$0xf0] }
 0x187   :  { %3408 = vmatpush.bf16.msra.mxu0 %v4789_v22  ;;  %v5509_v22 = vor.u32 %v6215_v9, %v5506_v11  ;;  %v3153_v40 = vadd.f32 %v6709_v62, %v3140_v18  ;;  %v5086_v9 = vld [vmem:[#allocation8 + $0x7c4] sm:$0xf0]  ;;  %v6170_v11 = vld [vmem:[#allocation8 + $0x994] sm:$0xf] }
 0x188   :  { %3421 = vmatpush.bf16.msra.mxu1 %v4949_v24  ;;  %3384 = vmatpush.bf16.msra.mxu2 %v4429_v30  ;;  %v5669_v24 = vor.u32 %v6255_v13, %v5666_v16  ;;  %v6250_v30 = vld [vmem:[#allocation8 + $0xc14] sm:$0xf]  ;;  %v5326_v13 = vld [vmem:[#allocation8 + $0x9a4] sm:$0xf0] }
 0x189   :  { %3393 = vmatpush.bf16.msra.mxu3 %v4669_v31  ;;  %v5646_v31 = vld [vmem:[#allocation8 + $0xc24] sm:$0xf0]  ;;  %v3166_v62 = vadd.f32 %v6714_v4, %v3153_v40  ;;  %v5469_v4 = vor.u32 %v6205_v41, %v5466_v42  ;;  %v5329_v29 = vor.u32 %v6170_v11, %v5326_v13  ;;  %v5066_v40 = vld [vmem:[#allocation8 + $0x79c] sm:$0xf0]  ;;  %v5286_v41 = vld [vmem:[#allocation8 + $0x954] sm:$0xf0] }
 0x18a   :  { %v5649_v38 = vor.u32 %v6250_v30, %v5646_v31  ;;  %v4252_v30 = vld [vmem:[#allocation8 + $0x128] sm:$0xf]  ;;  %v5903_v31 = vld [vmem:[#allocation8 + $0x138] sm:$0xf0] }
 0x18b   :  { %3409 = vmatpush.bf16.msra.mxu0 %v4769_v39  ;;  %3385 = vmatmul.bf16.vlgmr.msra.gmra.mxu2 %v6631_v6  ;;  %v4589_v39 = vor.u32 %v5985_v26, %v4586_v32  ;;  %v6190_v26 = vld [vmem:[#allocation8 + $0xa34] sm:$0xf]  ;;  %v5406_v32 = vld [vmem:[#allocation8 + $0xa44] sm:$0xf0] }
 0x18c   :  { %3429 = vmatpush.bf16.msrb.mxu2 %v5209_v36  ;;  %3422 = vmatpush.bf16.msra.mxu1 %v4929_v44  ;;  %v6180_v36 = vld [vmem:[#allocation8 + $0x9e4] sm:$0xf]  ;;  %v3141_v43 = vpop.f32.mrf.mxu3  ;;  %v5129_v44 = vor.u32 %v6120_v34, %v5126_v35  ;;  %v5069_v35 = vor.u32 %v6105_v23, %v5066_v40  ;;  %v5246_v23 = vld [vmem:[#allocation8 + $0x904] sm:$0xf0] }
 0x18d   :  { %3394 = vmatpush.bf16.msra.mxu3 %v4649_v51  ;;  %v5369_v50 = vor.u32 %v6180_v36, %v5366_v37  ;;  %v6115_v51 = vld [vmem:[#allocation8 + $0x7dc] sm:$0xf]  ;;  %v6230_v37 = vld [vmem:[#allocation8 + $0xb74] sm:$0xf]  ;;  %v5409_v43 = vor.u32 %v6190_v26, %v5406_v32  ;;  %v5973_v32 = vld [vmem:[#allocation8 + $0x368] sm:$0xf0] }
 0x18e   :  { %v3178_v58 = vpop.f32.mrf.mxu2 }
 0x18f   :  { %3410 = vmatpush.bf16.msra.mxu0 %v4749_v60  ;;  %v5109_v60 = vor.u32 %v6115_v51, %v5106_v52  ;;  %v5386_v51 = vld [vmem:[#allocation8 + $0xa1c] sm:$0xf0]  ;;  %v6225_v52 = vld [vmem:[#allocation8 + $0xb4c] sm:$0xf] }
 0x190   :  { %3430 = vmatpush.bf16.msrb.mxu2 %v5189_v55  ;;  %3423 = vmatpush.bf16.msra.mxu1 %v4909_v63  ;;  %v5629_v55 = vor.u32 %v6245_v25, %v5626_v46  ;;  %v5606_v63 = vld [vmem:[#allocation8 + $0xbd4] sm:$0xf0]  ;;  %v6727_v14 = vpop.f32.mrf.mxu1  ;;  %v6185_v25 = vld [vmem:[#allocation8 + $0xa0c] sm:$0xf] }
 0x191   :  { %3395 = vmatpush.bf16.msra.mxu3 %v4629_v5  ;;  %v6725_v5 = vpop.f32.mrf.mxu0  ;;  %v5609_v16 = vor.u32 %v6240_v59, %v5606_v63  ;;  %v5389_v59 = vor.u32 %v6185_v25, %v5386_v51  ;;  %v4212_v63 = vld [vmem:[#allocation8 + $0xd8] sm:$0xf] }
 0x192   :  { %3411 = vmatmul.bf16.vlgmr.msra.gmra.mxu0 %v6643_v49 }
 0x193   :  { %3455 = vmatpush.bf16.msrb.mxu0 %v5529_v0  ;;  %3424 = vmatmul.bf16.vlgmr.msra.gmra.mxu1 %v6655_v2  ;;  %v6110_v0 = vld [vmem:[#allocation8 + $0x7b4] sm:$0xf] }
 0x194   :  { %3468 = vmatpush.bf16.msrb.mxu1 %v5689_v1  ;;  %3431 = vmatpush.bf16.msrb.mxu2 %v5169_v15  ;;  %v6723_v1 = vadd.f32 %v3178_v58, %v3166_v62  ;;  %v5449_v15 = vor.u32 %v6200_v56, %v5446_v57  ;;  %v5089_v18 = vor.u32 %v6110_v0, %v5086_v9  ;;  %v5566_v62 = vld [vmem:[#allocation8 + $0xb84] sm:$0xf0]  ;;  %v6023_v58 = vld [vmem:[#allocation8 + $0x4f8] sm:$0xf0]  ;;  %v5893_v0 = vld [vmem:[#allocation8 + $0xe8] sm:$0xf0] }
 0x195   :  { %3396 = vmatpush.bf16.msra.mxu3 %v4609_v27  ;;  %v5306_v27 = vld [vmem:[#allocation8 + $0x97c] sm:$0xf0]  ;;  %v5569_v46 = vor.u32 %v6230_v37, %v5566_v62  ;;  %v4732_v56 = vld [vmem:[#allocation8 + $0x4e8] sm:$0xf]  ;;  %v5549_v9 = vor.u32 %v6225_v52, %v5546_v53  ;;  %v4672_v52 = vld [vmem:[#allocation8 + $0x470] sm:$0xf] }
 0x196   :  { %v3180_v34 = vpop.f32.mrf.mxu2  ;;  %v4733_v13 = vor.u32 %v6023_v58, %v4732_v56  ;;  %v5226_v37 = vld [vmem:[#allocation8 + $0x8dc] sm:$0xf0]  ;;  %v4172_v62 = vld [vmem:[#allocation8 + $0x88] sm:$0xf] }
 0x197   :  { %3456 = vmatpush.bf16.msrb.mxu0 %v5509_v22  ;;  %v5586_v22 = vld [vmem:[#allocation8 + $0xbac] sm:$0xf0]  ;;  %v4692_v34 = vld [vmem:[#allocation8 + $0x498] sm:$0xf]  ;;  %v4152_v53 = vld [vmem:[#allocation8 + $0x60] sm:$0xf] }
 0x198   :  { %3469 = vmatpush.bf16.msrb.mxu1 %v5669_v24  ;;  %3432 = vmatpush.bf16.msrb.mxu2 %v5149_v3  ;;  %v6165_v24 = vld [vmem:[#allocation8 + $0x96c] sm:$0xf]  ;;  %v5589_v3 = vor.u32 %v6235_v21, %v5586_v22  ;;  %v3219_v42 = vpop.f32.mrf.mxu1  ;;  %v6018_v21 = vld [vmem:[#allocation8 + $0x4d0] sm:$0xf0]  ;;  %v4492_v58 = vld [vmem:[#allocation8 + $0x308] sm:$0xf] }
 0x199   :  { %3397 = vmatpush.bf16.msra.mxu3 %v4589_v39  ;;  %v5309_v36 = vor.u32 %v6165_v24, %v5306_v27  ;;  %v6160_v39 = vld [vmem:[#allocation8 + $0x944] sm:$0xf]  ;;  %v6150_v22 = vld [vmem:[#allocation8 + $0x8f4] sm:$0xf]  ;;  %v4192_v24 = vld [vmem:[#allocation8 + $0xb0] sm:$0xf] }
 0x19a   :  { %v5289_v54 = vor.u32 %v6160_v39, %v5286_v41  ;;  %v5888_v27 = vld [vmem:[#allocation8 + $0xc0] sm:$0xf0]  ;;  %v5249_v26 = vor.u32 %v6150_v22, %v5246_v23  ;;  %v5943_v39 = vld [vmem:[#allocation8 + $0x278] sm:$0xf0]  ;;  %v5958_v22 = vld [vmem:[#allocation8 + $0x2f0] sm:$0xf0] }
 0x19b   :  { %3457 = vmatpush.bf16.msrb.mxu0 %v5489_v47  ;;  %v3206_v47 = vpop.f32.mrf.mxu0 }
 0x19c   :  { %3470 = vmatpush.bf16.msrb.mxu1 %v5649_v38  ;;  %3433 = vmatpush.bf16.msrb.mxu2 %v5129_v44  ;;  %v4253_v38 = vor.u32 %v5903_v31, %v4252_v30  ;;  %v4232_v44 = vld [vmem:[#allocation8 + $0x100] sm:$0xf]  ;;  %v4532_v30 = vld [vmem:[#allocation8 + $0x358] sm:$0xf] }
 0x19d   :  { %3442 = vmatpush.bf16.msrb.mxu3 %v5369_v50  ;;  %v5898_v50 = vld [vmem:[#allocation8 + $0x110] sm:$0xf0]  ;;  %v4533_v41 = vor.u32 %v5973_v32, %v4532_v30  ;;  %v5868_v30 = vld [vmem:[#allocation8 + $0x20] sm:$0xf0]  ;;  %v4892_v32 = vld [vmem:[#allocation8 + $0x628] sm:$0xf] }
 0x19e   :  { %3398 = vmatmul.bf16.vlgmr.msra.gmra.mxu3 %v6633_v7  ;;  %v4233_v57 = vor.u32 %v5898_v50, %v4232_v44  ;;  %v4512_v44 = vld [vmem:[#allocation8 + $0x330] sm:$0xf]  ;;  %v5968_v50 = vld [vmem:[#allocation8 + $0x340] sm:$0xf0] }
 0x19f   :  { %3458 = vmatpush.bf16.msrb.mxu0 %v5469_v4  ;;  %v4572_v4 = vld [vmem:[#allocation8 + $0x3a8] sm:$0xf]  ;;  %v4513_v56 = vor.u32 %v5968_v50, %v4512_v44 }
 0x1a0   :  { %3471 = vmatpush.bf16.msrb.mxu1 %v5629_v55  ;;  %3434 = vmatpush.bf16.msrb.mxu2 %v5109_v60  ;;  %v5983_v55 = vld [vmem:[#allocation8 + $0x3b8] sm:$0xf0]  ;;  %v4332_v50 = vld [vmem:[#allocation8 + $0x1c8] sm:$0xf] }
 0x1a1   :  { %3443 = vmatpush.bf16.msrb.mxu3 %v5349_v61  ;;  %v6155_v60 = vld [vmem:[#allocation8 + $0x91c] sm:$0xf]  ;;  %v5266_v61 = vld [vmem:[#allocation8 + $0x92c] sm:$0xf0]  ;;  %v4573_v11 = vor.u32 %v5983_v55, %v4572_v4  ;;  %v4392_v4 = vld [vmem:[#allocation8 + $0x240] sm:$0xf] }
 0x1a2   :  { %v5938_v55 = vld [vmem:[#allocation8 + $0x250] sm:$0xf0] }
 0x1a3   :  { %3459 = vmatpush.bf16.msrb.mxu0 %v5449_v15  ;;  %v5269_v15 = vor.u32 %v6155_v60, %v5266_v61  ;;  %v5963_v60 = vld [vmem:[#allocation8 + $0x318] sm:$0xf0] }
 0x1a4   :  { %3472 = vmatpush.bf16.msrb.mxu1 %v5609_v16  ;;  %3435 = vmatpush.bf16.msrb.mxu2 %v5089_v18  ;;  %v4552_v16 = vld [vmem:[#allocation8 + $0x380] sm:$0xf]  ;;  %v3191_v18 = vpop.f32.mrf.mxu3 }
 0x1a5   :  { %3444 = vmatpush.bf16.msrb.mxu3 %v5329_v29  ;;  %v4213_v29 = vor.u32 %v5893_v0, %v4212_v63  ;;  %v3192_v40 = vadd.f32 %v3191_v18, %v6723_v1  ;;  %v4193_v1 = vor.u32 %v5888_v27, %v4192_v24  ;;  %v4652_v63 = vld [vmem:[#allocation8 + $0x448] sm:$0xf]  ;;  %v6003_v0 = vld [vmem:[#allocation8 + $0x458] sm:$0xf0]  ;;  %v4493_v18 = vor.u32 %v5963_v60, %v4492_v58  ;;  %v4632_v24 = vld [vmem:[#allocation8 + $0x420] sm:$0xf] }
 0x1a6   :  { %v5998_v27 = vld [vmem:[#allocation8 + $0x430] sm:$0xf0]  ;;  %v5212_v58 = vld [vmem:[#allocation8 + $0x8a8] sm:$0xf]  ;;  %v6143_v60 = vld [vmem:[#allocation8 + $0x8b8] sm:$0xf0] }
 0x1a7   :  { %3460 = vmatpush.bf16.msrb.mxu0 %v5429_v28  ;;  %v4553_v28 = vor.u32 %v5978_v12, %v4552_v16  ;;  %v3205_v31 = vadd.f32 %v6725_v5, %v3192_v40  ;;  %v5883_v5 = vld [vmem:[#allocation8 + $0x98] sm:$0xf0]  ;;  %v4372_v16 = vld [vmem:[#allocation8 + $0x218] sm:$0xf]  ;;  %v5933_v12 = vld [vmem:[#allocation8 + $0x228] sm:$0xf0] }
 0x1a8   :  { %3473 = vmatpush.bf16.msrb.mxu1 %v5589_v3  ;;  %3436 = vmatpush.bf16.msrb.mxu2 %v5069_v35  ;;  %v4713_v3 = vor.u32 %v6018_v21, %v4712_v17  ;;  %v6013_v35 = vld [vmem:[#allocation8 + $0x4a8] sm:$0xf0]  ;;  %v4472_v21 = vld [vmem:[#allocation8 + $0x2e0] sm:$0xf]  ;;  %v4373_v40 = vor.u32 %v5933_v12, %v4372_v16  ;;  %v4852_v16 = vld [vmem:[#allocation8 + $0x5d8] sm:$0xf] }
 0x1a9   :  { %3445 = vmatpush.bf16.msrb.mxu3 %v5309_v36  ;;  %v6145_v36 = vld [vmem:[#allocation8 + $0x8cc] sm:$0xf]  ;;  %v6735_v47 = vadd.f32 %v6727_v14, %v3205_v31  ;;  %v4693_v42 = vor.u32 %v6013_v35, %v4692_v34  ;;  %v6008_v14 = vld [vmem:[#allocation8 + $0x480] sm:$0xf0]  ;;  %v4352_v31 = vld [vmem:[#allocation8 + $0x1f0] sm:$0xf]  ;;  %v4633_v35 = vor.u32 %v5998_v27, %v4632_v24 }
 0x1aa   :  { %v6063_v34 = vld [vmem:[#allocation8 + $0x638] sm:$0xf0]  ;;  %v6053_v12 = vld [vmem:[#allocation8 + $0x5e8] sm:$0xf0]  ;;  %v6138_v24 = vld [vmem:[#allocation8 + $0x890] sm:$0xf0] }
 0x1ab   :  { %3461 = vmatpush.bf16.msrb.mxu0 %v5409_v43  ;;  %3437 = vmatmul.bf16.vlgmr.msrb.gmra.mxu2 %v6649_v19  ;;  %v5229_v43 = vor.u32 %v6145_v36, %v5226_v37  ;;  %v5953_v36 = vld [vmem:[#allocation8 + $0x2c8] sm:$0xf0]  ;;  %v4893_v44 = vor.u32 %v6063_v34, %v4892_v32  ;;  %v5352_v27 = vld [vmem:[#allocation8 + $0x9c0] sm:$0xf]  ;;  %v4832_v34 = vld [vmem:[#allocation8 + $0x5b0] sm:$0xf] }
 0x1ac   :  { %3481 = vmatpush.bf16.msra.mxu2 %v4253_v38  ;;  %3474 = vmatpush.bf16.msrb.mxu1 %v5569_v46  ;;  %v4412_v38 = vld [vmem:[#allocation8 + $0x268] sm:$0xf]  ;;  %v3193_v25 = vpop.f32.mrf.mxu3  ;;  %v4173_v46 = vor.u32 %v5883_v5, %v4172_v62  ;;  %v4612_v5 = vld [vmem:[#allocation8 + $0x3f8] sm:$0xf]  ;;  %vm3612_vm12 = vcmp.ge.f32.partialorder %v6735_v47, 0.0 }
 0x1ad   :  { %3446 = vmatpush.bf16.msrb.mxu3 %v5289_v54  ;;  %v4413_v51 = vor.u32 %v5943_v39, %v4412_v38  ;;  %v5878_v54 = vld [vmem:[#allocation8 + $0x70] sm:$0xf0]  ;;  %v5993_v38 = vld [vmem:[#allocation8 + $0x408] sm:$0xf0]  ;;  %v6745_v39 = vld [vmem:[#allocation10] sm:$0x1f] }
 0x1ae   :  { %v4153_v61 = vor.u32 %v5878_v54, %v4152_v53  ;;  %v5923_v25 = vld [vmem:[#allocation8 + $0x1d8] sm:$0xf0]  ;;  %v4432_v53 = vld [vmem:[#allocation8 + $0x290] sm:$0xf]  ;;  %v4613_v54 = vor.u32 %v5993_v38, %v4612_v5  ;;  %v5332_v5 = vld [vmem:[#allocation8 + $0x998] sm:$0xf] }
 0x1af   :  { %3462 = vmatpush.bf16.msrb.mxu0 %v5389_v59  ;;  %v4393_v59 = vor.u32 %v5938_v55, %v4392_v4  ;;  %v5948_v4 = vld [vmem:[#allocation8 + $0x2a0] sm:$0xf0]  ;;  %v4592_v55 = vld [vmem:[#allocation8 + $0x3d0] sm:$0xf]  ;;  %v6173_v38 = vld [vmem:[#allocation8 + $0x9a8] sm:$0xf0] }
 0x1b0   :  { %3482 = vmatpush.bf16.msra.mxu2 %v4233_v57  ;;  %3475 = vmatpush.bf16.msrb.mxu1 %v5549_v9  ;;  %v4673_v57 = vor.u32 %v6008_v14, %v4672_v52  ;;  %v4132_v9 = vld [vmem:[#allocation8 + $0x38] sm:$0xf]  ;;  %v6742_v17 = vpop.f32.mrf.mxu1  ;;  %v4872_v52 = vld [vmem:[#allocation8 + $0x600] sm:$0xf]  ;;  %v6058_v14 = vld [vmem:[#allocation8 + $0x610] sm:$0xf0] }
 0x1b1   :  { %3447 = vmatpush.bf16.msrb.mxu3 %v5269_v15  ;;  %v5873_v15 = vld [vmem:[#allocation8 + $0x48] sm:$0xf0] }
 0x1b2   :  { %3463 = vmatmul.bf16.vlgmr.msrb.gmra.mxu0 %v6657_v10  ;;  %v4133_v23 = vor.u32 %v5873_v15, %v4132_v9  ;;  %v5918_v9 = vld [vmem:[#allocation8 + $0x1b0] sm:$0xf0]  ;;  %v4433_v15 = vor.u32 %v5948_v4, %v4432_v53  ;;  %v6128_v53 = vld [vmem:[#allocation8 + $0x840] sm:$0xf0] }
 0x1b3   :  { %3507 = vmatpush.bf16.msra.mxu0 %v4573_v11  ;;  %3476 = vmatmul.bf16.vlgmr.msrb.gmra.mxu1 %v6664_v8  ;;  %v6738_v11 = vpop.f32.mrf.mxu2 }
 0x1b4   :  { %3520 = vmatpush.bf16.msra.mxu1 %v4733_v13  ;;  %3483 = vmatpush.bf16.msra.mxu2 %v4213_v29  ;;  %v6740_v13 = vpop.f32.mrf.mxu0  ;;  %v4653_v29 = vor.u32 %v6003_v0, %v4652_v63  ;;  %v6183_v63 = vld [vmem:[#allocation8 + $0x9f8] sm:$0xf0]  ;;  %v4312_v0 = vld [vmem:[#allocation8 + $0x1a0] sm:$0xf] }
 0x1b5   :  { %3448 = vmatpush.bf16.msrb.mxu3 %v5249_v26  ;;  %v4473_v26 = vor.u32 %v5958_v22, %v4472_v21 }
 0x1b7   :  { %3508 = vmatpush.bf16.msra.mxu0 %v4553_v28  ;;  %v4112_v28 = vld [vmem:[#allocation8 + $0x10] sm:$0xf] }
 0x1b8   :  { %3521 = vmatpush.bf16.msra.mxu1 %v4713_v3  ;;  %3484 = vmatpush.bf16.msra.mxu2 %v4193_v1  ;;  %v5928_v3 = vld [vmem:[#allocation8 + $0x200] sm:$0xf0]  ;;  %v4452_v1 = vld [vmem:[#allocation8 + $0x2b8] sm:$0xf]  ;;  %v4113_v37 = vor.u32 %v5868_v30, %v4112_v28  ;;  %v4853_v30 = vor.u32 %v6053_v12, %v4852_v16  ;;  %v5292_v16 = vld [vmem:[#allocation8 + $0x948] sm:$0xf] }
 0x1b9   :  { %3449 = vmatpush.bf16.msrb.mxu3 %v5229_v43  ;;  %v4353_v62 = vor.u32 %v5928_v3, %v4352_v31  ;;  %v6178_v31 = vld [vmem:[#allocation8 + $0x9d0] sm:$0xf0]  ;;  %v4292_v3 = vld [vmem:[#allocation8 + $0x178] sm:$0xf]  ;;  %v6163_v12 = vld [vmem:[#allocation8 + $0x958] sm:$0xf0] }
 0x1bb   :  { %3509 = vmatpush.bf16.msra.mxu0 %v4533_v41  ;;  %v873_v41 = vperm.slane %v6745_v39, 2 }
 0x1bc   :  { %3522 = vmatpush.bf16.msra.mxu1 %v4693_v42  ;;  %3485 = vmatpush.bf16.msra.mxu2 %v4173_v46  ;;  %v3232_v42 = vpop.f32.mrf.mxu2  ;;  %v3258_v43 = vpop.f32.mrf.mxu0 }
 0x1bd   :  { %3494 = vmatpush.bf16.msra.mxu3 %v4413_v51  ;;  %v3271_v46 = vpop.f32.mrf.mxu1  ;;  %v4453_v51 = vor.u32 %v5953_v36, %v4452_v1  ;;  %v3231_v21 = vadd.f32 %v6738_v11, %v873_v41  ;;  %v5172_v11 = vld [vmem:[#allocation8 + $0x858] sm:$0xf]  ;;  %v5353_v36 = vor.u32 %v6178_v31, %v5352_v27  ;;  %v4272_v42 = vld [vmem:[#allocation8 + $0x150] sm:$0xf]  ;;  %v5908_v43 = vld [vmem:[#allocation8 + $0x160] sm:$0xf0] }
 0x1be   :  { %3450 = vmatmul.bf16.vlgmr.msrb.gmra.mxu3 %v6651_v20  ;;  %v6103_v46 = vld [vmem:[#allocation8 + $0x778] sm:$0xf0]  ;;  %v6118_v31 = vld [vmem:[#allocation8 + $0x7f0] sm:$0xf0] }
 0x1bf   :  { %3510 = vmatpush.bf16.msra.mxu0 %v4513_v56  ;;  %v5988_v56 = vld [vmem:[#allocation8 + $0x3e0] sm:$0xf0] }
 0x1c0   :  { %3523 = vmatpush.bf16.msra.mxu1 %v4673_v57  ;;  %3486 = vmatpush.bf16.msra.mxu2 %v4153_v61  ;;  %v4333_v57 = vor.u32 %v5923_v25, %v4332_v50  ;;  %v5372_v61 = vld [vmem:[#allocation8 + $0x9e8] sm:$0xf]  ;;  %v6043_v50 = vld [vmem:[#allocation8 + $0x598] sm:$0xf0] }
 0x1c1   :  { %3495 = vmatpush.bf16.msra.mxu3 %v4393_v59  ;;  %v4873_v59 = vor.u32 %v6058_v14, %v4872_v52  ;;  %v5373_v22 = vor.u32 %v6183_v63, %v5372_v61  ;;  %v3243_v28 = vpop.f32.mrf.mxu3  ;;  %v5052_v25 = vld [vmem:[#allocation8 + $0x768] sm:$0xf]  ;;  %v5333_v52 = vor.u32 %v6173_v38, %v5332_v5  ;;  %v4273_v14 = vor.u32 %v5908_v43, %v4272_v42  ;;  %v6098_v61 = vld [vmem:[#allocation8 + $0x750] sm:$0xf0]  ;;  %v5092_v5 = vld [vmem:[#allocation8 + $0x7b8] sm:$0xf] }
 0x1c2   :  { %v3244_v32 = vadd.f32 %v3243_v28, %v3231_v21  ;;  %v5132_v63 = vld [vmem:[#allocation8 + $0x808] sm:$0xf]  ;;  %v5293_v28 = vor.u32 %v6163_v12, %v5292_v16  ;;  %v6113_v38 = vld [vmem:[#allocation8 + $0x7c8] sm:$0xf0]  ;;  %v5252_v43 = vld [vmem:[#allocation8 + $0x8f8] sm:$0xf] }
 0x1c3   :  { %3511 = vmatpush.bf16.msra.mxu0 %v4493_v18  ;;  %v4593_v18 = vor.u32 %v5988_v56, %v4592_v55  ;;  %v5053_v55 = vor.u32 %v6103_v46, %v5052_v25  ;;  %v5312_v56 = vld [vmem:[#allocation8 + $0x970] sm:$0xf]  ;;  %v6279_v16 = vld [vmem:[#allocation11 + $0x78] sm:$0xff] }
 0x1c4   :  { %3524 = vmatpush.bf16.msra.mxu1 %v4653_v29  ;;  %3487 = vmatpush.bf16.msra.mxu2 %v4133_v23  ;;  %v5213_v29 = vor.u32 %v6143_v60, %v5212_v58  ;;  %v4313_v23 = vor.u32 %v5918_v9, %v4312_v0  ;;  %v3257_v1 = vadd.f32 %v6740_v13, %v3244_v32  ;;  %v6038_v58 = vld [vmem:[#allocation8 + $0x570] sm:$0xf0]  ;;  %v5032_v60 = vld [vmem:[#allocation8 + $0x740] sm:$0xf]  ;;  %v6123_v0 = vld [vmem:[#allocation8 + $0x818] sm:$0xf0] }
 0x1c5   :  { %3496 = vmatpush.bf16.msra.mxu3 %v4373_v40  ;;  %v5192_v40 = vld [vmem:[#allocation8 + $0x880] sm:$0xf]  ;;  %v5133_v27 = vor.u32 %v6123_v0, %v5132_v63  ;;  %v5492_v63 = vld [vmem:[#allocation8 + $0xad8] sm:$0xf]  ;;  %v6213_v0 = vld [vmem:[#allocation8 + $0xae8] sm:$0xf0] }
 0x1c6   :  { %v6754_v13 = vadd.f32 %v6742_v17, %v3257_v1  ;;  %v5272_v32 = vld [vmem:[#allocation8 + $0x920] sm:$0xf]  ;;  %v6088_v1 = vld [vmem:[#allocation8 + $0x700] sm:$0xf0] }
 0x1c7   :  { %3512 = vmatpush.bf16.msra.mxu0 %v4473_v26  ;;  %v5913_v26 = vld [vmem:[#allocation8 + $0x188] sm:$0xf0] }
 0x1c8   :  { %3525 = vmatpush.bf16.msra.mxu1 %v4633_v35  ;;  %3488 = vmatpush.bf16.msra.mxu2 %v4113_v37  ;;  %v5193_v35 = vor.u32 %v6138_v24, %v5192_v40  ;;  %v4293_v37 = vor.u32 %v5913_v26, %v4292_v3  ;;  %v6093_v40 = vld [vmem:[#allocation8 + $0x728] sm:$0xf0] }
 0x1c9   :  { %3497 = vmatpush.bf16.msra.mxu3 %v4353_v62  ;;  %v6133_v62 = vld [vmem:[#allocation8 + $0x868] sm:$0xf0] }
 0x1cb   :  { %3513 = vmatpush.bf16.msra.mxu0 %v4453_v51  ;;  %3489 = vmatmul.bf16.vlgmr.msra.gmra.mxu2 %v6626_v45  ;;  %v6048_v45 = vld [vmem:[#allocation8 + $0x5c0] sm:$0xf0]  ;;  %v5173_v51 = vor.u32 %v6133_v62, %v5172_v11  ;;  %v4992_v11 = vld [vmem:[#allocation8 + $0x6f0] sm:$0xf] }
 0x1cc   :  { %3533 = vmatpush.bf16.msrb.mxu2 %v4893_v44  ;;  %3526 = vmatpush.bf16.msra.mxu1 %v4613_v54  ;;  %v4833_v41 = vor.u32 %v6048_v45, %v4832_v34  ;;  %v4812_v44 = vld [vmem:[#allocation8 + $0x588] sm:$0xf]  ;;  %v3245_v54 = vpop.f32.mrf.mxu3  ;;  %v6158_v34 = vld [vmem:[#allocation8 + $0x930] sm:$0xf0]  ;;  %v4752_v45 = vld [vmem:[#allocation8 + $0x510] sm:$0xf]  ;;  %v4993_v42 = vor.u32 %v6088_v1, %v4992_v11 }
 0x1cd   :  { %3498 = vmatpush.bf16.msra.mxu3 %v4333_v57  ;;  %v4813_v4 = vor.u32 %v6043_v50, %v4812_v44  ;;  %v4792_v57 = vld [vmem:[#allocation8 + $0x560] sm:$0xf]  ;;  %v5273_v62 = vor.u32 %v6158_v34, %v5272_v32  ;;  %v6153_v44 = vld [vmem:[#allocation8 + $0x908] sm:$0xf0]  ;;  %v6218_v54 = vld [vmem:[#allocation8 + $0xb10] sm:$0xf0] }
 0x1ce   :  { %v4793_v9 = vor.u32 %v6038_v58, %v4792_v57  ;;  %v5232_v57 = vld [vmem:[#allocation8 + $0x8d0] sm:$0xf]  ;;  %v6148_v58 = vld [vmem:[#allocation8 + $0x8e0] sm:$0xf0]  ;;  %v5452_v34 = vld [vmem:[#allocation8 + $0xa88] sm:$0xf] }
 0x1cf   :  { %3514 = vmatpush.bf16.msra.mxu0 %v4433_v15  ;;  %v5033_v15 = vor.u32 %v6098_v61, %v5032_v60  ;;  %v6758_v21 = vpop.f32.mrf.mxu0  ;;  %v4952_v61 = vld [vmem:[#allocation8 + $0x6a0] sm:$0xf]  ;;  %v6068_v32 = vld [vmem:[#allocation8 + $0x660] sm:$0xf0]  ;;  %v6263_v11 = vld [vmem:[#allocation8 + $0xc78] sm:$0xf0] }
 0x1d0   :  { %3534 = vmatpush.bf16.msrb.mxu2 %v4873_v59  ;;  %3527 = vmatpush.bf16.msra.mxu1 %v4593_v18  ;;  %v4772_v18 = vld [vmem:[#allocation8 + $0x538] sm:$0xf]  ;;  %v6760_v24 = vpop.f32.mrf.mxu1  ;;  %v6269_v1 = vld [vmem:[#allocation11 + $0x28] sm:$0xff] }
 0x1d1   :  { %3499 = vmatpush.bf16.msra.mxu3 %v4313_v23  ;;  %v5012_v23 = vld [vmem:[#allocation8 + $0x718] sm:$0xf] }
 0x1d2   :  { %3515 = vmatmul.bf16.vlgmr.msra.gmra.mxu0 %v6631_v6  ;;  %v5152_v6 = vld [vmem:[#allocation8 + $0x830] sm:$0xf]  ;;  %v5013_v26 = vor.u32 %v6093_v40, %v5012_v23  ;;  %v4932_v23 = vld [vmem:[#allocation8 + $0x678] sm:$0xf]  ;;  %v6073_v40 = vld [vmem:[#allocation8 + $0x688] sm:$0xf0] }
 0x1d3   :  { %3559 = vmatpush.bf16.msrb.mxu0 %v5213_v29  ;;  %3528 = vmatmul.bf16.vlgmr.msra.gmra.mxu1 %v6633_v7  ;;  %v6168_v7 = vld [vmem:[#allocation8 + $0x980] sm:$0xf0]  ;;  %v5153_v17 = vor.u32 %v6128_v53, %v5152_v6  ;;  %v6756_v29 = vpop.f32.mrf.mxu2  ;;  %v5093_v6 = vor.u32 %v6113_v38, %v5092_v5  ;;  %v5512_v53 = vld [vmem:[#allocation8 + $0xb00] sm:$0xf]  ;;  %v6198_v38 = vld [vmem:[#allocation8 + $0xa70] sm:$0xf0] }
 0x1d4   :  { %3572 = vmatpush.bf16.msrb.mxu1 %v5373_v22  ;;  %3535 = vmatpush.bf16.msrb.mxu2 %v4853_v30  ;;  %v5313_v59 = vor.u32 %v6168_v7, %v5312_v56  ;;  %v6033_v22 = vld [vmem:[#allocation8 + $0x548] sm:$0xf0]  ;;  %v5112_v30 = vld [vmem:[#allocation8 + $0x7e0] sm:$0xf]  ;;  %v6108_v56 = vld [vmem:[#allocation8 + $0x7a0] sm:$0xf0]  ;;  %v5513_v60 = vor.u32 %v6218_v54, %v5512_v53 }
 0x1d5   :  { %3500 = vmatpush.bf16.msra.mxu3 %v4293_v37  ;;  %v4773_v3 = vor.u32 %v6033_v22, %v4772_v18  ;;  %v5532_v37 = vld [vmem:[#allocation8 + $0xb28] sm:$0xf]  ;;  %v5493_v22 = vor.u32 %v6213_v0, %v5492_v63  ;;  %v5432_v5 = vld [vmem:[#allocation8 + $0xa60] sm:$0xf] }
 0x1d6   :  { %v6267_v54 = vld [vmem:[#allocation11 + $0x18] sm:$0xff] }
 0x1d7   :  { %3560 = vmatpush.bf16.msrb.mxu0 %v5193_v35  ;;  %v6028_v35 = vld [vmem:[#allocation8 + $0x520] sm:$0xf0]  ;;  %v3310_v25 = vpop.f32.mrf.mxu0 }
 0x1d8   :  { %3573 = vmatpush.bf16.msrb.mxu1 %v5353_v36  ;;  %3536 = vmatpush.bf16.msrb.mxu2 %v4833_v41  ;;  %v5113_v36 = vor.u32 %v6118_v31, %v5112_v30  ;;  %v4753_v41 = vor.u32 %v6028_v35, %v4752_v45  ;;  %v6270_v30 = vld [vmem:[#allocation11 + $0x30] sm:$0xff]  ;;  %v4933_v31 = vor.u32 %v6073_v40, %v4932_v23  ;;  %v5692_v35 = vld [vmem:[#allocation8 + $0xc68] sm:$0xf]  ;;  %v6273_v23 = vld [vmem:[#allocation11 + $0x48] sm:$0xff]  ;;  %v3616_v40 = vmul.f32 0.01, %v6705_v33 }
 0x1d9   :  { %3501 = vmatpush.bf16.msra.mxu3 %v4273_v14  ;;  %v3323_v14 = vpop.f32.mrf.mxu1  ;;  %v6203_v45 = vld [vmem:[#allocation8 + $0xa98] sm:$0xf0]  ;;  %v5412_v25 = vld [vmem:[#allocation8 + $0xa38] sm:$0xf] }
 0x1da   :  { %v5652_v14 = vld [vmem:[#allocation8 + $0xc18] sm:$0xf] }
 0x1db   :  { %3561 = vmatpush.bf16.msrb.mxu0 %v5173_v51  ;;  %v3284_v50 = vpop.f32.mrf.mxu2  ;;  %v4972_v51 = vld [vmem:[#allocation8 + $0x6c8] sm:$0xf] }
 0x1dc   :  { %3574 = vmatpush.bf16.msrb.mxu1 %v5333_v52  ;;  %3537 = vmatpush.bf16.msrb.mxu2 %v4813_v4  ;;  %v6083_v52 = vld [vmem:[#allocation8 + $0x6d8] sm:$0xf0]  ;;  %v5253_v4 = vor.u32 %v6153_v44, %v5252_v43  ;;  %v6268_v43 = vld [vmem:[#allocation11 + $0x20] sm:$0xff]  ;;  %v5433_v44 = vor.u32 %v6198_v38, %v5432_v5 }
 0x1dd   :  { %3546 = vmatpush.bf16.msrb.mxu3 %v5053_v55  ;;  %v5072_v55 = vld [vmem:[#allocation8 + $0x790] sm:$0xf]  ;;  %v4973_v7 = vor.u32 %v6083_v52, %v4972_v51  ;;  %v6193_v52 = vld [vmem:[#allocation8 + $0xa48] sm:$0xf0]  ;;  %v6228_v5 = vld [vmem:[#allocation8 + $0xb60] sm:$0xf0] }
 0x1de   :  { %3502 = vmatmul.bf16.vlgmr.msra.gmra.mxu3 %v6641_v48  ;;  %v6223_v48 = vld [vmem:[#allocation8 + $0xb38] sm:$0xf0] }
 0x1df   :  { %3562 = vmatpush.bf16.msrb.mxu0 %v5153_v17  ;;  %v5533_v46 = vor.u32 %v6223_v48, %v5532_v37  ;;  %v6078_v17 = vld [vmem:[#allocation8 + $0x6b0] sm:$0xf0] }
 0x1e0   :  { %3575 = vmatpush.bf16.msrb.mxu1 %v5313_v59  ;;  %3538 = vmatpush.bf16.msrb.mxu2 %v4793_v9  ;;  %v5073_v59 = vor.u32 %v6108_v56, %v5072_v55  ;;  %v5233_v9 = vor.u32 %v6148_v58, %v5232_v57  ;;  %v4953_v12 = vor.u32 %v6078_v17, %v4952_v61  ;;  %v6188_v57 = vld [vmem:[#allocation8 + $0xa20] sm:$0xf0]  ;;  %v5632_v58 = vld [vmem:[#allocation8 + $0xbf0] sm:$0xf]  ;;  %v6266_v61 = vld [vmem:[#allocation11 + $0x10] sm:$0xff] }
 0x1e1   :  { %3547 = vmatpush.bf16.msrb.mxu3 %v5033_v15  ;;  %v6271_v15 = vld [vmem:[#allocation11 + $0x38] sm:$0xff]  ;;  %v6764_v18 = vpop.f32.mrf.mxu3  ;;  %v5413_v55 = vor.u32 %v6193_v52, %v5412_v25  ;;  %v6274_v17 = vld [vmem:[#allocation11 + $0x50] sm:$0xff] }
 0x1e3   :  { %3563 = vmatpush.bf16.msrb.mxu0 %v5133_v27  ;;  %v5472_v27 = vld [vmem:[#allocation8 + $0xab0] sm:$0xf] }
 0x1e4   :  { %3576 = vmatpush.bf16.msrb.mxu1 %v5293_v28  ;;  %3539 = vmatpush.bf16.msrb.mxu2 %v4773_v3  ;;  %v6208_v28 = vld [vmem:[#allocation8 + $0xac0] sm:$0xf0] }
 0x1e5   :  { %3548 = vmatpush.bf16.msrb.mxu3 %v5013_v26  ;;  %v5473_v3 = vor.u32 %v6208_v28, %v5472_v27  ;;  %v4912_v26 = vld [vmem:[#allocation8 + $0x650] sm:$0xf]  ;;  %v3617_v27 = vmul.f32 0.01, %v6735_v47 }
 0x1e6   :  { %v4913_v37 = vor.u32 %v6068_v32, %v4912_v26  ;;  %v6272_v26 = vld [vmem:[#allocation11 + $0x40] sm:$0xff]  ;;  %v3621_v32 = vsel %vm3611_vm11, %v6705_v33, %v3616_v40 }
 0x1e7   :  { %3564 = vmatpush.bf16.msrb.mxu0 %v5113_v36  ;;  %v6277_v36 = vld [vmem:[#allocation11 + $0x68] sm:$0xff] }
 0x1e8   :  { %3577 = vmatpush.bf16.msrb.mxu1 %v5273_v62  ;;  %3540 = vmatpush.bf16.msrb.mxu2 %v4753_v41  ;;  %v5453_v62 = vor.u32 %v6203_v45, %v5452_v34  ;;  %v5672_v41 = vld [vmem:[#allocation8 + $0xc40] sm:$0xf]  ;;  %v3622_v45 = vsel %vm3612_vm12, %v6735_v47, %v3617_v27  ;;  %v5552_v47 = vld [vmem:[#allocation8 + $0xb50] sm:$0xf] }
 0x1e9   :  { %3549 = vmatpush.bf16.msrb.mxu3 %v4993_v42  ;;  %v3297_v48 = vpop.f32.mrf.mxu3  ;;  %v6258_v42 = vld [vmem:[#allocation8 + $0xc50] sm:$0xf0] }
 0x1ea   :  { %v5673_v50 = vor.u32 %v6258_v42, %v5672_v41  ;;  %v3626_v48 = vpack.c.bf16 %v3621_v32, %v3621_v32  ;;  %v6283_v41 = vld [vmem:[#allocation11 + $0x98] sm:$0xff] }
 0x1eb   :  { %3565 = vmatpush.bf16.msrb.mxu0 %v5093_v6  ;;  %3541 = vmatmul.bf16.vlgmr.msrb.gmra.mxu2 %v6643_v49  ;;  %v6278_v49 = vld [vmem:[#allocation11 + $0x70] sm:$0xff]  ;;  %v6253_v6 = vld [vmem:[#allocation8 + $0xc28] sm:$0xf0]  ;;  %v6295_v42 = vld [vmem:[#allocation11 + $0xf8] sm:$0xff] }
 0x1ec   :  { %3585 = vmatpush.bf16.msra.mxu2 %v5533_v46  ;;  %3578 = vmatpush.bf16.msrb.mxu1 %v5253_v4  ;;  %v6275_v4 = vld [vmem:[#allocation11 + $0x58] sm:$0xff]  ;;  %v5653_v56 = vor.u32 %v6253_v6, %v5652_v14  ;;  %v6293_v6 = vld [vmem:[#allocation11 + $0xe8] sm:$0xff] }
 0x1ed   :  { %3550 = vmatpush.bf16.msrb.mxu3 %v4973_v7  ;;  %v5392_v7 = vld [vmem:[#allocation8 + $0xa10] sm:$0xf] }
 0x1ee   :  { %v6768_v46 = vpop.f32.mrf.mxu2 }
 0x1ef   :  { %3566 = vmatpush.bf16.msrb.mxu0 %v5073_v59  ;;  %v6770_v51 = vpop.f32.mrf.mxu0  ;;  %v5393_v59 = vor.u32 %v6188_v57, %v5392_v7  ;;  %v6291_v57 = vld [vmem:[#allocation11 + $0xd8] sm:$0xff] }
 0x1f0   :  { %3586 = vmatpush.bf16.msra.mxu2 %v5513_v60  ;;  %3579 = vmatpush.bf16.msrb.mxu1 %v5233_v9  ;;  %v6772_v53 = vpop.f32.mrf.mxu1  ;;  %v6248_v60 = vld [vmem:[#allocation8 + $0xc00] sm:$0xf0] }
 0x1f1   :  { %3551 = vmatpush.bf16.msrb.mxu3 %v4953_v12  ;;  %v6287_v9 = vld [vmem:[#allocation11 + $0xb8] sm:$0xff] }
 0x1f2   :  { %3567 = vmatmul.bf16.vlgmr.msrb.gmra.mxu0 %v6649_v19  ;;  %v5693_v19 = vor.u32 %v6263_v11, %v5692_v35  ;;  %v3283_v35 = vadd.f32 %v6756_v29, %v6754_v13  ;;  %v5553_v29 = vor.u32 %v6228_v5, %v5552_v47  ;;  %v6301_v47 = vld [vmem:[#allocation11 + $0x128] sm:$0xff] }
 0x1f3   :  { %3955 = vmatpush.bf16.msra.mxu0 %v6271_v15  ;;  %3580 = vmatmul.bf16.vlgmr.msrb.gmra.mxu1 %v6651_v20  ;;  %v6276_v20 = vld [vmem:[#allocation11 + $0x60] sm:$0xff] }
 0x1f4   :  { %3968 = vmatpush.bf16.msra.mxu1 %v6279_v16  ;;  %3587 = vmatpush.bf16.msra.mxu2 %v5493_v22  ;;  %v5612_v15 = vld [vmem:[#allocation8 + $0xbc8] sm:$0xf]  ;;  %v6243_v16 = vld [vmem:[#allocation8 + $0xbd8] sm:$0xf0]  ;;  %v6265_v22 = vld [vmem:[#allocation11 + $0x8] sm:$0xff] }
 0x1f5   :  { %3552 = vmatpush.bf16.msrb.mxu3 %v4933_v31  ;;  %v5613_v28 = vor.u32 %v6243_v16, %v5612_v15  ;;  %v6238_v31 = vld [vmem:[#allocation8 + $0xbb0] sm:$0xf0] }
 0x1f6   :  { %v3336_v63 = vpop.f32.mrf.mxu2 }
 0x1f7   :  { %3956 = vmatpush.bf16.msra.mxu0 %v6270_v30  ;;  %v3362_v0 = vpop.f32.mrf.mxu0  ;;  %v6286_v30 = vld [vmem:[#allocation11 + $0xb0] sm:$0xff] }
 0x1f8   :  { %3969 = vmatpush.bf16.msra.mxu1 %v6278_v49  ;;  %3588 = vmatpush.bf16.msra.mxu2 %v5473_v3  ;;  %v3375_v12 = vpop.f32.mrf.mxu1  ;;  %v5592_v49 = vld [vmem:[#allocation8 + $0xba0] sm:$0xf]  ;;  %v6264_v3 = vld [vmem:[#allocation11] sm:$0xff] }
 0x1f9   :  { %3553 = vmatpush.bf16.msrb.mxu3 %v4913_v37  ;;  %v5593_v34 = vor.u32 %v6238_v31, %v5592_v49  ;;  %v6233_v37 = vld [vmem:[#allocation8 + $0xb88] sm:$0xf0] }
 0x1fb   :  { %3957 = vmatpush.bf16.msra.mxu0 %v6269_v1  ;;  %v6285_v1 = vld [vmem:[#allocation11 + $0xa8] sm:$0xff] }
 0x1fc   :  { %3970 = vmatpush.bf16.msra.mxu1 %v6277_v36  ;;  %3589 = vmatpush.bf16.msra.mxu2 %v5453_v62  ;;  %v5572_v36 = vld [vmem:[#allocation8 + $0xb78] sm:$0xf]  ;;  %v3296_v62 = vadd.f32 %v6764_v18, %v3283_v35 }
 0x1fd   :  { %3598 = vmatpush.bf16.msra.mxu3 %v5693_v19  ;;  %v5573_v33 = vor.u32 %v6233_v37, %v5572_v36  ;;  %v6284_v19 = vld [vmem:[#allocation11 + $0xa0] sm:$0xff] }
 0x1fe   :  { %3554 = vmatmul.bf16.vlgmr.msrb.gmra.mxu3 %v6655_v2  ;;  %v5633_v2 = vor.u32 %v6248_v60, %v5632_v58  ;;  %v3309_v13 = vadd.f32 %v6758_v21, %v3296_v62  ;;  %v6281_v21 = vld [vmem:[#allocation11 + $0x88] sm:$0xff] }
 0x1ff   :  { %3958 = vmatpush.bf16.msra.mxu0 %v6268_v43 }
 0x200   :  { %3971 = vmatpush.bf16.msra.mxu1 %v6276_v20  ;;  %3590 = vmatpush.bf16.msra.mxu2 %v5433_v44  ;;  %v3322_v18 = vadd.f32 %v6760_v24, %v3309_v13  ;;  %v6282_v20 = vld [vmem:[#allocation11 + $0x90] sm:$0xff]  ;;  %v6280_v24 = vld [vmem:[#allocation11 + $0x80] sm:$0xff] }
 0x201   :  { %3599 = vmatpush.bf16.msra.mxu3 %v5673_v50  ;;  %v3347_v11 = vpop.f32.mrf.mxu3  ;;  %v6294_v44 = vld [vmem:[#allocation11 + $0xf0] sm:$0xff] }
 0x202   :  { %v3335_v43 = vadd.f32 %v6768_v46, %v3322_v18  ;;  %v6292_v46 = vld [vmem:[#allocation11 + $0xe0] sm:$0xff] }
 0x203   :  { %3959 = vmatpush.bf16.msra.mxu0 %v6267_v54 }
 0x204   :  { %3972 = vmatpush.bf16.msra.mxu1 %v6275_v4  ;;  %3591 = vmatpush.bf16.msra.mxu2 %v5413_v55  ;;  %v3348_v52 = vadd.f32 %v3347_v11, %v3335_v43 }
 0x205   :  { %3600 = vmatpush.bf16.msra.mxu3 %v5653_v56 }
 0x206   :  { %v3618_v54 = vmul.f32 0.01, %v3348_v52  ;;  %vm3613_vm13 = vcmp.ge.f32.partialorder %v3348_v52, 0.0 }
 0x207   :  { %3960 = vmatpush.bf16.msra.mxu0 %v6266_v61  ;;  %v6289_v61 = vld [vmem:[#allocation11 + $0xc8] sm:$0xff] }
 0x208   :  { %3973 = vmatpush.bf16.msra.mxu1 %v6274_v17  ;;  %3592 = vmatpush.bf16.msra.mxu2 %v5393_v59  ;;  %v3623_v56 = vsel %vm3613_vm13, %v3348_v52, %v3618_v54  ;;  %v874_v17 = vperm.slane %v6745_v39, 3  ;;  %v6288_v59 = vld [vmem:[#allocation11 + $0xc0] sm:$0xff] }
 0x209   :  { %3601 = vmatpush.bf16.msra.mxu3 %v5633_v2  ;;  %v3349_v38 = vpop.f32.mrf.mxu3  ;;  %v3628_v58 = vpack.c.bf16 %v3623_v56, %v3623_v56  ;;  %v6296_v52 = vld [vmem:[#allocation11 + $0x100] sm:$0xff] }
 0x20a   :  { %v3361_v63 = vadd.f32 %v6770_v51, %v874_v17 }
 0x20b   :  { %3961 = vmatpush.bf16.msra.mxu0 %v6265_v22  ;;  %3593 = vmatmul.bf16.vlgmr.msra.gmra.mxu2 %v6657_v10  ;;  %v3627_v10 = vpack.c.bf16 %v3622_v45, %v3622_v45 }
 0x20c   :  { %3981 = vmatpush.bf16.msrb.mxu2 %v6287_v9  ;;  %3974 = vmatpush.bf16.msra.mxu1 %v6273_v23  ;;  %v3374_v15 = vadd.f32 %v6772_v53, %v3361_v63 }
 0x20d   :  { %3602 = vmatpush.bf16.msra.mxu3 %v5613_v28 }
 0x20e   :  { %v3386_v50 = vpop.f32.mrf.mxu2 }
 0x20f   :  { %3962 = vmatpush.bf16.msra.mxu0 %v6264_v3  ;;  %v3412_v25 = vpop.f32.mrf.mxu0  ;;  %v3387_v12 = vadd.f32 %v3386_v50, %v3374_v15  ;;  %v875_v50 = vperm.slane %v6745_v39, 4 }
 0x210   :  { %3982 = vmatpush.bf16.msrb.mxu2 %v6286_v30  ;;  %3975 = vmatpush.bf16.msra.mxu1 %v6272_v26  ;;  %v3425_v14 = vpop.f32.mrf.mxu1 }
 0x211   :  { %3603 = vmatpush.bf16.msra.mxu3 %v5593_v34 }
 0x212   :  { %3963 = vmatmul.bf16.vlgmr.msra.gmra.mxu0 %v3626_v48 }
 0x213   :  { %3976 = vmatmul.bf16.vlgmr.msra.gmra.mxu1 %v3627_v10  ;;  %v6303_v10 = vld [vmem:[#allocation11 + $0x138] sm:$0xff] }
 0x214   :  { %3983 = vmatpush.bf16.msrb.mxu2 %v6285_v1  ;;  %4007 = vmatpush.bf16.msrb.mxu0 %v6303_v10 }
 0x215   :  { %3604 = vmatpush.bf16.msra.mxu3 %v5573_v33  ;;  %v6302_v33 = vld [vmem:[#allocation11 + $0x130] sm:$0xff] }
 0x216   :  { %v3388_v4 = vpop.f32.mrf.mxu2 }
 0x217   :  { %v3414_v55 = vpop.f32.mrf.mxu0 }
 0x218   :  { %3984 = vmatpush.bf16.msrb.mxu2 %v6284_v19  ;;  %v3427_v7 = vpop.f32.mrf.mxu1  ;;  %4008 = vmatpush.bf16.msrb.mxu0 %v6302_v33 }
 0x219   :  { %3605 = vmatpush.bf16.msra.mxu3 %v5553_v29  ;;  %v6300_v29 = vld [vmem:[#allocation11 + $0x120] sm:$0xff] }
 0x21c   :  { %3985 = vmatpush.bf16.msrb.mxu2 %v6283_v41  ;;  %3606 = vmatmul.bf16.vlgmr.msra.gmra.mxu3 %v6664_v8  ;;  %v6290_v8 = vld [vmem:[#allocation11 + $0xd0] sm:$0xff]  ;;  %v6299_v41 = vld [vmem:[#allocation11 + $0x118] sm:$0xff] }
 0x21d   :  { %3994 = vmatpush.bf16.msrb.mxu3 %v6295_v42  ;;  %4009 = vmatpush.bf16.msrb.mxu0 %v6301_v47  ;;  %v6298_v42 = vld [vmem:[#allocation11 + $0x110] sm:$0xff] }
 0x220   :  { %3986 = vmatpush.bf16.msrb.mxu2 %v6282_v20 }
 0x221   :  { %3995 = vmatpush.bf16.msrb.mxu3 %v6294_v44  ;;  %v3399_v60 = vpop.f32.mrf.mxu3  ;;  %4010 = vmatpush.bf16.msrb.mxu0 %v6300_v29  ;;  %v6297_v44 = vld [vmem:[#allocation11 + $0x108] sm:$0xff] }
 0x222   :  { %v3400_v22 = vadd.f32 %v3399_v60, %v3387_v12 }
 0x224   :  { %3987 = vmatpush.bf16.msrb.mxu2 %v6281_v21  ;;  %v3413_v27 = vadd.f32 %v3412_v25, %v3400_v22 }
 0x225   :  { %3996 = vmatpush.bf16.msrb.mxu3 %v6293_v6  ;;  %4011 = vmatpush.bf16.msrb.mxu0 %v6299_v41 }
 0x226   :  { %v3426_v30 = vadd.f32 %v3425_v14, %v3413_v27 }
 0x228   :  { %3988 = vmatpush.bf16.msrb.mxu2 %v6280_v24  ;;  %v6318_v24 = vld [vmem:[#allocation13] ss:$0 sm:$0xff] }
 0x229   :  { %3997 = vmatpush.bf16.msrb.mxu3 %v6292_v46  ;;  %v3401_v2 = vpop.f32.mrf.mxu3  ;;  %4012 = vmatpush.bf16.msrb.mxu0 %v6298_v42 }
 0x22b   :  { %3989 = vmatmul.bf16.vlgmr.msrb.gmra.mxu2 %v3628_v58 }
 0x22d   :  { %3998 = vmatpush.bf16.msrb.mxu3 %v6291_v57  ;;  %4013 = vmatpush.bf16.msrb.mxu0 %v6297_v44 }
 0x22e   :  { %v3438_v0 = vpop.f32.mrf.mxu2 }
 0x22f   :  { %v3464_v9 = vpop.f32.mrf.mxu0  ;;  %v3439_v49 = vadd.f32 %v3438_v0, %v3426_v30 }
 0x230   :  { %v3477_v16 = vpop.f32.mrf.mxu1 }
 0x231   :  { %3999 = vmatpush.bf16.msrb.mxu3 %v6290_v8  ;;  %4014 = vmatpush.bf16.msrb.mxu0 %v6296_v52 }
 0x235   :  { %4000 = vmatpush.bf16.msrb.mxu3 %v6289_v61 }
 0x236   :  { %v3440_v23 = vpop.f32.mrf.mxu2 }
 0x237   :  { %v3466_v40 = vpop.f32.mrf.mxu0 }
 0x238   :  { %v3479_v28 = vpop.f32.mrf.mxu1 }
 0x239   :  { %4001 = vmatpush.bf16.msrb.mxu3 %v6288_v59 }
 0x241   :  { %v3451_v31 = vpop.f32.mrf.mxu3 }
 0x242   :  { %v3452_v3 = vadd.f32 %v3451_v31, %v3439_v49 }
 0x244   :  { %v3465_v26 = vadd.f32 %v3464_v9, %v3452_v3 }
 0x246   :  { %v3478_v32 = vadd.f32 %v3477_v16, %v3465_v26 }
 0x248   :  { %vm3614_vm14 = vcmp.ge.f32.partialorder %v3478_v32, 0.0  ;;  %v3619_v51 = vmul.f32 0.01, %v3478_v32 }
 0x249   :  { %v3453_v34 = vpop.f32.mrf.mxu3 }
 0x24a   :  { %v3624_v45 = vsel %vm3614_vm14, %v3478_v32, %v3619_v51 }
 0x24b   :  { %v3629_v35 = vpack.c.bf16 %v3624_v45, %v3624_v45 }
 0x24d   :  { %4002 = vmatmul.bf16.vlgmr.msrb.gmra.mxu3 %v3629_v35 }
 0x24e   :  { %v3490_v53 = vpop.f32.mrf.mxu2 }
 0x24f   :  { %v3516_v11 = vpop.f32.mrf.mxu0  ;;  %v3491_v14 = vadd.f32 %v3490_v53, %v875_v50 }
 0x250   :  { %v3529_v1 = vpop.f32.mrf.mxu1 }
 0x256   :  { %v3492_v36 = vpop.f32.mrf.mxu2 }
 0x257   :  { %v3518_v37 = vpop.f32.mrf.mxu0 }
 0x258   :  { %v3531_v48 = vpop.f32.mrf.mxu1 }
 0x261   :  { %v3503_v62 = vpop.f32.mrf.mxu3 }
 0x262   :  { %v3504_v21 = vadd.f32 %v3503_v62, %v3491_v14 }
 0x264   :  { %v3517_v54 = vadd.f32 %v3516_v11, %v3504_v21 }
 0x266   :  { %v3530_v55 = vadd.f32 %v3529_v1, %v3517_v54 }
 0x269   :  { %v3505_v19 = vpop.f32.mrf.mxu3 }
 0x26e   :  { %v3542_v5 = vpop.f32.mrf.mxu2 }
 0x26f   :  { %v3568_v13 = vpop.f32.mrf.mxu0  ;;  %v3543_v57 = vadd.f32 %v3542_v5, %v3530_v55 }
 0x270   :  { %v3581_v38 = vpop.f32.mrf.mxu1 }
 0x276   :  { %v3544_v18 = vpop.f32.mrf.mxu2 }
 0x277   :  { %v3570_v43 = vpop.f32.mrf.mxu0 }
 0x278   :  { %v3583_v20 = vpop.f32.mrf.mxu1 }
 0x281   :  { %v3555_v25 = vpop.f32.mrf.mxu3 }
 0x282   :  { %v3556_v8 = vadd.f32 %v3555_v25, %v3543_v57 }
 0x284   :  { %v3569_v17 = vadd.f32 %v3568_v13, %v3556_v8 }
 0x286   :  { %v3582_v59 = vadd.f32 %v3581_v38, %v3569_v17 }
 0x289   :  { %v3557_v6 = vpop.f32.mrf.mxu3 }
 0x28e   :  { %v3594_v46 = vpop.f32.mrf.mxu2 }
 0x28f   :  { %v3964_v4 = vpop.f32.mrf.mxu0  ;;  %v3595_v2 = vadd.f32 %v3594_v46, %v3582_v59 }
 0x290   :  { %v3965_v56 = vadd.f32 %v6318_v24, %v3964_v4  ;;  %v3977_v7 = vpop.f32.mrf.mxu1 }
 0x292   :  { %v3978_v58 = vadd.f32 %v3977_v7, %v3965_v56 }
 0x296   :  { %v3596_v60 = vpop.f32.mrf.mxu2 }
 0x297   :  { %v3966_v61 = vpop.f32.mrf.mxu0 }
 0x298   :  { %v3979_v39 = vpop.f32.mrf.mxu1 }
 0x29f   :  { %v3607_v63 = vpop.f32.mrf.mxu3 }
 0x2a0   :  { %v3608_v0 = vadd.f32 %v3607_v63, %v3595_v2 }
 0x2a2   :  { %vm3615_vm15 = vcmp.ge.f32.partialorder %v3608_v0, 0.0  ;;  %v3620_v9 = vmul.f32 0.01, %v3608_v0 }
 0x2a4   :  { %v3625_v15 = vsel %vm3615_vm15, %v3608_v0, %v3620_v9 }
 0x2a5   :  { %v3630_v16 = vpack.c.bf16 %v3625_v15, %v3625_v15 }
 0x2a7   :  { %v3609_v12 = vpop.f32.mrf.mxu3  ;;  %4015 = vmatmul.bf16.vlgmr.msrb.gmra.mxu0 %v3630_v16 }
 0x2ae   :  { %v3990_v22 = vpop.f32.mrf.mxu2 }
 0x2af   :  { %v3991_v23 = vadd.f32 %v3990_v22, %v3978_v58 }
 0x2b6   :  { %v3992_v40 = vpop.f32.mrf.mxu2 }
 0x2d0   :  { %v4003_v27 = vpop.f32.mrf.mxu3 }
 0x2d1   :  { %v4004_v28 = vadd.f32 %v4003_v27, %v3991_v23 }
 0x2d8   :  { %v4005_v30 = vpop.f32.mrf.mxu3 }
 0x324   :  { %v4016_v49 = vpop.f32.mrf.mxu0 }
 0x325   :  { %v4017_v31 = vadd.f32 %v4016_v49, %v4004_v28 }
 0x327   :  { %6319 = vtanh.f32 %v4017_v31 }
 0x32c   :  { %v4018_v3 = vpop.f32.mrf.mxu0 }
 0x32d   :  { %v6320_v26 = vpop.eup %6319 }
 0x32e   :  { %v4021_v32 = vmul.f32 2.0, %v6320_v26 }
 0x330   :  { %v4022_v51 = vpack.c.bf16 %v4021_v32, %v4021_v32 }
 0x332   :  { %4023 = vst [vmem:[#allocation14] sm:$0xf] %v4022_v51 }
 0x333   :  { %4034 = dma.vmem_to_hbm [thread:$0]  %s4030_s6, 64, %s4032_s15, [#allocation4]  }
 0x334   :  { %6522 = dma.done.wait [#allocation4], 64  }
 0x335   :  { %6523 = vsyncadd [#allocation4], 4294967232 }
 0x336   :  { %4039 = vsyncpa [#allocation3], 1 }
 0x337   :  { %4040 = vsyncpa [#allocation6], 1 }
 0x338   :  { %4041 = vsyncpa [#allocation9], 1 }
 0x339   :  { %4042 = vsyncpa [#allocation12], 1 }
 0x33a   :  { %4043 = vsyncpa [#allocation4], 1 }

</bundles_post_ra>
